<compile_context>
chip_gen: v7x
topology: tpu7x:2x2x1
jax: 0.10.0
libtpu: 0.0.40
codegen_flags: <defaults>
</compile_context>

<pallas_src>
import functools

import numpy as np
import jax
import jax.numpy as jnp
from jax import lax
from jax.experimental import pallas as pl
from jax.experimental.pallas import tpu as pltpu

BN_EPS = 1e-5
NEG_BIG = -1e30  # mask value for padded logit lanes (finite -> no inf/nan)


# ----------------------------- Pallas kernels -------------------------------

def _pool_bn_relu_store(acc_ref, b_ref, o_ref, *, H, W, WP):
    """acc_ref holds conv outputs (f32) at row h*WP + w.  Apply 2x2 maxpool,
    per-channel BN bias, ReLU, and store the pooled (H//2, W//2, C) tile."""
    # h-pair max (vectorized, in place): acc[r] = max(acc[r], acc[r+WP])
    n1 = (H - 1) * WP
    acc_ref[pl.ds(0, n1), :] = jnp.maximum(acc_ref[pl.ds(0, n1), :],
                                           acc_ref[pl.ds(WP, n1), :])
    # w-pair max (vectorized, in place): acc[r] = max(acc[r], acc[r+1])
    n2 = n1 - 1
    acc_ref[pl.ds(0, n2), :] = jnp.maximum(acc_ref[pl.ds(0, n2), :],
                                           acc_ref[pl.ds(1, n2), :])
    bias = b_ref[...]                                   # (1, C) f32
    # gather the pooled rows (stride-2 selection) and store lane-dense rows.
    for hp in range(H // 2):
        row = acc_ref[pl.ds(2 * hp * WP, W // 2, stride=2), :]   # (W//2, C)
        row = jnp.maximum(row + bias, 0.0)
        o_ref[0, hp, :, :] = row.astype(o_ref.dtype)


def _conv1_kernel(x_ref, w_ref, b_ref, o_ref, acc_ref, *, H, W, WP):
    """x_ref: (H*W, 32) im2col'd bf16 rows of ONE image; w_ref: (32, 64) bf16
    (BN scale folded); fused matmul + bias + ReLU + 2x2 maxpool."""
    acc_ref[...] = jnp.dot(x_ref[...], w_ref[...],
                           preferred_element_type=jnp.float32)
    _pool_bn_relu_store(acc_ref, b_ref, o_ref, H=H, W=W, WP=WP)


def _conv2_kernel(x_ref, w_ref, b_ref, o_ref, acc_ref, *, H, W, WP, C, KS):
    """In-kernel im2col: x_ref is (1, Hp*WP, C) -- one zero-padded image
    flattened row-major with row period WP.  Tap (dy,dx) is the contiguous
    slab starting at dy*WP+dx; rows with w >= W are junk and never selected
    by the pooling epilogue."""
    n = H * WP
    for dy in range(KS):
        for dx in range(KS):
            tap = dy * KS + dx
            xs = x_ref[0, pl.ds(dy * WP + dx, n), :]            # (n, C) bf16
            wt = w_ref[pl.ds(tap * C, C), :]                    # (C, Cout) bf16
            contrib = jnp.dot(xs, wt, preferred_element_type=jnp.float32)
            if tap == 0:
                acc_ref[...] = contrib
            else:
                acc_ref[...] = acc_ref[...] + contrib
    _pool_bn_relu_store(acc_ref, b_ref, o_ref, H=H, W=W, WP=WP)


def _fc_fused_kernel(x_ref, w1_ref, b1_ref, w2_ref, b2_ref, o_ref):
    """fc1 + BN, fc2 + BN, log_softmax, all on a (TB, 128)-padded lane-dense
    layout.  Pad logit lanes carry bias NEG_BIG so the normalizer is exact."""
    f1 = jnp.dot(x_ref[...], w1_ref[...],
                 preferred_element_type=jnp.float32) + b1_ref[...]   # (TB,128)
    logits = jnp.dot(f1, w2_ref[...],
                     preferred_element_type=jnp.float32) + b2_ref[...]
    m = jnp.max(logits, axis=-1, keepdims=True)
    e = jnp.exp(logits - m)
    lse = jnp.log(jnp.sum(e, axis=-1, keepdims=True)) + m
    o_ref[...] = (logits - lse).astype(o_ref.dtype)


# ------------------------------ pallas_call wrappers -------------------------

def conv1_bn_relu_pool(p1, w, b, B):
    return pl.pallas_call(
        functools.partial(_conv1_kernel, H=28, W=28, WP=28),
        out_shape=jax.ShapeDtypeStruct((B, 14, 14, 64), jnp.bfloat16),
        grid=(B,),
        in_specs=[pl.BlockSpec((784, 32), lambda b: (b, 0)),
                  pl.BlockSpec((32, 64), lambda b: (0, 0)),
                  pl.BlockSpec((1, 64), lambda b: (0, 0))],
        out_specs=pl.BlockSpec((1, 14, 14, 64), lambda b: (b, 0, 0, 0)),
        scratch_shapes=[pltpu.VMEM((28 * 28, 64), jnp.float32)],
        compiler_params=pltpu.CompilerParams(
            dimension_semantics=("parallel",)),
    )(p1, w, b)


def conv2_bn_relu_pool(x2, w, b, B):
    return pl.pallas_call(
        functools.partial(_conv2_kernel, H=14, W=14, WP=18, C=64, KS=5),
        out_shape=jax.ShapeDtypeStruct((B, 7, 7, 128), jnp.bfloat16),
        grid=(B,),
        in_specs=[pl.BlockSpec((1, 19 * 18, 64), lambda b: (b, 0, 0)),
                  pl.BlockSpec((25 * 64, 128), lambda b: (0, 0)),
                  pl.BlockSpec((1, 128), lambda b: (0, 0))],
        out_specs=pl.BlockSpec((1, 7, 7, 128), lambda b: (b, 0, 0, 0)),
        scratch_shapes=[pltpu.VMEM((14 * 18, 128), jnp.float32)],
        compiler_params=pltpu.CompilerParams(
            dimension_semantics=("parallel",)),
    )(x2, w, b)


def fc_fused(flat, w1, b1, w2, b2):
    B = flat.shape[0]
    TB = min(B, 256)
    return pl.pallas_call(
        _fc_fused_kernel,
        out_shape=jax.ShapeDtypeStruct((B, 128), jnp.float32),
        grid=(pl.cdiv(B, TB),),
        in_specs=[pl.BlockSpec((TB, 6272), lambda i: (i, 0)),
                  pl.BlockSpec((6272, 128), lambda i: (0, 0)),
                  pl.BlockSpec((1, 128), lambda i: (0, 0)),
                  pl.BlockSpec((128, 128), lambda i: (0, 0)),
                  pl.BlockSpec((1, 128), lambda i: (0, 0))],
        out_specs=pl.BlockSpec((TB, 128), lambda i: (i, 0)),
        compiler_params=pltpu.CompilerParams(
            dimension_semantics=("parallel",)),
    )(flat, w1, b1, w2, b2)


# --------------------------------- Glue --------------------------------------

def im2col(x, k, pad):
    """x: (B,H,W,C) -> (B*H*W, k*k*C); taps ordered (kh, kw, cin)."""
    B, H, W, C = x.shape
    xp = jnp.pad(x, ((0, 0), (pad, pad), (pad, pad), (0, 0)))
    taps = [xp[:, dy:dy + H, dx:dx + W, :] for dy in range(k) for dx in range(k)]
    p = jnp.stack(taps, axis=3)                 # (B, H, W, k*k, C)
    return p.reshape(B * H * W, k * k * C)


def bn_fold(gamma, beta, mean, var):
    # Inference-mode BatchNorm folded to per-channel scale/bias.
    scale = gamma * lax.rsqrt(var + BN_EPS)
    bias = beta - mean * scale
    return scale[None, :].astype(jnp.float32), bias[None, :].astype(jnp.float32)


# ------------------------------ Parameters -----------------------------------

def init_params(key):
    ks = jax.random.split(key, 20)

    def bn(i, c):
        gamma = 1.0 + 0.1 * jax.random.normal(ks[i], (c,), jnp.float32)
        beta = 0.1 * jax.random.normal(ks[i + 1], (c,), jnp.float32)
        mean = 0.1 * jax.random.normal(ks[i + 2], (c,), jnp.float32)
        var = jax.random.uniform(ks[i + 3], (c,), jnp.float32, 0.5, 1.5)
        return bn_fold(gamma, beta, mean, var)

    # PyTorch-layout weights (OIHW convs, (out,in) linears), no biases.
    conv1_w = jax.random.normal(ks[0], (64, 1, 5, 5), jnp.float32) / np.sqrt(25.0)
    conv2_w = jax.random.normal(ks[1], (128, 64, 5, 5), jnp.float32) / np.sqrt(64 * 25)
    fc1_w = jax.random.normal(ks[2], (100, 6272), jnp.float32) / np.sqrt(6272.0)
    fc2_w = jax.random.normal(ks[3], (10, 100), jnp.float32) / np.sqrt(100.0)

    s1, b1 = bn(4, 64)
    s2, b2 = bn(8, 128)
    sf1, bf1 = bn(12, 100)
    sf2, bf2 = bn(16, 10)

    conv1_hwio = jnp.transpose(conv1_w, (2, 3, 1, 0))      # (5,5,1,64)
    conv2_hwio = jnp.transpose(conv2_w, (2, 3, 1, 0))      # (5,5,64,128)

    # Kernel-side matrices: BN scale folded into the weights, lane-friendly
    # zero padding, bf16 for the big MXU operands.
    w1_mat = jnp.pad(conv1_hwio.reshape(25, 64) * s1,
                     ((0, 7), (0, 0))).astype(jnp.bfloat16)            # (32, 64)
    w2_mat = (conv2_hwio.reshape(25 * 64, 128) * s2).astype(jnp.bfloat16)  # (1600,128)
    wf1_mat = jnp.pad(fc1_w.T * sf1, ((0, 0), (0, 28))).astype(jnp.bfloat16)  # (6272,128)
    bf1_pad = jnp.pad(bf1, ((0, 0), (0, 28)))                          # (1,128) f32
    wf2_mat = jnp.pad(fc2_w.T * sf2, ((0, 28), (0, 118)))              # (128,128) f32
    bf2_pad = jnp.pad(bf2, ((0, 0), (0, 118)), constant_values=NEG_BIG)  # (1,128) f32

    return dict(
        conv1_hwio=conv1_hwio, conv2_hwio=conv2_hwio, fc1_w=fc1_w, fc2_w=fc2_w,
        s1=s1, b1=b1, s2=s2, b2=b2, sf1=sf1, bf1=bf1, sf2=sf2, bf2=bf2,
        w1_mat=w1_mat, w2_mat=w2_mat, wf1_mat=wf1_mat, bf1_pad=bf1_pad,
        wf2_mat=wf2_mat, bf2_pad=bf2_pad,
    )


# ------------------------------- Forward --------------------------------------

def forward(params, x_nchw):
    x = jnp.transpose(x_nchw, (0, 2, 3, 1)).astype(jnp.float32)    # NCHW -> NHWC
    x = (x - 0.5) * 2.0
    B = x.shape[0]

    # conv1 + BN + ReLU + pool1 (fused kernel).
    # TODO(synk): conv1's im2col stays as XLA glue -- a 1-channel input makes
    #             in-kernel shifted matmuls lane-starved, and the (B*784, 32)
    #             bf16 im2col matrix is tiny.
    p1 = im2col(x, 5, 2)                                           # (B*784, 25)
    p1 = jnp.pad(p1, ((0, 0), (0, 7))).astype(jnp.bfloat16)        # K: 25 -> 32
    o1 = conv1_bn_relu_pool(p1, params['w1_mat'], params['b1'], B)  # (B,14,14,64)

    # conv2 + BN + ReLU + pool2 (fused kernel, in-kernel im2col via row shifts).
    x2 = jnp.pad(o1, ((0, 0), (2, 3), (2, 2), (0, 0)))             # (B,19,18,64)
    x2 = x2.reshape(B, 19 * 18, 64)
    o2 = conv2_bn_relu_pool(x2, params['w2_mat'], params['b2'], B)  # (B,7,7,128)

    # flatten in (h, w, c) order == torch permute(0,2,3,1) + flatten
    flat = o2.reshape(B, 6272)

    # fc1 + BN + fc2 + BN + log_softmax (single fused kernel, 128-lane output)
    out128 = fc_fused(flat, params['wf1_mat'], params['bf1_pad'],
                      params['wf2_mat'], params['bf2_pad'])        # (B, 128)
    return out128[:, :10]


# --------------------------- Pure-JAX reference -------------------------------

def reference_forward(params, x_nchw):
    x = jnp.transpose(x_nchw, (0, 2, 3, 1)).astype(jnp.float32)
    x = (x - 0.5) * 2.0
    dn = ('NHWC', 'HWIO', 'NHWC')
    hp = lax.Precision.HIGHEST

    c1 = lax.conv_general_dilated(x, params['conv1_hwio'], (1, 1), ((2, 2), (2, 2)),
                                  dimension_numbers=dn, precision=hp)
    c1 = jnp.maximum(c1 * params['s1'] + params['b1'], 0.0)
    o1 = lax.reduce_window(c1, -jnp.inf, lax.max, (1, 2, 2, 1), (1, 2, 2, 1), 'VALID')

    c2 = lax.conv_general_dilated(o1, params['conv2_hwio'], (1, 1), ((2, 2), (2, 2)),
                                  dimension_numbers=dn, precision=hp)
    c2 = jnp.maximum(c2 * params['s2'] + params['b2'], 0.0)
    o2 = lax.reduce_window(c2, -jnp.inf, lax.max, (1, 2, 2, 1), (1, 2, 2, 1), 'VALID')

    flat = o2.reshape(o2.shape[0], -1)
    f1 = jnp.dot(flat, params['fc1_w'].T, precision=hp) * params['sf1'] + params['bf1']
    logits = jnp.dot(f1, params['fc2_w'].T, precision=hp) * params['sf2'] + params['bf2']
    return jax.nn.log_softmax(logits, axis=-1)


# --------------------------------- Main ---------------------------------------

if __name__ == "__main__":
    key = jax.random.PRNGKey(0)
    pkey, xkey = jax.random.split(key)
    params = init_params(pkey)

    # MNIST-like input, NCHW as in PyTorch: batch=2, 1 channel, 28x28.
    x = jax.random.uniform(xkey, (2, 1, 28, 28), jnp.float32)

    out = jax.jit(lambda xx: forward(params, xx))(x)
    out = jax.block_until_ready(out)

    ref = reference_forward(params, x)
    np.testing.assert_allclose(np.asarray(out), np.asarray(ref), rtol=2e-2, atol=2e-2)
    assert out.shape == (2, 10)

    print("KERNEL_OK")
</pallas_src>

<mosaic_0001>
module attributes {stable_mosaic.version = 11 : i64} {
  func.func @_conv1_kernel(%arg0: i32, %arg1: memref<784x32xbf16, #tpu.memory_space<vmem>>, %arg2: memref<32x64xbf16, #tpu.memory_space<vmem>>, %arg3: memref<1x64xf32, #tpu.memory_space<vmem>>, %arg4: memref<1x14x14x64xbf16, #tpu.memory_space<vmem>>, %arg5: memref<784x64xf32, #tpu.memory_space<vmem>>) attributes {dimension_semantics = [#tpu.dimension_semantics<parallel>], iteration_bounds = array<i64: 2>, scalar_prefetch = 0 : i64, scratch_operands = 1 : i64, tpu.core_type = #tpu.core_type<tc>, window_params = [{transform_indices = @transform_0, window_bounds = array<i64: 784, 32>}, {pipeline_mode = #tpu.pipeline_mode<synchronous>, transform_indices = @transform_1, window_bounds = array<i64: 32, 64>}, {pipeline_mode = #tpu.pipeline_mode<synchronous>, transform_indices = @transform_2, window_bounds = array<i64: 1, 64>}, {transform_indices = @transform_3, window_bounds = array<i64: 1, 14, 14, 64>}]} {
    %c0 = arith.constant 0 : index
    %c0_0 = arith.constant 0 : index
    %0 = vector.load %arg1[%c0, %c0_0] : memref<784x32xbf16, #tpu.memory_space<vmem>>, vector<784x32xbf16>
    %c0_1 = arith.constant 0 : index
    %c0_2 = arith.constant 0 : index
    %1 = vector.load %arg2[%c0_1, %c0_2] : memref<32x64xbf16, #tpu.memory_space<vmem>>, vector<32x64xbf16>
    %cst = arith.constant dense<0.000000e+00> : vector<784x64xf32>
    %2 = tpu.matmul %0, %1, %cst {dimension_numbers = #tpu.dot_dimension_numbers<[1], [0], [0], [1], [0, 0, 1, 1], [], []>} : vector<784x32xbf16>, vector<32x64xbf16>, vector<784x64xf32> -> vector<784x64xf32>
    %c0_3 = arith.constant 0 : index
    %c0_4 = arith.constant 0 : index
    %3 = vector.load %arg5[%c0_3, %c0_4] : memref<784x64xf32, #tpu.memory_space<vmem>>, vector<784x64xf32>
    tpu.vector_store %arg5[%c0_3, %c0_4], %2 {strides = array<i32>} : memref<784x64xf32, #tpu.memory_space<vmem>>, vector<784x64xf32>,
    %c0_5 = arith.constant 0 : index
    %c0_6 = arith.constant 0 : index
    %4 = vector.load %arg5[%c0_5, %c0_6] : memref<784x64xf32, #tpu.memory_space<vmem>>, vector<756x64xf32>
    %c28 = arith.constant 28 : index
    %c0_7 = arith.constant 0 : index
    %5 = vector.load %arg5[%c28, %c0_7] : memref<784x64xf32, #tpu.memory_space<vmem>>, vector<756x64xf32>
    %6 = arith.maximumf %4, %5 : vector<756x64xf32>
    %c0_8 = arith.constant 0 : index
    %c0_9 = arith.constant 0 : index
    %7 = vector.load %arg5[%c0_8, %c0_9] : memref<784x64xf32, #tpu.memory_space<vmem>>, vector<756x64xf32>
    tpu.vector_store %arg5[%c0_8, %c0_9], %6 {strides = array<i32>} : memref<784x64xf32, #tpu.memory_space<vmem>>, vector<756x64xf32>,
    %c0_10 = arith.constant 0 : index
    %c0_11 = arith.constant 0 : index
    %8 = vector.load %arg5[%c0_10, %c0_11] : memref<784x64xf32, #tpu.memory_space<vmem>>, vector<755x64xf32>
    %c1 = arith.constant 1 : index
    %c0_12 = arith.constant 0 : index
    %9 = vector.load %arg5[%c1, %c0_12] : memref<784x64xf32, #tpu.memory_space<vmem>>, vector<755x64xf32>
    %10 = arith.maximumf %8, %9 : vector<755x64xf32>
    %c0_13 = arith.constant 0 : index
    %c0_14 = arith.constant 0 : index
    %11 = vector.load %arg5[%c0_13, %c0_14] : memref<784x64xf32, #tpu.memory_space<vmem>>, vector<755x64xf32>
    tpu.vector_store %arg5[%c0_13, %c0_14], %10 {strides = array<i32>} : memref<784x64xf32, #tpu.memory_space<vmem>>, vector<755x64xf32>,
    %c0_15 = arith.constant 0 : index
    %c0_16 = arith.constant 0 : index
    %12 = vector.load %arg3[%c0_15, %c0_16] : memref<1x64xf32, #tpu.memory_space<vmem>>, vector<1x64xf32>
    %c0_17 = arith.constant 0 : index
    %c0_18 = arith.constant 0 : index
    %13 = tpu.strided_load %arg5[%c0_17, %c0_18] {strides = array<i32: 2, 1>} : memref<784x64xf32, #tpu.memory_space<vmem>>, vector<14x64xf32>
    %14 = vector.broadcast %12 : vector<1x64xf32> to vector<14x64xf32>
    %15 = arith.addf %13, %14 : vector<14x64xf32>
    %cst_19 = arith.constant 0.000000e+00 : f32
    %16 = vector.broadcast %cst_19 : f32 to vector<14x64xf32>
    %17 = arith.maximumf %15, %16 : vector<14x64xf32>
    %18 = arith.truncf %17 : vector<14x64xf32> to vector<14x64xbf16>
    %c0_20 = arith.constant 0 : index
    %c0_21 = arith.constant 0 : index
    %c0_22 = arith.constant 0 : index
    %c0_23 = arith.constant 0 : index
    %19 = vector.load %arg4[%c0_20, %c0_21, %c0_22, %c0_23] : memref<1x14x14x64xbf16, #tpu.memory_space<vmem>>, vector<1x1x14x64xbf16>
    %20 = vector.shape_cast %19 : vector<1x1x14x64xbf16> to vector<14x64xbf16>
    %21 = vector.shape_cast %18 : vector<14x64xbf16> to vector<1x1x14x64xbf16>
    tpu.vector_store %arg4[%c0_20, %c0_21, %c0_22, %c0_23], %21 {strides = array<i32>} : memref<1x14x14x64xbf16, #tpu.memory_space<vmem>>, vector<1x1x14x64xbf16>,
    %c56 = arith.constant 56 : index
    %c0_24 = arith.constant 0 : index
    %22 = tpu.strided_load %arg5[%c56, %c0_24] {strides = array<i32: 2, 1>} : memref<784x64xf32, #tpu.memory_space<vmem>>, vector<14x64xf32>
    %23 = vector.broadcast %12 : vector<1x64xf32> to vector<14x64xf32>
    %24 = arith.addf %22, %23 : vector<14x64xf32>
    %cst_25 = arith.constant 0.000000e+00 : f32
    %25 = vector.broadcast %cst_25 : f32 to vector<14x64xf32>
    %26 = arith.maximumf %24, %25 : vector<14x64xf32>
    %27 = arith.truncf %26 : vector<14x64xf32> to vector<14x64xbf16>
    %c0_26 = arith.constant 0 : index
    %c1_27 = arith.constant 1 : index
    %c0_28 = arith.constant 0 : index
    %c0_29 = arith.constant 0 : index
    %28 = vector.load %arg4[%c0_26, %c1_27, %c0_28, %c0_29] : memref<1x14x14x64xbf16, #tpu.memory_space<vmem>>, vector<1x1x14x64xbf16>
    %29 = vector.shape_cast %28 : vector<1x1x14x64xbf16> to vector<14x64xbf16>
    %30 = vector.shape_cast %27 : vector<14x64xbf16> to vector<1x1x14x64xbf16>
    tpu.vector_store %arg4[%c0_26, %c1_27, %c0_28, %c0_29], %30 {strides = array<i32>} : memref<1x14x14x64xbf16, #tpu.memory_space<vmem>>, vector<1x1x14x64xbf16>,
    %c112 = arith.constant 112 : index
    %c0_30 = arith.constant 0 : index
    %31 = tpu.strided_load %arg5[%c112, %c0_30] {strides = array<i32: 2, 1>} : memref<784x64xf32, #tpu.memory_space<vmem>>, vector<14x64xf32>
    %32 = vector.broadcast %12 : vector<1x64xf32> to vector<14x64xf32>
    %33 = arith.addf %31, %32 : vector<14x64xf32>
    %cst_31 = arith.constant 0.000000e+00 : f32
    %34 = vector.broadcast %cst_31 : f32 to vector<14x64xf32>
    %35 = arith.maximumf %33, %34 : vector<14x64xf32>
    %36 = arith.truncf %35 : vector<14x64xf32> to vector<14x64xbf16>
    %c0_32 = arith.constant 0 : index
    %c2 = arith.constant 2 : index
    %c0_33 = arith.constant 0 : index
    %c0_34 = arith.constant 0 : index
    %37 = vector.load %arg4[%c0_32, %c2, %c0_33, %c0_34] : memref<1x14x14x64xbf16, #tpu.memory_space<vmem>>, vector<1x1x14x64xbf16>
    %38 = vector.shape_cast %37 : vector<1x1x14x64xbf16> to vector<14x64xbf16>
    %39 = vector.shape_cast %36 : vector<14x64xbf16> to vector<1x1x14x64xbf16>
    tpu.vector_store %arg4[%c0_32, %c2, %c0_33, %c0_34], %39 {strides = array<i32>} : memref<1x14x14x64xbf16, #tpu.memory_space<vmem>>, vector<1x1x14x64xbf16>,
    %c168 = arith.constant 168 : index
    %c0_35 = arith.constant 0 : index
    %40 = tpu.strided_load %arg5[%c168, %c0_35] {strides = array<i32: 2, 1>} : memref<784x64xf32, #tpu.memory_space<vmem>>, vector<14x64xf32>
    %41 = vector.broadcast %12 : vector<1x64xf32> to vector<14x64xf32>
    %42 = arith.addf %40, %41 : vector<14x64xf32>
    %cst_36 = arith.constant 0.000000e+00 : f32
    %43 = vector.broadcast %cst_36 : f32 to vector<14x64xf32>
    %44 = arith.maximumf %42, %43 : vector<14x64xf32>
    %45 = arith.truncf %44 : vector<14x64xf32> to vector<14x64xbf16>
    %c0_37 = arith.constant 0 : index
    %c3 = arith.constant 3 : index
    %c0_38 = arith.constant 0 : index
    %c0_39 = arith.constant 0 : index
    %46 = vector.load %arg4[%c0_37, %c3, %c0_38, %c0_39] : memref<1x14x14x64xbf16, #tpu.memory_space<vmem>>, vector<1x1x14x64xbf16>
    %47 = vector.shape_cast %46 : vector<1x1x14x64xbf16> to vector<14x64xbf16>
    %48 = vector.shape_cast %45 : vector<14x64xbf16> to vector<1x1x14x64xbf16>
    tpu.vector_store %arg4[%c0_37, %c3, %c0_38, %c0_39], %48 {strides = array<i32>} : memref<1x14x14x64xbf16, #tpu.memory_space<vmem>>, vector<1x1x14x64xbf16>,
    %c224 = arith.constant 224 : index
    %c0_40 = arith.constant 0 : index
    %49 = tpu.strided_load %arg5[%c224, %c0_40] {strides = array<i32: 2, 1>} : memref<784x64xf32, #tpu.memory_space<vmem>>, vector<14x64xf32>
    %50 = vector.broadcast %12 : vector<1x64xf32> to vector<14x64xf32>
    %51 = arith.addf %49, %50 : vector<14x64xf32>
    %cst_41 = arith.constant 0.000000e+00 : f32
    %52 = vector.broadcast %cst_41 : f32 to vector<14x64xf32>
    %53 = arith.maximumf %51, %52 : vector<14x64xf32>
    %54 = arith.truncf %53 : vector<14x64xf32> to vector<14x64xbf16>
    %c0_42 = arith.constant 0 : index
    %c4 = arith.constant 4 : index
    %c0_43 = arith.constant 0 : index
    %c0_44 = arith.constant 0 : index
    %55 = vector.load %arg4[%c0_42, %c4, %c0_43, %c0_44] : memref<1x14x14x64xbf16, #tpu.memory_space<vmem>>, vector<1x1x14x64xbf16>
    %56 = vector.shape_cast %55 : vector<1x1x14x64xbf16> to vector<14x64xbf16>
    %57 = vector.shape_cast %54 : vector<14x64xbf16> to vector<1x1x14x64xbf16>
    tpu.vector_store %arg4[%c0_42, %c4, %c0_43, %c0_44], %57 {strides = array<i32>} : memref<1x14x14x64xbf16, #tpu.memory_space<vmem>>, vector<1x1x14x64xbf16>,
    %c280 = arith.constant 280 : index
    %c0_45 = arith.constant 0 : index
    %58 = tpu.strided_load %arg5[%c280, %c0_45] {strides = array<i32: 2, 1>} : memref<784x64xf32, #tpu.memory_space<vmem>>, vector<14x64xf32>
    %59 = vector.broadcast %12 : vector<1x64xf32> to vector<14x64xf32>
    %60 = arith.addf %58, %59 : vector<14x64xf32>
    %cst_46 = arith.constant 0.000000e+00 : f32
    %61 = vector.broadcast %cst_46 : f32 to vector<14x64xf32>
    %62 = arith.maximumf %60, %61 : vector<14x64xf32>
    %63 = arith.truncf %62 : vector<14x64xf32> to vector<14x64xbf16>
    %c0_47 = arith.constant 0 : index
    %c5 = arith.constant 5 : index
    %c0_48 = arith.constant 0 : index
    %c0_49 = arith.constant 0 : index
    %64 = vector.load %arg4[%c0_47, %c5, %c0_48, %c0_49] : memref<1x14x14x64xbf16, #tpu.memory_space<vmem>>, vector<1x1x14x64xbf16>
    %65 = vector.shape_cast %64 : vector<1x1x14x64xbf16> to vector<14x64xbf16>
    %66 = vector.shape_cast %63 : vector<14x64xbf16> to vector<1x1x14x64xbf16>
    tpu.vector_store %arg4[%c0_47, %c5, %c0_48, %c0_49], %66 {strides = array<i32>} : memref<1x14x14x64xbf16, #tpu.memory_space<vmem>>, vector<1x1x14x64xbf16>,
    %c336 = arith.constant 336 : index
    %c0_50 = arith.constant 0 : index
    %67 = tpu.strided_load %arg5[%c336, %c0_50] {strides = array<i32: 2, 1>} : memref<784x64xf32, #tpu.memory_space<vmem>>, vector<14x64xf32>
    %68 = vector.broadcast %12 : vector<1x64xf32> to vector<14x64xf32>
    %69 = arith.addf %67, %68 : vector<14x64xf32>
    %cst_51 = arith.constant 0.000000e+00 : f32
    %70 = vector.broadcast %cst_51 : f32 to vector<14x64xf32>
    %71 = arith.maximumf %69, %70 : vector<14x64xf32>
    %72 = arith.truncf %71 : vector<14x64xf32> to vector<14x64xbf16>
    %c0_52 = arith.constant 0 : index
    %c6 = arith.constant 6 : index
    %c0_53 = arith.constant 0 : index
    %c0_54 = arith.constant 0 : index
    %73 = vector.load %arg4[%c0_52, %c6, %c0_53, %c0_54] : memref<1x14x14x64xbf16, #tpu.memory_space<vmem>>, vector<1x1x14x64xbf16>
    %74 = vector.shape_cast %73 : vector<1x1x14x64xbf16> to vector<14x64xbf16>
    %75 = vector.shape_cast %72 : vector<14x64xbf16> to vector<1x1x14x64xbf16>
    tpu.vector_store %arg4[%c0_52, %c6, %c0_53, %c0_54], %75 {strides = array<i32>} : memref<1x14x14x64xbf16, #tpu.memory_space<vmem>>, vector<1x1x14x64xbf16>,
    %c392 = arith.constant 392 : index
    %c0_55 = arith.constant 0 : index
    %76 = tpu.strided_load %arg5[%c392, %c0_55] {strides = array<i32: 2, 1>} : memref<784x64xf32, #tpu.memory_space<vmem>>, vector<14x64xf32>
    %77 = vector.broadcast %12 : vector<1x64xf32> to vector<14x64xf32>
    %78 = arith.addf %76, %77 : vector<14x64xf32>
    %cst_56 = arith.constant 0.000000e+00 : f32
    %79 = vector.broadcast %cst_56 : f32 to vector<14x64xf32>
    %80 = arith.maximumf %78, %79 : vector<14x64xf32>
    %81 = arith.truncf %80 : vector<14x64xf32> to vector<14x64xbf16>
    %c0_57 = arith.constant 0 : index
    %c7 = arith.constant 7 : index
    %c0_58 = arith.constant 0 : index
    %c0_59 = arith.constant 0 : index
    %82 = vector.load %arg4[%c0_57, %c7, %c0_58, %c0_59] : memref<1x14x14x64xbf16, #tpu.memory_space<vmem>>, vector<1x1x14x64xbf16>
    %83 = vector.shape_cast %82 : vector<1x1x14x64xbf16> to vector<14x64xbf16>
    %84 = vector.shape_cast %81 : vector<14x64xbf16> to vector<1x1x14x64xbf16>
    tpu.vector_store %arg4[%c0_57, %c7, %c0_58, %c0_59], %84 {strides = array<i32>} : memref<1x14x14x64xbf16, #tpu.memory_space<vmem>>, vector<1x1x14x64xbf16>,
    %c448 = arith.constant 448 : index
    %c0_60 = arith.constant 0 : index
    %85 = tpu.strided_load %arg5[%c448, %c0_60] {strides = array<i32: 2, 1>} : memref<784x64xf32, #tpu.memory_space<vmem>>, vector<14x64xf32>
    %86 = vector.broadcast %12 : vector<1x64xf32> to vector<14x64xf32>
    %87 = arith.addf %85, %86 : vector<14x64xf32>
    %cst_61 = arith.constant 0.000000e+00 : f32
    %88 = vector.broadcast %cst_61 : f32 to vector<14x64xf32>
    %89 = arith.maximumf %87, %88 : vector<14x64xf32>
    %90 = arith.truncf %89 : vector<14x64xf32> to vector<14x64xbf16>
    %c0_62 = arith.constant 0 : index
    %c8 = arith.constant 8 : index
    %c0_63 = arith.constant 0 : index
    %c0_64 = arith.constant 0 : index
    %91 = vector.load %arg4[%c0_62, %c8, %c0_63, %c0_64] : memref<1x14x14x64xbf16, #tpu.memory_space<vmem>>, vector<1x1x14x64xbf16>
    %92 = vector.shape_cast %91 : vector<1x1x14x64xbf16> to vector<14x64xbf16>
    %93 = vector.shape_cast %90 : vector<14x64xbf16> to vector<1x1x14x64xbf16>
    tpu.vector_store %arg4[%c0_62, %c8, %c0_63, %c0_64], %93 {strides = array<i32>} : memref<1x14x14x64xbf16, #tpu.memory_space<vmem>>, vector<1x1x14x64xbf16>,
    %c504 = arith.constant 504 : index
    %c0_65 = arith.constant 0 : index
    %94 = tpu.strided_load %arg5[%c504, %c0_65] {strides = array<i32: 2, 1>} : memref<784x64xf32, #tpu.memory_space<vmem>>, vector<14x64xf32>
    %95 = vector.broadcast %12 : vector<1x64xf32> to vector<14x64xf32>
    %96 = arith.addf %94, %95 : vector<14x64xf32>
    %cst_66 = arith.constant 0.000000e+00 : f32
    %97 = vector.broadcast %cst_66 : f32 to vector<14x64xf32>
    %98 = arith.maximumf %96, %97 : vector<14x64xf32>
    %99 = arith.truncf %98 : vector<14x64xf32> to vector<14x64xbf16>
    %c0_67 = arith.constant 0 : index
    %c9 = arith.constant 9 : index
    %c0_68 = arith.constant 0 : index
    %c0_69 = arith.constant 0 : index
    %100 = vector.load %arg4[%c0_67, %c9, %c0_68, %c0_69] : memref<1x14x14x64xbf16, #tpu.memory_space<vmem>>, vector<1x1x14x64xbf16>
    %101 = vector.shape_cast %100 : vector<1x1x14x64xbf16> to vector<14x64xbf16>
    %102 = vector.shape_cast %99 : vector<14x64xbf16> to vector<1x1x14x64xbf16>
    tpu.vector_store %arg4[%c0_67, %c9, %c0_68, %c0_69], %102 {strides = array<i32>} : memref<1x14x14x64xbf16, #tpu.memory_space<vmem>>, vector<1x1x14x64xbf16>,
    %c560 = arith.constant 560 : index
    %c0_70 = arith.constant 0 : index
    %103 = tpu.strided_load %arg5[%c560, %c0_70] {strides = array<i32: 2, 1>} : memref<784x64xf32, #tpu.memory_space<vmem>>, vector<14x64xf32>
    %104 = vector.broadcast %12 : vector<1x64xf32> to vector<14x64xf32>
    %105 = arith.addf %103, %104 : vector<14x64xf32>
    %cst_71 = arith.constant 0.000000e+00 : f32
    %106 = vector.broadcast %cst_71 : f32 to vector<14x64xf32>
    %107 = arith.maximumf %105, %106 : vector<14x64xf32>
    %108 = arith.truncf %107 : vector<14x64xf32> to vector<14x64xbf16>
    %c0_72 = arith.constant 0 : index
    %c10 = arith.constant 10 : index
    %c0_73 = arith.constant 0 : index
    %c0_74 = arith.constant 0 : index
    %109 = vector.load %arg4[%c0_72, %c10, %c0_73, %c0_74] : memref<1x14x14x64xbf16, #tpu.memory_space<vmem>>, vector<1x1x14x64xbf16>
    %110 = vector.shape_cast %109 : vector<1x1x14x64xbf16> to vector<14x64xbf16>
    %111 = vector.shape_cast %108 : vector<14x64xbf16> to vector<1x1x14x64xbf16>
    tpu.vector_store %arg4[%c0_72, %c10, %c0_73, %c0_74], %111 {strides = array<i32>} : memref<1x14x14x64xbf16, #tpu.memory_space<vmem>>, vector<1x1x14x64xbf16>,
    %c616 = arith.constant 616 : index
    %c0_75 = arith.constant 0 : index
    %112 = tpu.strided_load %arg5[%c616, %c0_75] {strides = array<i32: 2, 1>} : memref<784x64xf32, #tpu.memory_space<vmem>>, vector<14x64xf32>
    %113 = vector.broadcast %12 : vector<1x64xf32> to vector<14x64xf32>
    %114 = arith.addf %112, %113 : vector<14x64xf32>
    %cst_76 = arith.constant 0.000000e+00 : f32
    %115 = vector.broadcast %cst_76 : f32 to vector<14x64xf32>
    %116 = arith.maximumf %114, %115 : vector<14x64xf32>
    %117 = arith.truncf %116 : vector<14x64xf32> to vector<14x64xbf16>
    %c0_77 = arith.constant 0 : index
    %c11 = arith.constant 11 : index
    %c0_78 = arith.constant 0 : index
    %c0_79 = arith.constant 0 : index
    %118 = vector.load %arg4[%c0_77, %c11, %c0_78, %c0_79] : memref<1x14x14x64xbf16, #tpu.memory_space<vmem>>, vector<1x1x14x64xbf16>
    %119 = vector.shape_cast %118 : vector<1x1x14x64xbf16> to vector<14x64xbf16>
    %120 = vector.shape_cast %117 : vector<14x64xbf16> to vector<1x1x14x64xbf16>
    tpu.vector_store %arg4[%c0_77, %c11, %c0_78, %c0_79], %120 {strides = array<i32>} : memref<1x14x14x64xbf16, #tpu.memory_space<vmem>>, vector<1x1x14x64xbf16>,
    %c672 = arith.constant 672 : index
    %c0_80 = arith.constant 0 : index
    %121 = tpu.strided_load %arg5[%c672, %c0_80] {strides = array<i32: 2, 1>} : memref<784x64xf32, #tpu.memory_space<vmem>>, vector<14x64xf32>
    %122 = vector.broadcast %12 : vector<1x64xf32> to vector<14x64xf32>
    %123 = arith.addf %121, %122 : vector<14x64xf32>
    %cst_81 = arith.constant 0.000000e+00 : f32
    %124 = vector.broadcast %cst_81 : f32 to vector<14x64xf32>
    %125 = arith.maximumf %123, %124 : vector<14x64xf32>
    %126 = arith.truncf %125 : vector<14x64xf32> to vector<14x64xbf16>
    %c0_82 = arith.constant 0 : index
    %c12 = arith.constant 12 : index
    %c0_83 = arith.constant 0 : index
    %c0_84 = arith.constant 0 : index
    %127 = vector.load %arg4[%c0_82, %c12, %c0_83, %c0_84] : memref<1x14x14x64xbf16, #tpu.memory_space<vmem>>, vector<1x1x14x64xbf16>
    %128 = vector.shape_cast %127 : vector<1x1x14x64xbf16> to vector<14x64xbf16>
    %129 = vector.shape_cast %126 : vector<14x64xbf16> to vector<1x1x14x64xbf16>
    tpu.vector_store %arg4[%c0_82, %c12, %c0_83, %c0_84], %129 {strides = array<i32>} : memref<1x14x14x64xbf16, #tpu.memory_space<vmem>>, vector<1x1x14x64xbf16>,
    %c728 = arith.constant 728 : index
    %c0_85 = arith.constant 0 : index
    %130 = tpu.strided_load %arg5[%c728, %c0_85] {strides = array<i32: 2, 1>} : memref<784x64xf32, #tpu.memory_space<vmem>>, vector<14x64xf32>
    %131 = vector.broadcast %12 : vector<1x64xf32> to vector<14x64xf32>
    %132 = arith.addf %130, %131 : vector<14x64xf32>
    %cst_86 = arith.constant 0.000000e+00 : f32
    %133 = vector.broadcast %cst_86 : f32 to vector<14x64xf32>
    %134 = arith.maximumf %132, %133 : vector<14x64xf32>
    %135 = arith.truncf %134 : vector<14x64xf32> to vector<14x64xbf16>
    %c0_87 = arith.constant 0 : index
    %c13 = arith.constant 13 : index
    %c0_88 = arith.constant 0 : index
    %c0_89 = arith.constant 0 : index
    %136 = vector.load %arg4[%c0_87, %c13, %c0_88, %c0_89] : memref<1x14x14x64xbf16, #tpu.memory_space<vmem>>, vector<1x1x14x64xbf16>
    %137 = vector.shape_cast %136 : vector<1x1x14x64xbf16> to vector<14x64xbf16>
    %138 = vector.shape_cast %135 : vector<14x64xbf16> to vector<1x1x14x64xbf16>
    tpu.vector_store %arg4[%c0_87, %c13, %c0_88, %c0_89], %138 {strides = array<i32>} : memref<1x14x14x64xbf16, #tpu.memory_space<vmem>>, vector<1x1x14x64xbf16>,
    return
  }
  func.func @transform_0(%arg0: i32) -> (i32, i32) {
    %c0_i32 = arith.constant 0 : i32
    %c0_i32_0 = arith.constant 0 : i32
    return %arg0, %c0_i32 : i32, i32
  }
  func.func @transform_1(%arg0: i32) -> (i32, i32) {
    %c0_i32 = arith.constant 0 : i32
    %c0_i32_0 = arith.constant 0 : i32
    %c0_i32_1 = arith.constant 0 : i32
    return %c0_i32, %c0_i32_0 : i32, i32
  }
  func.func @transform_2(%arg0: i32) -> (i32, i32) {
    %c0_i32 = arith.constant 0 : i32
    %c0_i32_0 = arith.constant 0 : i32
    %c0_i32_1 = arith.constant 0 : i32
    return %c0_i32, %c0_i32_0 : i32, i32
  }
  func.func @transform_3(%arg0: i32) -> (i32, i32, i32, i32) {
    %c0_i32 = arith.constant 0 : i32
    %c0_i32_0 = arith.constant 0 : i32
    %c0_i32_1 = arith.constant 0 : i32
    %c0_i32_2 = arith.constant 0 : i32
    return %arg0, %c0_i32, %c0_i32_0, %c0_i32_1 : i32, i32, i32, i32
  }
}

module attributes {stable_mosaic.version = 11 : i64} {
  func.func @_conv2_kernel(%arg0: i32, %arg1: memref<1x342x64xbf16, #tpu.memory_space<vmem>>, %arg2: memref<1600x128xbf16, #tpu.memory_space<vmem>>, %arg3: memref<1x128xf32, #tpu.memory_space<vmem>>, %arg4: memref<1x7x7x128xbf16, #tpu.memory_space<vmem>>, %arg5: memref<252x128xf32, #tpu.memory_space<vmem>>) attributes {dimension_semantics = [#tpu.dimension_semantics<parallel>], iteration_bounds = array<i64: 2>, scalar_prefetch = 0 : i64, scratch_operands = 1 : i64, tpu.core_type = #tpu.core_type<tc>, window_params = [{transform_indices = @transform_0, window_bounds = array<i64: 1, 342, 64>}, {pipeline_mode = #tpu.pipeline_mode<synchronous>, transform_indices = @transform_1, window_bounds = array<i64: 1600, 128>}, {pipeline_mode = #tpu.pipeline_mode<synchronous>, transform_indices = @transform_2, window_bounds = array<i64: 1, 128>}, {transform_indices = @transform_3, window_bounds = array<i64: 1, 7, 7, 128>}]} {
    %c0 = arith.constant 0 : index
    %c0_0 = arith.constant 0 : index
    %c0_1 = arith.constant 0 : index
    %0 = vector.load %arg1[%c0, %c0_0, %c0_1] : memref<1x342x64xbf16, #tpu.memory_space<vmem>>, vector<1x252x64xbf16>
    %1 = vector.shape_cast %0 : vector<1x252x64xbf16> to vector<252x64xbf16>
    %c0_2 = arith.constant 0 : index
    %c0_3 = arith.constant 0 : index
    %2 = vector.load %arg2[%c0_2, %c0_3] : memref<1600x128xbf16, #tpu.memory_space<vmem>>, vector<64x128xbf16>
    %cst = arith.constant dense<0.000000e+00> : vector<252x128xf32>
    %3 = tpu.matmul %1, %2, %cst {dimension_numbers = #tpu.dot_dimension_numbers<[1], [0], [0], [1], [0, 0, 1, 1], [], []>} : vector<252x64xbf16>, vector<64x128xbf16>, vector<252x128xf32> -> vector<252x128xf32>
    %c0_4 = arith.constant 0 : index
    %c0_5 = arith.constant 0 : index
    %4 = vector.load %arg5[%c0_4, %c0_5] : memref<252x128xf32, #tpu.memory_space<vmem>>, vector<252x128xf32>
    tpu.vector_store %arg5[%c0_4, %c0_5], %3 {strides = array<i32>} : memref<252x128xf32, #tpu.memory_space<vmem>>, vector<252x128xf32>,
    %c0_6 = arith.constant 0 : index
    %c1 = arith.constant 1 : index
    %c0_7 = arith.constant 0 : index
    %5 = vector.load %arg1[%c0_6, %c1, %c0_7] : memref<1x342x64xbf16, #tpu.memory_space<vmem>>, vector<1x252x64xbf16>
    %6 = vector.shape_cast %5 : vector<1x252x64xbf16> to vector<252x64xbf16>
    %c64 = arith.constant 64 : index
    %c0_8 = arith.constant 0 : index
    %7 = vector.load %arg2[%c64, %c0_8] : memref<1600x128xbf16, #tpu.memory_space<vmem>>, vector<64x128xbf16>
    %cst_9 = arith.constant dense<0.000000e+00> : vector<252x128xf32>
    %8 = tpu.matmul %6, %7, %cst_9 {dimension_numbers = #tpu.dot_dimension_numbers<[1], [0], [0], [1], [0, 0, 1, 1], [], []>} : vector<252x64xbf16>, vector<64x128xbf16>, vector<252x128xf32> -> vector<252x128xf32>
    %c0_10 = arith.constant 0 : index
    %c0_11 = arith.constant 0 : index
    %9 = vector.load %arg5[%c0_10, %c0_11] : memref<252x128xf32, #tpu.memory_space<vmem>>, vector<252x128xf32>
    %10 = arith.addf %9, %8 : vector<252x128xf32>
    %c0_12 = arith.constant 0 : index
    %c0_13 = arith.constant 0 : index
    %11 = vector.load %arg5[%c0_12, %c0_13] : memref<252x128xf32, #tpu.memory_space<vmem>>, vector<252x128xf32>
    tpu.vector_store %arg5[%c0_12, %c0_13], %10 {strides = array<i32>} : memref<252x128xf32, #tpu.memory_space<vmem>>, vector<252x128xf32>,
    %c0_14 = arith.constant 0 : index
    %c2 = arith.constant 2 : index
    %c0_15 = arith.constant 0 : index
    %12 = vector.load %arg1[%c0_14, %c2, %c0_15] : memref<1x342x64xbf16, #tpu.memory_space<vmem>>, vector<1x252x64xbf16>
    %13 = vector.shape_cast %12 : vector<1x252x64xbf16> to vector<252x64xbf16>
    %c128 = arith.constant 128 : index
    %c0_16 = arith.constant 0 : index
    %14 = vector.load %arg2[%c128, %c0_16] : memref<1600x128xbf16, #tpu.memory_space<vmem>>, vector<64x128xbf16>
    %cst_17 = arith.constant dense<0.000000e+00> : vector<252x128xf32>
    %15 = tpu.matmul %13, %14, %cst_17 {dimension_numbers = #tpu.dot_dimension_numbers<[1], [0], [0], [1], [0, 0, 1, 1], [], []>} : vector<252x64xbf16>, vector<64x128xbf16>, vector<252x128xf32> -> vector<252x128xf32>
    %c0_18 = arith.constant 0 : index
    %c0_19 = arith.constant 0 : index
    %16 = vector.load %arg5[%c0_18, %c0_19] : memref<252x128xf32, #tpu.memory_space<vmem>>, vector<252x128xf32>
    %17 = arith.addf %16, %15 : vector<252x128xf32>
    %c0_20 = arith.constant 0 : index
    %c0_21 = arith.constant 0 : index
    %18 = vector.load %arg5[%c0_20, %c0_21] : memref<252x128xf32, #tpu.memory_space<vmem>>, vector<252x128xf32>
    tpu.vector_store %arg5[%c0_20, %c0_21], %17 {strides = array<i32>} : memref<252x128xf32, #tpu.memory_space<vmem>>, vector<252x128xf32>,
    %c0_22 = arith.constant 0 : index
    %c3 = arith.constant 3 : index
    %c0_23 = arith.constant 0 : index
    %19 = vector.load %arg1[%c0_22, %c3, %c0_23] : memref<1x342x64xbf16, #tpu.memory_space<vmem>>, vector<1x252x64xbf16>
    %20 = vector.shape_cast %19 : vector<1x252x64xbf16> to vector<252x64xbf16>
    %c192 = arith.constant 192 : index
    %c0_24 = arith.constant 0 : index
    %21 = vector.load %arg2[%c192, %c0_24] : memref<1600x128xbf16, #tpu.memory_space<vmem>>, vector<64x128xbf16>
    %cst_25 = arith.constant dense<0.000000e+00> : vector<252x128xf32>
    %22 = tpu.matmul %20, %21, %cst_25 {dimension_numbers = #tpu.dot_dimension_numbers<[1], [0], [0], [1], [0, 0, 1, 1], [], []>} : vector<252x64xbf16>, vector<64x128xbf16>, vector<252x128xf32> -> vector<252x128xf32>
    %c0_26 = arith.constant 0 : index
    %c0_27 = arith.constant 0 : index
    %23 = vector.load %arg5[%c0_26, %c0_27] : memref<252x128xf32, #tpu.memory_space<vmem>>, vector<252x128xf32>
    %24 = arith.addf %23, %22 : vector<252x128xf32>
    %c0_28 = arith.constant 0 : index
    %c0_29 = arith.constant 0 : index
    %25 = vector.load %arg5[%c0_28, %c0_29] : memref<252x128xf32, #tpu.memory_space<vmem>>, vector<252x128xf32>
    tpu.vector_store %arg5[%c0_28, %c0_29], %24 {strides = array<i32>} : memref<252x128xf32, #tpu.memory_space<vmem>>, vector<252x128xf32>,
    %c0_30 = arith.constant 0 : index
    %c4 = arith.constant 4 : index
    %c0_31 = arith.constant 0 : index
    %26 = vector.load %arg1[%c0_30, %c4, %c0_31] : memref<1x342x64xbf16, #tpu.memory_space<vmem>>, vector<1x252x64xbf16>
    %27 = vector.shape_cast %26 : vector<1x252x64xbf16> to vector<252x64xbf16>
    %c256 = arith.constant 256 : index
    %c0_32 = arith.constant 0 : index
    %28 = vector.load %arg2[%c256, %c0_32] : memref<1600x128xbf16, #tpu.memory_space<vmem>>, vector<64x128xbf16>
    %cst_33 = arith.constant dense<0.000000e+00> : vector<252x128xf32>
    %29 = tpu.matmul %27, %28, %cst_33 {dimension_numbers = #tpu.dot_dimension_numbers<[1], [0], [0], [1], [0, 0, 1, 1], [], []>} : vector<252x64xbf16>, vector<64x128xbf16>, vector<252x128xf32> -> vector<252x128xf32>
    %c0_34 = arith.constant 0 : index
    %c0_35 = arith.constant 0 : index
    %30 = vector.load %arg5[%c0_34, %c0_35] : memref<252x128xf32, #tpu.memory_space<vmem>>, vector<252x128xf32>
    %31 = arith.addf %30, %29 : vector<252x128xf32>
    %c0_36 = arith.constant 0 : index
    %c0_37 = arith.constant 0 : index
    %32 = vector.load %arg5[%c0_36, %c0_37] : memref<252x128xf32, #tpu.memory_space<vmem>>, vector<252x128xf32>
    tpu.vector_store %arg5[%c0_36, %c0_37], %31 {strides = array<i32>} : memref<252x128xf32, #tpu.memory_space<vmem>>, vector<252x128xf32>,
    %c0_38 = arith.constant 0 : index
    %c18 = arith.constant 18 : index
    %c0_39 = arith.constant 0 : index
    %33 = vector.load %arg1[%c0_38, %c18, %c0_39] : memref<1x342x64xbf16, #tpu.memory_space<vmem>>, vector<1x252x64xbf16>
    %34 = vector.shape_cast %33 : vector<1x252x64xbf16> to vector<252x64xbf16>
    %c320 = arith.constant 320 : index
    %c0_40 = arith.constant 0 : index
    %35 = vector.load %arg2[%c320, %c0_40] : memref<1600x128xbf16, #tpu.memory_space<vmem>>, vector<64x128xbf16>
    %cst_41 = arith.constant dense<0.000000e+00> : vector<252x128xf32>
    %36 = tpu.matmul %34, %35, %cst_41 {dimension_numbers = #tpu.dot_dimension_numbers<[1], [0], [0], [1], [0, 0, 1, 1], [], []>} : vector<252x64xbf16>, vector<64x128xbf16>, vector<252x128xf32> -> vector<252x128xf32>
    %c0_42 = arith.constant 0 : index
    %c0_43 = arith.constant 0 : index
    %37 = vector.load %arg5[%c0_42, %c0_43] : memref<252x128xf32, #tpu.memory_space<vmem>>, vector<252x128xf32>
    %38 = arith.addf %37, %36 : vector<252x128xf32>
    %c0_44 = arith.constant 0 : index
    %c0_45 = arith.constant 0 : index
    %39 = vector.load %arg5[%c0_44, %c0_45] : memref<252x128xf32, #tpu.memory_space<vmem>>, vector<252x128xf32>
    tpu.vector_store %arg5[%c0_44, %c0_45], %38 {strides = array<i32>} : memref<252x128xf32, #tpu.memory_space<vmem>>, vector<252x128xf32>,
    %c0_46 = arith.constant 0 : index
    %c19 = arith.constant 19 : index
    %c0_47 = arith.constant 0 : index
    %40 = vector.load %arg1[%c0_46, %c19, %c0_47] : memref<1x342x64xbf16, #tpu.memory_space<vmem>>, vector<1x252x64xbf16>
    %41 = vector.shape_cast %40 : vector<1x252x64xbf16> to vector<252x64xbf16>
    %c384 = arith.constant 384 : index
    %c0_48 = arith.constant 0 : index
    %42 = vector.load %arg2[%c384, %c0_48] : memref<1600x128xbf16, #tpu.memory_space<vmem>>, vector<64x128xbf16>
    %cst_49 = arith.constant dense<0.000000e+00> : vector<252x128xf32>
    %43 = tpu.matmul %41, %42, %cst_49 {dimension_numbers = #tpu.dot_dimension_numbers<[1], [0], [0], [1], [0, 0, 1, 1], [], []>} : vector<252x64xbf16>, vector<64x128xbf16>, vector<252x128xf32> -> vector<252x128xf32>
    %c0_50 = arith.constant 0 : index
    %c0_51 = arith.constant 0 : index
    %44 = vector.load %arg5[%c0_50, %c0_51] : memref<252x128xf32, #tpu.memory_space<vmem>>, vector<252x128xf32>
    %45 = arith.addf %44, %43 : vector<252x128xf32>
    %c0_52 = arith.constant 0 : index
    %c0_53 = arith.constant 0 : index
    %46 = vector.load %arg5[%c0_52, %c0_53] : memref<252x128xf32, #tpu.memory_space<vmem>>, vector<252x128xf32>
    tpu.vector_store %arg5[%c0_52, %c0_53], %45 {strides = array<i32>} : memref<252x128xf32, #tpu.memory_space<vmem>>, vector<252x128xf32>,
    %c0_54 = arith.constant 0 : index
    %c20 = arith.constant 20 : index
    %c0_55 = arith.constant 0 : index
    %47 = vector.load %arg1[%c0_54, %c20, %c0_55] : memref<1x342x64xbf16, #tpu.memory_space<vmem>>, vector<1x252x64xbf16>
    %48 = vector.shape_cast %47 : vector<1x252x64xbf16> to vector<252x64xbf16>
    %c448 = arith.constant 448 : index
    %c0_56 = arith.constant 0 : index
    %49 = vector.load %arg2[%c448, %c0_56] : memref<1600x128xbf16, #tpu.memory_space<vmem>>, vector<64x128xbf16>
    %cst_57 = arith.constant dense<0.000000e+00> : vector<252x128xf32>
    %50 = tpu.matmul %48, %49, %cst_57 {dimension_numbers = #tpu.dot_dimension_numbers<[1], [0], [0], [1], [0, 0, 1, 1], [], []>} : vector<252x64xbf16>, vector<64x128xbf16>, vector<252x128xf32> -> vector<252x128xf32>
    %c0_58 = arith.constant 0 : index
    %c0_59 = arith.constant 0 : index
    %51 = vector.load %arg5[%c0_58, %c0_59] : memref<252x128xf32, #tpu.memory_space<vmem>>, vector<252x128xf32>
    %52 = arith.addf %51, %50 : vector<252x128xf32>
    %c0_60 = arith.constant 0 : index
    %c0_61 = arith.constant 0 : index
    %53 = vector.load %arg5[%c0_60, %c0_61] : memref<252x128xf32, #tpu.memory_space<vmem>>, vector<252x128xf32>
    tpu.vector_store %arg5[%c0_60, %c0_61], %52 {strides = array<i32>} : memref<252x128xf32, #tpu.memory_space<vmem>>, vector<252x128xf32>,
    %c0_62 = arith.constant 0 : index
    %c21 = arith.constant 21 : index
    %c0_63 = arith.constant 0 : index
    %54 = vector.load %arg1[%c0_62, %c21, %c0_63] : memref<1x342x64xbf16, #tpu.memory_space<vmem>>, vector<1x252x64xbf16>
    %55 = vector.shape_cast %54 : vector<1x252x64xbf16> to vector<252x64xbf16>
    %c512 = arith.constant 512 : index
    %c0_64 = arith.constant 0 : index
    %56 = vector.load %arg2[%c512, %c0_64] : memref<1600x128xbf16, #tpu.memory_space<vmem>>, vector<64x128xbf16>
    %cst_65 = arith.constant dense<0.000000e+00> : vector<252x128xf32>
    %57 = tpu.matmul %55, %56, %cst_65 {dimension_numbers = #tpu.dot_dimension_numbers<[1], [0], [0], [1], [0, 0, 1, 1], [], []>} : vector<252x64xbf16>, vector<64x128xbf16>, vector<252x128xf32> -> vector<252x128xf32>
    %c0_66 = arith.constant 0 : index
    %c0_67 = arith.constant 0 : index
    %58 = vector.load %arg5[%c0_66, %c0_67] : memref<252x128xf32, #tpu.memory_space<vmem>>, vector<252x128xf32>
    %59 = arith.addf %58, %57 : vector<252x128xf32>
    %c0_68 = arith.constant 0 : index
    %c0_69 = arith.constant 0 : index
    %60 = vector.load %arg5[%c0_68, %c0_69] : memref<252x128xf32, #tpu.memory_space<vmem>>, vector<252x128xf32>
    tpu.vector_store %arg5[%c0_68, %c0_69], %59 {strides = array<i32>} : memref<252x128xf32, #tpu.memory_space<vmem>>, vector<252x128xf32>,
    %c0_70 = arith.constant 0 : index
    %c22 = arith.constant 22 : index
    %c0_71 = arith.constant 0 : index
    %61 = vector.load %arg1[%c0_70, %c22, %c0_71] : memref<1x342x64xbf16, #tpu.memory_space<vmem>>, vector<1x252x64xbf16>
    %62 = vector.shape_cast %61 : vector<1x252x64xbf16> to vector<252x64xbf16>
    %c576 = arith.constant 576 : index
    %c0_72 = arith.constant 0 : index
    %63 = vector.load %arg2[%c576, %c0_72] : memref<1600x128xbf16, #tpu.memory_space<vmem>>, vector<64x128xbf16>
    %cst_73 = arith.constant dense<0.000000e+00> : vector<252x128xf32>
    %64 = tpu.matmul %62, %63, %cst_73 {dimension_numbers = #tpu.dot_dimension_numbers<[1], [0], [0], [1], [0, 0, 1, 1], [], []>} : vector<252x64xbf16>, vector<64x128xbf16>, vector<252x128xf32> -> vector<252x128xf32>
    %c0_74 = arith.constant 0 : index
    %c0_75 = arith.constant 0 : index
    %65 = vector.load %arg5[%c0_74, %c0_75] : memref<252x128xf32, #tpu.memory_space<vmem>>, vector<252x128xf32>
    %66 = arith.addf %65, %64 : vector<252x128xf32>
    %c0_76 = arith.constant 0 : index
    %c0_77 = arith.constant 0 : index
    %67 = vector.load %arg5[%c0_76, %c0_77] : memref<252x128xf32, #tpu.memory_space<vmem>>, vector<252x128xf32>
    tpu.vector_store %arg5[%c0_76, %c0_77], %66 {strides = array<i32>} : memref<252x128xf32, #tpu.memory_space<vmem>>, vector<252x128xf32>,
    %c0_78 = arith.constant 0 : index
    %c36 = arith.constant 36 : index
    %c0_79 = arith.constant 0 : index
    %68 = vector.load %arg1[%c0_78, %c36, %c0_79] : memref<1x342x64xbf16, #tpu.memory_space<vmem>>, vector<1x252x64xbf16>
    %69 = vector.shape_cast %68 : vector<1x252x64xbf16> to vector<252x64xbf16>
    %c640 = arith.constant 640 : index
    %c0_80 = arith.constant 0 : index
    %70 = vector.load %arg2[%c640, %c0_80] : memref<1600x128xbf16, #tpu.memory_space<vmem>>, vector<64x128xbf16>
    %cst_81 = arith.constant dense<0.000000e+00> : vector<252x128xf32>
    %71 = tpu.matmul %69, %70, %cst_81 {dimension_numbers = #tpu.dot_dimension_numbers<[1], [0], [0], [1], [0, 0, 1, 1], [], []>} : vector<252x64xbf16>, vector<64x128xbf16>, vector<252x128xf32> -> vector<252x128xf32>
    %c0_82 = arith.constant 0 : index
    %c0_83 = arith.constant 0 : index
    %72 = vector.load %arg5[%c0_82, %c0_83] : memref<252x128xf32, #tpu.memory_space<vmem>>, vector<252x128xf32>
    %73 = arith.addf %72, %71 : vector<252x128xf32>
    %c0_84 = arith.constant 0 : index
    %c0_85 = arith.constant 0 : index
    %74 = vector.load %arg5[%c0_84, %c0_85] : memref<252x128xf32, #tpu.memory_space<vmem>>, vector<252x128xf32>
    tpu.vector_store %arg5[%c0_84, %c0_85], %73 {strides = array<i32>} : memref<252x128xf32, #tpu.memory_space<vmem>>, vector<252x128xf32>,
    %c0_86 = arith.constant 0 : index
    %c37 = arith.constant 37 : index
    %c0_87 = arith.constant 0 : index
    %75 = vector.load %arg1[%c0_86, %c37, %c0_87] : memref<1x342x64xbf16, #tpu.memory_space<vmem>>, vector<1x252x64xbf16>
    %76 = vector.shape_cast %75 : vector<1x252x64xbf16> to vector<252x64xbf16>
    %c704 = arith.constant 704 : index
    %c0_88 = arith.constant 0 : index
    %77 = vector.load %arg2[%c704, %c0_88] : memref<1600x128xbf16, #tpu.memory_space<vmem>>, vector<64x128xbf16>
    %cst_89 = arith.constant dense<0.000000e+00> : vector<252x128xf32>
    %78 = tpu.matmul %76, %77, %cst_89 {dimension_numbers = #tpu.dot_dimension_numbers<[1], [0], [0], [1], [0, 0, 1, 1], [], []>} : vector<252x64xbf16>, vector<64x128xbf16>, vector<252x128xf32> -> vector<252x128xf32>
    %c0_90 = arith.constant 0 : index
    %c0_91 = arith.constant 0 : index
    %79 = vector.load %arg5[%c0_90, %c0_91] : memref<252x128xf32, #tpu.memory_space<vmem>>, vector<252x128xf32>
    %80 = arith.addf %79, %78 : vector<252x128xf32>
    %c0_92 = arith.constant 0 : index
    %c0_93 = arith.constant 0 : index
    %81 = vector.load %arg5[%c0_92, %c0_93] : memref<252x128xf32, #tpu.memory_space<vmem>>, vector<252x128xf32>
    tpu.vector_store %arg5[%c0_92, %c0_93], %80 {strides = array<i32>} : memref<252x128xf32, #tpu.memory_space<vmem>>, vector<252x128xf32>,
    %c0_94 = arith.constant 0 : index
    %c38 = arith.constant 38 : index
    %c0_95 = arith.constant 0 : index
    %82 = vector.load %arg1[%c0_94, %c38, %c0_95] : memref<1x342x64xbf16, #tpu.memory_space<vmem>>, vector<1x252x64xbf16>
    %83 = vector.shape_cast %82 : vector<1x252x64xbf16> to vector<252x64xbf16>
    %c768 = arith.constant 768 : index
    %c0_96 = arith.constant 0 : index
    %84 = vector.load %arg2[%c768, %c0_96] : memref<1600x128xbf16, #tpu.memory_space<vmem>>, vector<64x128xbf16>
    %cst_97 = arith.constant dense<0.000000e+00> : vector<252x128xf32>
    %85 = tpu.matmul %83, %84, %cst_97 {dimension_numbers = #tpu.dot_dimension_numbers<[1], [0], [0], [1], [0, 0, 1, 1], [], []>} : vector<252x64xbf16>, vector<64x128xbf16>, vector<252x128xf32> -> vector<252x128xf32>
    %c0_98 = arith.constant 0 : index
    %c0_99 = arith.constant 0 : index
    %86 = vector.load %arg5[%c0_98, %c0_99] : memref<252x128xf32, #tpu.memory_space<vmem>>, vector<252x128xf32>
    %87 = arith.addf %86, %85 : vector<252x128xf32>
    %c0_100 = arith.constant 0 : index
    %c0_101 = arith.constant 0 : index
    %88 = vector.load %arg5[%c0_100, %c0_101] : memref<252x128xf32, #tpu.memory_space<vmem>>, vector<252x128xf32>
    tpu.vector_store %arg5[%c0_100, %c0_101], %87 {strides = array<i32>} : memref<252x128xf32, #tpu.memory_space<vmem>>, vector<252x128xf32>,
    %c0_102 = arith.constant 0 : index
    %c39 = arith.constant 39 : index
    %c0_103 = arith.constant 0 : index
    %89 = vector.load %arg1[%c0_102, %c39, %c0_103] : memref<1x342x64xbf16, #tpu.memory_space<vmem>>, vector<1x252x64xbf16>
    %90 = vector.shape_cast %89 : vector<1x252x64xbf16> to vector<252x64xbf16>
    %c832 = arith.constant 832 : index
    %c0_104 = arith.constant 0 : index
    %91 = vector.load %arg2[%c832, %c0_104] : memref<1600x128xbf16, #tpu.memory_space<vmem>>, vector<64x128xbf16>
    %cst_105 = arith.constant dense<0.000000e+00> : vector<252x128xf32>
    %92 = tpu.matmul %90, %91, %cst_105 {dimension_numbers = #tpu.dot_dimension_numbers<[1], [0], [0], [1], [0, 0, 1, 1], [], []>} : vector<252x64xbf16>, vector<64x128xbf16>, vector<252x128xf32> -> vector<252x128xf32>
    %c0_106 = arith.constant 0 : index
    %c0_107 = arith.constant 0 : index
    %93 = vector.load %arg5[%c0_106, %c0_107] : memref<252x128xf32, #tpu.memory_space<vmem>>, vector<252x128xf32>
    %94 = arith.addf %93, %92 : vector<252x128xf32>
    %c0_108 = arith.constant 0 : index
    %c0_109 = arith.constant 0 : index
    %95 = vector.load %arg5[%c0_108, %c0_109] : memref<252x128xf32, #tpu.memory_space<vmem>>, vector<252x128xf32>
    tpu.vector_store %arg5[%c0_108, %c0_109], %94 {strides = array<i32>} : memref<252x128xf32, #tpu.memory_space<vmem>>, vector<252x128xf32>,
    %c0_110 = arith.constant 0 : index
    %c40 = arith.constant 40 : index
    %c0_111 = arith.constant 0 : index
    %96 = vector.load %arg1[%c0_110, %c40, %c0_111] : memref<1x342x64xbf16, #tpu.memory_space<vmem>>, vector<1x252x64xbf16>
    %97 = vector.shape_cast %96 : vector<1x252x64xbf16> to vector<252x64xbf16>
    %c896 = arith.constant 896 : index
    %c0_112 = arith.constant 0 : index
    %98 = vector.load %arg2[%c896, %c0_112] : memref<1600x128xbf16, #tpu.memory_space<vmem>>, vector<64x128xbf16>
    %cst_113 = arith.constant dense<0.000000e+00> : vector<252x128xf32>
    %99 = tpu.matmul %97, %98, %cst_113 {dimension_numbers = #tpu.dot_dimension_numbers<[1], [0], [0], [1], [0, 0, 1, 1], [], []>} : vector<252x64xbf16>, vector<64x128xbf16>, vector<252x128xf32> -> vector<252x128xf32>
    %c0_114 = arith.constant 0 : index
    %c0_115 = arith.constant 0 : index
    %100 = vector.load %arg5[%c0_114, %c0_115] : memref<252x128xf32, #tpu.memory_space<vmem>>, vector<252x128xf32>
    %101 = arith.addf %100, %99 : vector<252x128xf32>
    %c0_116 = arith.constant 0 : index
    %c0_117 = arith.constant 0 : index
    %102 = vector.load %arg5[%c0_116, %c0_117] : memref<252x128xf32, #tpu.memory_space<vmem>>, vector<252x128xf32>
    tpu.vector_store %arg5[%c0_116, %c0_117], %101 {strides = array<i32>} : memref<252x128xf32, #tpu.memory_space<vmem>>, vector<252x128xf32>,
    %c0_118 = arith.constant 0 : index
    %c54 = arith.constant 54 : index
    %c0_119 = arith.constant 0 : index
    %103 = vector.load %arg1[%c0_118, %c54, %c0_119] : memref<1x342x64xbf16, #tpu.memory_space<vmem>>, vector<1x252x64xbf16>
    %104 = vector.shape_cast %103 : vector<1x252x64xbf16> to vector<252x64xbf16>
    %c960 = arith.constant 960 : index
    %c0_120 = arith.constant 0 : index
    %105 = vector.load %arg2[%c960, %c0_120] : memref<1600x128xbf16, #tpu.memory_space<vmem>>, vector<64x128xbf16>
    %cst_121 = arith.constant dense<0.000000e+00> : vector<252x128xf32>
    %106 = tpu.matmul %104, %105, %cst_121 {dimension_numbers = #tpu.dot_dimension_numbers<[1], [0], [0], [1], [0, 0, 1, 1], [], []>} : vector<252x64xbf16>, vector<64x128xbf16>, vector<252x128xf32> -> vector<252x128xf32>
    %c0_122 = arith.constant 0 : index
    %c0_123 = arith.constant 0 : index
    %107 = vector.load %arg5[%c0_122, %c0_123] : memref<252x128xf32, #tpu.memory_space<vmem>>, vector<252x128xf32>
    %108 = arith.addf %107, %106 : vector<252x128xf32>
    %c0_124 = arith.constant 0 : index
    %c0_125 = arith.constant 0 : index
    %109 = vector.load %arg5[%c0_124, %c0_125] : memref<252x128xf32, #tpu.memory_space<vmem>>, vector<252x128xf32>
    tpu.vector_store %arg5[%c0_124, %c0_125], %108 {strides = array<i32>} : memref<252x128xf32, #tpu.memory_space<vmem>>, vector<252x128xf32>,
    %c0_126 = arith.constant 0 : index
    %c55 = arith.constant 55 : index
    %c0_127 = arith.constant 0 : index
    %110 = vector.load %arg1[%c0_126, %c55, %c0_127] : memref<1x342x64xbf16, #tpu.memory_space<vmem>>, vector<1x252x64xbf16>
    %111 = vector.shape_cast %110 : vector<1x252x64xbf16> to vector<252x64xbf16>
    %c1024 = arith.constant 1024 : index
    %c0_128 = arith.constant 0 : index
    %112 = vector.load %arg2[%c1024, %c0_128] : memref<1600x128xbf16, #tpu.memory_space<vmem>>, vector<64x128xbf16>
    %cst_129 = arith.constant dense<0.000000e+00> : vector<252x128xf32>
    %113 = tpu.matmul %111, %112, %cst_129 {dimension_numbers = #tpu.dot_dimension_numbers<[1], [0], [0], [1], [0, 0, 1, 1], [], []>} : vector<252x64xbf16>, vector<64x128xbf16>, vector<252x128xf32> -> vector<252x128xf32>
    %c0_130 = arith.constant 0 : index
    %c0_131 = arith.constant 0 : index
    %114 = vector.load %arg5[%c0_130, %c0_131] : memref<252x128xf32, #tpu.memory_space<vmem>>, vector<252x128xf32>
    %115 = arith.addf %114, %113 : vector<252x128xf32>
    %c0_132 = arith.constant 0 : index
    %c0_133 = arith.constant 0 : index
    %116 = vector.load %arg5[%c0_132, %c0_133] : memref<252x128xf32, #tpu.memory_space<vmem>>, vector<252x128xf32>
    tpu.vector_store %arg5[%c0_132, %c0_133], %115 {strides = array<i32>} : memref<252x128xf32, #tpu.memory_space<vmem>>, vector<252x128xf32>,
    %c0_134 = arith.constant 0 : index
    %c56 = arith.constant 56 : index
    %c0_135 = arith.constant 0 : index
    %117 = vector.load %arg1[%c0_134, %c56, %c0_135] : memref<1x342x64xbf16, #tpu.memory_space<vmem>>, vector<1x252x64xbf16>
    %118 = vector.shape_cast %117 : vector<1x252x64xbf16> to vector<252x64xbf16>
    %c1088 = arith.constant 1088 : index
    %c0_136 = arith.constant 0 : index
    %119 = vector.load %arg2[%c1088, %c0_136] : memref<1600x128xbf16, #tpu.memory_space<vmem>>, vector<64x128xbf16>
    %cst_137 = arith.constant dense<0.000000e+00> : vector<252x128xf32>
    %120 = tpu.matmul %118, %119, %cst_137 {dimension_numbers = #tpu.dot_dimension_numbers<[1], [0], [0], [1], [0, 0, 1, 1], [], []>} : vector<252x64xbf16>, vector<64x128xbf16>, vector<252x128xf32> -> vector<252x128xf32>
    %c0_138 = arith.constant 0 : index
    %c0_139 = arith.constant 0 : index
    %121 = vector.load %arg5[%c0_138, %c0_139] : memref<252x128xf32, #tpu.memory_space<vmem>>, vector<252x128xf32>
    %122 = arith.addf %121, %120 : vector<252x128xf32>
    %c0_140 = arith.constant 0 : index
    %c0_141 = arith.constant 0 : index
    %123 = vector.load %arg5[%c0_140, %c0_141] : memref<252x128xf32, #tpu.memory_space<vmem>>, vector<252x128xf32>
    tpu.vector_store %arg5[%c0_140, %c0_141], %122 {strides = array<i32>} : memref<252x128xf32, #tpu.memory_space<vmem>>, vector<252x128xf32>,
    %c0_142 = arith.constant 0 : index
    %c57 = arith.constant 57 : index
    %c0_143 = arith.constant 0 : index
    %124 = vector.load %arg1[%c0_142, %c57, %c0_143] : memref<1x342x64xbf16, #tpu.memory_space<vmem>>, vector<1x252x64xbf16>
    %125 = vector.shape_cast %124 : vector<1x252x64xbf16> to vector<252x64xbf16>
    %c1152 = arith.constant 1152 : index
    %c0_144 = arith.constant 0 : index
    %126 = vector.load %arg2[%c1152, %c0_144] : memref<1600x128xbf16, #tpu.memory_space<vmem>>, vector<64x128xbf16>
    %cst_145 = arith.constant dense<0.000000e+00> : vector<252x128xf32>
    %127 = tpu.matmul %125, %126, %cst_145 {dimension_numbers = #tpu.dot_dimension_numbers<[1], [0], [0], [1], [0, 0, 1, 1], [], []>} : vector<252x64xbf16>, vector<64x128xbf16>, vector<252x128xf32> -> vector<252x128xf32>
    %c0_146 = arith.constant 0 : index
    %c0_147 = arith.constant 0 : index
    %128 = vector.load %arg5[%c0_146, %c0_147] : memref<252x128xf32, #tpu.memory_space<vmem>>, vector<252x128xf32>
    %129 = arith.addf %128, %127 : vector<252x128xf32>
    %c0_148 = arith.constant 0 : index
    %c0_149 = arith.constant 0 : index
    %130 = vector.load %arg5[%c0_148, %c0_149] : memref<252x128xf32, #tpu.memory_space<vmem>>, vector<252x128xf32>
    tpu.vector_store %arg5[%c0_148, %c0_149], %129 {strides = array<i32>} : memref<252x128xf32, #tpu.memory_space<vmem>>, vector<252x128xf32>,
    %c0_150 = arith.constant 0 : index
    %c58 = arith.constant 58 : index
    %c0_151 = arith.constant 0 : index
    %131 = vector.load %arg1[%c0_150, %c58, %c0_151] : memref<1x342x64xbf16, #tpu.memory_space<vmem>>, vector<1x252x64xbf16>
    %132 = vector.shape_cast %131 : vector<1x252x64xbf16> to vector<252x64xbf16>
    %c1216 = arith.constant 1216 : index
    %c0_152 = arith.constant 0 : index
    %133 = vector.load %arg2[%c1216, %c0_152] : memref<1600x128xbf16, #tpu.memory_space<vmem>>, vector<64x128xbf16>
    %cst_153 = arith.constant dense<0.000000e+00> : vector<252x128xf32>
    %134 = tpu.matmul %132, %133, %cst_153 {dimension_numbers = #tpu.dot_dimension_numbers<[1], [0], [0], [1], [0, 0, 1, 1], [], []>} : vector<252x64xbf16>, vector<64x128xbf16>, vector<252x128xf32> -> vector<252x128xf32>
    %c0_154 = arith.constant 0 : index
    %c0_155 = arith.constant 0 : index
    %135 = vector.load %arg5[%c0_154, %c0_155] : memref<252x128xf32, #tpu.memory_space<vmem>>, vector<252x128xf32>
    %136 = arith.addf %135, %134 : vector<252x128xf32>
    %c0_156 = arith.constant 0 : index
    %c0_157 = arith.constant 0 : index
    %137 = vector.load %arg5[%c0_156, %c0_157] : memref<252x128xf32, #tpu.memory_space<vmem>>, vector<252x128xf32>
    tpu.vector_store %arg5[%c0_156, %c0_157], %136 {strides = array<i32>} : memref<252x128xf32, #tpu.memory_space<vmem>>, vector<252x128xf32>,
    %c0_158 = arith.constant 0 : index
    %c72 = arith.constant 72 : index
    %c0_159 = arith.constant 0 : index
    %138 = vector.load %arg1[%c0_158, %c72, %c0_159] : memref<1x342x64xbf16, #tpu.memory_space<vmem>>, vector<1x252x64xbf16>
    %139 = vector.shape_cast %138 : vector<1x252x64xbf16> to vector<252x64xbf16>
    %c1280 = arith.constant 1280 : index
    %c0_160 = arith.constant 0 : index
    %140 = vector.load %arg2[%c1280, %c0_160] : memref<1600x128xbf16, #tpu.memory_space<vmem>>, vector<64x128xbf16>
    %cst_161 = arith.constant dense<0.000000e+00> : vector<252x128xf32>
    %141 = tpu.matmul %139, %140, %cst_161 {dimension_numbers = #tpu.dot_dimension_numbers<[1], [0], [0], [1], [0, 0, 1, 1], [], []>} : vector<252x64xbf16>, vector<64x128xbf16>, vector<252x128xf32> -> vector<252x128xf32>
    %c0_162 = arith.constant 0 : index
    %c0_163 = arith.constant 0 : index
    %142 = vector.load %arg5[%c0_162, %c0_163] : memref<252x128xf32, #tpu.memory_space<vmem>>, vector<252x128xf32>
    %143 = arith.addf %142, %141 : vector<252x128xf32>
    %c0_164 = arith.constant 0 : index
    %c0_165 = arith.constant 0 : index
    %144 = vector.load %arg5[%c0_164, %c0_165] : memref<252x128xf32, #tpu.memory_space<vmem>>, vector<252x128xf32>
    tpu.vector_store %arg5[%c0_164, %c0_165], %143 {strides = array<i32>} : memref<252x128xf32, #tpu.memory_space<vmem>>, vector<252x128xf32>,
    %c0_166 = arith.constant 0 : index
    %c73 = arith.constant 73 : index
    %c0_167 = arith.constant 0 : index
    %145 = vector.load %arg1[%c0_166, %c73, %c0_167] : memref<1x342x64xbf16, #tpu.memory_space<vmem>>, vector<1x252x64xbf16>
    %146 = vector.shape_cast %145 : vector<1x252x64xbf16> to vector<252x64xbf16>
    %c1344 = arith.constant 1344 : index
    %c0_168 = arith.constant 0 : index
    %147 = vector.load %arg2[%c1344, %c0_168] : memref<1600x128xbf16, #tpu.memory_space<vmem>>, vector<64x128xbf16>
    %cst_169 = arith.constant dense<0.000000e+00> : vector<252x128xf32>
    %148 = tpu.matmul %146, %147, %cst_169 {dimension_numbers = #tpu.dot_dimension_numbers<[1], [0], [0], [1], [0, 0, 1, 1], [], []>} : vector<252x64xbf16>, vector<64x128xbf16>, vector<252x128xf32> -> vector<252x128xf32>
    %c0_170 = arith.constant 0 : index
    %c0_171 = arith.constant 0 : index
    %149 = vector.load %arg5[%c0_170, %c0_171] : memref<252x128xf32, #tpu.memory_space<vmem>>, vector<252x128xf32>
    %150 = arith.addf %149, %148 : vector<252x128xf32>
    %c0_172 = arith.constant 0 : index
    %c0_173 = arith.constant 0 : index
    %151 = vector.load %arg5[%c0_172, %c0_173] : memref<252x128xf32, #tpu.memory_space<vmem>>, vector<252x128xf32>
    tpu.vector_store %arg5[%c0_172, %c0_173], %150 {strides = array<i32>} : memref<252x128xf32, #tpu.memory_space<vmem>>, vector<252x128xf32>,
    %c0_174 = arith.constant 0 : index
    %c74 = arith.constant 74 : index
    %c0_175 = arith.constant 0 : index
    %152 = vector.load %arg1[%c0_174, %c74, %c0_175] : memref<1x342x64xbf16, #tpu.memory_space<vmem>>, vector<1x252x64xbf16>
    %153 = vector.shape_cast %152 : vector<1x252x64xbf16> to vector<252x64xbf16>
    %c1408 = arith.constant 1408 : index
    %c0_176 = arith.constant 0 : index
    %154 = vector.load %arg2[%c1408, %c0_176] : memref<1600x128xbf16, #tpu.memory_space<vmem>>, vector<64x128xbf16>
    %cst_177 = arith.constant dense<0.000000e+00> : vector<252x128xf32>
    %155 = tpu.matmul %153, %154, %cst_177 {dimension_numbers = #tpu.dot_dimension_numbers<[1], [0], [0], [1], [0, 0, 1, 1], [], []>} : vector<252x64xbf16>, vector<64x128xbf16>, vector<252x128xf32> -> vector<252x128xf32>
    %c0_178 = arith.constant 0 : index
    %c0_179 = arith.constant 0 : index
    %156 = vector.load %arg5[%c0_178, %c0_179] : memref<252x128xf32, #tpu.memory_space<vmem>>, vector<252x128xf32>
    %157 = arith.addf %156, %155 : vector<252x128xf32>
    %c0_180 = arith.constant 0 : index
    %c0_181 = arith.constant 0 : index
    %158 = vector.load %arg5[%c0_180, %c0_181] : memref<252x128xf32, #tpu.memory_space<vmem>>, vector<252x128xf32>
    tpu.vector_store %arg5[%c0_180, %c0_181], %157 {strides = array<i32>} : memref<252x128xf32, #tpu.memory_space<vmem>>, vector<252x128xf32>,
    %c0_182 = arith.constant 0 : index
    %c75 = arith.constant 75 : index
    %c0_183 = arith.constant 0 : index
    %159 = vector.load %arg1[%c0_182, %c75, %c0_183] : memref<1x342x64xbf16, #tpu.memory_space<vmem>>, vector<1x252x64xbf16>
    %160 = vector.shape_cast %159 : vector<1x252x64xbf16> to vector<252x64xbf16>
    %c1472 = arith.constant 1472 : index
    %c0_184 = arith.constant 0 : index
    %161 = vector.load %arg2[%c1472, %c0_184] : memref<1600x128xbf16, #tpu.memory_space<vmem>>, vector<64x128xbf16>
    %cst_185 = arith.constant dense<0.000000e+00> : vector<252x128xf32>
    %162 = tpu.matmul %160, %161, %cst_185 {dimension_numbers = #tpu.dot_dimension_numbers<[1], [0], [0], [1], [0, 0, 1, 1], [], []>} : vector<252x64xbf16>, vector<64x128xbf16>, vector<252x128xf32> -> vector<252x128xf32>
    %c0_186 = arith.constant 0 : index
    %c0_187 = arith.constant 0 : index
    %163 = vector.load %arg5[%c0_186, %c0_187] : memref<252x128xf32, #tpu.memory_space<vmem>>, vector<252x128xf32>
    %164 = arith.addf %163, %162 : vector<252x128xf32>
    %c0_188 = arith.constant 0 : index
    %c0_189 = arith.constant 0 : index
    %165 = vector.load %arg5[%c0_188, %c0_189] : memref<252x128xf32, #tpu.memory_space<vmem>>, vector<252x128xf32>
    tpu.vector_store %arg5[%c0_188, %c0_189], %164 {strides = array<i32>} : memref<252x128xf32, #tpu.memory_space<vmem>>, vector<252x128xf32>,
    %c0_190 = arith.constant 0 : index
    %c76 = arith.constant 76 : index
    %c0_191 = arith.constant 0 : index
    %166 = vector.load %arg1[%c0_190, %c76, %c0_191] : memref<1x342x64xbf16, #tpu.memory_space<vmem>>, vector<1x252x64xbf16>
    %167 = vector.shape_cast %166 : vector<1x252x64xbf16> to vector<252x64xbf16>
    %c1536 = arith.constant 1536 : index
    %c0_192 = arith.constant 0 : index
    %168 = vector.load %arg2[%c1536, %c0_192] : memref<1600x128xbf16, #tpu.memory_space<vmem>>, vector<64x128xbf16>
    %cst_193 = arith.constant dense<0.000000e+00> : vector<252x128xf32>
    %169 = tpu.matmul %167, %168, %cst_193 {dimension_numbers = #tpu.dot_dimension_numbers<[1], [0], [0], [1], [0, 0, 1, 1], [], []>} : vector<252x64xbf16>, vector<64x128xbf16>, vector<252x128xf32> -> vector<252x128xf32>
    %c0_194 = arith.constant 0 : index
    %c0_195 = arith.constant 0 : index
    %170 = vector.load %arg5[%c0_194, %c0_195] : memref<252x128xf32, #tpu.memory_space<vmem>>, vector<252x128xf32>
    %171 = arith.addf %170, %169 : vector<252x128xf32>
    %c0_196 = arith.constant 0 : index
    %c0_197 = arith.constant 0 : index
    %172 = vector.load %arg5[%c0_196, %c0_197] : memref<252x128xf32, #tpu.memory_space<vmem>>, vector<252x128xf32>
    tpu.vector_store %arg5[%c0_196, %c0_197], %171 {strides = array<i32>} : memref<252x128xf32, #tpu.memory_space<vmem>>, vector<252x128xf32>,
    %c0_198 = arith.constant 0 : index
    %c0_199 = arith.constant 0 : index
    %173 = vector.load %arg5[%c0_198, %c0_199] : memref<252x128xf32, #tpu.memory_space<vmem>>, vector<234x128xf32>
    %c18_200 = arith.constant 18 : index
    %c0_201 = arith.constant 0 : index
    %174 = vector.load %arg5[%c18_200, %c0_201] : memref<252x128xf32, #tpu.memory_space<vmem>>, vector<234x128xf32>
    %175 = arith.maximumf %173, %174 : vector<234x128xf32>
    %c0_202 = arith.constant 0 : index
    %c0_203 = arith.constant 0 : index
    %176 = vector.load %arg5[%c0_202, %c0_203] : memref<252x128xf32, #tpu.memory_space<vmem>>, vector<234x128xf32>
    tpu.vector_store %arg5[%c0_202, %c0_203], %175 {strides = array<i32>} : memref<252x128xf32, #tpu.memory_space<vmem>>, vector<234x128xf32>,
    %c0_204 = arith.constant 0 : index
    %c0_205 = arith.constant 0 : index
    %177 = vector.load %arg5[%c0_204, %c0_205] : memref<252x128xf32, #tpu.memory_space<vmem>>, vector<233x128xf32>
    %c1_206 = arith.constant 1 : index
    %c0_207 = arith.constant 0 : index
    %178 = vector.load %arg5[%c1_206, %c0_207] : memref<252x128xf32, #tpu.memory_space<vmem>>, vector<233x128xf32>
    %179 = arith.maximumf %177, %178 : vector<233x128xf32>
    %c0_208 = arith.constant 0 : index
    %c0_209 = arith.constant 0 : index
    %180 = vector.load %arg5[%c0_208, %c0_209] : memref<252x128xf32, #tpu.memory_space<vmem>>, vector<233x128xf32>
    tpu.vector_store %arg5[%c0_208, %c0_209], %179 {strides = array<i32>} : memref<252x128xf32, #tpu.memory_space<vmem>>, vector<233x128xf32>,
    %c0_210 = arith.constant 0 : index
    %c0_211 = arith.constant 0 : index
    %181 = vector.load %arg3[%c0_210, %c0_211] : memref<1x128xf32, #tpu.memory_space<vmem>>, vector<1x128xf32>
    %c0_212 = arith.constant 0 : index
    %c0_213 = arith.constant 0 : index
    %182 = tpu.strided_load %arg5[%c0_212, %c0_213] {strides = array<i32: 2, 1>} : memref<252x128xf32, #tpu.memory_space<vmem>>, vector<7x128xf32>
    %183 = vector.broadcast %181 : vector<1x128xf32> to vector<7x128xf32>
    %184 = arith.addf %182, %183 : vector<7x128xf32>
    %cst_214 = arith.constant 0.000000e+00 : f32
    %185 = vector.broadcast %cst_214 : f32 to vector<7x128xf32>
    %186 = arith.maximumf %184, %185 : vector<7x128xf32>
    %187 = arith.truncf %186 : vector<7x128xf32> to vector<7x128xbf16>
    %c0_215 = arith.constant 0 : index
    %c0_216 = arith.constant 0 : index
    %c0_217 = arith.constant 0 : index
    %c0_218 = arith.constant 0 : index
    %188 = vector.load %arg4[%c0_215, %c0_216, %c0_217, %c0_218] : memref<1x7x7x128xbf16, #tpu.memory_space<vmem>>, vector<1x1x7x128xbf16>
    %189 = vector.shape_cast %188 : vector<1x1x7x128xbf16> to vector<7x128xbf16>
    %190 = vector.shape_cast %187 : vector<7x128xbf16> to vector<1x1x7x128xbf16>
    tpu.vector_store %arg4[%c0_215, %c0_216, %c0_217, %c0_218], %190 {strides = array<i32>} : memref<1x7x7x128xbf16, #tpu.memory_space<vmem>>, vector<1x1x7x128xbf16>,
    %c36_219 = arith.constant 36 : index
    %c0_220 = arith.constant 0 : index
    %191 = tpu.strided_load %arg5[%c36_219, %c0_220] {strides = array<i32: 2, 1>} : memref<252x128xf32, #tpu.memory_space<vmem>>, vector<7x128xf32>
    %192 = vector.broadcast %181 : vector<1x128xf32> to vector<7x128xf32>
    %193 = arith.addf %191, %192 : vector<7x128xf32>
    %cst_221 = arith.constant 0.000000e+00 : f32
    %194 = vector.broadcast %cst_221 : f32 to vector<7x128xf32>
    %195 = arith.maximumf %193, %194 : vector<7x128xf32>
    %196 = arith.truncf %195 : vector<7x128xf32> to vector<7x128xbf16>
    %c0_222 = arith.constant 0 : index
    %c1_223 = arith.constant 1 : index
    %c0_224 = arith.constant 0 : index
    %c0_225 = arith.constant 0 : index
    %197 = vector.load %arg4[%c0_222, %c1_223, %c0_224, %c0_225] : memref<1x7x7x128xbf16, #tpu.memory_space<vmem>>, vector<1x1x7x128xbf16>
    %198 = vector.shape_cast %197 : vector<1x1x7x128xbf16> to vector<7x128xbf16>
    %199 = vector.shape_cast %196 : vector<7x128xbf16> to vector<1x1x7x128xbf16>
    tpu.vector_store %arg4[%c0_222, %c1_223, %c0_224, %c0_225], %199 {strides = array<i32>} : memref<1x7x7x128xbf16, #tpu.memory_space<vmem>>, vector<1x1x7x128xbf16>,
    %c72_226 = arith.constant 72 : index
    %c0_227 = arith.constant 0 : index
    %200 = tpu.strided_load %arg5[%c72_226, %c0_227] {strides = array<i32: 2, 1>} : memref<252x128xf32, #tpu.memory_space<vmem>>, vector<7x128xf32>
    %201 = vector.broadcast %181 : vector<1x128xf32> to vector<7x128xf32>
    %202 = arith.addf %200, %201 : vector<7x128xf32>
    %cst_228 = arith.constant 0.000000e+00 : f32
    %203 = vector.broadcast %cst_228 : f32 to vector<7x128xf32>
    %204 = arith.maximumf %202, %203 : vector<7x128xf32>
    %205 = arith.truncf %204 : vector<7x128xf32> to vector<7x128xbf16>
    %c0_229 = arith.constant 0 : index
    %c2_230 = arith.constant 2 : index
    %c0_231 = arith.constant 0 : index
    %c0_232 = arith.constant 0 : index
    %206 = vector.load %arg4[%c0_229, %c2_230, %c0_231, %c0_232] : memref<1x7x7x128xbf16, #tpu.memory_space<vmem>>, vector<1x1x7x128xbf16>
    %207 = vector.shape_cast %206 : vector<1x1x7x128xbf16> to vector<7x128xbf16>
    %208 = vector.shape_cast %205 : vector<7x128xbf16> to vector<1x1x7x128xbf16>
    tpu.vector_store %arg4[%c0_229, %c2_230, %c0_231, %c0_232], %208 {strides = array<i32>} : memref<1x7x7x128xbf16, #tpu.memory_space<vmem>>, vector<1x1x7x128xbf16>,
    %c108 = arith.constant 108 : index
    %c0_233 = arith.constant 0 : index
    %209 = tpu.strided_load %arg5[%c108, %c0_233] {strides = array<i32: 2, 1>} : memref<252x128xf32, #tpu.memory_space<vmem>>, vector<7x128xf32>
    %210 = vector.broadcast %181 : vector<1x128xf32> to vector<7x128xf32>
    %211 = arith.addf %209, %210 : vector<7x128xf32>
    %cst_234 = arith.constant 0.000000e+00 : f32
    %212 = vector.broadcast %cst_234 : f32 to vector<7x128xf32>
    %213 = arith.maximumf %211, %212 : vector<7x128xf32>
    %214 = arith.truncf %213 : vector<7x128xf32> to vector<7x128xbf16>
    %c0_235 = arith.constant 0 : index
    %c3_236 = arith.constant 3 : index
    %c0_237 = arith.constant 0 : index
    %c0_238 = arith.constant 0 : index
    %215 = vector.load %arg4[%c0_235, %c3_236, %c0_237, %c0_238] : memref<1x7x7x128xbf16, #tpu.memory_space<vmem>>, vector<1x1x7x128xbf16>
    %216 = vector.shape_cast %215 : vector<1x1x7x128xbf16> to vector<7x128xbf16>
    %217 = vector.shape_cast %214 : vector<7x128xbf16> to vector<1x1x7x128xbf16>
    tpu.vector_store %arg4[%c0_235, %c3_236, %c0_237, %c0_238], %217 {strides = array<i32>} : memref<1x7x7x128xbf16, #tpu.memory_space<vmem>>, vector<1x1x7x128xbf16>,
    %c144 = arith.constant 144 : index
    %c0_239 = arith.constant 0 : index
    %218 = tpu.strided_load %arg5[%c144, %c0_239] {strides = array<i32: 2, 1>} : memref<252x128xf32, #tpu.memory_space<vmem>>, vector<7x128xf32>
    %219 = vector.broadcast %181 : vector<1x128xf32> to vector<7x128xf32>
    %220 = arith.addf %218, %219 : vector<7x128xf32>
    %cst_240 = arith.constant 0.000000e+00 : f32
    %221 = vector.broadcast %cst_240 : f32 to vector<7x128xf32>
    %222 = arith.maximumf %220, %221 : vector<7x128xf32>
    %223 = arith.truncf %222 : vector<7x128xf32> to vector<7x128xbf16>
    %c0_241 = arith.constant 0 : index
    %c4_242 = arith.constant 4 : index
    %c0_243 = arith.constant 0 : index
    %c0_244 = arith.constant 0 : index
    %224 = vector.load %arg4[%c0_241, %c4_242, %c0_243, %c0_244] : memref<1x7x7x128xbf16, #tpu.memory_space<vmem>>, vector<1x1x7x128xbf16>
    %225 = vector.shape_cast %224 : vector<1x1x7x128xbf16> to vector<7x128xbf16>
    %226 = vector.shape_cast %223 : vector<7x128xbf16> to vector<1x1x7x128xbf16>
    tpu.vector_store %arg4[%c0_241, %c4_242, %c0_243, %c0_244], %226 {strides = array<i32>} : memref<1x7x7x128xbf16, #tpu.memory_space<vmem>>, vector<1x1x7x128xbf16>,
    %c180 = arith.constant 180 : index
    %c0_245 = arith.constant 0 : index
    %227 = tpu.strided_load %arg5[%c180, %c0_245] {strides = array<i32: 2, 1>} : memref<252x128xf32, #tpu.memory_space<vmem>>, vector<7x128xf32>
    %228 = vector.broadcast %181 : vector<1x128xf32> to vector<7x128xf32>
    %229 = arith.addf %227, %228 : vector<7x128xf32>
    %cst_246 = arith.constant 0.000000e+00 : f32
    %230 = vector.broadcast %cst_246 : f32 to vector<7x128xf32>
    %231 = arith.maximumf %229, %230 : vector<7x128xf32>
    %232 = arith.truncf %231 : vector<7x128xf32> to vector<7x128xbf16>
    %c0_247 = arith.constant 0 : index
    %c5 = arith.constant 5 : index
    %c0_248 = arith.constant 0 : index
    %c0_249 = arith.constant 0 : index
    %233 = vector.load %arg4[%c0_247, %c5, %c0_248, %c0_249] : memref<1x7x7x128xbf16, #tpu.memory_space<vmem>>, vector<1x1x7x128xbf16>
    %234 = vector.shape_cast %233 : vector<1x1x7x128xbf16> to vector<7x128xbf16>
    %235 = vector.shape_cast %232 : vector<7x128xbf16> to vector<1x1x7x128xbf16>
    tpu.vector_store %arg4[%c0_247, %c5, %c0_248, %c0_249], %235 {strides = array<i32>} : memref<1x7x7x128xbf16, #tpu.memory_space<vmem>>, vector<1x1x7x128xbf16>,
    %c216 = arith.constant 216 : index
    %c0_250 = arith.constant 0 : index
    %236 = tpu.strided_load %arg5[%c216, %c0_250] {strides = array<i32: 2, 1>} : memref<252x128xf32, #tpu.memory_space<vmem>>, vector<7x128xf32>
    %237 = vector.broadcast %181 : vector<1x128xf32> to vector<7x128xf32>
    %238 = arith.addf %236, %237 : vector<7x128xf32>
    %cst_251 = arith.constant 0.000000e+00 : f32
    %239 = vector.broadcast %cst_251 : f32 to vector<7x128xf32>
    %240 = arith.maximumf %238, %239 : vector<7x128xf32>
    %241 = arith.truncf %240 : vector<7x128xf32> to vector<7x128xbf16>
    %c0_252 = arith.constant 0 : index
    %c6 = arith.constant 6 : index
    %c0_253 = arith.constant 0 : index
    %c0_254 = arith.constant 0 : index
    %242 = vector.load %arg4[%c0_252, %c6, %c0_253, %c0_254] : memref<1x7x7x128xbf16, #tpu.memory_space<vmem>>, vector<1x1x7x128xbf16>
    %243 = vector.shape_cast %242 : vector<1x1x7x128xbf16> to vector<7x128xbf16>
    %244 = vector.shape_cast %241 : vector<7x128xbf16> to vector<1x1x7x128xbf16>
    tpu.vector_store %arg4[%c0_252, %c6, %c0_253, %c0_254], %244 {strides = array<i32>} : memref<1x7x7x128xbf16, #tpu.memory_space<vmem>>, vector<1x1x7x128xbf16>,
    return
  }
  func.func @transform_0(%arg0: i32) -> (i32, i32, i32) {
    %c0_i32 = arith.constant 0 : i32
    %c0_i32_0 = arith.constant 0 : i32
    %c0_i32_1 = arith.constant 0 : i32
    return %arg0, %c0_i32, %c0_i32_0 : i32, i32, i32
  }
  func.func @transform_1(%arg0: i32) -> (i32, i32) {
    %c0_i32 = arith.constant 0 : i32
    %c0_i32_0 = arith.constant 0 : i32
    %c0_i32_1 = arith.constant 0 : i32
    return %c0_i32, %c0_i32_0 : i32, i32
  }
  func.func @transform_2(%arg0: i32) -> (i32, i32) {
    %c0_i32 = arith.constant 0 : i32
    %c0_i32_0 = arith.constant 0 : i32
    %c0_i32_1 = arith.constant 0 : i32
    return %c0_i32, %c0_i32_0 : i32, i32
  }
  func.func @transform_3(%arg0: i32) -> (i32, i32, i32, i32) {
    %c0_i32 = arith.constant 0 : i32
    %c0_i32_0 = arith.constant 0 : i32
    %c0_i32_1 = arith.constant 0 : i32
    %c0_i32_2 = arith.constant 0 : i32
    return %arg0, %c0_i32, %c0_i32_0, %c0_i32_1 : i32, i32, i32, i32
  }
}

module attributes {stable_mosaic.version = 11 : i64} {
  func.func @_fc_fused_kernel(%arg0: i32, %arg1: memref<2x6272xbf16, #tpu.memory_space<vmem>>, %arg2: memref<6272x128xbf16, #tpu.memory_space<vmem>>, %arg3: memref<1x128xf32, #tpu.memory_space<vmem>>, %arg4: memref<128x128xf32, #tpu.memory_space<vmem>>, %arg5: memref<1x128xf32, #tpu.memory_space<vmem>>, %arg6: memref<2x128xf32, #tpu.memory_space<vmem>>) attributes {dimension_semantics = [#tpu.dimension_semantics<parallel>], iteration_bounds = array<i64: 1>, scalar_prefetch = 0 : i64, scratch_operands = 0 : i64, tpu.core_type = #tpu.core_type<tc>, window_params = [{transform_indices = @transform_0, window_bounds = array<i64: 2, 6272>}, {pipeline_mode = #tpu.pipeline_mode<synchronous>, transform_indices = @transform_1, window_bounds = array<i64: 6272, 128>}, {pipeline_mode = #tpu.pipeline_mode<synchronous>, transform_indices = @transform_2, window_bounds = array<i64: 1, 128>}, {pipeline_mode = #tpu.pipeline_mode<synchronous>, transform_indices = @transform_3, window_bounds = array<i64: 128, 128>}, {pipeline_mode = #tpu.pipeline_mode<synchronous>, transform_indices = @transform_4, window_bounds = array<i64: 1, 128>}, {transform_indices = @transform_5, window_bounds = array<i64: 2, 128>}]} {
    %c0 = arith.constant 0 : index
    %c0_0 = arith.constant 0 : index
    %0 = vector.load %arg1[%c0, %c0_0] : memref<2x6272xbf16, #tpu.memory_space<vmem>>, vector<2x6272xbf16>
    %c0_1 = arith.constant 0 : index
    %c0_2 = arith.constant 0 : index
    %1 = vector.load %arg2[%c0_1, %c0_2] : memref<6272x128xbf16, #tpu.memory_space<vmem>>, vector<6272x128xbf16>
    %cst = arith.constant dense<0.000000e+00> : vector<2x128xf32>
    %2 = tpu.matmul %0, %1, %cst {dimension_numbers = #tpu.dot_dimension_numbers<[1], [0], [0], [1], [0, 0, 1, 1], [], []>} : vector<2x6272xbf16>, vector<6272x128xbf16>, vector<2x128xf32> -> vector<2x128xf32>
    %c0_3 = arith.constant 0 : index
    %c0_4 = arith.constant 0 : index
    %3 = vector.load %arg3[%c0_3, %c0_4] : memref<1x128xf32, #tpu.memory_space<vmem>>, vector<1x128xf32>
    %4 = vector.broadcast %3 : vector<1x128xf32> to vector<2x128xf32>
    %5 = arith.addf %2, %4 : vector<2x128xf32>
    %c0_5 = arith.constant 0 : index
    %c0_6 = arith.constant 0 : index
    %6 = vector.load %arg4[%c0_5, %c0_6] : memref<128x128xf32, #tpu.memory_space<vmem>>, vector<128x128xf32>
    %cst_7 = arith.constant dense<0.000000e+00> : vector<2x128xf32>
    %7 = tpu.matmul %5, %6, %cst_7 {dimension_numbers = #tpu.dot_dimension_numbers<[1], [0], [0], [1], [0, 0, 1, 1], [], []>} : vector<2x128xf32>, vector<128x128xf32>, vector<2x128xf32> -> vector<2x128xf32>
    %c0_8 = arith.constant 0 : index
    %c0_9 = arith.constant 0 : index
    %8 = vector.load %arg5[%c0_8, %c0_9] : memref<1x128xf32, #tpu.memory_space<vmem>>, vector<1x128xf32>
    %9 = vector.broadcast %8 : vector<1x128xf32> to vector<2x128xf32>
    %10 = arith.addf %7, %9 : vector<2x128xf32>
    %cst_10 = arith.constant dense<0xFF800000> : vector<2xf32>
    %11 = vector.multi_reduction <maximumf>, %10, %cst_10 [1] : vector<2x128xf32> to vector<2xf32>
    %12 = vector.shape_cast %11 : vector<2xf32> to vector<2x1xf32>
    %13 = vector.broadcast %12 : vector<2x1xf32> to vector<2x128xf32>
    %14 = arith.subf %10, %13 : vector<2x128xf32>
    %15 = math.exp %14 : vector<2x128xf32>
    %cst_11 = arith.constant dense<0.000000e+00> : vector<2xf32>
    %16 = vector.multi_reduction <add>, %15, %cst_11 [1] : vector<2x128xf32> to vector<2xf32>
    %17 = vector.shape_cast %16 : vector<2xf32> to vector<2x1xf32>
    %18 = math.log %17 : vector<2x1xf32>
    %19 = arith.addf %18, %12 : vector<2x1xf32>
    %20 = vector.broadcast %19 : vector<2x1xf32> to vector<2x128xf32>
    %21 = arith.subf %10, %20 : vector<2x128xf32>
    %c0_12 = arith.constant 0 : index
    %c0_13 = arith.constant 0 : index
    %22 = vector.load %arg6[%c0_12, %c0_13] : memref<2x128xf32, #tpu.memory_space<vmem>>, vector<2x128xf32>
    tpu.vector_store %arg6[%c0_12, %c0_13], %21 {strides = array<i32>} : memref<2x128xf32, #tpu.memory_space<vmem>>, vector<2x128xf32>,
    return
  }
  func.func @transform_0(%arg0: i32) -> (i32, i32) {
    %c0_i32 = arith.constant 0 : i32
    %c0_i32_0 = arith.constant 0 : i32
    return %arg0, %c0_i32 : i32, i32
  }
  func.func @transform_1(%arg0: i32) -> (i32, i32) {
    %c0_i32 = arith.constant 0 : i32
    %c0_i32_0 = arith.constant 0 : i32
    %c0_i32_1 = arith.constant 0 : i32
    return %c0_i32, %c0_i32_0 : i32, i32
  }
  func.func @transform_2(%arg0: i32) -> (i32, i32) {
    %c0_i32 = arith.constant 0 : i32
    %c0_i32_0 = arith.constant 0 : i32
    %c0_i32_1 = arith.constant 0 : i32
    return %c0_i32, %c0_i32_0 : i32, i32
  }
  func.func @transform_3(%arg0: i32) -> (i32, i32) {
    %c0_i32 = arith.constant 0 : i32
    %c0_i32_0 = arith.constant 0 : i32
    %c0_i32_1 = arith.constant 0 : i32
    return %c0_i32, %c0_i32_0 : i32, i32
  }
  func.func @transform_4(%arg0: i32) -> (i32, i32) {
    %c0_i32 = arith.constant 0 : i32
    %c0_i32_0 = arith.constant 0 : i32
    %c0_i32_1 = arith.constant 0 : i32
    return %c0_i32, %c0_i32_0 : i32, i32
  }
  func.func @transform_5(%arg0: i32) -> (i32, i32) {
    %c0_i32 = arith.constant 0 : i32
    %c0_i32_0 = arith.constant 0 : i32
    return %arg0, %c0_i32 : i32, i32
  }
}

</mosaic_0001>

<bundles_post_ra>
// kernel: _lambda_.3
= control target key start
LH: loop header
LB: loop body
LE: loop exit
PB: predicated region body
PF: predicated region fallthrough
CT: control target
= control target key end

     0   :  { %s2834_s12 = smov 0   ;;  %s3466_s0 = inlined_call_operand.vmem [shape: bf16[1568,32], index: 0, kind: input, shape index: {}]   ;;  %s3467_s1 = inlined_call_operand.vmem [shape: bf16[32,64], index: 1, kind: input, shape index: {}]   ;;  %s3468_s2 = inlined_call_operand.vmem [shape: f32[1,64], index: 2, kind: input, shape index: {}]   ;;  %s3469_s3 = inlined_call_operand.vmem [shape: bf16[2,14,14,64], index: 3, kind: output, shape index: {}]  }
   0x1 LB: > { %s2840_s13 = sadd.s32 4294967295, %s2810_s12   ;;  %p2297_p0 = scmp.ge.s32.totalorder %s2810_s12, 1  ;;  %s2810_s12 = sphi %s2834_s12, %s13_s12  }
   0x2   : > { %p138_p1 = scmp.lt.s32.totalorder %s2810_s12, 3 }
   0x4   : > { %p139_p2 = pnand %p2297_p0, %p138_p1 }
   0x5   : > { %v2751_v0 = vld [vmem:[%s3467_s1] sm:$0xff] (!%p139_p2)   ;;  %v2812_v1 = vmov (!%p139_p2), 0.0   ;;  %v2752_v2 = vld [vmem:[%s3467_s1 + $0x8] sm:$0xff] (!%p139_p2)   ;;  %s162_s18 = smul.u32 (!%p139_p2), 98, %s2840_s13  ;;  %vm2813_vm0 = vmmov (!%p139_p2), 0   ;;  %vm533_vm1 = vcmask (!%p139_p2), 261120  }
   0x6   : > { %142 = sbr.rel (%p139_p2) target bundleno = 466 (0x1d2), region = 32  ;;  %2536 = vmatprep.subr.bf16.mxu0 (!%p139_p2), %v2812_v1  ;;  %2736 = vmatprep.subr.bf16.mxu1 (!%p139_p2), %v2812_v1  ;;  %vm1106_vm2 = vcmask (!%p139_p2), 523264   ;;  %p168_p4 = scmp.lt.s32.totalorder (!%p139_p2), %s2840_s13, 1  ;;  %vm1584_vm3 = vcmask (!%p139_p2), 519168   ;;  %vm1965_vm4 = vcmask (!%p139_p2), 518144  }
   0x7   : > { %2537 = vmatpush3.bf16.msra.mxu0 (!%p139_p2), %v2751_v0  ;;  %2738 = vmatpush3.bf16.msra.mxu1 (!%p139_p2), %v2751_v0  ;;  %p163_p3 = scmp.lt.s32.totalorder (!%p139_p2), %s162_s18, 195 }
   0x8   : > { %2538 = vmatprep.subr.bf16.mxu0 (!%p139_p2), %v2812_v1  ;;  %2737 = vmatprep.subr.bf16.mxu1 (!%p139_p2), %v2812_v1 }
   0x9   : > { %2540 = vmatprep.mubr.msk.bf16.mxu0 (!%p139_p2), %vm2813_vm0, %v2812_v1  ;;  %2640 = vmatprep.mubr.msk.bf16.mxu1 (!%p139_p2), %vm2813_vm0, %v2812_v1 }
   0xb   : > { %2539 = vmatpush3.bf16.msra.mxu0 (!%p139_p2), %v2752_v2  ;;  %2739 = vmatpush3.bf16.msra.mxu1 (!%p139_p2), %v2752_v2 }
   0xd   : > { %s3471_s18 = smov (!%p163_p3, %s162_s18), 195  ;;  %s3473_s13 = smov (!%p168_p4, %s2840_s13), 1 }
   0xe   : > { %s2298_s19 = sshll.u32 %s3471_s18, 2  ;;  %s2740_s25 = smul.u32 112, %s3473_s13 }
   0xf   : > { %s2862_s22 = scalar_lea.vmem %s3466_s0, %s2298_s19 }
  0x10   : > { %v2753_v3 = vld [vmem:[%s2862_s22] sm:$0xff]   ;;  %v2754_v4 = vld [vmem:[%s2862_s22 + $0xc8] sm:$0xff]   ;;  %v2756_v6 = vld [vmem:[%s2862_s22 + $0xd0] sm:$0xff]   ;;  %s3130_s28 = scalar_lea.vmem %s3469_s3, %s2740_s25 }
  0x11   : > { %2541 = vmatmul.mubr.msk.bf16.vlgmr.msra.gmra.mrb[0].mxu0 %vm533_vm1, %v2753_v3  ;;  %2641 = vmatmul.mubr.msk.bf16.vlgmr.msra.gmra.mrb[0].mxu1 %vm533_vm1, %v2754_v4  ;;  %v2755_v5 = vld [vmem:[%s2862_s22 + $0x8] sm:$0xff]   ;;  %v2757_v7 = vld [vmem:[%s2862_s22 + $0x10] sm:$0xff]   ;;  %v2758_v8 = vld [vmem:[%s2862_s22 + $0xd8] sm:$0xff]  }
  0x12   : > { %2544 = vmatprep.mubr.msk.bf16.mxu0 %vm2813_vm0, %v2812_v1  ;;  %2644 = vmatprep.mubr.msk.bf16.mxu1 %vm2813_vm0, %v2812_v1  ;;  %v2759_v9 = vld [vmem:[%s2862_s22 + $0x18] sm:$0xff]   ;;  %v2760_v10 = vld [vmem:[%s2862_s22 + $0xe0] sm:$0xff]   ;;  %v2762_v12 = vld [vmem:[%s2862_s22 + $0xe8] sm:$0xff]  }
  0x13   : > { %v2761_v11 = vld [vmem:[%s2862_s22 + $0x20] sm:$0xff]   ;;  %v2763_v13 = vld [vmem:[%s2862_s22 + $0x28] sm:$0xff]   ;;  %v2764_v14 = vld [vmem:[%s2862_s22 + $0xf0] sm:$0xff]  }
  0x14   : > { %v2765_v15 = vld [vmem:[%s2862_s22 + $0x30] sm:$0xff]   ;;  %v2766_v16 = vld [vmem:[%s2862_s22 + $0xf8] sm:$0xff]   ;;  %v2768_v18 = vld [vmem:[%s2862_s22 + $0x100] sm:$0xff]  }
  0x15   : > { %v2767_v17 = vld [vmem:[%s2862_s22 + $0x38] sm:$0xff]   ;;  %v2769_v19 = vld [vmem:[%s2862_s22 + $0x40] sm:$0xff]   ;;  %v2770_v20 = vld [vmem:[%s2862_s22 + $0x108] sm:$0xff]  }
  0x16   : > { %v2771_v21 = vld [vmem:[%s2862_s22 + $0x48] sm:$0xff]   ;;  %v2772_v22 = vld [vmem:[%s2862_s22 + $0x110] sm:$0xff]   ;;  %v2774_v24 = vld [vmem:[%s2862_s22 + $0x118] sm:$0xff]  }
  0x17   : > { %v2773_v23 = vld [vmem:[%s2862_s22 + $0x50] sm:$0xff]   ;;  %v2775_v25 = vld [vmem:[%s2862_s22 + $0x58] sm:$0xff]   ;;  %v2776_v26 = vld [vmem:[%s2862_s22 + $0x120] sm:$0xff]  }
  0x18   : > { %v2777_v27 = vld [vmem:[%s2862_s22 + $0x60] sm:$0xff]   ;;  %v2778_v28 = vld [vmem:[%s2862_s22 + $0x128] sm:$0xff]   ;;  %v2780_v30 = vld [vmem:[%s2862_s22 + $0x130] sm:$0xff]  }
  0x19   : > { %2545 = vmatmul.mubr.msk.bf16.gmra.mrb[4].mxu0 %vm533_vm1, %v2755_v5  ;;  %2645 = vmatmul.mubr.msk.bf16.gmra.mrb[4].mxu1 %vm533_vm1, %v2756_v6  ;;  %v2779_v29 = vld [vmem:[%s2862_s22 + $0x68] sm:$0xff]   ;;  %v2781_v31 = vld [vmem:[%s2862_s22 + $0x70] sm:$0xff]   ;;  %v2782_v32 = vld [vmem:[%s2862_s22 + $0x138] sm:$0xff]  }
  0x1a   : > { %2548 = vmatprep.mubr.msk.bf16.mxu0 %vm2813_vm0, %v2812_v1  ;;  %2648 = vmatprep.mubr.msk.bf16.mxu1 %vm2813_vm0, %v2812_v1  ;;  %v2783_v33 = vld [vmem:[%s2862_s22 + $0x78] sm:$0xff]   ;;  %v2784_v34 = vld [vmem:[%s2862_s22 + $0x140] sm:$0xff]   ;;  %v2786_v36 = vld [vmem:[%s2862_s22 + $0x148] sm:$0xff]  }
  0x1b   : > { %v2785_v35 = vld [vmem:[%s2862_s22 + $0x80] sm:$0xff]   ;;  %v2787_v37 = vld [vmem:[%s2862_s22 + $0x88] sm:$0xff]   ;;  %v2788_v38 = vld [vmem:[%s2862_s22 + $0x150] sm:$0xff]  }
  0x1c   : > { %v2789_v39 = vld [vmem:[%s2862_s22 + $0x90] sm:$0xff]   ;;  %v2790_v40 = vld [vmem:[%s2862_s22 + $0x158] sm:$0xff]   ;;  %v2792_v42 = vld [vmem:[%s2862_s22 + $0x160] sm:$0xff]  }
  0x1d   : > { %v2791_v41 = vld [vmem:[%s2862_s22 + $0x98] sm:$0xff]   ;;  %v2793_v43 = vld [vmem:[%s2862_s22 + $0xa0] sm:$0xff]   ;;  %v2794_v44 = vld [vmem:[%s2862_s22 + $0x168] sm:$0xff]  }
  0x1e   : > { %v2795_v45 = vld [vmem:[%s2862_s22 + $0xa8] sm:$0xff]   ;;  %v2796_v46 = vld [vmem:[%s2862_s22 + $0x170] sm:$0xff]   ;;  %v2798_v48 = vld [vmem:[%s2862_s22 + $0x178] sm:$0xff]  }
  0x1f   : > { %v2797_v47 = vld [vmem:[%s2862_s22 + $0xb0] sm:$0xff]   ;;  %v2799_v49 = vld [vmem:[%s2862_s22 + $0xb8] sm:$0xff]   ;;  %v2800_v50 = vld [vmem:[%s2862_s22 + $0x180] sm:$0xff]  }
  0x20   : > { %v2801_v51 = vld [vmem:[%s2862_s22 + $0xc0] sm:$0xff]  }
  0x21   : > { %2549 = vmatmul.mubr.msk.bf16.gmra.mrb[8].mxu0 %vm533_vm1, %v2757_v7  ;;  %2649 = vmatmul.mubr.msk.bf16.gmra.mrb[8].mxu1 %vm533_vm1, %v2758_v8 }
  0x22   : > { %2552 = vmatprep.mubr.msk.bf16.mxu0 %vm2813_vm0, %v2812_v1  ;;  %2652 = vmatprep.mubr.msk.bf16.mxu1 %vm2813_vm0, %v2812_v1 }
  0x29   : > { %2553 = vmatmul.mubr.msk.bf16.gmra.mrb[12].mxu0 %vm533_vm1, %v2759_v9  ;;  %2653 = vmatmul.mubr.msk.bf16.gmra.mrb[12].mxu1 %vm533_vm1, %v2760_v10 }
  0x2a   : > { %2556 = vmatprep.mubr.msk.bf16.mxu0 %vm2813_vm0, %v2812_v1  ;;  %2656 = vmatprep.mubr.msk.bf16.mxu1 %vm2813_vm0, %v2812_v1 }
  0x31   : > { %2557 = vmatmul.mubr.msk.bf16.gmra.mrb[16].mxu0 %vm533_vm1, %v2761_v11  ;;  %2657 = vmatmul.mubr.msk.bf16.gmra.mrb[16].mxu1 %vm533_vm1, %v2762_v12 }
  0x32   : > { %2560 = vmatprep.mubr.msk.bf16.mxu0 %vm2813_vm0, %v2812_v1  ;;  %2660 = vmatprep.mubr.msk.bf16.mxu1 %vm2813_vm0, %v2812_v1 }
  0x39   : > { %2561 = vmatmul.mubr.msk.bf16.gmra.mrb[20].mxu0 %vm533_vm1, %v2763_v13  ;;  %2661 = vmatmul.mubr.msk.bf16.gmra.mrb[20].mxu1 %vm533_vm1, %v2764_v14 }
  0x3a   : > { %2564 = vmatprep.mubr.msk.bf16.mxu0 %vm2813_vm0, %v2812_v1  ;;  %2664 = vmatprep.mubr.msk.bf16.mxu1 %vm2813_vm0, %v2812_v1 }
  0x41   : > { %2565 = vmatmul.mubr.msk.bf16.gmra.mrb[24].mxu0 %vm533_vm1, %v2765_v15  ;;  %2665 = vmatmul.mubr.msk.bf16.gmra.mrb[24].mxu1 %vm533_vm1, %v2766_v16 }
  0x42   : > { %2568 = vmatprep.mubr.msk.bf16.mxu0 %vm2813_vm0, %v2812_v1  ;;  %2668 = vmatprep.mubr.msk.bf16.mxu1 %vm2813_vm0, %v2812_v1 }
  0x49   : > { %2569 = vmatmul.mubr.msk.bf16.gmra.mrb[28].mxu0 %vm533_vm1, %v2767_v17  ;;  %2669 = vmatmul.mubr.msk.bf16.gmra.mrb[28].mxu1 %vm533_vm1, %v2768_v18 }
  0x4a   : > { %2572 = vmatprep.mubr.msk.bf16.mxu0 %vm2813_vm0, %v2812_v1  ;;  %2672 = vmatprep.mubr.msk.bf16.mxu1 %vm2813_vm0, %v2812_v1 }
  0x51   : > { %2573 = vmatmul.mubr.msk.bf16.gmra.mrb[32].mxu0 %vm533_vm1, %v2769_v19  ;;  %2673 = vmatmul.mubr.msk.bf16.gmra.mrb[32].mxu1 %vm533_vm1, %v2770_v20 }
  0x52   : > { %2576 = vmatprep.mubr.msk.bf16.mxu0 %vm2813_vm0, %v2812_v1  ;;  %2676 = vmatprep.mubr.msk.bf16.mxu1 %vm2813_vm0, %v2812_v1 }
  0x59   : > { %2577 = vmatmul.mubr.msk.bf16.gmra.mrb[36].mxu0 %vm533_vm1, %v2771_v21  ;;  %2677 = vmatmul.mubr.msk.bf16.gmra.mrb[36].mxu1 %vm533_vm1, %v2772_v22 }
  0x5a   : > { %2580 = vmatprep.mubr.msk.bf16.mxu0 %vm2813_vm0, %v2812_v1  ;;  %2680 = vmatprep.mubr.msk.bf16.mxu1 %vm2813_vm0, %v2812_v1 }
  0x61   : > { %2581 = vmatmul.mubr.msk.bf16.gmra.mrb[40].mxu0 %vm533_vm1, %v2773_v23  ;;  %2681 = vmatmul.mubr.msk.bf16.gmra.mrb[40].mxu1 %vm533_vm1, %v2774_v24 }
  0x62   : > { %2584 = vmatprep.mubr.msk.bf16.mxu0 %vm2813_vm0, %v2812_v1  ;;  %2684 = vmatprep.mubr.msk.bf16.mxu1 %vm2813_vm0, %v2812_v1 }
  0x69   : > { %2585 = vmatmul.mubr.msk.bf16.gmra.mrb[44].mxu0 %vm533_vm1, %v2775_v25  ;;  %2685 = vmatmul.mubr.msk.bf16.gmra.mrb[44].mxu1 %vm533_vm1, %v2776_v26 }
  0x6a   : > { %2588 = vmatprep.mubr.msk.bf16.mxu0 %vm2813_vm0, %v2812_v1  ;;  %2688 = vmatprep.mubr.msk.bf16.mxu1 %vm2813_vm0, %v2812_v1 }
  0x71   : > { %2589 = vmatmul.mubr.msk.bf16.gmra.mrb[48].mxu0 %vm533_vm1, %v2777_v27  ;;  %2689 = vmatmul.mubr.msk.bf16.gmra.mrb[48].mxu1 %vm533_vm1, %v2778_v28 }
  0x72   : > { %2592 = vmatprep.mubr.msk.bf16.mxu0 %vm2813_vm0, %v2812_v1  ;;  %2692 = vmatprep.mubr.msk.bf16.mxu1 %vm2813_vm0, %v2812_v1 }
  0x79   : > { %2593 = vmatmul.mubr.msk.bf16.gmra.mrb[52].mxu0 %vm533_vm1, %v2779_v29  ;;  %2693 = vmatmul.mubr.msk.bf16.gmra.mrb[52].mxu1 %vm533_vm1, %v2780_v30 }
  0x7a   : > { %2596 = vmatprep.mubr.msk.bf16.mxu0 %vm2813_vm0, %v2812_v1  ;;  %2696 = vmatprep.mubr.msk.bf16.mxu1 %vm2813_vm0, %v2812_v1 }
  0x81   : > { %2597 = vmatmul.mubr.msk.bf16.gmra.mrb[56].mxu0 %vm533_vm1, %v2781_v31  ;;  %2697 = vmatmul.mubr.msk.bf16.gmra.mrb[56].mxu1 %vm533_vm1, %v2782_v32 }
  0x82   : > { %2600 = vmatprep.mubr.msk.bf16.mxu0 %vm2813_vm0, %v2812_v1  ;;  %2700 = vmatprep.mubr.msk.bf16.mxu1 %vm2813_vm0, %v2812_v1 }
  0x89   : > { %2601 = vmatmul.mubr.msk.bf16.gmra.mrb[60].mxu0 %vm533_vm1, %v2783_v33  ;;  %2701 = vmatmul.mubr.msk.bf16.gmra.mrb[60].mxu1 %vm533_vm1, %v2784_v34 }
  0x8a   : > { %2604 = vmatprep.mubr.msk.bf16.mxu0 %vm2813_vm0, %v2812_v1  ;;  %2704 = vmatprep.mubr.msk.bf16.mxu1 %vm2813_vm0, %v2812_v1 }
  0x91   : > { %2605 = vmatmul.mubr.msk.bf16.gmra.mrb[64].mxu0 %vm533_vm1, %v2785_v35  ;;  %2705 = vmatmul.mubr.msk.bf16.gmra.mrb[64].mxu1 %vm533_vm1, %v2786_v36 }
  0x92   : > { %2608 = vmatprep.mubr.msk.bf16.mxu0 %vm2813_vm0, %v2812_v1  ;;  %2708 = vmatprep.mubr.msk.bf16.mxu1 %vm2813_vm0, %v2812_v1 }
  0x99   : > { %2609 = vmatmul.mubr.msk.bf16.gmra.mrb[68].mxu0 %vm533_vm1, %v2787_v37  ;;  %2709 = vmatmul.mubr.msk.bf16.gmra.mrb[68].mxu1 %vm533_vm1, %v2788_v38 }
  0x9a   : > { %2612 = vmatprep.mubr.msk.bf16.mxu0 %vm2813_vm0, %v2812_v1  ;;  %2712 = vmatprep.mubr.msk.bf16.mxu1 %vm2813_vm0, %v2812_v1 }
  0xa1   : > { %2613 = vmatmul.mubr.msk.bf16.gmra.mrb[72].mxu0 %vm533_vm1, %v2789_v39  ;;  %2713 = vmatmul.mubr.msk.bf16.gmra.mrb[72].mxu1 %vm533_vm1, %v2790_v40 }
  0xa2   : > { %2616 = vmatprep.mubr.msk.bf16.mxu0 %vm2813_vm0, %v2812_v1  ;;  %2716 = vmatprep.mubr.msk.bf16.mxu1 %vm2813_vm0, %v2812_v1 }
  0xa9   : > { %2617 = vmatmul.mubr.msk.bf16.gmra.mrb[76].mxu0 %vm533_vm1, %v2791_v41  ;;  %2717 = vmatmul.mubr.msk.bf16.gmra.mrb[76].mxu1 %vm533_vm1, %v2792_v42 }
  0xaa   : > { %2620 = vmatprep.mubr.msk.bf16.mxu0 %vm2813_vm0, %v2812_v1  ;;  %2720 = vmatprep.mubr.msk.bf16.mxu1 %vm2813_vm0, %v2812_v1 }
  0xb1   : > { %2621 = vmatmul.mubr.msk.bf16.gmra.mrb[80].mxu0 %vm533_vm1, %v2793_v43  ;;  %2721 = vmatmul.mubr.msk.bf16.gmra.mrb[80].mxu1 %vm533_vm1, %v2794_v44 }
  0xb2   : > { %2624 = vmatprep.mubr.msk.bf16.mxu0 %vm2813_vm0, %v2812_v1  ;;  %2724 = vmatprep.mubr.msk.bf16.mxu1 %vm2813_vm0, %v2812_v1 }
  0xb9   : > { %2625 = vmatmul.mubr.msk.bf16.gmra.mrb[84].mxu0 %vm533_vm1, %v2795_v45  ;;  %2725 = vmatmul.mubr.msk.bf16.gmra.mrb[84].mxu1 %vm533_vm1, %v2796_v46 }
  0xba   : > { %2628 = vmatprep.mubr.msk.bf16.mxu0 %vm2813_vm0, %v2812_v1  ;;  %2728 = vmatprep.mubr.msk.bf16.mxu1 %vm2813_vm0, %v2812_v1 }
  0xc1   : > { %2629 = vmatmul.mubr.msk.bf16.gmra.mrb[88].mxu0 %vm533_vm1, %v2797_v47  ;;  %2729 = vmatmul.mubr.msk.bf16.gmra.mrb[88].mxu1 %vm533_vm1, %v2798_v48 }
  0xc2   : > { %2632 = vmatprep.mubr.msk.bf16.mxu0 %vm2813_vm0, %v2812_v1  ;;  %2732 = vmatprep.mubr.msk.bf16.mxu1 %vm2813_vm0, %v2812_v1 }
  0xc9   : > { %2633 = vmatmul.mubr.msk.bf16.gmra.mrb[92].mxu0 %vm533_vm1, %v2799_v49  ;;  %2733 = vmatmul.mubr.msk.bf16.gmra.mrb[92].mxu1 %vm533_vm1, %v2800_v50 }
  0xca   : > { %2636 = vmatprep.mubr.msk.bf16.mxu0 %vm2813_vm0, %v2812_v1 }
  0xd1   : > { %2637 = vmatmul.mubr.msk.bf16.gmra.mrb[96].mxu0 %vm533_vm1, %v2801_v51 }
  0xe4   : > { %v715_v52 = vpop.f32.mrb[0].mxu0  ;;  %v915_v54 = vpop.f32.mrb[0].mxu1 }
  0xe5   : > { %1107 = vst.msk [vmem:[#allocation2] sm:$0xff] %vm1106_vm2, %v715_v52  ;;  %v2542_v53 = vpop.f32.mrb[1].mxu0  ;;  %1157 = vst.msk [vmem:[#allocation2 + $0x190] sm:$0xff] %vm1106_vm2, %v915_v54  ;;  %v2642_v56 = vpop.f32.mrb[1].mxu1 }
  0xe6   : > { %v718_v55 = vpop.f32.mrb[2].mxu0  ;;  %v918_v58 = vpop.f32.mrb[2].mxu1 }
  0xe7   : > { %1108 = vst.msk [vmem:[#allocation2 + $0x8] sm:$0xff] %vm1106_vm2, %v718_v55  ;;  %v2543_v57 = vpop.f32.mrb[3].mxu0  ;;  %1158 = vst.msk [vmem:[#allocation2 + $0x198] sm:$0xff] %vm1106_vm2, %v918_v58  ;;  %v2643_v59 = vpop.f32.mrb[3].mxu1 }
  0xec   : > { %v723_v60 = vpop.f32.mrb[4].mxu0  ;;  %v923_v61 = vpop.f32.mrb[4].mxu1  ;;  %v1205_v12 = vld [vmem:[#allocation2] sm:$0xff] }
  0xed   : > { %1109 = vst.msk [vmem:[#allocation2 + $0x10] sm:$0xff] %vm1106_vm2, %v723_v60  ;;  %v2546_v62 = vpop.f32.mrb[5].mxu0  ;;  %1159 = vst.msk [vmem:[#allocation2 + $0x1a0] sm:$0xff] %vm1106_vm2, %v923_v61  ;;  %v2646_v0 = vpop.f32.mrb[5].mxu1 }
  0xee   : > { %v726_v63 = vpop.f32.mrb[6].mxu0  ;;  %v926_v2 = vpop.f32.mrb[6].mxu1  ;;  %v1206_v18 = vld [vmem:[#allocation2 + $0x8] sm:$0xff]  ;;  %v1256_v22 = vld [vmem:[#allocation2 + $0x198] sm:$0xff] }
  0xef   : > { %1110 = vst.msk [vmem:[#allocation2 + $0x18] sm:$0xff] %vm1106_vm2, %v726_v63  ;;  %v2547_v1 = vpop.f32.mrb[7].mxu0  ;;  %1160 = vst.msk [vmem:[#allocation2 + $0x1a8] sm:$0xff] %vm1106_vm2, %v926_v2  ;;  %v2647_v3 = vpop.f32.mrb[7].mxu1  ;;  %v3073_v29 = vld [vmem:[#allocation2 + $0x194] sm:$0xff] }
  0xf4   : > { %v731_v4 = vpop.f32.mrb[8].mxu0  ;;  %v931_v5 = vpop.f32.mrb[8].mxu1  ;;  %v3075_v30 = vld [vmem:[#allocation2 + $0x19c] sm:$0xff]  ;;  %v1207_v31 = vld [vmem:[#allocation2 + $0x10] sm:$0xff] }
  0xf5   : > { %1111 = vst.msk [vmem:[#allocation2 + $0x20] sm:$0xff] %vm1106_vm2, %v731_v4  ;;  %v2550_v6 = vpop.f32.mrb[9].mxu0  ;;  %1161 = vst.msk [vmem:[#allocation2 + $0x1b0] sm:$0xff] %vm1106_vm2, %v931_v5  ;;  %v2650_v7 = vpop.f32.mrb[9].mxu1  ;;  %v1257_v34 = vld [vmem:[#allocation2 + $0x1a0] sm:$0xff] }
  0xf6   : > { %v734_v8 = vpop.f32.mrb[10].mxu0  ;;  %v934_v9 = vpop.f32.mrb[10].mxu1  ;;  %v1208_v39 = vld [vmem:[#allocation2 + $0x18] sm:$0xff]  ;;  %v1258_v44 = vld [vmem:[#allocation2 + $0x1a8] sm:$0xff] }
  0xf7   : > { %1112 = vst.msk [vmem:[#allocation2 + $0x28] sm:$0xff] %vm1106_vm2, %v734_v8  ;;  %v2551_v10 = vpop.f32.mrb[11].mxu0  ;;  %1162 = vst.msk [vmem:[#allocation2 + $0x1b8] sm:$0xff] %vm1106_vm2, %v934_v9  ;;  %v2651_v11 = vpop.f32.mrb[11].mxu1  ;;  %v3083_v49 = vld [vmem:[#allocation2 + $0x1a4] sm:$0xff] }
  0xfc   : > { %v1300_v13 = vld [vmem:[#allocation2 + $0x1c] sm:$0xff]  ;;  %v739_v14 = vpop.f32.mrb[12].mxu0  ;;  %v939_v16 = vpop.f32.mrb[12].mxu1  ;;  %v3087_v54 = vld [vmem:[#allocation2 + $0x1ac] sm:$0xff] }
  0xfd   : > { %v1395_v15 = vmax.f32 %v1205_v12, %v1300_v13  ;;  %1113 = vst.msk [vmem:[#allocation2 + $0x30] sm:$0xff] %vm1106_vm2, %v739_v14  ;;  %v2554_v17 = vpop.f32.mrb[13].mxu0  ;;  %1163 = vst.msk [vmem:[#allocation2 + $0x1c0] sm:$0xff] %vm1106_vm2, %v939_v16  ;;  %v2654_v20 = vpop.f32.mrb[13].mxu1  ;;  %v1209_v56 = vld [vmem:[#allocation2 + $0x20] sm:$0xff]  ;;  %v1259_v59 = vld [vmem:[#allocation2 + $0x1b0] sm:$0xff] }
  0xfe   : > { %v1301_v19 = vld [vmem:[#allocation2 + $0x24] sm:$0xff]  ;;  %v742_v21 = vpop.f32.mrb[14].mxu0  ;;  %v1351_v24 = vld [vmem:[#allocation2 + $0x1b4] sm:$0xff]  ;;  %v942_v25 = vpop.f32.mrb[14].mxu1 }
  0xff   : > { %1490 = vst.msk [vmem:[#allocation2] sm:$0xff] %vm1106_vm2, %v1395_v15  ;;  %v1396_v23 = vmax.f32 %v1206_v18, %v1301_v19  ;;  %1114 = vst.msk [vmem:[#allocation2 + $0x38] sm:$0xff] %vm1106_vm2, %v742_v21  ;;  %v2555_v26 = vpop.f32.mrb[15].mxu0  ;;  %v1446_v27 = vmax.f32 %v1256_v22, %v1351_v24  ;;  %v2655_v28 = vpop.f32.mrb[15].mxu1  ;;  %v1210_v0 = vld [vmem:[#allocation2 + $0x28] sm:$0xff]  ;;  %v1260_v6 = vld [vmem:[#allocation2 + $0x1b8] sm:$0xff] }
 0x100   : > { %1164 = vst.msk [vmem:[#allocation2 + $0x1c8] sm:$0xff] %vm1106_vm2, %v942_v25  ;;  %v3112_v25 = vld [vmem:[%s3468_s2] ss:$0 sm:$0xff] }
 0x101   : > { %1491 = vst.msk [vmem:[#allocation2 + $0x8] sm:$0xff] %vm1106_vm2, %v1396_v23  ;;  %1541 = vst.msk [vmem:[#allocation2 + $0x198] sm:$0xff] %vm1106_vm2, %v1446_v27 }
 0x104   : > { %v1302_v32 = vld [vmem:[#allocation2 + $0x2c] sm:$0xff]  ;;  %v747_v33 = vpop.f32.mrb[16].mxu0  ;;  %v1352_v36 = vld [vmem:[#allocation2 + $0x1bc] sm:$0xff]  ;;  %v947_v37 = vpop.f32.mrb[16].mxu1 }
 0x105   : > { %v1397_v35 = vmax.f32 %v1207_v31, %v1302_v32  ;;  %1115 = vst.msk [vmem:[#allocation2 + $0x40] sm:$0xff] %vm1106_vm2, %v747_v33  ;;  %v2558_v38 = vpop.f32.mrb[17].mxu0  ;;  %v1447_v40 = vmax.f32 %v1257_v34, %v1352_v36  ;;  %1165 = vst.msk [vmem:[#allocation2 + $0x1d0] sm:$0xff] %vm1106_vm2, %v947_v37  ;;  %v2658_v42 = vpop.f32.mrb[17].mxu1  ;;  %v1211_v22 = vld [vmem:[#allocation2 + $0x30] sm:$0xff]  ;;  %v1261_v26 = vld [vmem:[#allocation2 + $0x1c0] sm:$0xff] }
 0x106   : > { %v1303_v41 = vld [vmem:[#allocation2 + $0x34] sm:$0xff]  ;;  %v750_v43 = vpop.f32.mrb[18].mxu0  ;;  %v950_v47 = vpop.f32.mrb[18].mxu1  ;;  %v1586_v50 = vld [vmem:[#allocation2] sm:$0xff] }
 0x107   : > { %1492 = vst.msk [vmem:[#allocation2 + $0x10] sm:$0xff] %vm1106_vm2, %v1397_v35  ;;  %v1398_v45 = vmax.f32 %v1208_v39, %v1303_v41  ;;  %v1353_v46 = vld [vmem:[#allocation2 + $0x1c4] sm:$0xff]  ;;  %1116 = vst.msk [vmem:[#allocation2 + $0x48] sm:$0xff] %vm1106_vm2, %v750_v43  ;;  %v2559_v48 = vpop.f32.mrb[19].mxu0  ;;  %v2659_v53 = vpop.f32.mrb[19].mxu1  ;;  %v1212_v33 = vld [vmem:[#allocation2 + $0x38] sm:$0xff] }
 0x108   : > { %v1681_v51 = vld [vmem:[#allocation2 + $0x1] sm:$0xff]  ;;  %v1448_v52 = vmax.f32 %v1258_v44, %v1353_v46  ;;  %1166 = vst.msk [vmem:[#allocation2 + $0x1d8] sm:$0xff] %vm1106_vm2, %v950_v47  ;;  %1542 = vst.msk [vmem:[#allocation2 + $0x1a0] sm:$0xff] %vm1106_vm2, %v1447_v40 }
 0x109   : > { %v1776_v55 = vmax.f32 %v1586_v50, %v1681_v51  ;;  %1493 = vst.msk [vmem:[#allocation2 + $0x18] sm:$0xff] %vm1106_vm2, %v1398_v45  ;;  %v1587_v1 = vld [vmem:[#allocation2 + $0x8] sm:$0xff] }
 0x10a   : > { %1543 = vst.msk [vmem:[#allocation2 + $0x1a8] sm:$0xff] %vm1106_vm2, %v1448_v52  ;;  %v1262_v39 = vld [vmem:[#allocation2 + $0x1c8] sm:$0xff] }
 0x10b   : > { %1871 = vst.msk [vmem:[#allocation2] sm:$0xff] %vm1106_vm2, %v1776_v55 }
 0x10c   : > { %v1304_v57 = vld [vmem:[#allocation2 + $0x3c] sm:$0xff]  ;;  %v755_v58 = vpop.f32.mrb[20].mxu0  ;;  %v1354_v61 = vld [vmem:[#allocation2 + $0x1cc] sm:$0xff]  ;;  %v955_v62 = vpop.f32.mrb[20].mxu1 }
 0x10d   : > { %v1399_v60 = vmax.f32 %v1209_v56, %v1304_v57  ;;  %1117 = vst.msk [vmem:[#allocation2 + $0x50] sm:$0xff] %vm1106_vm2, %v755_v58  ;;  %v2562_v63 = vpop.f32.mrb[21].mxu0  ;;  %v1449_v3 = vmax.f32 %v1259_v59, %v1354_v61  ;;  %1167 = vst.msk [vmem:[#allocation2 + $0x1e0] sm:$0xff] %vm1106_vm2, %v955_v62  ;;  %v2662_v4 = vpop.f32.mrb[21].mxu1  ;;  %v1213_v62 = vld [vmem:[#allocation2 + $0x40] sm:$0xff] }
 0x10e   : > { %v1682_v2 = vld [vmem:[#allocation2 + $0x9] sm:$0xff]  ;;  %v758_v5 = vpop.f32.mrb[22].mxu0  ;;  %v958_v10 = vpop.f32.mrb[22].mxu1 }
 0x10f   : > { %v1777_v7 = vmax.f32 %v1587_v1, %v1682_v2  ;;  %1494 = vst.msk [vmem:[#allocation2 + $0x20] sm:$0xff] %vm1106_vm2, %v1399_v60  ;;  %v1305_v8 = vld [vmem:[#allocation2 + $0x44] sm:$0xff]  ;;  %v1355_v9 = vld [vmem:[#allocation2 + $0x1d4] sm:$0xff]  ;;  %1118 = vst.msk [vmem:[#allocation2 + $0x58] sm:$0xff] %vm1106_vm2, %v758_v5  ;;  %v2563_v11 = vpop.f32.mrb[23].mxu0  ;;  %v2663_v16 = vpop.f32.mrb[23].mxu1 }
 0x110   : > { %v1588_v12 = vld [vmem:[#allocation2 + $0x10] sm:$0xff]  ;;  %1544 = vst.msk [vmem:[#allocation2 + $0x1b0] sm:$0xff] %vm1106_vm2, %v1449_v3  ;;  %v1400_v14 = vmax.f32 %v1210_v0, %v1305_v8  ;;  %v1450_v15 = vmax.f32 %v1260_v6, %v1355_v9  ;;  %1168 = vst.msk [vmem:[#allocation2 + $0x1e8] sm:$0xff] %vm1106_vm2, %v958_v10  ;;  %v1638_v18 = vld [vmem:[#allocation2 + $0x1a0] sm:$0xff] }
 0x111   : > { %v1683_v13 = vld [vmem:[#allocation2 + $0x11] sm:$0xff]  ;;  %1872 = vst.msk [vmem:[#allocation2 + $0x8] sm:$0xff] %vm1106_vm2, %v1777_v7  ;;  %v1733_v19 = vld [vmem:[#allocation2 + $0x1a1] sm:$0xff]  ;;  %v3103_v21 = vld [vmem:[#allocation2 + $0x199] sm:$0xff] }
 0x112   : > { %v1778_v17 = vmax.f32 %v1588_v12, %v1683_v13  ;;  %1495 = vst.msk [vmem:[#allocation2 + $0x28] sm:$0xff] %vm1106_vm2, %v1400_v14  ;;  %1545 = vst.msk [vmem:[#allocation2 + $0x1b8] sm:$0xff] %vm1106_vm2, %v1450_v15  ;;  %v1828_v20 = vmax.f32 %v1638_v18, %v1733_v19  ;;  %v1589_v34 = vld [vmem:[#allocation2 + $0x18] sm:$0xff]  ;;  %v1639_v44 = vld [vmem:[#allocation2 + $0x1a8] sm:$0xff] }
 0x113   : > { %v1263_v2 = vld [vmem:[#allocation2 + $0x1d0] sm:$0xff]  ;;  %v1214_v7 = vld [vmem:[#allocation2 + $0x48] sm:$0xff] }
 0x114   : > { %1873 = vst.msk [vmem:[#allocation2 + $0x10] sm:$0xff] %vm1106_vm2, %v1778_v17  ;;  %v1306_v23 = vld [vmem:[#allocation2 + $0x4c] sm:$0xff]  ;;  %v763_v24 = vpop.f32.mrb[24].mxu0  ;;  %1923 = vst.msk [vmem:[#allocation2 + $0x1a0] sm:$0xff] %vm1106_vm2, %v1828_v20  ;;  %v1356_v28 = vld [vmem:[#allocation2 + $0x1dc] sm:$0xff]  ;;  %v963_v31 = vpop.f32.mrb[24].mxu1 }
 0x115   : > { %v1401_v27 = vmax.f32 %v1211_v22, %v1306_v23  ;;  %1119 = vst.msk [vmem:[#allocation2 + $0x60] sm:$0xff] %vm1106_vm2, %v763_v24  ;;  %v2566_v32 = vpop.f32.mrb[25].mxu0  ;;  %v1451_v36 = vmax.f32 %v1261_v26, %v1356_v28  ;;  %1169 = vst.msk [vmem:[#allocation2 + $0x1f0] sm:$0xff] %vm1106_vm2, %v963_v31  ;;  %v2666_v37 = vpop.f32.mrb[25].mxu1  ;;  %v1264_v20 = vld [vmem:[#allocation2 + $0x1d8] sm:$0xff] }
 0x116   : > { %v1684_v35 = vld [vmem:[#allocation2 + $0x19] sm:$0xff]  ;;  %v766_v38 = vpop.f32.mrb[26].mxu0  ;;  %v966_v42 = vpop.f32.mrb[26].mxu1 }
 0x117   : > { %v1779_v40 = vmax.f32 %v1589_v34, %v1684_v35  ;;  %1496 = vst.msk [vmem:[#allocation2 + $0x30] sm:$0xff] %vm1106_vm2, %v1401_v27  ;;  %v1307_v41 = vld [vmem:[#allocation2 + $0x54] sm:$0xff]  ;;  %1120 = vst.msk [vmem:[#allocation2 + $0x68] sm:$0xff] %vm1106_vm2, %v766_v38  ;;  %v2567_v43 = vpop.f32.mrb[27].mxu0  ;;  %v1357_v47 = vld [vmem:[#allocation2 + $0x1e4] sm:$0xff]  ;;  %v2667_v48 = vpop.f32.mrb[27].mxu1 }
 0x118   : > { %v1968_v45 = vld [vmem:[#allocation2] ss:$2 sm:$0xff]  ;;  %1546 = vst.msk [vmem:[#allocation2 + $0x1c0] sm:$0xff] %vm1106_vm2, %v1451_v36  ;;  %v1402_v46 = vmax.f32 %v1212_v33, %v1307_v41  ;;  %1170 = vst.msk [vmem:[#allocation2 + $0x1f8] sm:$0xff] %vm1106_vm2, %v966_v42  ;;  %v1452_v55 = vmax.f32 %v1262_v39, %v1357_v47  ;;  %v1640_v57 = vld [vmem:[#allocation2 + $0x1b0] sm:$0xff] }
 0x119   : > { %v1734_v50 = vld [vmem:[#allocation2 + $0x1a9] sm:$0xff]  ;;  %v1977_v51 = vadd.f32 %v3112_v25, %v1968_v45  ;;  %v1590_v52 = vld [vmem:[#allocation2 + $0x20] sm:$0xff]  ;;  %1874 = vst.msk [vmem:[#allocation2 + $0x18] sm:$0xff] %vm1106_vm2, %v1779_v40  ;;  %v1735_v59 = vld [vmem:[#allocation2 + $0x1b1] sm:$0xff] }
 0x11a   : > { %v1685_v53 = vld [vmem:[#allocation2 + $0x21] sm:$0xff]  ;;  %v1829_v56 = vmax.f32 %v1639_v44, %v1734_v50  ;;  %1497 = vst.msk [vmem:[#allocation2 + $0x38] sm:$0xff] %vm1106_vm2, %v1402_v46  ;;  %v1830_v61 = vmax.f32 %v1640_v57, %v1735_v59  ;;  %1547 = vst.msk [vmem:[#allocation2 + $0x1c8] sm:$0xff] %vm1106_vm2, %v1452_v55  ;;  %v1641_v13 = vld [vmem:[#allocation2 + $0x1b8] sm:$0xff] }
 0x11b   : > { %v1780_v58 = vmax.f32 %v1590_v52, %v1685_v53  ;;  %v1979_v60 = vmax.f32 %v1977_v51, 0.0  ;;  %v1591_v8 = vld [vmem:[#allocation2 + $0x28] sm:$0xff]  ;;  %v1215_v38 = vld [vmem:[#allocation2 + $0x50] sm:$0xff]  ;;  %v1265_v42 = vld [vmem:[#allocation2 + $0x1e0] sm:$0xff] }
 0x11c   : > { %1924 = vst.msk [vmem:[#allocation2 + $0x1a8] sm:$0xff] %vm1106_vm2, %v1829_v56  ;;  %v1308_v63 = vld [vmem:[#allocation2 + $0x5c] sm:$0xff]  ;;  %v771_v0 = vpop.f32.mrb[28].mxu0  ;;  %v1358_v4 = vld [vmem:[#allocation2 + $0x1ec] sm:$0xff]  ;;  %v971_v5 = vpop.f32.mrb[28].mxu1  ;;  %1925 = vst.msk [vmem:[#allocation2 + $0x1b0] sm:$0xff] %vm1106_vm2, %v1830_v61 }
 0x11d   : > { %1875 = vst.msk [vmem:[#allocation2 + $0x20] sm:$0xff] %vm1106_vm2, %v1780_v58  ;;  %v2457_v1 = vpack.c.bf16 %v1979_v60, %v1979_v60  ;;  %v1403_v3 = vmax.f32 %v1213_v62, %v1308_v63  ;;  %1121 = vst.msk [vmem:[#allocation2 + $0x70] sm:$0xff] %vm1106_vm2, %v771_v0  ;;  %v2570_v6 = vpop.f32.mrb[29].mxu0  ;;  %v1453_v10 = vmax.f32 %v1263_v2, %v1358_v4  ;;  %v2670_v11 = vpop.f32.mrb[29].mxu1  ;;  %v1216_v47 = vld [vmem:[#allocation2 + $0x58] sm:$0xff]  ;;  %v1266_v61 = vld [vmem:[#allocation2 + $0x1e8] sm:$0xff] }
 0x11e   : > { %v1686_v9 = vld [vmem:[#allocation2 + $0x29] sm:$0xff]  ;;  %1171 = vst.msk [vmem:[#allocation2 + $0x200] sm:$0xff] %vm1106_vm2, %v971_v5  ;;  %v774_v12 = vpop.f32.mrb[30].mxu0  ;;  %v974_v17 = vpop.f32.mrb[30].mxu1 }
 0x11f   : > { %v1781_v14 = vmax.f32 %v1591_v8, %v1686_v9  ;;  %v1736_v15 = vld [vmem:[#allocation2 + $0x1b9] sm:$0xff]  ;;  %1498 = vst.msk [vmem:[#allocation2 + $0x40] sm:$0xff] %vm1106_vm2, %v1403_v3  ;;  %v1309_v16 = vld [vmem:[#allocation2 + $0x64] sm:$0xff]  ;;  %1122 = vst.msk [vmem:[#allocation2 + $0x78] sm:$0xff] %vm1106_vm2, %v774_v12  ;;  %v2571_v18 = vpop.f32.mrb[31].mxu0  ;;  %v2671_v26 = vpop.f32.mrb[31].mxu1 }
 0x120   : > { %1989 = vst.msk [vmem:[%s3130_s28] sm:$0xf] %vm1584_vm3, %v2457_v1  ;;  %v1970_v19 = vld [vmem:[#allocation2 + $0x10] ss:$2 sm:$0x3f]  ;;  %v1831_v22 = vmax.f32 %v1641_v13, %v1736_v15  ;;  %v1404_v23 = vmax.f32 %v1214_v7, %v1309_v16  ;;  %v1642_v33 = vld [vmem:[#allocation2 + $0x1c0] sm:$0xff] }
 0x121   : > { %1548 = vst.msk [vmem:[#allocation2 + $0x1d0] sm:$0xff] %vm1106_vm2, %v1453_v10  ;;  %v1359_v24 = vld [vmem:[#allocation2 + $0x1f4] sm:$0xff]  ;;  %1172 = vst.msk [vmem:[#allocation2 + $0x208] sm:$0xff] %vm1106_vm2, %v974_v17  ;;  %v1978_v27 = vadd.f32 %v3112_v25, %v1970_v19  ;;  %v1737_v35 = vld [vmem:[#allocation2 + $0x1c1] sm:$0xff] }
 0x122   : > { %v1592_v28 = vld [vmem:[#allocation2 + $0x30] sm:$0xff]  ;;  %1876 = vst.msk [vmem:[#allocation2 + $0x28] sm:$0xff] %vm1106_vm2, %v1781_v14  ;;  %v1454_v32 = vmax.f32 %v1264_v20, %v1359_v24  ;;  %1926 = vst.msk [vmem:[#allocation2 + $0x1b8] sm:$0xff] %vm1106_vm2, %v1831_v22  ;;  %v1832_v37 = vmax.f32 %v1642_v33, %v1737_v35  ;;  %v1593_v48 = vld [vmem:[#allocation2 + $0x38] sm:$0xff] }
 0x123   : > { %v1687_v31 = vld [vmem:[#allocation2 + $0x31] sm:$0xff]  ;;  %1499 = vst.msk [vmem:[#allocation2 + $0x48] sm:$0xff] %vm1106_vm2, %v1404_v23  ;;  %v1980_v36 = vmax.f32 %v1978_v27, 0.0  ;;  %v1643_v55 = vld [vmem:[#allocation2 + $0x1c8] sm:$0xff]  ;;  %v1217_v9 = vld [vmem:[#allocation2 + $0x60] sm:$0xff] }
 0x124   : > { %v1782_v34 = vmax.f32 %v1592_v28, %v1687_v31  ;;  %1549 = vst.msk [vmem:[#allocation2 + $0x1d8] sm:$0xff] %vm1106_vm2, %v1454_v32  ;;  %v1310_v39 = vld [vmem:[#allocation2 + $0x6c] sm:$0xff]  ;;  %v779_v40 = vpop.f32.mrb[32].mxu0  ;;  %1927 = vst.msk [vmem:[#allocation2 + $0x1c0] sm:$0xff] %vm1106_vm2, %v1832_v37  ;;  %v979_v45 = vpop.f32.mrb[32].mxu1  ;;  %v1268_v33 = vld [vmem:[#allocation2 + $0x1f8] sm:$0xff] }
 0x125   : > { %v2458_v41 = vpack.c.bf16 %v1980_v36, %v1980_v36  ;;  %v1405_v43 = vmax.f32 %v1215_v38, %v1310_v39  ;;  %v1360_v44 = vld [vmem:[#allocation2 + $0x1fc] sm:$0xff]  ;;  %1123 = vst.msk [vmem:[#allocation2 + $0x80] sm:$0xff] %vm1106_vm2, %v779_v40  ;;  %v2574_v46 = vpop.f32.mrb[33].mxu0  ;;  %1173 = vst.msk [vmem:[#allocation2 + $0x210] sm:$0xff] %vm1106_vm2, %v979_v45  ;;  %v2674_v52 = vpop.f32.mrb[33].mxu1  ;;  %v1267_v12 = vld [vmem:[#allocation2 + $0x1f0] sm:$0xff] }
 0x126   : > { %1877 = vst.msk [vmem:[#allocation2 + $0x30] sm:$0xff] %vm1106_vm2, %v1782_v34  ;;  %v1688_v50 = vld [vmem:[#allocation2 + $0x39] sm:$0xff]  ;;  %v1455_v51 = vmax.f32 %v1265_v42, %v1360_v44  ;;  %v782_v53 = vpop.f32.mrb[34].mxu0  ;;  %v982_v59 = vpop.f32.mrb[34].mxu1  ;;  %v1218_v17 = vld [vmem:[#allocation2 + $0x68] sm:$0xff] }
 0x127   : > { %v1783_v56 = vmax.f32 %v1593_v48, %v1688_v50  ;;  %1500 = vst.msk [vmem:[#allocation2 + $0x50] sm:$0xff] %vm1106_vm2, %v1405_v43  ;;  %v1311_v58 = vld [vmem:[#allocation2 + $0x74] sm:$0xff]  ;;  %1124 = vst.msk [vmem:[#allocation2 + $0x88] sm:$0xff] %vm1106_vm2, %v782_v53  ;;  %v2575_v60 = vpop.f32.mrb[35].mxu0  ;;  %v2675_v1 = vpop.f32.mrb[35].mxu1  ;;  %v1594_v2 = vld [vmem:[#allocation2 + $0x40] sm:$0xff] }
 0x128   : > { %v1738_v57 = vld [vmem:[#allocation2 + $0x1c9] sm:$0xff]  ;;  %1990 = vst.msk [vmem:[%s3130_s28 + $0x4] sm:$0x7] %vm1965_vm4, %v2458_v41  ;;  %v1406_v63 = vmax.f32 %v1216_v47, %v1311_v58 }
 0x129   : > { %v1833_v62 = vmax.f32 %v1643_v55, %v1738_v57  ;;  %1550 = vst.msk [vmem:[#allocation2 + $0x1e0] sm:$0xff] %vm1106_vm2, %v1455_v51  ;;  %v1361_v0 = vld [vmem:[#allocation2 + $0x204] sm:$0xff]  ;;  %1174 = vst.msk [vmem:[#allocation2 + $0x218] sm:$0xff] %vm1106_vm2, %v982_v59  ;;  %v1644_v5 = vld [vmem:[#allocation2 + $0x1d0] sm:$0xff] }
 0x12a   : > { %1878 = vst.msk [vmem:[#allocation2 + $0x38] sm:$0xff] %vm1106_vm2, %v1783_v56  ;;  %v1689_v3 = vld [vmem:[#allocation2 + $0x41] sm:$0xff]  ;;  %v1456_v4 = vmax.f32 %v1266_v61, %v1361_v0  ;;  %1501 = vst.msk [vmem:[#allocation2 + $0x58] sm:$0xff] %vm1106_vm2, %v1406_v63  ;;  %v1219_v51 = vld [vmem:[#allocation2 + $0x70] sm:$0xff] }
 0x12b   : > { %1928 = vst.msk [vmem:[#allocation2 + $0x1c8] sm:$0xff] %vm1106_vm2, %v1833_v62  ;;  %v1784_v6 = vmax.f32 %v1594_v2, %v1689_v3  ;;  %v1739_v7 = vld [vmem:[#allocation2 + $0x1d1] sm:$0xff]  ;;  %v1595_v18 = vld [vmem:[#allocation2 + $0x48] sm:$0xff]  ;;  %v1269_v55 = vld [vmem:[#allocation2 + $0x200] sm:$0xff] }
 0x12c   : > { %v1834_v8 = vmax.f32 %v1644_v5, %v1739_v7  ;;  %1551 = vst.msk [vmem:[#allocation2 + $0x1e8] sm:$0xff] %vm1106_vm2, %v1456_v4  ;;  %v1312_v10 = vld [vmem:[#allocation2 + $0x7c] sm:$0xff]  ;;  %v787_v11 = vpop.f32.mrb[36].mxu0  ;;  %v1362_v14 = vld [vmem:[#allocation2 + $0x20c] sm:$0xff]  ;;  %v987_v15 = vpop.f32.mrb[36].mxu1 }
 0x12d   : > { %1879 = vst.msk [vmem:[#allocation2 + $0x40] sm:$0xff] %vm1106_vm2, %v1784_v6  ;;  %v1407_v13 = vmax.f32 %v1217_v9, %v1312_v10  ;;  %1125 = vst.msk [vmem:[#allocation2 + $0x90] sm:$0xff] %vm1106_vm2, %v787_v11  ;;  %v2578_v16 = vpop.f32.mrb[37].mxu0  ;;  %v1457_v20 = vmax.f32 %v1267_v12, %v1362_v14  ;;  %v2678_v22 = vpop.f32.mrb[37].mxu1  ;;  %v1645_v24 = vld [vmem:[#allocation2 + $0x1d8] sm:$0xff]  ;;  %v1270_v11 = vld [vmem:[#allocation2 + $0x208] sm:$0xff] }
 0x12e   : > { %1929 = vst.msk [vmem:[#allocation2 + $0x1d0] sm:$0xff] %vm1106_vm2, %v1834_v8  ;;  %v1690_v19 = vld [vmem:[#allocation2 + $0x49] sm:$0xff]  ;;  %1175 = vst.msk [vmem:[#allocation2 + $0x220] sm:$0xff] %vm1106_vm2, %v987_v15  ;;  %v790_v23 = vpop.f32.mrb[38].mxu0  ;;  %v990_v31 = vpop.f32.mrb[38].mxu1  ;;  %v1220_v62 = vld [vmem:[#allocation2 + $0x78] sm:$0xff] }
 0x12f   : > { %v1785_v26 = vmax.f32 %v1595_v18, %v1690_v19  ;;  %1502 = vst.msk [vmem:[#allocation2 + $0x60] sm:$0xff] %vm1106_vm2, %v1407_v13  ;;  %v1313_v28 = vld [vmem:[#allocation2 + $0x84] sm:$0xff]  ;;  %1126 = vst.msk [vmem:[#allocation2 + $0x98] sm:$0xff] %vm1106_vm2, %v790_v23  ;;  %v2579_v32 = vpop.f32.mrb[39].mxu0  ;;  %v2679_v37 = vpop.f32.mrb[39].mxu1  ;;  %v1596_v39 = vld [vmem:[#allocation2 + $0x50] sm:$0xff] }
 0x130   : > { %v1740_v27 = vld [vmem:[#allocation2 + $0x1d9] sm:$0xff]  ;;  %1552 = vst.msk [vmem:[#allocation2 + $0x1f0] sm:$0xff] %vm1106_vm2, %v1457_v20  ;;  %v1408_v35 = vmax.f32 %v1218_v17, %v1313_v28  ;;  %1176 = vst.msk [vmem:[#allocation2 + $0x228] sm:$0xff] %vm1106_vm2, %v990_v31 }
 0x131   : > { %v1835_v34 = vmax.f32 %v1645_v24, %v1740_v27  ;;  %v1363_v36 = vld [vmem:[#allocation2 + $0x214] sm:$0xff]  ;;  %1880 = vst.msk [vmem:[#allocation2 + $0x48] sm:$0xff] %vm1106_vm2, %v1785_v26  ;;  %v1646_v43 = vld [vmem:[#allocation2 + $0x1e0] sm:$0xff] }
 0x132   : > { %v2125_v38 = vld [vmem:[#allocation2 + $0x1c0] ss:$2 sm:$0xff]  ;;  %v1691_v40 = vld [vmem:[#allocation2 + $0x51] sm:$0xff]  ;;  %v1458_v41 = vmax.f32 %v1268_v33, %v1363_v36  ;;  %1503 = vst.msk [vmem:[#allocation2 + $0x68] sm:$0xff] %vm1106_vm2, %v1408_v35 }
 0x133   : > { %v2128_v42 = vadd.f32 %v3112_v25, %v2125_v38  ;;  %1930 = vst.msk [vmem:[#allocation2 + $0x1d8] sm:$0xff] %vm1106_vm2, %v1835_v34  ;;  %v1786_v44 = vmax.f32 %v1596_v39, %v1691_v40  ;;  %v1741_v45 = vld [vmem:[#allocation2 + $0x1e1] sm:$0xff]  ;;  %v1597_v63 = vld [vmem:[#allocation2 + $0x58] sm:$0xff]  ;;  %v1271_v35 = vld [vmem:[#allocation2 + $0x210] sm:$0xff] }
 0x134   : > { %v1992_v46 = vld [vmem:[#allocation2 + $0x38] ss:$2 sm:$0xff]  ;;  %v1836_v47 = vmax.f32 %v1646_v43, %v1741_v45  ;;  %1553 = vst.msk [vmem:[#allocation2 + $0x1f8] sm:$0xff] %vm1106_vm2, %v1458_v41  ;;  %v1314_v52 = vld [vmem:[#allocation2 + $0x8c] sm:$0xff]  ;;  %v795_v53 = vpop.f32.mrb[40].mxu0  ;;  %v995_v58 = vpop.f32.mrb[40].mxu1 }
 0x135   : > { %v2130_v48 = vmax.f32 %v2128_v42, 0.0  ;;  %v1995_v50 = vadd.f32 %v3112_v25, %v1992_v46  ;;  %1881 = vst.msk [vmem:[#allocation2 + $0x50] sm:$0xff] %vm1106_vm2, %v1786_v44  ;;  %v1409_v56 = vmax.f32 %v1219_v51, %v1314_v52  ;;  %v1364_v57 = vld [vmem:[#allocation2 + $0x21c] sm:$0xff]  ;;  %1127 = vst.msk [vmem:[#allocation2 + $0xa0] sm:$0xff] %vm1106_vm2, %v795_v53  ;;  %v2582_v59 = vpop.f32.mrb[41].mxu0  ;;  %v2682_v2 = vpop.f32.mrb[41].mxu1 }
 0x136   : > { %1931 = vst.msk [vmem:[#allocation2 + $0x1e0] sm:$0xff] %vm1106_vm2, %v1836_v47  ;;  %v1692_v0 = vld [vmem:[#allocation2 + $0x59] sm:$0xff]  ;;  %v1459_v1 = vmax.f32 %v1269_v55, %v1364_v57  ;;  %1177 = vst.msk [vmem:[#allocation2 + $0x230] sm:$0xff] %vm1106_vm2, %v995_v58  ;;  %v798_v3 = vpop.f32.mrb[42].mxu0  ;;  %v1647_v4 = vld [vmem:[#allocation2 + $0x1e8] sm:$0xff]  ;;  %v998_v8 = vpop.f32.mrb[42].mxu1 }
 0x137   : > { %v2473_v60 = vpack.c.bf16 %v2130_v48, %v2130_v48  ;;  %v1997_v61 = vmax.f32 %v1995_v50, 0.0  ;;  %v1787_v5 = vmax.f32 %v1597_v63, %v1692_v0  ;;  %v1742_v6 = vld [vmem:[#allocation2 + $0x1e9] sm:$0xff]  ;;  %1504 = vst.msk [vmem:[#allocation2 + $0x70] sm:$0xff] %vm1106_vm2, %v1409_v56  ;;  %v1315_v7 = vld [vmem:[#allocation2 + $0x94] sm:$0xff]  ;;  %1128 = vst.msk [vmem:[#allocation2 + $0xa8] sm:$0xff] %vm1106_vm2, %v798_v3  ;;  %v2583_v9 = vpop.f32.mrb[43].mxu0 }
 0x138   : > { %v1837_v12 = vmax.f32 %v1647_v4, %v1742_v6  ;;  %1554 = vst.msk [vmem:[#allocation2 + $0x200] sm:$0xff] %vm1106_vm2, %v1459_v1  ;;  %v1410_v13 = vmax.f32 %v1220_v62, %v1315_v7  ;;  %v1365_v14 = vld [vmem:[#allocation2 + $0x224] sm:$0xff]  ;;  %1178 = vst.msk [vmem:[#allocation2 + $0x238] sm:$0xff] %vm1106_vm2, %v998_v8  ;;  %v2683_v15 = vpop.f32.mrb[43].mxu1  ;;  %v1648_v22 = vld [vmem:[#allocation2 + $0x1f0] sm:$0xff] }
 0x139   : > { %v2459_v10 = vpack.c.bf16 %v1997_v61, %v1997_v61  ;;  %2433 = vst.msk [vmem:[%s3130_s28 + $0x40] sm:$0xf] %vm1584_vm3, %v2473_v60  ;;  %v1598_v17 = vld [vmem:[#allocation2 + $0x60] sm:$0xff]  ;;  %v1460_v19 = vmax.f32 %v1270_v11, %v1365_v14  ;;  %v1222_v42 = vld [vmem:[#allocation2 + $0x88] sm:$0xff]  ;;  %v1272_v57 = vld [vmem:[#allocation2 + $0x218] sm:$0xff] }
 0x13a   : > { %v2127_v16 = vld [vmem:[#allocation2 + $0x1d0] ss:$2 sm:$0x3f]  ;;  %1882 = vst.msk [vmem:[#allocation2 + $0x58] sm:$0xff] %vm1106_vm2, %v1787_v5  ;;  %v1693_v18 = vld [vmem:[#allocation2 + $0x61] sm:$0xff]  ;;  %1932 = vst.msk [vmem:[#allocation2 + $0x1e8] sm:$0xff] %vm1106_vm2, %v1837_v12 }
 0x13b   : > { %v2129_v20 = vadd.f32 %v3112_v25, %v2127_v16  ;;  %v1788_v23 = vmax.f32 %v1598_v17, %v1693_v18  ;;  %v1743_v24 = vld [vmem:[#allocation2 + $0x1f1] sm:$0xff]  ;;  %1505 = vst.msk [vmem:[#allocation2 + $0x78] sm:$0xff] %vm1106_vm2, %v1410_v13  ;;  %1555 = vst.msk [vmem:[#allocation2 + $0x208] sm:$0xff] %vm1106_vm2, %v1460_v19  ;;  %v1221_v32 = vld [vmem:[#allocation2 + $0x80] sm:$0xff] }
 0x13c   : > { %2405 = vst.msk [vmem:[%s3130_s28 + $0x8] sm:$0xf] %vm1584_vm3, %v2459_v10  ;;  %v1994_v26 = vld [vmem:[#allocation2 + $0x48] ss:$2 sm:$0x3f]  ;;  %v1838_v27 = vmax.f32 %v1648_v22, %v1743_v24  ;;  %v1316_v33 = vld [vmem:[#allocation2 + $0x9c] sm:$0xff] }
 0x13d   : > { %v2131_v28 = vmax.f32 %v2129_v20, 0.0  ;;  %v1996_v31 = vadd.f32 %v3112_v25, %v1994_v26  ;;  %1883 = vst.msk [vmem:[#allocation2 + $0x60] sm:$0xff] %vm1106_vm2, %v1788_v23  ;;  %v803_v34 = vpop.f32.mrb[44].mxu0  ;;  %v1411_v36 = vmax.f32 %v1221_v32, %v1316_v33  ;;  %v1366_v37 = vld [vmem:[#allocation2 + $0x22c] sm:$0xff]  ;;  %v1003_v38 = vpop.f32.mrb[44].mxu1  ;;  %v1649_v48 = vld [vmem:[#allocation2 + $0x1f8] sm:$0xff] }
 0x13e   : > { %1933 = vst.msk [vmem:[#allocation2 + $0x1f0] sm:$0xff] %vm1106_vm2, %v1838_v27  ;;  %1129 = vst.msk [vmem:[#allocation2 + $0xb0] sm:$0xff] %vm1106_vm2, %v803_v34  ;;  %v2586_v39 = vpop.f32.mrb[45].mxu0  ;;  %v1599_v43 = vld [vmem:[#allocation2 + $0x68] sm:$0xff]  ;;  %v1461_v45 = vmax.f32 %v1271_v35, %v1366_v37  ;;  %v2686_v46 = vpop.f32.mrb[45].mxu1  ;;  %v1600_v62 = vld [vmem:[#allocation2 + $0x70] sm:$0xff] }
 0x13f   : > { %v2474_v40 = vpack.c.bf16 %v2131_v28, %v2131_v28  ;;  %v1998_v41 = vmax.f32 %v1996_v31, 0.0  ;;  %v1694_v44 = vld [vmem:[#allocation2 + $0x69] sm:$0xff]  ;;  %1179 = vst.msk [vmem:[#allocation2 + $0x240] sm:$0xff] %vm1106_vm2, %v1003_v38  ;;  %v806_v47 = vpop.f32.mrb[46].mxu0  ;;  %v1744_v51 = vld [vmem:[#allocation2 + $0x1f9] sm:$0xff]  ;;  %1506 = vst.msk [vmem:[#allocation2 + $0x80] sm:$0xff] %vm1106_vm2, %v1411_v36 }
 0x140   : > { %v1789_v50 = vmax.f32 %v1599_v43, %v1694_v44  ;;  %v1317_v52 = vld [vmem:[#allocation2 + $0xa4] sm:$0xff]  ;;  %1130 = vst.msk [vmem:[#allocation2 + $0xb8] sm:$0xff] %vm1106_vm2, %v806_v47  ;;  %v1006_v53 = vpop.f32.mrb[46].mxu1  ;;  %v2587_v55 = vpop.f32.mrb[47].mxu0  ;;  %v1839_v58 = vmax.f32 %v1649_v48, %v1744_v51  ;;  %1556 = vst.msk [vmem:[#allocation2 + $0x210] sm:$0xff] %vm1106_vm2, %v1461_v45  ;;  %v1367_v60 = vld [vmem:[#allocation2 + $0x234] sm:$0xff] }
 0x141   : > { %v2460_v56 = vpack.c.bf16 %v1998_v41, %v1998_v41  ;;  %v1412_v59 = vmax.f32 %v1222_v42, %v1317_v52  ;;  %1180 = vst.msk [vmem:[#allocation2 + $0x248] sm:$0xff] %vm1106_vm2, %v1006_v53  ;;  %v2687_v61 = vpop.f32.mrb[47].mxu1  ;;  %v1462_v0 = vmax.f32 %v1272_v57, %v1367_v60  ;;  %v1650_v1 = vld [vmem:[#allocation2 + $0x200] sm:$0xff]  ;;  %v1223_v5 = vld [vmem:[#allocation2 + $0x90] sm:$0xff]  ;;  %v1224_v13 = vld [vmem:[#allocation2 + $0x98] sm:$0xff] }
 0x142   : > { %2434 = vst.msk [vmem:[%s3130_s28 + $0x44] sm:$0x7] %vm1965_vm4, %v2474_v40  ;;  %v1695_v63 = vld [vmem:[#allocation2 + $0x71] sm:$0xff]  ;;  %v1745_v3 = vld [vmem:[#allocation2 + $0x201] sm:$0xff] }
 0x143   : > { %1884 = vst.msk [vmem:[#allocation2 + $0x68] sm:$0xff] %vm1106_vm2, %v1789_v50  ;;  %1934 = vst.msk [vmem:[#allocation2 + $0x1f8] sm:$0xff] %vm1106_vm2, %v1839_v58  ;;  %v1790_v2 = vmax.f32 %v1600_v62, %v1695_v63  ;;  %v1840_v4 = vmax.f32 %v1650_v1, %v1745_v3  ;;  %v1273_v8 = vld [vmem:[#allocation2 + $0x220] sm:$0xff]  ;;  %v1601_v14 = vld [vmem:[#allocation2 + $0x78] sm:$0xff] }
 0x144   : > { %1507 = vst.msk [vmem:[#allocation2 + $0x88] sm:$0xff] %vm1106_vm2, %v1412_v59  ;;  %1557 = vst.msk [vmem:[#allocation2 + $0x218] sm:$0xff] %vm1106_vm2, %v1462_v0  ;;  %v811_v7 = vpop.f32.mrb[48].mxu0  ;;  %v1011_v11 = vpop.f32.mrb[48].mxu1  ;;  %v1651_v19 = vld [vmem:[#allocation2 + $0x208] sm:$0xff]  ;;  %v1225_v42 = vld [vmem:[#allocation2 + $0xa0] sm:$0xff] }
 0x145   : > { %2406 = vst.msk [vmem:[%s3130_s28 + $0xc] sm:$0x7] %vm1965_vm4, %v2460_v56  ;;  %v1318_v6 = vld [vmem:[#allocation2 + $0xac] sm:$0xff]  ;;  %v2590_v12 = vpop.f32.mrb[49].mxu0  ;;  %v2690_v17 = vpop.f32.mrb[49].mxu1  ;;  %v1276_v3 = vld [vmem:[#allocation2 + $0x238] sm:$0xff] }
 0x146   : > { %1885 = vst.msk [vmem:[#allocation2 + $0x70] sm:$0xff] %vm1106_vm2, %v1790_v2  ;;  %1935 = vst.msk [vmem:[#allocation2 + $0x200] sm:$0xff] %vm1106_vm2, %v1840_v4  ;;  %v1413_v9 = vmax.f32 %v1223_v5, %v1318_v6  ;;  %v1368_v10 = vld [vmem:[#allocation2 + $0x23c] sm:$0xff]  ;;  %v814_v18 = vpop.f32.mrb[50].mxu0  ;;  %v1014_v24 = vpop.f32.mrb[50].mxu1  ;;  %v1274_v27 = vld [vmem:[#allocation2 + $0x228] sm:$0xff] }
 0x147   : > { %1131 = vst.msk [vmem:[#allocation2 + $0xc0] sm:$0xff] %vm1106_vm2, %v811_v7  ;;  %v1696_v15 = vld [vmem:[#allocation2 + $0x79] sm:$0xff]  ;;  %v1463_v16 = vmax.f32 %v1273_v8, %v1368_v10  ;;  %1181 = vst.msk [vmem:[#allocation2 + $0x250] sm:$0xff] %vm1106_vm2, %v1011_v11  ;;  %v1746_v22 = vld [vmem:[#allocation2 + $0x209] sm:$0xff]  ;;  %v2591_v26 = vpop.f32.mrb[51].mxu0  ;;  %v2691_v33 = vpop.f32.mrb[51].mxu1 }
 0x148   : > { %v1791_v20 = vmax.f32 %v1601_v14, %v1696_v15  ;;  %1508 = vst.msk [vmem:[#allocation2 + $0x90] sm:$0xff] %vm1106_vm2, %v1413_v9  ;;  %v1319_v23 = vld [vmem:[#allocation2 + $0xb4] sm:$0xff]  ;;  %1132 = vst.msk [vmem:[#allocation2 + $0xc8] sm:$0xff] %vm1106_vm2, %v814_v18  ;;  %v1841_v28 = vmax.f32 %v1651_v19, %v1746_v22  ;;  %v1369_v32 = vld [vmem:[#allocation2 + $0x244] sm:$0xff] }
 0x149   : > { %1558 = vst.msk [vmem:[#allocation2 + $0x220] sm:$0xff] %vm1106_vm2, %v1463_v16  ;;  %v1414_v31 = vmax.f32 %v1224_v13, %v1319_v23  ;;  %1182 = vst.msk [vmem:[#allocation2 + $0x258] sm:$0xff] %vm1106_vm2, %v1014_v24  ;;  %v1602_v34 = vld [vmem:[#allocation2 + $0x80] sm:$0xff]  ;;  %v1464_v36 = vmax.f32 %v1274_v27, %v1369_v32  ;;  %v1652_v37 = vld [vmem:[#allocation2 + $0x210] sm:$0xff] }
 0x14a   : > { %1886 = vst.msk [vmem:[#allocation2 + $0x78] sm:$0xff] %vm1106_vm2, %v1791_v20  ;;  %1936 = vst.msk [vmem:[#allocation2 + $0x208] sm:$0xff] %vm1106_vm2, %v1841_v28  ;;  %v1275_v46 = vld [vmem:[#allocation2 + $0x230] sm:$0xff]  ;;  %v1226_v52 = vld [vmem:[#allocation2 + $0xa8] sm:$0xff] }
 0x14b   : > { %v1697_v35 = vld [vmem:[#allocation2 + $0x81] sm:$0xff]  ;;  %v1747_v39 = vld [vmem:[#allocation2 + $0x211] sm:$0xff]  ;;  %1509 = vst.msk [vmem:[#allocation2 + $0x98] sm:$0xff] %vm1106_vm2, %v1414_v31  ;;  %1559 = vst.msk [vmem:[#allocation2 + $0x228] sm:$0xff] %vm1106_vm2, %v1464_v36 }
 0x14c   : > { %v1792_v38 = vmax.f32 %v1602_v34, %v1697_v35  ;;  %v1842_v40 = vmax.f32 %v1652_v37, %v1747_v39  ;;  %v819_v44 = vpop.f32.mrb[52].mxu0  ;;  %v1019_v50 = vpop.f32.mrb[52].mxu1  ;;  %v1603_v53 = vld [vmem:[#allocation2 + $0x88] sm:$0xff]  ;;  %v1653_v60 = vld [vmem:[#allocation2 + $0x218] sm:$0xff]  ;;  %v1227_v19 = vld [vmem:[#allocation2 + $0xb0] sm:$0xff] }
 0x14d   : > { %v2144_v41 = vld [vmem:[#allocation2 + $0x1f8] ss:$2 sm:$0xff]  ;;  %1133 = vst.msk [vmem:[#allocation2 + $0xd0] sm:$0xff] %vm1106_vm2, %v819_v44  ;;  %v2594_v51 = vpop.f32.mrb[53].mxu0  ;;  %1183 = vst.msk [vmem:[#allocation2 + $0x260] sm:$0xff] %vm1106_vm2, %v1019_v50  ;;  %v2694_v57 = vpop.f32.mrb[53].mxu1 }
 0x14e   : > { %1887 = vst.msk [vmem:[#allocation2 + $0x80] sm:$0xff] %vm1106_vm2, %v1792_v38  ;;  %v1320_v43 = vld [vmem:[#allocation2 + $0xbc] sm:$0xff]  ;;  %v2147_v45 = vadd.f32 %v3112_v25, %v2144_v41  ;;  %1937 = vst.msk [vmem:[#allocation2 + $0x210] sm:$0xff] %vm1106_vm2, %v1842_v40  ;;  %v1370_v48 = vld [vmem:[#allocation2 + $0x24c] sm:$0xff]  ;;  %v822_v58 = vpop.f32.mrb[54].mxu0  ;;  %v1022_v0 = vpop.f32.mrb[54].mxu1 }
 0x14f   : > { %v1415_v47 = vmax.f32 %v1225_v42, %v1320_v43  ;;  %v1698_v55 = vld [vmem:[#allocation2 + $0x89] sm:$0xff]  ;;  %v1465_v56 = vmax.f32 %v1275_v46, %v1370_v48  ;;  %1134 = vst.msk [vmem:[#allocation2 + $0xd8] sm:$0xff] %vm1106_vm2, %v822_v58  ;;  %v2595_v1 = vpop.f32.mrb[55].mxu0  ;;  %1184 = vst.msk [vmem:[#allocation2 + $0x268] sm:$0xff] %vm1106_vm2, %v1022_v0  ;;  %v2695_v7 = vpop.f32.mrb[55].mxu1  ;;  %v1277_v26 = vld [vmem:[#allocation2 + $0x240] sm:$0xff] }
 0x150   : > { %v2149_v59 = vmax.f32 %v2147_v45, 0.0  ;;  %v1793_v61 = vmax.f32 %v1603_v53, %v1698_v55  ;;  %v1748_v62 = vld [vmem:[#allocation2 + $0x219] sm:$0xff]  ;;  %v1321_v63 = vld [vmem:[#allocation2 + $0xc4] sm:$0xff]  ;;  %v1604_v10 = vld [vmem:[#allocation2 + $0x90] sm:$0xff] }
 0x151   : > { %1510 = vst.msk [vmem:[#allocation2 + $0xa0] sm:$0xff] %vm1106_vm2, %v1415_v47  ;;  %v2011_v2 = vld [vmem:[#allocation2 + $0x70] ss:$2 sm:$0xff]  ;;  %v1843_v4 = vmax.f32 %v1653_v60, %v1748_v62  ;;  %1560 = vst.msk [vmem:[#allocation2 + $0x230] sm:$0xff] %vm1106_vm2, %v1465_v56  ;;  %v1416_v5 = vmax.f32 %v1226_v52, %v1321_v63  ;;  %v1654_v13 = vld [vmem:[#allocation2 + $0x220] sm:$0xff] }
 0x152   : > { %v1371_v6 = vld [vmem:[#allocation2 + $0x254] sm:$0xff]  ;;  %v2475_v8 = vpack.c.bf16 %v2149_v59, %v2149_v59  ;;  %v2014_v9 = vadd.f32 %v3112_v25, %v2011_v2  ;;  %1888 = vst.msk [vmem:[#allocation2 + $0x88] sm:$0xff] %vm1106_vm2, %v1793_v61  ;;  %v1749_v15 = vld [vmem:[#allocation2 + $0x221] sm:$0xff] }
 0x153   : > { %v1699_v11 = vld [vmem:[#allocation2 + $0x91] sm:$0xff]  ;;  %v1466_v12 = vmax.f32 %v1276_v3, %v1371_v6  ;;  %1938 = vst.msk [vmem:[#allocation2 + $0x218] sm:$0xff] %vm1106_vm2, %v1843_v4  ;;  %1511 = vst.msk [vmem:[#allocation2 + $0xa8] sm:$0xff] %vm1106_vm2, %v1416_v5  ;;  %v1844_v17 = vmax.f32 %v1654_v13, %v1749_v15  ;;  %v1655_v40 = vld [vmem:[#allocation2 + $0x228] sm:$0xff] }
 0x154   : > { %v1794_v14 = vmax.f32 %v1604_v10, %v1699_v11  ;;  %v2016_v16 = vmax.f32 %v2014_v9, 0.0  ;;  %2437 = vst.msk [vmem:[%s3130_s28 + $0x48] sm:$0xf] %vm1584_vm3, %v2475_v8  ;;  %v1322_v20 = vld [vmem:[#allocation2 + $0xcc] sm:$0xff]  ;;  %v827_v22 = vpop.f32.mrb[56].mxu0  ;;  %v1372_v28 = vld [vmem:[#allocation2 + $0x25c] sm:$0xff] }
 0x155   : > { %1561 = vst.msk [vmem:[#allocation2 + $0x238] sm:$0xff] %vm1106_vm2, %v1466_v12  ;;  %v2146_v18 = vld [vmem:[#allocation2 + $0x208] ss:$2 sm:$0x3f]  ;;  %1939 = vst.msk [vmem:[#allocation2 + $0x220] sm:$0xff] %vm1106_vm2, %v1844_v17  ;;  %v1417_v27 = vmax.f32 %v1227_v19, %v1322_v20  ;;  %v1027_v31 = vpop.f32.mrb[56].mxu1  ;;  %v1467_v36 = vmax.f32 %v1277_v26, %v1372_v28 }
 0x156   : > { %1889 = vst.msk [vmem:[#allocation2 + $0x90] sm:$0xff] %vm1106_vm2, %v1794_v14  ;;  %v2461_v23 = vpack.c.bf16 %v2016_v16, %v2016_v16  ;;  %v2148_v24 = vadd.f32 %v3112_v25, %v2146_v18  ;;  %1135 = vst.msk [vmem:[#allocation2 + $0xe0] sm:$0xff] %vm1106_vm2, %v827_v22  ;;  %v2598_v32 = vpop.f32.mrb[57].mxu0  ;;  %v1228_v33 = vld [vmem:[#allocation2 + $0xb8] sm:$0xff]  ;;  %v2698_v37 = vpop.f32.mrb[57].mxu1  ;;  %v1278_v47 = vld [vmem:[#allocation2 + $0x248] sm:$0xff] }
 0x157   : > { %v1605_v34 = vld [vmem:[#allocation2 + $0x98] sm:$0xff]  ;;  %1185 = vst.msk [vmem:[#allocation2 + $0x270] sm:$0xff] %vm1106_vm2, %v1027_v31  ;;  %v830_v38 = vpop.f32.mrb[58].mxu0  ;;  %1512 = vst.msk [vmem:[#allocation2 + $0xb0] sm:$0xff] %vm1106_vm2, %v1417_v27  ;;  %v1030_v44 = vpop.f32.mrb[58].mxu1  ;;  %v1373_v51 = vld [vmem:[#allocation2 + $0x264] sm:$0xff] }
 0x158   : > { %v1700_v35 = vld [vmem:[#allocation2 + $0x99] sm:$0xff]  ;;  %v2150_v39 = vmax.f32 %v2148_v24, 0.0  ;;  %v1750_v42 = vld [vmem:[#allocation2 + $0x229] sm:$0xff]  ;;  %1136 = vst.msk [vmem:[#allocation2 + $0xe8] sm:$0xff] %vm1106_vm2, %v830_v38  ;;  %v2599_v45 = vpop.f32.mrb[59].mxu0  ;;  %1562 = vst.msk [vmem:[#allocation2 + $0x240] sm:$0xff] %vm1106_vm2, %v1467_v36  ;;  %v1468_v58 = vmax.f32 %v1278_v47, %v1373_v51 }
 0x159   : > { %v1795_v41 = vmax.f32 %v1605_v34, %v1700_v35  ;;  %v1323_v43 = vld [vmem:[#allocation2 + $0xd4] sm:$0xff]  ;;  %2409 = vst.msk [vmem:[%s3130_s28 + $0x10] sm:$0xf] %vm1584_vm3, %v2461_v23  ;;  %v2013_v46 = vld [vmem:[#allocation2 + $0x80] ss:$2 sm:$0x3f]  ;;  %v1845_v48 = vmax.f32 %v1655_v40, %v1750_v42 }
 0x15a   : > { %v1418_v50 = vmax.f32 %v1228_v33, %v1323_v43  ;;  %1186 = vst.msk [vmem:[#allocation2 + $0x278] sm:$0xff] %vm1106_vm2, %v1030_v44  ;;  %v2699_v52 = vpop.f32.mrb[59].mxu1  ;;  %v2476_v53 = vpack.c.bf16 %v2150_v39, %v2150_v39  ;;  %v2015_v55 = vadd.f32 %v3112_v25, %v2013_v46  ;;  %v1606_v56 = vld [vmem:[#allocation2 + $0xa0] sm:$0xff]  ;;  %v1656_v59 = vld [vmem:[#allocation2 + $0x230] sm:$0xff]  ;;  %1563 = vst.msk [vmem:[#allocation2 + $0x248] sm:$0xff] %vm1106_vm2, %v1468_v58 }
 0x15b   : > { %1890 = vst.msk [vmem:[#allocation2 + $0x98] sm:$0xff] %vm1106_vm2, %v1795_v41  ;;  %v1701_v57 = vld [vmem:[#allocation2 + $0xa1] sm:$0xff]  ;;  %1940 = vst.msk [vmem:[#allocation2 + $0x228] sm:$0xff] %vm1106_vm2, %v1845_v48  ;;  %v1279_v3 = vld [vmem:[#allocation2 + $0x250] sm:$0xff] }
 0x15c   : > { %v1796_v60 = vmax.f32 %v1606_v56, %v1701_v57  ;;  %v1751_v61 = vld [vmem:[#allocation2 + $0x231] sm:$0xff]  ;;  %1513 = vst.msk [vmem:[#allocation2 + $0xb8] sm:$0xff] %vm1106_vm2, %v1418_v50  ;;  %v2017_v62 = vmax.f32 %v2015_v55, 0.0  ;;  %v1229_v0 = vld [vmem:[#allocation2 + $0xc0] sm:$0xff]  ;;  %v835_v1 = vpop.f32.mrb[60].mxu0  ;;  %v1035_v6 = vpop.f32.mrb[60].mxu1 }
 0x15d   : > { %v1846_v63 = vmax.f32 %v1656_v59, %v1751_v61  ;;  %2438 = vst.msk [vmem:[%s3130_s28 + $0x4c] sm:$0x7] %vm1965_vm4, %v2476_v53  ;;  %v1324_v25 = vld [vmem:[#allocation2 + $0xdc] sm:$0xff]  ;;  %v2602_v7 = vpop.f32.mrb[61].mxu0  ;;  %v1230_v8 = vld [vmem:[#allocation2 + $0xc8] sm:$0xff]  ;;  %v2702_v12 = vpop.f32.mrb[61].mxu1 }
 0x15e   : > { %1891 = vst.msk [vmem:[#allocation2 + $0xa0] sm:$0xff] %vm1106_vm2, %v1796_v60  ;;  %v2462_v2 = vpack.c.bf16 %v2017_v62, %v2017_v62  ;;  %v1419_v4 = vmax.f32 %v1229_v0, %v1324_v25  ;;  %v1374_v5 = vld [vmem:[#allocation2 + $0x26c] sm:$0xff]  ;;  %1137 = vst.msk [vmem:[#allocation2 + $0xf0] sm:$0xff] %vm1106_vm2, %v835_v1  ;;  %v838_v13 = vpop.f32.mrb[62].mxu0  ;;  %v1657_v14 = vld [vmem:[#allocation2 + $0x238] sm:$0xff]  ;;  %v1038_v18 = vpop.f32.mrb[62].mxu1 }
 0x15f   : > { %1941 = vst.msk [vmem:[#allocation2 + $0x230] sm:$0xff] %vm1106_vm2, %v1846_v63  ;;  %v1607_v9 = vld [vmem:[#allocation2 + $0xa8] sm:$0xff]  ;;  %v1469_v11 = vmax.f32 %v1279_v3, %v1374_v5  ;;  %1187 = vst.msk [vmem:[#allocation2 + $0x280] sm:$0xff] %vm1106_vm2, %v1035_v6  ;;  %v1752_v16 = vld [vmem:[#allocation2 + $0x239] sm:$0xff]  ;;  %v2603_v19 = vpop.f32.mrb[63].mxu0  ;;  %v2703_v26 = vpop.f32.mrb[63].mxu1 }
 0x160   : > { %v1702_v10 = vld [vmem:[#allocation2 + $0xa9] sm:$0xff]  ;;  %1514 = vst.msk [vmem:[#allocation2 + $0xc0] sm:$0xff] %vm1106_vm2, %v1419_v4  ;;  %1138 = vst.msk [vmem:[#allocation2 + $0xf8] sm:$0xff] %vm1106_vm2, %v838_v13  ;;  %v1280_v20 = vld [vmem:[#allocation2 + $0x258] sm:$0xff]  ;;  %v1847_v22 = vmax.f32 %v1657_v14, %v1752_v16 }
 0x161   : > { %v1797_v15 = vmax.f32 %v1607_v9, %v1702_v10  ;;  %v1325_v17 = vld [vmem:[#allocation2 + $0xe4] sm:$0xff]  ;;  %2410 = vst.msk [vmem:[%s3130_s28 + $0x14] sm:$0x7] %vm1965_vm4, %v2462_v2  ;;  %v1375_v24 = vld [vmem:[#allocation2 + $0x274] sm:$0xff]  ;;  %v3280_v2 = vld [vmem:[%s3468_s2] ss:$0 sm:$0xff] }
 0x162   : > { %1564 = vst.msk [vmem:[#allocation2 + $0x250] sm:$0xff] %vm1106_vm2, %v1469_v11  ;;  %v1420_v23 = vmax.f32 %v1230_v8, %v1325_v17  ;;  %1188 = vst.msk [vmem:[#allocation2 + $0x288] sm:$0xff] %vm1106_vm2, %v1038_v18  ;;  %v1608_v27 = vld [vmem:[#allocation2 + $0xb0] sm:$0xff]  ;;  %v1470_v31 = vmax.f32 %v1280_v20, %v1375_v24  ;;  %v1658_v32 = vld [vmem:[#allocation2 + $0x240] sm:$0xff] }
 0x163   : > { %1892 = vst.msk [vmem:[#allocation2 + $0xa8] sm:$0xff] %vm1106_vm2, %v1797_v15  ;;  %v1703_v28 = vld [vmem:[#allocation2 + $0xb1] sm:$0xff]  ;;  %1942 = vst.msk [vmem:[#allocation2 + $0x238] sm:$0xff] %vm1106_vm2, %v1847_v22  ;;  %v1753_v34 = vld [vmem:[#allocation2 + $0x241] sm:$0xff] }
 0x164   : > { %v1798_v33 = vmax.f32 %v1608_v27, %v1703_v28  ;;  %1515 = vst.msk [vmem:[#allocation2 + $0xc8] sm:$0xff] %vm1106_vm2, %v1420_v23  ;;  %v1848_v35 = vmax.f32 %v1658_v32, %v1753_v34  ;;  %1565 = vst.msk [vmem:[#allocation2 + $0x258] sm:$0xff] %vm1106_vm2, %v1470_v31  ;;  %v1231_v36 = vld [vmem:[#allocation2 + $0xd0] sm:$0xff]  ;;  %v843_v38 = vpop.f32.mrb[64].mxu0  ;;  %v1281_v39 = vld [vmem:[#allocation2 + $0x260] sm:$0xff]  ;;  %v1043_v42 = vpop.f32.mrb[64].mxu1 }
 0x165   : > { %v1326_v37 = vld [vmem:[#allocation2 + $0xec] sm:$0xff]  ;;  %1139 = vst.msk [vmem:[#allocation2 + $0x100] sm:$0xff] %vm1106_vm2, %v843_v38  ;;  %v2606_v43 = vpop.f32.mrb[65].mxu0  ;;  %v1232_v44 = vld [vmem:[#allocation2 + $0xd8] sm:$0xff]  ;;  %1189 = vst.msk [vmem:[#allocation2 + $0x290] sm:$0xff] %vm1106_vm2, %v1043_v42  ;;  %v2706_v48 = vpop.f32.mrb[65].mxu1 }
 0x166   : > { %1893 = vst.msk [vmem:[#allocation2 + $0xb0] sm:$0xff] %vm1106_vm2, %v1798_v33  ;;  %1943 = vst.msk [vmem:[#allocation2 + $0x240] sm:$0xff] %vm1106_vm2, %v1848_v35  ;;  %v1421_v40 = vmax.f32 %v1231_v36, %v1326_v37  ;;  %v1376_v41 = vld [vmem:[#allocation2 + $0x27c] sm:$0xff]  ;;  %v846_v50 = vpop.f32.mrb[66].mxu0  ;;  %v1659_v51 = vld [vmem:[#allocation2 + $0x248] sm:$0xff]  ;;  %v1046_v56 = vpop.f32.mrb[66].mxu1 }
 0x167   : > { %v1609_v45 = vld [vmem:[#allocation2 + $0xb8] sm:$0xff]  ;;  %v1471_v47 = vmax.f32 %v1281_v39, %v1376_v41  ;;  %1140 = vst.msk [vmem:[#allocation2 + $0x108] sm:$0xff] %vm1106_vm2, %v846_v50  ;;  %v2607_v57 = vpop.f32.mrb[67].mxu0  ;;  %v1282_v58 = vld [vmem:[#allocation2 + $0x268] sm:$0xff]  ;;  %1190 = vst.msk [vmem:[#allocation2 + $0x298] sm:$0xff] %vm1106_vm2, %v1046_v56  ;;  %v2707_v62 = vpop.f32.mrb[67].mxu1 }
 0x168   : > { %v1704_v46 = vld [vmem:[#allocation2 + $0xb9] sm:$0xff]  ;;  %1516 = vst.msk [vmem:[#allocation2 + $0xd0] sm:$0xff] %vm1106_vm2, %v1421_v40  ;;  %v1283_v14 = vld [vmem:[#allocation2 + $0x270] sm:$0xff]  ;;  %v1234_v22 = vld [vmem:[#allocation2 + $0xe8] sm:$0xff] }
 0x169   : > { %v1799_v52 = vmax.f32 %v1609_v45, %v1704_v46  ;;  %v1754_v53 = vld [vmem:[#allocation2 + $0x249] sm:$0xff]  ;;  %v1327_v55 = vld [vmem:[#allocation2 + $0xf4] sm:$0xff]  ;;  %1566 = vst.msk [vmem:[#allocation2 + $0x260] sm:$0xff] %vm1106_vm2, %v1471_v47  ;;  %v1610_v0 = vld [vmem:[#allocation2 + $0xc0] sm:$0xff] }
 0x16a   : > { %v1849_v59 = vmax.f32 %v1659_v51, %v1754_v53  ;;  %v1422_v60 = vmax.f32 %v1232_v44, %v1327_v55  ;;  %v1377_v61 = vld [vmem:[#allocation2 + $0x284] sm:$0xff]  ;;  %v2163_v63 = vld [vmem:[#allocation2 + $0x230] ss:$2 sm:$0xff] }
 0x16b   : > { %1894 = vst.msk [vmem:[#allocation2 + $0xb8] sm:$0xff] %vm1106_vm2, %v1799_v52  ;;  %v1705_v25 = vld [vmem:[#allocation2 + $0xc1] sm:$0xff]  ;;  %v1472_v1 = vmax.f32 %v1282_v58, %v1377_v61  ;;  %v2166_v3 = vadd.f32 %v3280_v2, %v2163_v63  ;;  %v1660_v4 = vld [vmem:[#allocation2 + $0x250] sm:$0xff]  ;;  %v1661_v31 = vld [vmem:[#allocation2 + $0x258] sm:$0xff] }
 0x16c   : > { %1944 = vst.msk [vmem:[#allocation2 + $0x248] sm:$0xff] %vm1106_vm2, %v1849_v59  ;;  %v1800_v5 = vmax.f32 %v1610_v0, %v1705_v25  ;;  %v1755_v6 = vld [vmem:[#allocation2 + $0x251] sm:$0xff]  ;;  %1517 = vst.msk [vmem:[#allocation2 + $0xd8] sm:$0xff] %vm1106_vm2, %v1422_v60  ;;  %v1233_v11 = vld [vmem:[#allocation2 + $0xe0] sm:$0xff]  ;;  %v851_v13 = vpop.f32.mrb[68].mxu0  ;;  %v1051_v17 = vpop.f32.mrb[68].mxu1 }
 0x16d   : > { %v2030_v7 = vld [vmem:[#allocation2 + $0xa8] ss:$2 sm:$0xff]  ;;  %v1850_v8 = vmax.f32 %v1660_v4, %v1755_v6  ;;  %1567 = vst.msk [vmem:[#allocation2 + $0x268] sm:$0xff] %vm1106_vm2, %v1472_v1  ;;  %v2168_v9 = vmax.f32 %v2166_v3, 0.0  ;;  %v1328_v12 = vld [vmem:[#allocation2 + $0xfc] sm:$0xff]  ;;  %1141 = vst.msk [vmem:[#allocation2 + $0x110] sm:$0xff] %vm1106_vm2, %v851_v13 }
 0x16e   : > { %v2033_v10 = vadd.f32 %v3280_v2, %v2030_v7  ;;  %1895 = vst.msk [vmem:[#allocation2 + $0xc0] sm:$0xff] %vm1106_vm2, %v1800_v5  ;;  %v1423_v15 = vmax.f32 %v1233_v11, %v1328_v12  ;;  %v1378_v16 = vld [vmem:[#allocation2 + $0x28c] sm:$0xff]  ;;  %v2610_v18 = vpop.f32.mrb[69].mxu0  ;;  %1191 = vst.msk [vmem:[#allocation2 + $0x2a0] sm:$0xff] %vm1106_vm2, %v1051_v17  ;;  %v2710_v27 = vpop.f32.mrb[69].mxu1  ;;  %v1329_v34 = vld [vmem:[#allocation2 + $0x104] sm:$0xff] }
 0x16f   : > { %1945 = vst.msk [vmem:[#allocation2 + $0x250] sm:$0xff] %vm1106_vm2, %v1850_v8  ;;  %v2477_v19 = vpack.c.bf16 %v2168_v9, %v2168_v9  ;;  %v1611_v23 = vld [vmem:[#allocation2 + $0xc8] sm:$0xff]  ;;  %v1473_v26 = vmax.f32 %v1283_v14, %v1378_v16  ;;  %v854_v28 = vpop.f32.mrb[70].mxu0  ;;  %v1054_v35 = vpop.f32.mrb[70].mxu1  ;;  %v1284_v38 = vld [vmem:[#allocation2 + $0x278] sm:$0xff]  ;;  %v1424_v40 = vmax.f32 %v1234_v22, %v1329_v34  ;;  %v1612_v44 = vld [vmem:[#allocation2 + $0xd0] sm:$0xff] }
 0x170   : > { %v2035_v20 = vmax.f32 %v2033_v10, 0.0  ;;  %v1706_v24 = vld [vmem:[#allocation2 + $0xc9] sm:$0xff]  ;;  %v1756_v33 = vld [vmem:[#allocation2 + $0x259] sm:$0xff]  ;;  %1518 = vst.msk [vmem:[#allocation2 + $0xe0] sm:$0xff] %vm1106_vm2, %v1423_v15  ;;  %1142 = vst.msk [vmem:[#allocation2 + $0x118] sm:$0xff] %vm1106_vm2, %v854_v28  ;;  %v2611_v36 = vpop.f32.mrb[71].mxu0 }
 0x171   : > { %v1801_v32 = vmax.f32 %v1611_v23, %v1706_v24  ;;  %v1851_v39 = vmax.f32 %v1661_v31, %v1756_v33  ;;  %1568 = vst.msk [vmem:[#allocation2 + $0x270] sm:$0xff] %vm1106_vm2, %v1473_v26  ;;  %v1379_v41 = vld [vmem:[#allocation2 + $0x294] sm:$0xff]  ;;  %1192 = vst.msk [vmem:[#allocation2 + $0x2a8] sm:$0xff] %vm1106_vm2, %v1054_v35  ;;  %v2711_v42 = vpop.f32.mrb[71].mxu1  ;;  %v1662_v48 = vld [vmem:[#allocation2 + $0x260] sm:$0xff] }
 0x172   : > { %v2463_v37 = vpack.c.bf16 %v2035_v20, %v2035_v20  ;;  %2441 = vst.msk [vmem:[%s3130_s28 + $0x50] sm:$0xf] %vm1584_vm3, %v2477_v19  ;;  %v1474_v46 = vmax.f32 %v1284_v38, %v1379_v41  ;;  %v1235_v57 = vld [vmem:[#allocation2 + $0xf0] sm:$0xff]  ;;  %v1285_v60 = vld [vmem:[#allocation2 + $0x280] sm:$0xff]  ;;  %v1236_v3 = vld [vmem:[#allocation2 + $0xf8] sm:$0xff] }
 0x173   : > { %v2165_v43 = vld [vmem:[#allocation2 + $0x240] ss:$2 sm:$0x3f]  ;;  %1896 = vst.msk [vmem:[#allocation2 + $0xc8] sm:$0xff] %vm1106_vm2, %v1801_v32  ;;  %v1707_v45 = vld [vmem:[#allocation2 + $0xd1] sm:$0xff]  ;;  %1946 = vst.msk [vmem:[#allocation2 + $0x258] sm:$0xff] %vm1106_vm2, %v1851_v39 }
 0x174   : > { %v2167_v47 = vadd.f32 %v3280_v2, %v2165_v43  ;;  %v1802_v50 = vmax.f32 %v1612_v44, %v1707_v45  ;;  %v1757_v51 = vld [vmem:[#allocation2 + $0x261] sm:$0xff]  ;;  %1519 = vst.msk [vmem:[#allocation2 + $0xe8] sm:$0xff] %vm1106_vm2, %v1424_v40  ;;  %1569 = vst.msk [vmem:[#allocation2 + $0x278] sm:$0xff] %vm1106_vm2, %v1474_v46  ;;  %v1330_v58 = vld [vmem:[#allocation2 + $0x10c] sm:$0xff]  ;;  %v859_v59 = vpop.f32.mrb[72].mxu0  ;;  %v1059_v63 = vpop.f32.mrb[72].mxu1 }
 0x175   : > { %2413 = vst.msk [vmem:[%s3130_s28 + $0x18] sm:$0xf] %vm1584_vm3, %v2463_v37  ;;  %v2032_v52 = vld [vmem:[#allocation2 + $0xb8] ss:$2 sm:$0x3f]  ;;  %v1852_v53 = vmax.f32 %v1662_v48, %v1757_v51  ;;  %v1425_v61 = vmax.f32 %v1235_v57, %v1330_v58  ;;  %v2614_v0 = vpop.f32.mrb[73].mxu0 }
 0x176   : > { %v2169_v55 = vmax.f32 %v2167_v47, 0.0  ;;  %v2034_v56 = vadd.f32 %v3280_v2, %v2032_v52  ;;  %1897 = vst.msk [vmem:[#allocation2 + $0xd0] sm:$0xff] %vm1106_vm2, %v1802_v50  ;;  %v1380_v62 = vld [vmem:[#allocation2 + $0x29c] sm:$0xff]  ;;  %1143 = vst.msk [vmem:[#allocation2 + $0x120] sm:$0xff] %vm1106_vm2, %v859_v59  ;;  %v2714_v7 = vpop.f32.mrb[73].mxu1  ;;  %v862_v8 = vpop.f32.mrb[74].mxu0 }
 0x177   : > { %1947 = vst.msk [vmem:[#allocation2 + $0x260] sm:$0xff] %vm1106_vm2, %v1852_v53  ;;  %v1613_v4 = vld [vmem:[#allocation2 + $0xd8] sm:$0xff]  ;;  %v1475_v6 = vmax.f32 %v1285_v60, %v1380_v62  ;;  %1193 = vst.msk [vmem:[#allocation2 + $0x2b0] sm:$0xff] %vm1106_vm2, %v1059_v63  ;;  %v1663_v9 = vld [vmem:[#allocation2 + $0x268] sm:$0xff]  ;;  %v1062_v13 = vpop.f32.mrb[74].mxu1  ;;  %v2615_v14 = vpop.f32.mrb[75].mxu0 }
 0x178   : > { %v2478_v25 = vpack.c.bf16 %v2169_v55, %v2169_v55  ;;  %v2036_v1 = vmax.f32 %v2034_v56, 0.0  ;;  %v1708_v5 = vld [vmem:[#allocation2 + $0xd9] sm:$0xff]  ;;  %v1758_v11 = vld [vmem:[#allocation2 + $0x269] sm:$0xff]  ;;  %1520 = vst.msk [vmem:[#allocation2 + $0xf0] sm:$0xff] %vm1106_vm2, %v1425_v61  ;;  %1144 = vst.msk [vmem:[#allocation2 + $0x128] sm:$0xff] %vm1106_vm2, %v862_v8  ;;  %v2715_v20 = vpop.f32.mrb[75].mxu1 }
 0x179   : > { %v1803_v10 = vmax.f32 %v1613_v4, %v1708_v5  ;;  %v1331_v12 = vld [vmem:[#allocation2 + $0x114] sm:$0xff]  ;;  %v1286_v16 = vld [vmem:[#allocation2 + $0x288] sm:$0xff]  ;;  %v1853_v17 = vmax.f32 %v1663_v9, %v1758_v11  ;;  %1570 = vst.msk [vmem:[#allocation2 + $0x280] sm:$0xff] %vm1106_vm2, %v1475_v6  ;;  %1194 = vst.msk [vmem:[#allocation2 + $0x2b8] sm:$0xff] %vm1106_vm2, %v1062_v13 }
 0x17a   : > { %v2464_v15 = vpack.c.bf16 %v2036_v1, %v2036_v1  ;;  %v1426_v18 = vmax.f32 %v1236_v3, %v1331_v12  ;;  %v1381_v19 = vld [vmem:[#allocation2 + $0x2a4] sm:$0xff]  ;;  %2442 = vst.msk [vmem:[%s3130_s28 + $0x54] sm:$0x7] %vm1965_vm4, %v2478_v25  ;;  %v1664_v26 = vld [vmem:[#allocation2 + $0x270] sm:$0xff]  ;;  %v1288_v53 = vld [vmem:[#allocation2 + $0x298] sm:$0xff] }
 0x17b   : > { %v1614_v22 = vld [vmem:[#allocation2 + $0xe0] sm:$0xff]  ;;  %1898 = vst.msk [vmem:[#allocation2 + $0xd8] sm:$0xff] %vm1106_vm2, %v1803_v10  ;;  %v1476_v24 = vmax.f32 %v1286_v16, %v1381_v19  ;;  %1948 = vst.msk [vmem:[#allocation2 + $0x268] sm:$0xff] %vm1106_vm2, %v1853_v17  ;;  %v1759_v28 = vld [vmem:[#allocation2 + $0x271] sm:$0xff] }
 0x17c   : > { %v1709_v23 = vld [vmem:[#allocation2 + $0xe1] sm:$0xff]  ;;  %1521 = vst.msk [vmem:[#allocation2 + $0xf8] sm:$0xff] %vm1106_vm2, %v1426_v18  ;;  %v1854_v31 = vmax.f32 %v1664_v26, %v1759_v28  ;;  %v867_v34 = vpop.f32.mrb[76].mxu0  ;;  %v1287_v35 = vld [vmem:[#allocation2 + $0x290] sm:$0xff]  ;;  %v1067_v38 = vpop.f32.mrb[76].mxu1  ;;  %v1665_v46 = vld [vmem:[#allocation2 + $0x278] sm:$0xff] }
 0x17d   : > { %v1804_v27 = vmax.f32 %v1614_v22, %v1709_v23  ;;  %2414 = vst.msk [vmem:[%s3130_s28 + $0x1c] sm:$0x7] %vm1965_vm4, %v2464_v15  ;;  %v1237_v32 = vld [vmem:[#allocation2 + $0x100] sm:$0xff]  ;;  %v2618_v39 = vpop.f32.mrb[77].mxu0  ;;  %v1238_v40 = vld [vmem:[#allocation2 + $0x108] sm:$0xff]  ;;  %v2718_v44 = vpop.f32.mrb[77].mxu1 }
 0x17e   : > { %1571 = vst.msk [vmem:[#allocation2 + $0x288] sm:$0xff] %vm1106_vm2, %v1476_v24  ;;  %v1332_v33 = vld [vmem:[#allocation2 + $0x11c] sm:$0xff]  ;;  %1949 = vst.msk [vmem:[#allocation2 + $0x270] sm:$0xff] %vm1106_vm2, %v1854_v31  ;;  %v1382_v37 = vld [vmem:[#allocation2 + $0x2ac] sm:$0xff]  ;;  %v870_v45 = vpop.f32.mrb[78].mxu0  ;;  %v1070_v51 = vpop.f32.mrb[78].mxu1 }
 0x17f   : > { %1899 = vst.msk [vmem:[#allocation2 + $0xe0] sm:$0xff] %vm1106_vm2, %v1804_v27  ;;  %v1427_v36 = vmax.f32 %v1237_v32, %v1332_v33  ;;  %1145 = vst.msk [vmem:[#allocation2 + $0x130] sm:$0xff] %vm1106_vm2, %v867_v34  ;;  %v1615_v41 = vld [vmem:[#allocation2 + $0xe8] sm:$0xff]  ;;  %v1477_v43 = vmax.f32 %v1287_v35, %v1382_v37  ;;  %v2619_v52 = vpop.f32.mrb[79].mxu0  ;;  %v2719_v58 = vpop.f32.mrb[79].mxu1  ;;  %v1616_v59 = vld [vmem:[#allocation2 + $0xf0] sm:$0xff] }
 0x180   : > { %v1710_v42 = vld [vmem:[#allocation2 + $0xe9] sm:$0xff]  ;;  %1195 = vst.msk [vmem:[#allocation2 + $0x2c0] sm:$0xff] %vm1106_vm2, %v1067_v38  ;;  %v1760_v48 = vld [vmem:[#allocation2 + $0x279] sm:$0xff]  ;;  %1146 = vst.msk [vmem:[#allocation2 + $0x138] sm:$0xff] %vm1106_vm2, %v870_v45 }
 0x181   : > { %v1805_v47 = vmax.f32 %v1615_v41, %v1710_v42  ;;  %1522 = vst.msk [vmem:[#allocation2 + $0x100] sm:$0xff] %vm1106_vm2, %v1427_v36  ;;  %v1333_v50 = vld [vmem:[#allocation2 + $0x124] sm:$0xff]  ;;  %v1855_v55 = vmax.f32 %v1665_v46, %v1760_v48  ;;  %1572 = vst.msk [vmem:[#allocation2 + $0x290] sm:$0xff] %vm1106_vm2, %v1477_v43  ;;  %v1383_v57 = vld [vmem:[#allocation2 + $0x2b4] sm:$0xff] }
 0x182   : > { %v1428_v56 = vmax.f32 %v1238_v40, %v1333_v50  ;;  %1196 = vst.msk [vmem:[#allocation2 + $0x2c8] sm:$0xff] %vm1106_vm2, %v1070_v51  ;;  %v1478_v61 = vmax.f32 %v1288_v53, %v1383_v57  ;;  %v1666_v62 = vld [vmem:[#allocation2 + $0x280] sm:$0xff]  ;;  %v1239_v3 = vld [vmem:[#allocation2 + $0x110] sm:$0xff]  ;;  %v1240_v12 = vld [vmem:[#allocation2 + $0x118] sm:$0xff] }
 0x183   : > { %1900 = vst.msk [vmem:[#allocation2 + $0xe8] sm:$0xff] %vm1106_vm2, %v1805_v47  ;;  %v1711_v60 = vld [vmem:[#allocation2 + $0xf1] sm:$0xff]  ;;  %1950 = vst.msk [vmem:[#allocation2 + $0x278] sm:$0xff] %vm1106_vm2, %v1855_v55  ;;  %v1289_v7 = vld [vmem:[#allocation2 + $0x2a0] sm:$0xff] }
 0x184   : > { %v1806_v63 = vmax.f32 %v1616_v59, %v1711_v60  ;;  %1523 = vst.msk [vmem:[#allocation2 + $0x108] sm:$0xff] %vm1106_vm2, %v1428_v56  ;;  %1573 = vst.msk [vmem:[#allocation2 + $0x298] sm:$0xff] %vm1106_vm2, %v1478_v61  ;;  %v875_v5 = vpop.f32.mrb[80].mxu0  ;;  %v1075_v10 = vpop.f32.mrb[80].mxu1  ;;  %v1617_v13 = vld [vmem:[#allocation2 + $0xf8] sm:$0xff]  ;;  %v1290_v28 = vld [vmem:[#allocation2 + $0x2a8] sm:$0xff] }
 0x185   : > { %v1761_v0 = vld [vmem:[#allocation2 + $0x281] sm:$0xff]  ;;  %1147 = vst.msk [vmem:[#allocation2 + $0x140] sm:$0xff] %vm1106_vm2, %v875_v5  ;;  %v2622_v11 = vpop.f32.mrb[81].mxu0  ;;  %1197 = vst.msk [vmem:[#allocation2 + $0x2d0] sm:$0xff] %vm1106_vm2, %v1075_v10  ;;  %v2722_v16 = vpop.f32.mrb[81].mxu1  ;;  %v1291_v52 = vld [vmem:[#allocation2 + $0x2b0] sm:$0xff] }
 0x186   : > { %v1856_v25 = vmax.f32 %v1666_v62, %v1761_v0  ;;  %v2182_v1 = vld [vmem:[#allocation2 + $0x268] ss:$2 sm:$0xff]  ;;  %1901 = vst.msk [vmem:[#allocation2 + $0xf0] sm:$0xff] %vm1106_vm2, %v1806_v63  ;;  %v878_v17 = vpop.f32.mrb[82].mxu0  ;;  %v1078_v24 = vpop.f32.mrb[82].mxu1  ;;  %v1241_v46 = vld [vmem:[#allocation2 + $0x120] sm:$0xff] }
 0x187   : > { %v1334_v4 = vld [vmem:[#allocation2 + $0x12c] sm:$0xff]  ;;  %v2185_v6 = vadd.f32 %v3280_v2, %v2182_v1  ;;  %v1384_v9 = vld [vmem:[#allocation2 + $0x2bc] sm:$0xff]  ;;  %v1335_v23 = vld [vmem:[#allocation2 + $0x134] sm:$0xff]  ;;  %1148 = vst.msk [vmem:[#allocation2 + $0x148] sm:$0xff] %vm1106_vm2, %v878_v17  ;;  %v2623_v26 = vpop.f32.mrb[83].mxu0  ;;  %v2723_v34 = vpop.f32.mrb[83].mxu1 }
 0x188   : > { %1951 = vst.msk [vmem:[#allocation2 + $0x280] sm:$0xff] %vm1106_vm2, %v1856_v25  ;;  %v1429_v8 = vmax.f32 %v1239_v3, %v1334_v4  ;;  %v1712_v14 = vld [vmem:[#allocation2 + $0xf9] sm:$0xff]  ;;  %v1479_v15 = vmax.f32 %v1289_v7, %v1384_v9  ;;  %v1667_v19 = vld [vmem:[#allocation2 + $0x288] sm:$0xff]  ;;  %v1430_v32 = vmax.f32 %v1240_v12, %v1335_v23  ;;  %1198 = vst.msk [vmem:[#allocation2 + $0x2d8] sm:$0xff] %vm1106_vm2, %v1078_v24 }
 0x189   : > { %v2187_v18 = vmax.f32 %v2185_v6, 0.0  ;;  %v1807_v20 = vmax.f32 %v1617_v13, %v1712_v14  ;;  %v1762_v22 = vld [vmem:[#allocation2 + $0x289] sm:$0xff]  ;;  %v1618_v37 = vld [vmem:[#allocation2 + $0x100] sm:$0xff] }
 0x18a   : > { %1524 = vst.msk [vmem:[#allocation2 + $0x110] sm:$0xff] %vm1106_vm2, %v1429_v8  ;;  %v2049_v27 = vld [vmem:[#allocation2 + $0xe0] ss:$2 sm:$0xff]  ;;  %v1857_v31 = vmax.f32 %v1667_v19, %v1762_v22  ;;  %1574 = vst.msk [vmem:[#allocation2 + $0x2a0] sm:$0xff] %vm1106_vm2, %v1479_v15  ;;  %v1668_v40 = vld [vmem:[#allocation2 + $0x290] sm:$0xff] }
 0x18b   : > { %v1385_v33 = vld [vmem:[#allocation2 + $0x2c4] sm:$0xff]  ;;  %v2479_v35 = vpack.c.bf16 %v2187_v18, %v2187_v18  ;;  %v2052_v36 = vadd.f32 %v3280_v2, %v2049_v27  ;;  %1902 = vst.msk [vmem:[#allocation2 + $0xf8] sm:$0xff] %vm1106_vm2, %v1807_v20  ;;  %v1763_v42 = vld [vmem:[#allocation2 + $0x291] sm:$0xff]  ;;  %1525 = vst.msk [vmem:[#allocation2 + $0x118] sm:$0xff] %vm1106_vm2, %v1430_v32 }
 0x18c   : > { %v1713_v38 = vld [vmem:[#allocation2 + $0x101] sm:$0xff]  ;;  %v1480_v39 = vmax.f32 %v1290_v28, %v1385_v33  ;;  %1952 = vst.msk [vmem:[#allocation2 + $0x288] sm:$0xff] %vm1106_vm2, %v1857_v31  ;;  %v1858_v44 = vmax.f32 %v1668_v40, %v1763_v42  ;;  %v883_v48 = vpop.f32.mrb[84].mxu0  ;;  %v1386_v55 = vld [vmem:[#allocation2 + $0x2cc] sm:$0xff]  ;;  %v1083_v56 = vpop.f32.mrb[84].mxu1  ;;  %v1669_v25 = vld [vmem:[#allocation2 + $0x298] sm:$0xff] }
 0x18d   : > { %v1808_v41 = vmax.f32 %v1618_v37, %v1713_v38  ;;  %v2054_v43 = vmax.f32 %v2052_v36, 0.0  ;;  %2445 = vst.msk [vmem:[%s3130_s28 + $0x58] sm:$0xf] %vm1584_vm3, %v2479_v35  ;;  %v1336_v47 = vld [vmem:[#allocation2 + $0x13c] sm:$0xff]  ;;  %v2626_v57 = vpop.f32.mrb[85].mxu0  ;;  %v1242_v58 = vld [vmem:[#allocation2 + $0x128] sm:$0xff]  ;;  %v1481_v61 = vmax.f32 %v1291_v52, %v1386_v55 }
 0x18e   : > { %1575 = vst.msk [vmem:[#allocation2 + $0x2a8] sm:$0xff] %vm1106_vm2, %v1480_v39  ;;  %1953 = vst.msk [vmem:[#allocation2 + $0x290] sm:$0xff] %vm1106_vm2, %v1858_v44  ;;  %v1431_v53 = vmax.f32 %v1241_v46, %v1336_v47  ;;  %v1619_v59 = vld [vmem:[#allocation2 + $0x108] sm:$0xff]  ;;  %v2726_v62 = vpop.f32.mrb[85].mxu1  ;;  %v886_v63 = vpop.f32.mrb[86].mxu0  ;;  %v1292_v8 = vld [vmem:[#allocation2 + $0x2b8] sm:$0xff] }
 0x18f   : > { %v2184_v45 = vld [vmem:[#allocation2 + $0x278] ss:$2 sm:$0x3f]  ;;  %1903 = vst.msk [vmem:[#allocation2 + $0x100] sm:$0xff] %vm1106_vm2, %v1808_v41  ;;  %v2465_v50 = vpack.c.bf16 %v2054_v43, %v2054_v43  ;;  %1149 = vst.msk [vmem:[#allocation2 + $0x150] sm:$0xff] %vm1106_vm2, %v883_v48  ;;  %v1337_v4 = vld [vmem:[#allocation2 + $0x144] sm:$0xff] }
 0x190   : > { %v2186_v51 = vadd.f32 %v3280_v2, %v2184_v45  ;;  %1199 = vst.msk [vmem:[#allocation2 + $0x2e0] sm:$0xff] %vm1106_vm2, %v1083_v56  ;;  %1526 = vst.msk [vmem:[#allocation2 + $0x120] sm:$0xff] %vm1106_vm2, %v1431_v53  ;;  %v1086_v5 = vpop.f32.mrb[86].mxu1  ;;  %v2627_v6 = vpop.f32.mrb[87].mxu0  ;;  %v1432_v10 = vmax.f32 %v1242_v58, %v1337_v4  ;;  %v1387_v11 = vld [vmem:[#allocation2 + $0x2d4] sm:$0xff]  ;;  %v1293_v31 = vld [vmem:[#allocation2 + $0x2c0] sm:$0xff] }
 0x191   : > { %v1714_v60 = vld [vmem:[#allocation2 + $0x109] sm:$0xff]  ;;  %v1764_v3 = vld [vmem:[#allocation2 + $0x299] sm:$0xff]  ;;  %1150 = vst.msk [vmem:[#allocation2 + $0x158] sm:$0xff] %vm1106_vm2, %v886_v63  ;;  %1576 = vst.msk [vmem:[#allocation2 + $0x2b0] sm:$0xff] %vm1106_vm2, %v1481_v61  ;;  %v2727_v12 = vpop.f32.mrb[87].mxu1  ;;  %v1482_v17 = vmax.f32 %v1292_v8, %v1387_v11 }
 0x192   : > { %v2188_v0 = vmax.f32 %v2186_v51, 0.0  ;;  %v1809_v1 = vmax.f32 %v1619_v59, %v1714_v60  ;;  %2417 = vst.msk [vmem:[%s3130_s28 + $0x20] sm:$0xf] %vm1584_vm3, %v2465_v50  ;;  %v2051_v7 = vld [vmem:[#allocation2 + $0xf0] ss:$2 sm:$0x3f]  ;;  %v1859_v9 = vmax.f32 %v1669_v25, %v1764_v3 }
 0x193   : > { %1200 = vst.msk [vmem:[#allocation2 + $0x2e8] sm:$0xff] %vm1106_vm2, %v1086_v5  ;;  %v2053_v14 = vadd.f32 %v3280_v2, %v2051_v7  ;;  %v1620_v15 = vld [vmem:[#allocation2 + $0x110] sm:$0xff]  ;;  %v1670_v18 = vld [vmem:[#allocation2 + $0x2a0] sm:$0xff]  ;;  %1527 = vst.msk [vmem:[#allocation2 + $0x128] sm:$0xff] %vm1106_vm2, %v1432_v10 }
 0x194   : > { %v2480_v13 = vpack.c.bf16 %v2188_v0, %v2188_v0  ;;  %1904 = vst.msk [vmem:[#allocation2 + $0x108] sm:$0xff] %vm1106_vm2, %v1809_v1  ;;  %v1715_v16 = vld [vmem:[#allocation2 + $0x111] sm:$0xff]  ;;  %1954 = vst.msk [vmem:[#allocation2 + $0x298] sm:$0xff] %vm1106_vm2, %v1859_v9  ;;  %v891_v27 = vpop.f32.mrb[88].mxu0  ;;  %v1091_v34 = vpop.f32.mrb[88].mxu1  ;;  %v1294_v48 = vld [vmem:[#allocation2 + $0x2c8] sm:$0xff] }
 0x195   : > { %v1810_v19 = vmax.f32 %v1620_v15, %v1715_v16  ;;  %v1765_v20 = vld [vmem:[#allocation2 + $0x2a1] sm:$0xff]  ;;  %v2055_v22 = vmax.f32 %v2053_v14, 0.0  ;;  %1577 = vst.msk [vmem:[#allocation2 + $0x2b8] sm:$0xff] %vm1106_vm2, %v1482_v17  ;;  %v1243_v24 = vld [vmem:[#allocation2 + $0x130] sm:$0xff]  ;;  %1151 = vst.msk [vmem:[#allocation2 + $0x160] sm:$0xff] %vm1106_vm2, %v891_v27  ;;  %v2630_v35 = vpop.f32.mrb[89].mxu0 }
 0x196   : > { %v1860_v23 = vmax.f32 %v1670_v18, %v1765_v20  ;;  %2446 = vst.msk [vmem:[%s3130_s28 + $0x5c] sm:$0x7] %vm1965_vm4, %v2480_v13  ;;  %v1338_v26 = vld [vmem:[#allocation2 + $0x14c] sm:$0xff]  ;;  %v1244_v36 = vld [vmem:[#allocation2 + $0x138] sm:$0xff]  ;;  %v2730_v40 = vpop.f32.mrb[89].mxu1  ;;  %v894_v41 = vpop.f32.mrb[90].mxu0 }
 0x197   : > { %1905 = vst.msk [vmem:[#allocation2 + $0x110] sm:$0xff] %vm1106_vm2, %v1810_v19  ;;  %v2466_v28 = vpack.c.bf16 %v2055_v22, %v2055_v22  ;;  %v1433_v32 = vmax.f32 %v1243_v24, %v1338_v26  ;;  %v1388_v33 = vld [vmem:[#allocation2 + $0x2dc] sm:$0xff]  ;;  %1201 = vst.msk [vmem:[#allocation2 + $0x2f0] sm:$0xff] %vm1106_vm2, %v1091_v34  ;;  %v1671_v42 = vld [vmem:[#allocation2 + $0x2a8] sm:$0xff]  ;;  %v1094_v46 = vpop.f32.mrb[90].mxu1  ;;  %v2631_v47 = vpop.f32.mrb[91].mxu0 }
 0x198   : > { %1955 = vst.msk [vmem:[#allocation2 + $0x2a0] sm:$0xff] %vm1106_vm2, %v1860_v23  ;;  %v1621_v37 = vld [vmem:[#allocation2 + $0x118] sm:$0xff]  ;;  %v1483_v39 = vmax.f32 %v1293_v31, %v1388_v33  ;;  %v1766_v44 = vld [vmem:[#allocation2 + $0x2a9] sm:$0xff]  ;;  %1152 = vst.msk [vmem:[#allocation2 + $0x168] sm:$0xff] %vm1106_vm2, %v894_v41  ;;  %v2731_v53 = vpop.f32.mrb[91].mxu1 }
 0x199   : > { %v1716_v38 = vld [vmem:[#allocation2 + $0x119] sm:$0xff]  ;;  %1528 = vst.msk [vmem:[#allocation2 + $0x130] sm:$0xff] %vm1106_vm2, %v1433_v32  ;;  %v1861_v50 = vmax.f32 %v1671_v42, %v1766_v44  ;;  %1202 = vst.msk [vmem:[#allocation2 + $0x2f8] sm:$0xff] %vm1106_vm2, %v1094_v46  ;;  %v1672_v58 = vld [vmem:[#allocation2 + $0x2b0] sm:$0xff] }
 0x19a   : > { %v1811_v43 = vmax.f32 %v1621_v37, %v1716_v38  ;;  %v1339_v45 = vld [vmem:[#allocation2 + $0x154] sm:$0xff]  ;;  %2418 = vst.msk [vmem:[%s3130_s28 + $0x24] sm:$0x7] %vm1965_vm4, %v2466_v28  ;;  %v1389_v52 = vld [vmem:[#allocation2 + $0x2e4] sm:$0xff] }
 0x19b   : > { %1578 = vst.msk [vmem:[#allocation2 + $0x2c0] sm:$0xff] %vm1106_vm2, %v1483_v39  ;;  %v1434_v51 = vmax.f32 %v1244_v36, %v1339_v45  ;;  %v1622_v55 = vld [vmem:[#allocation2 + $0x120] sm:$0xff]  ;;  %v1484_v57 = vmax.f32 %v1294_v48, %v1389_v52  ;;  %1956 = vst.msk [vmem:[#allocation2 + $0x2a8] sm:$0xff] %vm1106_vm2, %v1861_v50  ;;  %v1295_v63 = vld [vmem:[#allocation2 + $0x2d0] sm:$0xff] }
 0x19c   : > { %1906 = vst.msk [vmem:[#allocation2 + $0x118] sm:$0xff] %vm1106_vm2, %v1811_v43  ;;  %v1717_v56 = vld [vmem:[#allocation2 + $0x121] sm:$0xff]  ;;  %v1767_v60 = vld [vmem:[#allocation2 + $0x2b1] sm:$0xff]  ;;  %v899_v25 = vpop.f32.mrb[92].mxu0  ;;  %v1099_v6 = vpop.f32.mrb[92].mxu1 }
 0x19d   : > { %v1812_v59 = vmax.f32 %v1622_v55, %v1717_v56  ;;  %1529 = vst.msk [vmem:[#allocation2 + $0x138] sm:$0xff] %vm1106_vm2, %v1434_v51  ;;  %v1862_v61 = vmax.f32 %v1672_v58, %v1767_v60  ;;  %1579 = vst.msk [vmem:[#allocation2 + $0x2c8] sm:$0xff] %vm1106_vm2, %v1484_v57  ;;  %v1245_v62 = vld [vmem:[#allocation2 + $0x140] sm:$0xff]  ;;  %v1246_v1 = vld [vmem:[#allocation2 + $0x148] sm:$0xff]  ;;  %v2634_v7 = vpop.f32.mrb[93].mxu0  ;;  %v2734_v12 = vpop.f32.mrb[93].mxu1 }
 0x19e   : > { %v1340_v0 = vld [vmem:[#allocation2 + $0x15c] sm:$0xff]  ;;  %v1390_v5 = vld [vmem:[#allocation2 + $0x2ec] sm:$0xff]  ;;  %1153 = vst.msk [vmem:[#allocation2 + $0x170] sm:$0xff] %vm1106_vm2, %v899_v25  ;;  %1203 = vst.msk [vmem:[#allocation2 + $0x300] sm:$0xff] %vm1106_vm2, %v1099_v6  ;;  %v902_v13 = vpop.f32.mrb[94].mxu0  ;;  %v1102_v19 = vpop.f32.mrb[94].mxu1 }
 0x19f   : > { %1907 = vst.msk [vmem:[#allocation2 + $0x120] sm:$0xff] %vm1106_vm2, %v1812_v59  ;;  %v1296_v3 = vld [vmem:[#allocation2 + $0x2d8] sm:$0xff]  ;;  %1957 = vst.msk [vmem:[#allocation2 + $0x2b0] sm:$0xff] %vm1106_vm2, %v1862_v61  ;;  %v1435_v4 = vmax.f32 %v1245_v62, %v1340_v0  ;;  %v1623_v8 = vld [vmem:[#allocation2 + $0x128] sm:$0xff]  ;;  %v1485_v10 = vmax.f32 %v1295_v63, %v1390_v5  ;;  %v2635_v20 = vpop.f32.mrb[95].mxu0  ;;  %v2735_v24 = vpop.f32.mrb[95].mxu1 }
 0x1a0   : > { %v1718_v9 = vld [vmem:[#allocation2 + $0x129] sm:$0xff]  ;;  %v1673_v14 = vld [vmem:[#allocation2 + $0x2b8] sm:$0xff]  ;;  %1154 = vst.msk [vmem:[#allocation2 + $0x178] sm:$0xff] %vm1106_vm2, %v902_v13  ;;  %1204 = vst.msk [vmem:[#allocation2 + $0x308] sm:$0xff] %vm1106_vm2, %v1102_v19 }
 0x1a1   : > { %v1341_v11 = vld [vmem:[#allocation2 + $0x164] sm:$0xff]  ;;  %v1813_v15 = vmax.f32 %v1623_v8, %v1718_v9  ;;  %1530 = vst.msk [vmem:[#allocation2 + $0x140] sm:$0xff] %vm1106_vm2, %v1435_v4  ;;  %v1391_v18 = vld [vmem:[#allocation2 + $0x2f4] sm:$0xff]  ;;  %1580 = vst.msk [vmem:[#allocation2 + $0x2d0] sm:$0xff] %vm1106_vm2, %v1485_v10 }
 0x1a2   : > { %v1768_v16 = vld [vmem:[#allocation2 + $0x2b9] sm:$0xff]  ;;  %v1436_v17 = vmax.f32 %v1246_v1, %v1341_v11  ;;  %v1486_v23 = vmax.f32 %v1296_v3, %v1391_v18  ;;  %v1624_v27 = vld [vmem:[#allocation2 + $0x130] sm:$0xff]  ;;  %v1298_v51 = vld [vmem:[#allocation2 + $0x2e8] sm:$0xff] }
 0x1a3   : > { %v1863_v22 = vmax.f32 %v1673_v14, %v1768_v16  ;;  %v2201_v26 = vld [vmem:[#allocation2 + $0x2a0] ss:$2 sm:$0xff]  ;;  %1908 = vst.msk [vmem:[#allocation2 + $0x128] sm:$0xff] %vm1106_vm2, %v1813_v15  ;;  %v1247_v39 = vld [vmem:[#allocation2 + $0x150] sm:$0xff]  ;;  %v1248_v43 = vld [vmem:[#allocation2 + $0x158] sm:$0xff] }
 0x1a4   : > { %v1719_v28 = vld [vmem:[#allocation2 + $0x131] sm:$0xff]  ;;  %1531 = vst.msk [vmem:[#allocation2 + $0x148] sm:$0xff] %vm1106_vm2, %v1436_v17  ;;  %v2204_v31 = vadd.f32 %v3280_v2, %v2201_v26  ;;  %v1674_v32 = vld [vmem:[#allocation2 + $0x2c0] sm:$0xff]  ;;  %1581 = vst.msk [vmem:[#allocation2 + $0x2d8] sm:$0xff] %vm1106_vm2, %v1486_v23  ;;  %v907_v41 = vpop.f32.mrb[96].mxu0 }
 0x1a5   : > { %1958 = vst.msk [vmem:[#allocation2 + $0x2b8] sm:$0xff] %vm1106_vm2, %v1863_v22  ;;  %v1814_v33 = vmax.f32 %v1624_v27, %v1719_v28  ;;  %v1769_v34 = vld [vmem:[#allocation2 + $0x2c1] sm:$0xff]  ;;  %v1342_v40 = vld [vmem:[#allocation2 + $0x16c] sm:$0xff]  ;;  %1155 = vst.msk [vmem:[#allocation2 + $0x180] sm:$0xff] %vm1106_vm2, %v907_v41  ;;  %v2638_v46 = vpop.f32.mrb[97].mxu0 }
 0x1a6   : > { %v2068_v35 = vld [vmem:[#allocation2 + $0x118] ss:$2 sm:$0xff]  ;;  %v1864_v36 = vmax.f32 %v1674_v32, %v1769_v34  ;;  %v2206_v37 = vmax.f32 %v2204_v31, 0.0  ;;  %v1437_v44 = vmax.f32 %v1247_v39, %v1342_v40  ;;  %v1675_v52 = vld [vmem:[#allocation2 + $0x2c8] sm:$0xff]  ;;  %v910_v56 = vpop.f32.mrb[98].mxu0  ;;  %v1255_v22 = vld [vmem:[#allocation2 + $0x190] sm:$0xff] }
 0x1a7   : > { %v2071_v38 = vadd.f32 %v3280_v2, %v2068_v35  ;;  %1909 = vst.msk [vmem:[#allocation2 + $0x130] sm:$0xff] %vm1106_vm2, %v1814_v33  ;;  %v1297_v42 = vld [vmem:[#allocation2 + $0x2e0] sm:$0xff]  ;;  %v1625_v50 = vld [vmem:[#allocation2 + $0x138] sm:$0xff]  ;;  %1156 = vst.msk [vmem:[#allocation2 + $0x188] sm:$0xff] %vm1106_vm2, %v910_v56  ;;  %v2639_v61 = vpop.f32.mrb[99].mxu0  ;;  %v1445_v33 = vmax.f32 %v1255_v22, %v3087_v54 }
 0x1a8   : > { %1959 = vst.msk [vmem:[#allocation2 + $0x2c0] sm:$0xff] %vm1106_vm2, %v1864_v36  ;;  %v1392_v45 = vld [vmem:[#allocation2 + $0x2fc] sm:$0xff]  ;;  %v2481_v47 = vpack.c.bf16 %v2206_v37, %v2206_v37  ;;  %v1770_v59 = vld [vmem:[#allocation2 + $0x2c9] sm:$0xff]  ;;  %1532 = vst.msk [vmem:[#allocation2 + $0x150] sm:$0xff] %vm1106_vm2, %v1437_v44 }
 0x1a9   : > { %v2073_v48 = vmax.f32 %v2071_v38, 0.0  ;;  %v1720_v53 = vld [vmem:[#allocation2 + $0x139] sm:$0xff]  ;;  %v1487_v55 = vmax.f32 %v1297_v42, %v1392_v45  ;;  %v1865_v63 = vmax.f32 %v1675_v52, %v1770_v59  ;;  %v1393_v3 = vld [vmem:[#allocation2 + $0x304] sm:$0xff]  ;;  %v1676_v6 = vld [vmem:[#allocation2 + $0x2d0] sm:$0xff] }
 0x1aa   : > { %v1626_v57 = vld [vmem:[#allocation2 + $0x140] sm:$0xff]  ;;  %v1815_v58 = vmax.f32 %v1625_v50, %v1720_v53  ;;  %v1343_v60 = vld [vmem:[#allocation2 + $0x174] sm:$0xff]  ;;  %2449 = vst.msk [vmem:[%s3130_s28 + $0x60] sm:$0xf] %vm1584_vm3, %v2481_v47  ;;  %v1488_v8 = vmax.f32 %v1298_v51, %v1393_v3  ;;  %v1299_v10 = vld [vmem:[#allocation2 + $0x2f0] sm:$0xf] }
 0x1ab   : > { %v2467_v62 = vpack.c.bf16 %v2073_v48, %v2073_v48  ;;  %v1721_v0 = vld [vmem:[#allocation2 + $0x141] sm:$0xff]  ;;  %1582 = vst.msk [vmem:[#allocation2 + $0x2e0] sm:$0xff] %vm1106_vm2, %v1487_v55  ;;  %v1252_v25 = vld [vmem:[#allocation2 + $0x178] sm:$0xff]  ;;  %v1438_v1 = vmax.f32 %v1248_v43, %v1343_v60  ;;  %1960 = vst.msk [vmem:[#allocation2 + $0x2c8] sm:$0xff] %vm1106_vm2, %v1865_v63 }
 0x1ac   : > { %v2203_v4 = vld [vmem:[#allocation2 + $0x2b0] ss:$2 sm:$0x3f]  ;;  %1910 = vst.msk [vmem:[#allocation2 + $0x138] sm:$0xff] %vm1106_vm2, %v1815_v58  ;;  %v1816_v5 = vmax.f32 %v1626_v57, %v1721_v0  ;;  %v1394_v12 = vld [vmem:[#allocation2 + $0x30c] sm:$0xf]  ;;  %v1442_v14 = vmax.f32 %v1252_v25, %v3073_v29 }
 0x1ad   : > { %v1771_v7 = vld [vmem:[#allocation2 + $0x2d1] sm:$0xff]  ;;  %v2205_v9 = vadd.f32 %v3280_v2, %v2203_v4  ;;  %1533 = vst.msk [vmem:[#allocation2 + $0x158] sm:$0xff] %vm1106_vm2, %v1438_v1  ;;  %v1489_v15 = vmax.f32 %v1299_v10, %v1394_v12  ;;  %1583 = vst.msk [vmem:[#allocation2 + $0x2e8] sm:$0xff] %vm1106_vm2, %v1488_v8  ;;  %v1249_v18 = vld [vmem:[#allocation2 + $0x160] sm:$0xff] }
 0x1ae   : > { %v1866_v11 = vmax.f32 %v1676_v6, %v1771_v7  ;;  %2421 = vst.msk [vmem:[%s3130_s28 + $0x28] sm:$0xf] %vm1584_vm3, %v2467_v62  ;;  %v2070_v13 = vld [vmem:[#allocation2 + $0x128] ss:$2 sm:$0x3f]  ;;  %v1253_v19 = vld [vmem:[#allocation2 + $0x180] sm:$0xff] }
 0x1af   : > { %1911 = vst.msk [vmem:[#allocation2 + $0x140] sm:$0xff] %vm1106_vm2, %v1816_v5  ;;  %v2207_v16 = vmax.f32 %v2205_v9, 0.0  ;;  %v2072_v17 = vadd.f32 %v3280_v2, %v2070_v13  ;;  %v1344_v20 = vld [vmem:[#allocation2 + $0x17c] sm:$0xff]  ;;  %v1443_v24 = vmax.f32 %v1253_v19, %v3075_v30  ;;  %v1250_v29 = vld [vmem:[#allocation2 + $0x168] sm:$0xff]  ;;  %v1251_v40 = vld [vmem:[#allocation2 + $0x170] sm:$0xff] }
 0x1b0   : > { %1961 = vst.msk [vmem:[#allocation2 + $0x2d0] sm:$0xff] %vm1106_vm2, %v1866_v11  ;;  %v1439_v23 = vmax.f32 %v1249_v18, %v1344_v20  ;;  %1537 = vst.msk [vmem:[#allocation2 + $0x178] sm:$0xff] %vm1106_vm2, %v1442_v14  ;;  %v1627_v28 = vld [vmem:[#allocation2 + $0x148] sm:$0xff]  ;;  %v1677_v34 = vld [vmem:[#allocation2 + $0x2d8] sm:$0xff] }
 0x1b1   : > { %1585 = vst.msk [vmem:[#allocation2 + $0x2f0] sm:$0xf] %vm1584_vm3, %v1489_v15  ;;  %v2482_v26 = vpack.c.bf16 %v2207_v16, %v2207_v16  ;;  %v2074_v27 = vmax.f32 %v2072_v17, 0.0  ;;  %v1722_v31 = vld [vmem:[#allocation2 + $0x149] sm:$0xff]  ;;  %v1637_v62 = vld [vmem:[#allocation2 + $0x198] sm:$0xff] }
 0x1b2   : > { %v1254_v32 = vld [vmem:[#allocation2 + $0x188] sm:$0xff]  ;;  %v1817_v35 = vmax.f32 %v1627_v28, %v1722_v31  ;;  %v1772_v36 = vld [vmem:[#allocation2 + $0x2d9] sm:$0xff]  ;;  %1534 = vst.msk [vmem:[#allocation2 + $0x160] sm:$0xff] %vm1106_vm2, %v1439_v23  ;;  %v1628_v43 = vld [vmem:[#allocation2 + $0x150] sm:$0xff]  ;;  %v1827_v13 = vmax.f32 %v1637_v62, %v3103_v21 }
 0x1b3   : > { %v1345_v37 = vld [vmem:[#allocation2 + $0x184] sm:$0xff]  ;;  %v1444_v38 = vmax.f32 %v1254_v32, %v3083_v49  ;;  %v2468_v30 = vpack.c.bf16 %v2074_v27, %v2074_v27  ;;  %v1867_v39 = vmax.f32 %v1677_v34, %v1772_v36  ;;  %2450 = vst.msk [vmem:[%s3130_s28 + $0x64] sm:$0x7] %vm1965_vm4, %v2482_v26  ;;  %v1346_v41 = vld [vmem:[#allocation2 + $0x18c] sm:$0xff] }
 0x1b4   : > { %v1440_v42 = vmax.f32 %v1250_v29, %v1345_v37  ;;  %1538 = vst.msk [vmem:[#allocation2 + $0x180] sm:$0xff] %vm1106_vm2, %v1443_v24  ;;  %1912 = vst.msk [vmem:[#allocation2 + $0x148] sm:$0xff] %vm1106_vm2, %v1817_v35  ;;  %v1723_v54 = vld [vmem:[#allocation2 + $0x151] sm:$0xff]  ;;  %v1441_v44 = vmax.f32 %v1251_v40, %v1346_v41  ;;  %v1678_v49 = vld [vmem:[#allocation2 + $0x2e0] sm:$0xff] }
 0x1b5   : > { %1539 = vst.msk [vmem:[#allocation2 + $0x188] sm:$0xff] %vm1106_vm2, %v1444_v38  ;;  %1540 = vst.msk [vmem:[#allocation2 + $0x190] sm:$0xff] %vm1106_vm2, %v1445_v33  ;;  %v1818_v45 = vmax.f32 %v1628_v43, %v1723_v54  ;;  %v1679_v46 = vld [vmem:[#allocation2 + $0x2e8] sm:$0xff]  ;;  %v1629_v56 = vld [vmem:[#allocation2 + $0x158] sm:$0xff] }
 0x1b6   : > { %1962 = vst.msk [vmem:[#allocation2 + $0x2d8] sm:$0xff] %vm1106_vm2, %v1867_v39  ;;  %v1773_v47 = vld [vmem:[#allocation2 + $0x2e1] sm:$0xff]  ;;  %1535 = vst.msk [vmem:[#allocation2 + $0x168] sm:$0xff] %vm1106_vm2, %v1440_v42  ;;  %v2803_v33 = vld [vmem:[%s3468_s2] ss:$0 sm:$0xff] }
 0x1b7   : > { %2422 = vst.msk [vmem:[%s3130_s28 + $0x2c] sm:$0x7] %vm1965_vm4, %v2468_v30  ;;  %v1868_v48 = vmax.f32 %v1678_v49, %v1773_v47  ;;  %v1633_v58 = vld [vmem:[#allocation2 + $0x178] sm:$0xff] }
 0x1b8   : > { %1536 = vst.msk [vmem:[#allocation2 + $0x170] sm:$0xff] %vm1106_vm2, %v1441_v44  ;;  %1913 = vst.msk [vmem:[#allocation2 + $0x150] sm:$0xff] %vm1106_vm2, %v1818_v45  ;;  %v1680_v50 = vld [vmem:[#allocation2 + $0x2f0] sm:$0x7] }
 0x1b9   : > { %v1774_v51 = vld [vmem:[#allocation2 + $0x2e9] sm:$0xff]  ;;  %v1775_v52 = vld [vmem:[#allocation2 + $0x2f1] sm:$0x7]  ;;  %1963 = vst.msk [vmem:[#allocation2 + $0x2e0] sm:$0xff] %vm1106_vm2, %v1868_v48  ;;  %v1724_v57 = vld [vmem:[#allocation2 + $0x159] sm:$0xff] }
 0x1ba   : > { %v1869_v53 = vmax.f32 %v1679_v46, %v1774_v51  ;;  %v1870_v55 = vmax.f32 %v1680_v50, %v1775_v52  ;;  %v1819_v59 = vmax.f32 %v1629_v56, %v1724_v57  ;;  %v1630_v60 = vld [vmem:[#allocation2 + $0x160] sm:$0xff] }
 0x1bb   : > { %v1634_v61 = vld [vmem:[#allocation2 + $0x180] sm:$0xff] }
 0x1bc   : > { %1964 = vst.msk [vmem:[#allocation2 + $0x2e8] sm:$0xff] %vm1106_vm2, %v1869_v53  ;;  %v1728_v63 = vld [vmem:[#allocation2 + $0x179] sm:$0xff]  ;;  %v1635_v0 = vld [vmem:[#allocation2 + $0x188] sm:$0xff]  ;;  %v1636_v25 = vld [vmem:[#allocation2 + $0x190] sm:$0xff] }
 0x1bd   : > { %1966 = vst.msk [vmem:[#allocation2 + $0x2f0] sm:$0x7] %vm1965_vm4, %v1870_v55  ;;  %v1729_v1 = vld [vmem:[#allocation2 + $0x181] sm:$0xff]  ;;  %v1823_v3 = vmax.f32 %v1633_v58, %v1728_v63  ;;  %v1730_v6 = vld [vmem:[#allocation2 + $0x189] sm:$0xff]  ;;  %v1731_v14 = vld [vmem:[#allocation2 + $0x191] sm:$0xff] }
 0x1be   : > { %1914 = vst.msk [vmem:[#allocation2 + $0x158] sm:$0xff] %vm1106_vm2, %v1819_v59  ;;  %v1631_v4 = vld [vmem:[#allocation2 + $0x168] sm:$0xff]  ;;  %v1824_v7 = vmax.f32 %v1634_v61, %v1729_v1  ;;  %v1825_v12 = vmax.f32 %v1635_v0, %v1730_v6  ;;  %v1826_v18 = vmax.f32 %v1636_v25, %v1731_v14  ;;  %1922 = vst.msk [vmem:[#allocation2 + $0x198] sm:$0xff] %vm1106_vm2, %v1827_v13 }
 0x1bf   : > { %v1725_v5 = vld [vmem:[#allocation2 + $0x161] sm:$0xff]  ;;  %v1632_v8 = vld [vmem:[#allocation2 + $0x170] sm:$0xff] }
 0x1c0   : > { %v1726_v9 = vld [vmem:[#allocation2 + $0x169] sm:$0xff]  ;;  %v1727_v10 = vld [vmem:[#allocation2 + $0x171] sm:$0xff]  ;;  %v1820_v11 = vmax.f32 %v1630_v60, %v1725_v5  ;;  %1919 = vst.msk [vmem:[#allocation2 + $0x180] sm:$0xff] %vm1106_vm2, %v1824_v7  ;;  %1920 = vst.msk [vmem:[#allocation2 + $0x188] sm:$0xff] %vm1106_vm2, %v1825_v12 }
 0x1c1   : > { %v1821_v15 = vmax.f32 %v1631_v4, %v1726_v9  ;;  %v1822_v16 = vmax.f32 %v1632_v8, %v1727_v10  ;;  %1918 = vst.msk [vmem:[#allocation2 + $0x178] sm:$0xff] %vm1106_vm2, %v1823_v3  ;;  %v2220_v17 = vld [vmem:[#allocation2 + $0x2d8] ss:$2 sm:$0xff]  ;;  %1921 = vst.msk [vmem:[#allocation2 + $0x190] sm:$0xff] %vm1106_vm2, %v1826_v18 }
 0x1c2   : > { %1915 = vst.msk [vmem:[#allocation2 + $0x160] sm:$0xff] %vm1106_vm2, %v1820_v11  ;;  %v2223_v19 = vadd.f32 %v3280_v2, %v2220_v17 }
 0x1c3   : > { %1916 = vst.msk [vmem:[#allocation2 + $0x168] sm:$0xff] %vm1106_vm2, %v1821_v15  ;;  %1917 = vst.msk [vmem:[#allocation2 + $0x170] sm:$0xff] %vm1106_vm2, %v1822_v16 }
 0x1c4   : > { %v2222_v21 = vld [vmem:[#allocation2 + $0x2e8] ss:$2 sm:$0x3f]  ;;  %v2225_v22 = vmax.f32 %v2223_v19, 0.0 }
 0x1c5   : > { %v2224_v20 = vadd.f32 %v3280_v2, %v2222_v21  ;;  %v2087_v23 = vld [vmem:[#allocation2 + $0x150] ss:$2 sm:$0xff] }
 0x1c6   : > { %v2483_v29 = vpack.c.bf16 %v2225_v22, %v2225_v22  ;;  %v2090_v26 = vadd.f32 %v3280_v2, %v2087_v23  ;;  %v2108_v31 = vld [vmem:[#allocation2 + $0x198] ss:$2 sm:$0x3f] }
 0x1c7   : > { %v2226_v24 = vmax.f32 %v2224_v20, 0.0  ;;  %v2110_v34 = vadd.f32 %v2803_v33, %v2108_v31 }
 0x1c8   : > { %2453 = vst.msk [vmem:[%s3130_s28 + $0x68] sm:$0xf] %vm1584_vm3, %v2483_v29  ;;  %v2092_v28 = vmax.f32 %v2090_v26, 0.0  ;;  %v2106_v37 = vld [vmem:[#allocation2 + $0x188] ss:$2 sm:$0xff] }
 0x1c9   : > { %v2484_v27 = vpack.c.bf16 %v2226_v24, %v2226_v24  ;;  %v2109_v2 = vadd.f32 %v2803_v33, %v2106_v37  ;;  %v2112_v38 = vmax.f32 %v2110_v34, 0.0 }
 0x1ca   : > { %v2089_v32 = vld [vmem:[#allocation2 + $0x160] ss:$2 sm:$0x3f]  ;;  %v2469_v35 = vpack.c.bf16 %v2092_v28, %v2092_v28 }
 0x1cb   : > { %2454 = vst.msk [vmem:[%s3130_s28 + $0x6c] sm:$0x7] %vm1965_vm4, %v2484_v27  ;;  %v2091_v36 = vadd.f32 %v2803_v33, %v2089_v32  ;;  %v2111_v39 = vmax.f32 %v2109_v2, 0.0  ;;  %v2472_v40 = vpack.c.bf16 %v2112_v38, %v2112_v38 }
 0x1cc   : > { %2425 = vst.msk [vmem:[%s3130_s28 + $0x30] sm:$0xf] %vm1584_vm3, %v2469_v35 }
 0x1cd   : > { %v2093_v30 = vmax.f32 %v2091_v36, 0.0  ;;  %v2471_v42 = vpack.c.bf16 %v2111_v39, %v2111_v39  ;;  %2430 = vst.msk [vmem:[%s3130_s28 + $0x3c] sm:$0x7] %vm1965_vm4, %v2472_v40 }
 0x1cf   : > { %v2470_v41 = vpack.c.bf16 %v2093_v30, %v2093_v30  ;;  %2429 = vst.msk [vmem:[%s3130_s28 + $0x38] sm:$0xf] %vm1584_vm3, %v2471_v42 }
 0x1d1   : > { %2426 = vst.msk [vmem:[%s3130_s28 + $0x34] sm:$0x7] %vm1965_vm4, %v2470_v41 }
 0x1d2 PF: > { %s13_s12 = sadd.s32 1, %s2810_s12  }
 0x1d3   : > { %p10_p5 = scmp.ge.s32.totalorder %s13_s12, 4  }
 0x1d5   :  { %12 = sbr.rel (!%p10_p5) target bundleno = 1 (0x1), region = 102 }

// kernel: _lambda_.5
= control target key start
LH: loop header
LB: loop body
LE: loop exit
PB: predicated region body
PF: predicated region fallthrough
CT: control target
= control target key end

     0   :  { %v831_v27 = vlaneseq  ;;  %v6117_v35 = vmov 1966171168   ;;  %s7496_s0 = inlined_call_operand.vmem [shape: bf16[2,6272], index: 0, kind: input, shape index: {}]   ;;  %s7497_s1 = inlined_call_operand.vmem [shape: bf16[6272,128], index: 1, kind: input, shape index: {}]   ;;  %s7498_s2 = inlined_call_operand.vmem [shape: f32[1,128], index: 2, kind: input, shape index: {}]   ;;  %s7499_s3 = inlined_call_operand.vmem [shape: f32[128,128], index: 3, kind: input, shape index: {}]   ;;  %s7500_s4 = inlined_call_operand.vmem [shape: f32[1,128], index: 4, kind: input, shape index: {}]   ;;  %s7501_s5 = inlined_call_operand.hbm [shape: f32[2,128], index: 5, kind: output, shape index: {}]  }
   0x1   :  { %v5691_v0 = vld [vmem:[%s7497_s1 + $0x40] sm:$0xff]   ;;  %v5695_v4 = vld [vmem:[%s7497_s1 + $0x48] sm:$0xff]   ;;  %v5699_v8 = vld [vmem:[%s7497_s1 + $0x50] sm:$0xff]   ;;  %v829_v36 = vunpack.c.l.s4 %v6117_v35 }
   0x2   :  { %v5692_v1 = vld [vmem:[%s7497_s1] sm:$0xff]   ;;  %5053 = vmatprep.subr.bf16.mxu0 %v5691_v0  ;;  %v5696_v5 = vld [vmem:[%s7497_s1 + $0x8] sm:$0xff]   ;;  %v5700_v9 = vld [vmem:[%s7497_s1 + $0x10] sm:$0xff]   ;;  %v832_v32 = vshrl.u32 %v831_v27, 7 }
   0x3   :  { %v5693_v2 = vld [vmem:[%s7497_s1 + $0xc0] sm:$0xff]   ;;  %5054 = vmatpush3.bf16.msra.mxu0 %v5692_v1  ;;  %v5697_v6 = vld [vmem:[%s7497_s1 + $0xc8] sm:$0xff]   ;;  %v5701_v10 = vld [vmem:[%s7497_s1 + $0xd0] sm:$0xff]   ;;  %v830_v39 = vunpack.c.0.s8 %v829_v36 }
   0x4   :  { %v5694_v3 = vld [vmem:[%s7497_s1 + $0x80] sm:$0xff]   ;;  %5075 = vmatprep.subr.bf16.mxu1 %v5693_v2  ;;  %5055 = vmatprep.subr.bf16.mxu0 %v5695_v4  ;;  %v5698_v7 = vld [vmem:[%s7497_s1 + $0x88] sm:$0xff]   ;;  %v5702_v11 = vld [vmem:[%s7497_s1 + $0x90] sm:$0xff]  }
   0x5   :  { %5076 = vmatpush3.bf16.msra.mxu1 %v5694_v3  ;;  %v5703_v12 = vld [vmem:[%s7497_s1 + $0x58] sm:$0xff]   ;;  %v5707_v16 = vld [vmem:[%s7497_s1 + $0x60] sm:$0xff]   ;;  %v5711_v20 = vld [vmem:[%s7497_s1 + $0x68] sm:$0xff]   ;;  %v6257_v41 = vsub.s32 %v830_v39, %v832_v32 }
   0x6   :  { %5077 = vmatprep.subr.bf16.mxu1 %v5697_v6  ;;  %v5704_v13 = vld [vmem:[%s7497_s1 + $0x18] sm:$0xff]   ;;  %v5708_v17 = vld [vmem:[%s7497_s1 + $0x20] sm:$0xff]   ;;  %v5712_v21 = vld [vmem:[%s7497_s1 + $0x28] sm:$0xff]  }
   0x7   :  { %5056 = vmatpush3.bf16.msra.mxu0 %v5696_v5  ;;  %v5705_v14 = vld [vmem:[%s7497_s1 + $0xd8] sm:$0xff]   ;;  %v5709_v18 = vld [vmem:[%s7497_s1 + $0xe0] sm:$0xff]   ;;  %v5713_v22 = vld [vmem:[%s7497_s1 + $0xe8] sm:$0xff]  }
   0x8   :  { %5057 = vmatprep.subr.bf16.mxu0 %v5699_v8  ;;  %v5706_v15 = vld [vmem:[%s7497_s1 + $0x98] sm:$0xff]   ;;  %v5710_v19 = vld [vmem:[%s7497_s1 + $0xa0] sm:$0xff]   ;;  %v5714_v23 = vld [vmem:[%s7497_s1 + $0xa8] sm:$0xff]  }
   0x9   :  { %5078 = vmatpush3.bf16.msra.mxu1 %v5698_v7  ;;  %v5715_v24 = vld [vmem:[%s7497_s1 + $0x70] sm:$0xff]   ;;  %v5719_v29 = vld [vmem:[%s7497_s1 + $0x78] sm:$0xff]   ;;  %v22_v33 = vld [vmem:[%s7496_s0] sm:$0xff] }
   0xa   :  { %5079 = vmatprep.subr.bf16.mxu1 %v5701_v10  ;;  %v5716_v25 = vld [vmem:[%s7497_s1 + $0x30] sm:$0xff]   ;;  %v5720_v30 = vld [vmem:[%s7497_s1 + $0x38] sm:$0xff]   ;;  %v5724_v37 = vld [vmem:[%s7497_s1 + $0x140] sm:$0xff]   ;;  %v827_v38 = vcombine.high %v22_v33, %v22_v33  ;;  %v834_v42 = vrot.slane %v22_v33, %v6257_v41 }
   0xb   :  { %5058 = vmatpush3.bf16.msra.mxu0 %v5700_v9  ;;  %v5717_v26 = vld [vmem:[%s7497_s1 + $0xf0] sm:$0xff]   ;;  %v5721_v31 = vld [vmem:[%s7497_s1 + $0xf8] sm:$0xff]   ;;  %v5726_v40 = vld [vmem:[%s7497_s1 + $0x1c0] sm:$0xff]  }
   0xc   :  { %5059 = vmatprep.subr.bf16.mxu0 %v5703_v12  ;;  %v5718_v28 = vld [vmem:[%s7497_s1 + $0xb0] sm:$0xff]   ;;  %v5723_v34 = vld [vmem:[%s7497_s1 + $0xb8] sm:$0xff]   ;;  %v6261_v43 = vrot.slane %v827_v38, %v6257_v41  ;;  %v842_v44 = vcombine.high %v834_v42, %v834_v42  ;;  %v850_v45 = vrot.slane %v834_v42, %v6257_v41  ;;  %v5725_v47 = vld [vmem:[%s7497_s1 + $0x100] sm:$0xff]  }
   0xd   :  { %5080 = vmatpush3.bf16.msra.mxu1 %v5702_v11  ;;  %v5727_v49 = vld [vmem:[%s7497_s1 + $0x180] sm:$0xff]   ;;  %v5728_v52 = vld [vmem:[%s7497_s1 + $0x148] sm:$0xff]   ;;  %v5732_v58 = vld [vmem:[%s7497_s1 + $0x150] sm:$0xff]  }
   0xe   :  { %5081 = vmatprep.subr.bf16.mxu1 %v5705_v14  ;;  %v843_v46 = vcombine.high %v6261_v43, %v6261_v43  ;;  %v864_v48 = vrot.slane %v842_v44, %v6257_v41  ;;  %v872_v51 = vcombine.high %v850_v45, %v850_v45  ;;  %v5729_v54 = vld [vmem:[%s7497_s1 + $0x108] sm:$0xff]   ;;  %v5733_v59 = vld [vmem:[%s7497_s1 + $0x110] sm:$0xff]   ;;  %v5736_v62 = vld [vmem:[%s7497_s1 + $0x158] sm:$0xff]  }
   0xf   :  { %5060 = vmatpush3.bf16.msra.mxu0 %v5704_v13  ;;  %v5730_v55 = vld [vmem:[%s7497_s1 + $0x1c8] sm:$0xff]   ;;  %v5734_v60 = vld [vmem:[%s7497_s1 + $0x1d0] sm:$0xff]   ;;  %v5737_v63 = vld [vmem:[%s7497_s1 + $0x118] sm:$0xff]  }
  0x10   :  { %5061 = vmatprep.subr.bf16.mxu0 %v5707_v16  ;;  %v871_v50 = vrot.slane %v843_v46, %v6257_v41  ;;  %3568 = vmatprep.mubr.bf16.mxu0 %v864_v48  ;;  %v874_v53 = vcombine.high %v864_v48, %v864_v48  ;;  %v5731_v57 = vld [vmem:[%s7497_s1 + $0x188] sm:$0xff]   ;;  %v5735_v61 = vld [vmem:[%s7497_s1 + $0x190] sm:$0xff]   ;;  %v5738_v0 = vld [vmem:[%s7497_s1 + $0x1d8] sm:$0xff]  }
  0x11   :  { %5082 = vmatpush3.bf16.msra.mxu1 %v5706_v15  ;;  %v5739_v1 = vld [vmem:[%s7497_s1 + $0x198] sm:$0xff]   ;;  %v5740_v2 = vld [vmem:[%s7497_s1 + $0x160] sm:$0xff]   ;;  %v5744_v6 = vld [vmem:[%s7497_s1 + $0x168] sm:$0xff]  }
  0x12   :  { %5083 = vmatprep.subr.bf16.mxu1 %v5709_v18  ;;  %v875_v56 = vcombine.high %v871_v50, %v871_v50  ;;  %3608 = vmatprep.mubr.bf16.mxu1 %v874_v53  ;;  %v5741_v3 = vld [vmem:[%s7497_s1 + $0x120] sm:$0xff]   ;;  %v5745_v7 = vld [vmem:[%s7497_s1 + $0x128] sm:$0xff]   ;;  %v5748_v10 = vld [vmem:[%s7497_s1 + $0x170] sm:$0xff]   ;;  %v857_v18 = vrot.slane %v6261_v43, %v6257_v41 }
  0x13   :  { %5062 = vmatpush3.bf16.msra.mxu0 %v5708_v17  ;;  %v5742_v4 = vld [vmem:[%s7497_s1 + $0x1e0] sm:$0xff]   ;;  %v5746_v8 = vld [vmem:[%s7497_s1 + $0x1e8] sm:$0xff]   ;;  %v5749_v11 = vld [vmem:[%s7497_s1 + $0x130] sm:$0xff]  }
  0x14   :  { %5063 = vmatprep.subr.bf16.mxu0 %v5711_v20  ;;  %v5743_v5 = vld [vmem:[%s7497_s1 + $0x1a0] sm:$0xff]   ;;  %v5747_v9 = vld [vmem:[%s7497_s1 + $0x1a8] sm:$0xff]   ;;  %v5750_v12 = vld [vmem:[%s7497_s1 + $0x1f0] sm:$0xff]  }
  0x15   :  { %5084 = vmatpush3.bf16.msra.mxu1 %v5710_v19  ;;  %v5751_v13 = vld [vmem:[%s7497_s1 + $0x1b0] sm:$0xff]   ;;  %v5752_v14 = vld [vmem:[%s7497_s1 + $0x178] sm:$0xff]   ;;  %v5756_v19 = vld [vmem:[%s7497_s1 + $0x240] sm:$0xff]  }
  0x16   :  { %5085 = vmatprep.subr.bf16.mxu1 %v5713_v22  ;;  %v5753_v15 = vld [vmem:[%s7497_s1 + $0x138] sm:$0xff]   ;;  %v5757_v20 = vld [vmem:[%s7497_s1 + $0x200] sm:$0xff]   ;;  %v5763_v27 = vld [vmem:[%s7497_s1 + $0x288] sm:$0xff]  }
  0x17   :  { %5064 = vmatpush3.bf16.msra.mxu0 %v5712_v21  ;;  %v5754_v16 = vld [vmem:[%s7497_s1 + $0x1f8] sm:$0xff]   ;;  %v5758_v21 = vld [vmem:[%s7497_s1 + $0x2c0] sm:$0xff]   ;;  %v5777_v42 = vld [vmem:[%s7497_s1 + $0x228] sm:$0xff]  }
  0x18   :  { %5065 = vmatprep.subr.bf16.mxu0 %v5715_v24  ;;  %v5755_v17 = vld [vmem:[%s7497_s1 + $0x1b8] sm:$0xff]   ;;  %v5759_v22 = vld [vmem:[%s7497_s1 + $0x280] sm:$0xff]   ;;  %v5760_v24 = vld [vmem:[%s7497_s1 + $0x248] sm:$0xff]  }
  0x19   :  { %5086 = vmatpush3.bf16.msra.mxu1 %v5714_v23  ;;  %v873_v23 = vcombine.high %v857_v18, %v857_v18  ;;  %v5768_v32 = vld [vmem:[%s7497_s1 + $0x258] sm:$0xff]   ;;  %v5772_v36 = vld [vmem:[%s7497_s1 + $0x260] sm:$0xff]   ;;  %v5778_v43 = vld [vmem:[%s7497_s1 + $0x2e8] sm:$0xff]  }
  0x1a   :  { %5087 = vmatprep.subr.bf16.mxu1 %v5717_v26  ;;  %v5762_v26 = vld [vmem:[%s7497_s1 + $0x2c8] sm:$0xff]   ;;  %v5769_v33 = vld [vmem:[%s7497_s1 + $0x218] sm:$0xff]   ;;  %v5774_v38 = vld [vmem:[%s7497_s1 + $0x2e0] sm:$0xff]  }
  0x1b   :  { %5066 = vmatpush3.bf16.msra.mxu0 %v5716_v25  ;;  %v5761_v25 = vld [vmem:[%s7497_s1 + $0x208] sm:$0xff]   ;;  %v5771_v35 = vld [vmem:[%s7497_s1 + $0x298] sm:$0xff]   ;;  %v5775_v39 = vld [vmem:[%s7497_s1 + $0x2a0] sm:$0xff]  }
  0x1c   :  { %5067 = vmatprep.subr.bf16.mxu0 %v5719_v29  ;;  %v5765_v29 = vld [vmem:[%s7497_s1 + $0x210] sm:$0xff]   ;;  %v5779_v44 = vld [vmem:[%s7497_s1 + $0x2a8] sm:$0xff]  }
  0x1d   :  { %5088 = vmatpush3.bf16.msra.mxu1 %v5718_v28  ;;  %v5764_v28 = vld [vmem:[%s7497_s1 + $0x250] sm:$0xff]   ;;  %v23_v46 = vld [vmem:[%s7496_s0 + $0x8] sm:$0xff] }
  0x1e   :  { %5089 = vmatprep.subr.bf16.mxu1 %v5721_v31  ;;  %v5767_v31 = vld [vmem:[%s7497_s1 + $0x290] sm:$0xff]   ;;  %v883_v48 = vrot.slane %v23_v46, %v6257_v41 }
  0x1f   :  { %5068 = vmatpush3.bf16.msra.mxu0 %v5720_v30  ;;  %v5766_v30 = vld [vmem:[%s7497_s1 + $0x2d0] sm:$0xff]  }
  0x20   :  { %5097 = vmatprep.subr.bf16.mxu0 %v5724_v37  ;;  %v5773_v37 = vld [vmem:[%s7497_s1 + $0x220] sm:$0xff]  }
  0x21   :  { %5090 = vmatpush3.bf16.msra.mxu1 %v5723_v34  ;;  %v5770_v34 = vld [vmem:[%s7497_s1 + $0x2d8] sm:$0xff]  }
  0x22   :  { %5119 = vmatprep.subr.bf16.mxu1 %v5726_v40  ;;  %3569 = vmatmul.mubr.bf16.vlgmr.msra.gmra.mrb[0].mxu0 %v850_v45  ;;  %v5776_v40 = vld [vmem:[%s7497_s1 + $0x268] sm:$0xff]   ;;  %v5780_v45 = vld [vmem:[%s7497_s1 + $0x270] sm:$0xff]  }
  0x23   :  { %5098 = vmatpush3.bf16.msra.mxu0 %v5725_v47  ;;  %3648 = vmatprep.mubr.bf16.mxu0 %v871_v50  ;;  %v5781_v47 = vld [vmem:[%s7497_s1 + $0x230] sm:$0xff]  }
  0x24   :  { %3609 = vmatmul.mubr.bf16.vlgmr.msra.gmra.mrb[0].mxu1 %v872_v51  ;;  %5099 = vmatprep.subr.bf16.mxu0 %v5728_v52  ;;  %v5782_v50 = vld [vmem:[%s7497_s1 + $0x2f0] sm:$0xff]   ;;  %v891_v52 = vcombine.high %v883_v48, %v883_v48 }
  0x25   :  { %5120 = vmatpush3.bf16.msra.mxu1 %v5727_v49  ;;  %3688 = vmatprep.mubr.bf16.mxu1 %v875_v56  ;;  %v876_v49 = vcombine.high %v23_v46, %v23_v46  ;;  %v5783_v51 = vld [vmem:[%s7497_s1 + $0x2b0] sm:$0xff]  }
  0x26   :  { %5121 = vmatprep.subr.bf16.mxu1 %v5730_v55  ;;  %v5785_v55 = vld [vmem:[%s7497_s1 + $0x238] sm:$0xff]   ;;  %v913_v56 = vrot.slane %v891_v52, %v6257_v41  ;;  %v5831_v46 = vld [vmem:[%s7497_s1 + $0x4d0] sm:$0xff]   ;;  %v5837_v52 = vld [vmem:[%s7497_s1 + $0x460] sm:$0xff]  }
  0x27   :  { %5100 = vmatpush3.bf16.msra.mxu0 %v5729_v54  ;;  %v6449_v53 = vrot.slane %v876_v49, %v6257_v41  ;;  %v5784_v54 = vld [vmem:[%s7497_s1 + $0x278] sm:$0xff]  }
  0x28   :  { %5101 = vmatprep.subr.bf16.mxu0 %v5732_v58  ;;  %v5786_v58 = vld [vmem:[%s7497_s1 + $0x2f8] sm:$0xff]  }
  0x29   :  { %5122 = vmatpush3.bf16.msra.mxu1 %v5731_v57  ;;  %v892_v57 = vcombine.high %v6449_v53, %v6449_v53  ;;  %v5834_v49 = vld [vmem:[%s7497_s1 + $0x418] sm:$0xff]  }
  0x2a   :  { %5123 = vmatprep.subr.bf16.mxu1 %v5734_v60  ;;  %v923_v60 = vcombine.high %v913_v56, %v913_v56 }
  0x2b   :  { %5102 = vmatpush3.bf16.msra.mxu0 %v5733_v59  ;;  %v5787_v59 = vld [vmem:[%s7497_s1 + $0x2b8] sm:$0xff]  }
  0x2c   :  { %5103 = vmatprep.subr.bf16.mxu0 %v5736_v62  ;;  %v5788_v62 = vld [vmem:[%s7497_s1 + $0x340] sm:$0xff]  }
  0x2d   :  { %5124 = vmatpush3.bf16.msra.mxu1 %v5735_v61  ;;  %v899_v61 = vrot.slane %v883_v48, %v6257_v41  ;;  %v5833_v48 = vld [vmem:[%s7497_s1 + $0x458] sm:$0xff]  }
  0x2e   :  { %5125 = vmatprep.subr.bf16.mxu1 %v5738_v0  ;;  %v920_v0 = vrot.slane %v892_v57, %v6257_v41  ;;  %v5842_v57 = vld [vmem:[%s7497_s1 + $0x428] sm:$0xff]  }
  0x2f   :  { %5104 = vmatpush3.bf16.msra.mxu0 %v5737_v63  ;;  %v5789_v63 = vld [vmem:[%s7497_s1 + $0x300] sm:$0xff]  }
  0x30   :  { %5105 = vmatprep.subr.bf16.mxu0 %v5740_v2  ;;  %v5791_v2 = vld [vmem:[%s7497_s1 + $0x380] sm:$0xff]  }
  0x31   :  { %5126 = vmatpush3.bf16.msra.mxu1 %v5739_v1  ;;  %v5790_v1 = vld [vmem:[%s7497_s1 + $0x3c0] sm:$0xff]  }
  0x32   :  { %5127 = vmatprep.subr.bf16.mxu1 %v5742_v4  ;;  %v5792_v4 = vld [vmem:[%s7497_s1 + $0x348] sm:$0xff]  }
  0x33   :  { %5106 = vmatpush3.bf16.msra.mxu0 %v5741_v3  ;;  %v921_v3 = vcombine.high %v899_v61, %v899_v61 }
  0x34   :  { %5107 = vmatprep.subr.bf16.mxu0 %v5744_v6  ;;  %v924_v6 = vcombine.high %v920_v0, %v920_v0 }
  0x35   :  { %5128 = vmatpush3.bf16.msra.mxu1 %v5743_v5  ;;  %v5793_v5 = vld [vmem:[%s7497_s1 + $0x308] sm:$0xff]  }
  0x36   :  { %5129 = vmatprep.subr.bf16.mxu1 %v5746_v8  ;;  %v5795_v8 = vld [vmem:[%s7497_s1 + $0x388] sm:$0xff]  }
  0x37   :  { %5108 = vmatpush3.bf16.msra.mxu0 %v5745_v7  ;;  %v5794_v7 = vld [vmem:[%s7497_s1 + $0x3c8] sm:$0xff]  }
  0x38   :  { %5109 = vmatprep.subr.bf16.mxu0 %v5748_v10  ;;  %v5797_v10 = vld [vmem:[%s7497_s1 + $0x310] sm:$0xff]  }
  0x39   :  { %5130 = vmatpush3.bf16.msra.mxu1 %v5747_v9  ;;  %v5796_v9 = vld [vmem:[%s7497_s1 + $0x350] sm:$0xff]  }
  0x3a   :  { %5131 = vmatprep.subr.bf16.mxu1 %v5750_v12  ;;  %v5799_v12 = vld [vmem:[%s7497_s1 + $0x390] sm:$0xff]  }
  0x3b   :  { %5110 = vmatpush3.bf16.msra.mxu0 %v5749_v11  ;;  %v5798_v11 = vld [vmem:[%s7497_s1 + $0x3d0] sm:$0xff]  }
  0x3c   :  { %5111 = vmatprep.subr.bf16.mxu0 %v5752_v14  ;;  %v5801_v14 = vld [vmem:[%s7497_s1 + $0x318] sm:$0xff]  }
  0x3d   :  { %5132 = vmatpush3.bf16.msra.mxu1 %v5751_v13  ;;  %v5800_v13 = vld [vmem:[%s7497_s1 + $0x358] sm:$0xff]  }
  0x3e   :  { %5133 = vmatprep.subr.bf16.mxu1 %v5754_v16  ;;  %v5803_v16 = vld [vmem:[%s7497_s1 + $0x398] sm:$0xff]  }
  0x3f   :  { %5112 = vmatpush3.bf16.msra.mxu0 %v5753_v15  ;;  %v5802_v15 = vld [vmem:[%s7497_s1 + $0x3d8] sm:$0xff]  }
  0x40   :  { %5141 = vmatprep.subr.bf16.mxu0 %v5756_v19  ;;  %v5806_v19 = vld [vmem:[%s7497_s1 + $0x3e0] sm:$0xff]  }
  0x41   :  { %5134 = vmatpush3.bf16.msra.mxu1 %v5755_v17  ;;  %v5804_v17 = vld [vmem:[%s7497_s1 + $0x360] sm:$0xff]  }
  0x42   :  { %3649 = vmatmul.mubr.bf16.vlgmr.msra.gmra.mrb[4].mxu0 %v857_v18  ;;  %5163 = vmatprep.subr.bf16.mxu1 %v5758_v21  ;;  %v5805_v18 = vld [vmem:[%s7497_s1 + $0x320] sm:$0xff]   ;;  %v5808_v21 = vld [vmem:[%s7497_s1 + $0x368] sm:$0xff]  }
  0x43   :  { %5142 = vmatpush3.bf16.msra.mxu0 %v5757_v20  ;;  %3728 = vmatprep.mubr.bf16.mxu0 %v913_v56  ;;  %v5807_v20 = vld [vmem:[%s7497_s1 + $0x3a0] sm:$0xff]   ;;  %v5841_v56 = vld [vmem:[%s7497_s1 + $0x468] sm:$0xff]  }
  0x44   :  { %3689 = vmatmul.mubr.bf16.vlgmr.msra.gmra.mrb[4].mxu1 %v873_v23  ;;  %5143 = vmatprep.subr.bf16.mxu0 %v5760_v24  ;;  %v5810_v23 = vld [vmem:[%s7497_s1 + $0x3e8] sm:$0xff]  }
  0x45   :  { %5164 = vmatpush3.bf16.msra.mxu1 %v5759_v22  ;;  %3768 = vmatprep.mubr.bf16.mxu1 %v923_v60  ;;  %v5809_v22 = vld [vmem:[%s7497_s1 + $0x328] sm:$0xff]   ;;  %v5845_v60 = vld [vmem:[%s7497_s1 + $0x470] sm:$0xff]  }
  0x46   :  { %5165 = vmatprep.subr.bf16.mxu1 %v5762_v26  ;;  %v5811_v24 = vld [vmem:[%s7497_s1 + $0x3a8] sm:$0xff]   ;;  %v5813_v26 = vld [vmem:[%s7497_s1 + $0x330] sm:$0xff]  }
  0x47   :  { %5144 = vmatpush3.bf16.msra.mxu0 %v5761_v25  ;;  %v5812_v25 = vld [vmem:[%s7497_s1 + $0x370] sm:$0xff]  }
  0x48   :  { %5145 = vmatprep.subr.bf16.mxu0 %v5764_v28  ;;  %v5815_v28 = vld [vmem:[%s7497_s1 + $0x3b0] sm:$0xff]  }
  0x49   :  { %5166 = vmatpush3.bf16.msra.mxu1 %v5763_v27  ;;  %v5814_v27 = vld [vmem:[%s7497_s1 + $0x3f0] sm:$0xff]  }
  0x4a   :  { %5167 = vmatprep.subr.bf16.mxu1 %v5766_v30  ;;  %v5817_v30 = vld [vmem:[%s7497_s1 + $0x338] sm:$0xff]  }
  0x4b   :  { %5146 = vmatpush3.bf16.msra.mxu0 %v5765_v29  ;;  %v5816_v29 = vld [vmem:[%s7497_s1 + $0x378] sm:$0xff]  }
  0x4c   :  { %5147 = vmatprep.subr.bf16.mxu0 %v5768_v32  ;;  %v5820_v32 = vld [vmem:[%s7497_s1 + $0x3b8] sm:$0xff]  }
  0x4d   :  { %5168 = vmatpush3.bf16.msra.mxu1 %v5767_v31  ;;  %v5818_v31 = vld [vmem:[%s7497_s1 + $0x3f8] sm:$0xff]  }
  0x4e   :  { %5169 = vmatprep.subr.bf16.mxu1 %v5770_v34  ;;  %v5821_v34 = vld [vmem:[%s7497_s1 + $0x440] sm:$0xff]  }
  0x4f   :  { %5148 = vmatpush3.bf16.msra.mxu0 %v5769_v33  ;;  %v906_v33 = vrot.slane %v6449_v53, %v6257_v41  ;;  %v5838_v53 = vld [vmem:[%s7497_s1 + $0x420] sm:$0xff]  }
  0x50   :  { %5149 = vmatprep.subr.bf16.mxu0 %v5772_v36  ;;  %v5823_v36 = vld [vmem:[%s7497_s1 + $0x4c0] sm:$0xff]  }
  0x51   :  { %5170 = vmatpush3.bf16.msra.mxu1 %v5771_v35  ;;  %v5822_v35 = vld [vmem:[%s7497_s1 + $0x400] sm:$0xff]  }
  0x52   :  { %5171 = vmatprep.subr.bf16.mxu1 %v5774_v38  ;;  %v922_v38 = vcombine.high %v906_v33, %v906_v33 }
  0x53   :  { %5150 = vmatpush3.bf16.msra.mxu0 %v5773_v37  ;;  %v5824_v37 = vld [vmem:[%s7497_s1 + $0x480] sm:$0xff]  }
  0x54   :  { %5151 = vmatprep.subr.bf16.mxu0 %v5776_v40  ;;  %v5826_v40 = vld [vmem:[%s7497_s1 + $0x408] sm:$0xff]  }
  0x55   :  { %5172 = vmatpush3.bf16.msra.mxu1 %v5775_v39  ;;  %v5825_v39 = vld [vmem:[%s7497_s1 + $0x448] sm:$0xff]  }
  0x56   :  { %5173 = vmatprep.subr.bf16.mxu1 %v5778_v43  ;;  %v5828_v43 = vld [vmem:[%s7497_s1 + $0x488] sm:$0xff]  }
  0x57   :  { %5152 = vmatpush3.bf16.msra.mxu0 %v5777_v42  ;;  %v5827_v42 = vld [vmem:[%s7497_s1 + $0x4c8] sm:$0xff]  }
  0x58   :  { %5153 = vmatprep.subr.bf16.mxu0 %v5780_v45  ;;  %v5830_v45 = vld [vmem:[%s7497_s1 + $0x410] sm:$0xff]  }
  0x59   :  { %5174 = vmatpush3.bf16.msra.mxu1 %v5779_v44  ;;  %v5829_v44 = vld [vmem:[%s7497_s1 + $0x450] sm:$0xff]  }
  0x5a   :  { %5175 = vmatprep.subr.bf16.mxu1 %v5782_v50  ;;  %v5835_v50 = vld [vmem:[%s7497_s1 + $0x4d8] sm:$0xff]  }
  0x5b   :  { %5154 = vmatpush3.bf16.msra.mxu0 %v5781_v47  ;;  %v5832_v47 = vld [vmem:[%s7497_s1 + $0x490] sm:$0xff]  }
  0x5c   :  { %5155 = vmatprep.subr.bf16.mxu0 %v5784_v54  ;;  %v5839_v54 = vld [vmem:[%s7497_s1 + $0x4e0] sm:$0xff]  }
  0x5d   :  { %5176 = vmatpush3.bf16.msra.mxu1 %v5783_v51  ;;  %v5836_v51 = vld [vmem:[%s7497_s1 + $0x498] sm:$0xff]  }
  0x5e   :  { %5177 = vmatprep.subr.bf16.mxu1 %v5786_v58  ;;  %v5843_v58 = vld [vmem:[%s7497_s1 + $0x4e8] sm:$0xff]  }
  0x5f   :  { %5156 = vmatpush3.bf16.msra.mxu0 %v5785_v55  ;;  %v5840_v55 = vld [vmem:[%s7497_s1 + $0x4a0] sm:$0xff]  }
  0x60   :  { %5185 = vmatprep.subr.bf16.mxu0 %v5788_v62  ;;  %v5846_v62 = vld [vmem:[%s7497_s1 + $0x430] sm:$0xff]  }
  0x61   :  { %5178 = vmatpush3.bf16.msra.mxu1 %v5787_v59  ;;  %v5844_v59 = vld [vmem:[%s7497_s1 + $0x4a8] sm:$0xff]  }
  0x62   :  { %3729 = vmatmul.mubr.bf16.vlgmr.msra.gmra.mrb[8].mxu0 %v899_v61  ;;  %5207 = vmatprep.subr.bf16.mxu1 %v5790_v1  ;;  %v24_v61 = vld [vmem:[%s7496_s0 + $0x10] sm:$0xff] }
  0x63   :  { %5186 = vmatpush3.bf16.msra.mxu0 %v5789_v63  ;;  %3808 = vmatprep.mubr.bf16.mxu0 %v920_v0  ;;  %v932_v63 = vrot.slane %v24_v61, %v6257_v41  ;;  %v925_v0 = vcombine.high %v24_v61, %v24_v61  ;;  %v5847_v1 = vld [vmem:[%s7497_s1 + $0x4f0] sm:$0xff]  }
  0x64   :  { %3769 = vmatmul.mubr.bf16.vlgmr.msra.gmra.mrb[8].mxu1 %v921_v3  ;;  %5187 = vmatprep.subr.bf16.mxu0 %v5792_v4  ;;  %v5896_v61 = vld [vmem:[%s7497_s1 + $0x6d0] sm:$0xff]  }
  0x65   :  { %5208 = vmatpush3.bf16.msra.mxu1 %v5791_v2  ;;  %3848 = vmatprep.mubr.bf16.mxu1 %v924_v6  ;;  %v5848_v2 = vld [vmem:[%s7497_s1 + $0x4b0] sm:$0xff]   ;;  %v940_v3 = vcombine.high %v932_v63, %v932_v63  ;;  %v6655_v4 = vrot.slane %v925_v0, %v6257_v41  ;;  %v5850_v6 = vld [vmem:[%s7497_s1 + $0x438] sm:$0xff]  }
  0x66   :  { %5209 = vmatprep.subr.bf16.mxu1 %v5794_v7  ;;  %v5899_v0 = vld [vmem:[%s7497_s1 + $0x618] sm:$0xff]  }
  0x67   :  { %5188 = vmatpush3.bf16.msra.mxu0 %v5793_v5  ;;  %v5849_v5 = vld [vmem:[%s7497_s1 + $0x478] sm:$0xff]   ;;  %v962_v7 = vrot.slane %v940_v3, %v6257_v41  ;;  %v5902_v3 = vld [vmem:[%s7497_s1 + $0x660] sm:$0xff]  }
  0x68   :  { %5189 = vmatprep.subr.bf16.mxu0 %v5796_v9  ;;  %v5851_v9 = vld [vmem:[%s7497_s1 + $0x4f8] sm:$0xff]  }
  0x69   :  { %5210 = vmatpush3.bf16.msra.mxu1 %v5795_v8  ;;  %v941_v8 = vcombine.high %v6655_v4, %v6655_v4 }
  0x6a   :  { %5211 = vmatprep.subr.bf16.mxu1 %v5798_v11  ;;  %v972_v11 = vcombine.high %v962_v7, %v962_v7 }
  0x6b   :  { %5190 = vmatpush3.bf16.msra.mxu0 %v5797_v10  ;;  %v5852_v10 = vld [vmem:[%s7497_s1 + $0x4b8] sm:$0xff]  }
  0x6c   :  { %5191 = vmatprep.subr.bf16.mxu0 %v5800_v13  ;;  %v5853_v13 = vld [vmem:[%s7497_s1 + $0x540] sm:$0xff]  }
  0x6d   :  { %5212 = vmatpush3.bf16.msra.mxu1 %v5799_v12  ;;  %v948_v12 = vrot.slane %v932_v63, %v6257_v41  ;;  %v5898_v63 = vld [vmem:[%s7497_s1 + $0x658] sm:$0xff]  }
  0x6e   :  { %5213 = vmatprep.subr.bf16.mxu1 %v5802_v15  ;;  %v969_v15 = vrot.slane %v941_v8, %v6257_v41  ;;  %v5907_v8 = vld [vmem:[%s7497_s1 + $0x628] sm:$0xff]  }
  0x6f   :  { %5192 = vmatpush3.bf16.msra.mxu0 %v5801_v14  ;;  %v5854_v14 = vld [vmem:[%s7497_s1 + $0x500] sm:$0xff]  }
  0x70   :  { %5193 = vmatprep.subr.bf16.mxu0 %v5804_v17  ;;  %v5856_v17 = vld [vmem:[%s7497_s1 + $0x580] sm:$0xff]  }
  0x71   :  { %5214 = vmatpush3.bf16.msra.mxu1 %v5803_v16  ;;  %v5855_v16 = vld [vmem:[%s7497_s1 + $0x5c0] sm:$0xff]  }
  0x72   :  { %5215 = vmatprep.subr.bf16.mxu1 %v5806_v19  ;;  %v5857_v19 = vld [vmem:[%s7497_s1 + $0x548] sm:$0xff]  }
  0x73   :  { %5194 = vmatpush3.bf16.msra.mxu0 %v5805_v18  ;;  %v970_v18 = vcombine.high %v948_v12, %v948_v12 }
  0x74   :  { %5195 = vmatprep.subr.bf16.mxu0 %v5808_v21  ;;  %v973_v21 = vcombine.high %v969_v15, %v969_v15 }
  0x75   :  { %5216 = vmatpush3.bf16.msra.mxu1 %v5807_v20  ;;  %v5858_v20 = vld [vmem:[%s7497_s1 + $0x508] sm:$0xff]  }
  0x76   :  { %5217 = vmatprep.subr.bf16.mxu1 %v5810_v23  ;;  %v5860_v23 = vld [vmem:[%s7497_s1 + $0x588] sm:$0xff]  }
  0x77   :  { %5196 = vmatpush3.bf16.msra.mxu0 %v5809_v22  ;;  %v5859_v22 = vld [vmem:[%s7497_s1 + $0x5c8] sm:$0xff]  }
  0x78   :  { %5197 = vmatprep.subr.bf16.mxu0 %v5812_v25  ;;  %v5862_v25 = vld [vmem:[%s7497_s1 + $0x510] sm:$0xff]  }
  0x79   :  { %5218 = vmatpush3.bf16.msra.mxu1 %v5811_v24  ;;  %v5861_v24 = vld [vmem:[%s7497_s1 + $0x550] sm:$0xff]  }
  0x7a   :  { %5219 = vmatprep.subr.bf16.mxu1 %v5814_v27  ;;  %v5864_v27 = vld [vmem:[%s7497_s1 + $0x590] sm:$0xff]  }
  0x7b   :  { %5198 = vmatpush3.bf16.msra.mxu0 %v5813_v26  ;;  %v5863_v26 = vld [vmem:[%s7497_s1 + $0x5d0] sm:$0xff]  }
  0x7c   :  { %5199 = vmatprep.subr.bf16.mxu0 %v5816_v29  ;;  %v5866_v29 = vld [vmem:[%s7497_s1 + $0x518] sm:$0xff]  }
  0x7d   :  { %5220 = vmatpush3.bf16.msra.mxu1 %v5815_v28  ;;  %v5865_v28 = vld [vmem:[%s7497_s1 + $0x558] sm:$0xff]  }
  0x7e   :  { %5221 = vmatprep.subr.bf16.mxu1 %v5818_v31  ;;  %v5868_v31 = vld [vmem:[%s7497_s1 + $0x598] sm:$0xff]  }
  0x7f   :  { %5200 = vmatpush3.bf16.msra.mxu0 %v5817_v30  ;;  %v5867_v30 = vld [vmem:[%s7497_s1 + $0x5d8] sm:$0xff]  }
  0x80   :  { %5229 = vmatprep.subr.bf16.mxu0 %v5821_v34  ;;  %v5871_v34 = vld [vmem:[%s7497_s1 + $0x5e0] sm:$0xff]  }
  0x81   :  { %5222 = vmatpush3.bf16.msra.mxu1 %v5820_v32  ;;  %v5869_v32 = vld [vmem:[%s7497_s1 + $0x560] sm:$0xff]  }
  0x82   :  { %3809 = vmatmul.mubr.bf16.vlgmr.msra.gmra.mrb[12].mxu0 %v906_v33  ;;  %5251 = vmatprep.subr.bf16.mxu1 %v5823_v36  ;;  %v5870_v33 = vld [vmem:[%s7497_s1 + $0x520] sm:$0xff]   ;;  %v5873_v36 = vld [vmem:[%s7497_s1 + $0x568] sm:$0xff]  }
  0x83   :  { %5230 = vmatpush3.bf16.msra.mxu0 %v5822_v35  ;;  %3888 = vmatprep.mubr.bf16.mxu0 %v962_v7  ;;  %v5872_v35 = vld [vmem:[%s7497_s1 + $0x5a0] sm:$0xff]   ;;  %v5906_v7 = vld [vmem:[%s7497_s1 + $0x668] sm:$0xff]  }
  0x84   :  { %3849 = vmatmul.mubr.bf16.vlgmr.msra.gmra.mrb[12].mxu1 %v922_v38  ;;  %5231 = vmatprep.subr.bf16.mxu0 %v5825_v39  ;;  %v5875_v38 = vld [vmem:[%s7497_s1 + $0x5e8] sm:$0xff]  }
  0x85   :  { %5252 = vmatpush3.bf16.msra.mxu1 %v5824_v37  ;;  %3928 = vmatprep.mubr.bf16.mxu1 %v972_v11  ;;  %v5874_v37 = vld [vmem:[%s7497_s1 + $0x528] sm:$0xff]   ;;  %v5910_v11 = vld [vmem:[%s7497_s1 + $0x670] sm:$0xff]  }
  0x86   :  { %5253 = vmatprep.subr.bf16.mxu1 %v5827_v42  ;;  %v5876_v39 = vld [vmem:[%s7497_s1 + $0x5a8] sm:$0xff]   ;;  %v5878_v42 = vld [vmem:[%s7497_s1 + $0x530] sm:$0xff]  }
  0x87   :  { %5232 = vmatpush3.bf16.msra.mxu0 %v5826_v40  ;;  %v5877_v40 = vld [vmem:[%s7497_s1 + $0x570] sm:$0xff]  }
  0x88   :  { %5233 = vmatprep.subr.bf16.mxu0 %v5829_v44  ;;  %v5880_v44 = vld [vmem:[%s7497_s1 + $0x5b0] sm:$0xff]  }
  0x89   :  { %5254 = vmatpush3.bf16.msra.mxu1 %v5828_v43  ;;  %v5879_v43 = vld [vmem:[%s7497_s1 + $0x5f0] sm:$0xff]  }
  0x8a   :  { %5255 = vmatprep.subr.bf16.mxu1 %v5831_v46  ;;  %v5882_v46 = vld [vmem:[%s7497_s1 + $0x538] sm:$0xff]  }
  0x8b   :  { %5234 = vmatpush3.bf16.msra.mxu0 %v5830_v45  ;;  %v5881_v45 = vld [vmem:[%s7497_s1 + $0x578] sm:$0xff]  }
  0x8c   :  { %5235 = vmatprep.subr.bf16.mxu0 %v5833_v48  ;;  %v5885_v48 = vld [vmem:[%s7497_s1 + $0x5b8] sm:$0xff]  }
  0x8d   :  { %5256 = vmatpush3.bf16.msra.mxu1 %v5832_v47  ;;  %v5883_v47 = vld [vmem:[%s7497_s1 + $0x5f8] sm:$0xff]  }
  0x8e   :  { %5257 = vmatprep.subr.bf16.mxu1 %v5835_v50  ;;  %v5886_v50 = vld [vmem:[%s7497_s1 + $0x640] sm:$0xff]  }
  0x8f   :  { %5236 = vmatpush3.bf16.msra.mxu0 %v5834_v49  ;;  %v955_v49 = vrot.slane %v6655_v4, %v6257_v41  ;;  %v5903_v4 = vld [vmem:[%s7497_s1 + $0x620] sm:$0xff]  }
  0x90   :  { %5237 = vmatprep.subr.bf16.mxu0 %v5837_v52  ;;  %v5888_v52 = vld [vmem:[%s7497_s1 + $0x6c0] sm:$0xff]  }
  0x91   :  { %5258 = vmatpush3.bf16.msra.mxu1 %v5836_v51  ;;  %v5887_v51 = vld [vmem:[%s7497_s1 + $0x600] sm:$0xff]  }
  0x92   :  { %5259 = vmatprep.subr.bf16.mxu1 %v5839_v54  ;;  %v971_v54 = vcombine.high %v955_v49, %v955_v49 }
  0x93   :  { %5238 = vmatpush3.bf16.msra.mxu0 %v5838_v53  ;;  %v5889_v53 = vld [vmem:[%s7497_s1 + $0x680] sm:$0xff]  }
  0x94   :  { %5239 = vmatprep.subr.bf16.mxu0 %v5841_v56  ;;  %v5891_v56 = vld [vmem:[%s7497_s1 + $0x608] sm:$0xff]  }
  0x95   :  { %5260 = vmatpush3.bf16.msra.mxu1 %v5840_v55  ;;  %v5890_v55 = vld [vmem:[%s7497_s1 + $0x648] sm:$0xff]  }
  0x96   :  { %5261 = vmatprep.subr.bf16.mxu1 %v5843_v58  ;;  %v5893_v58 = vld [vmem:[%s7497_s1 + $0x688] sm:$0xff]  }
  0x97   :  { %5240 = vmatpush3.bf16.msra.mxu0 %v5842_v57  ;;  %v5892_v57 = vld [vmem:[%s7497_s1 + $0x6c8] sm:$0xff]  }
  0x98   :  { %5241 = vmatprep.subr.bf16.mxu0 %v5845_v60  ;;  %v5895_v60 = vld [vmem:[%s7497_s1 + $0x610] sm:$0xff]  }
  0x99   :  { %5262 = vmatpush3.bf16.msra.mxu1 %v5844_v59  ;;  %v5894_v59 = vld [vmem:[%s7497_s1 + $0x650] sm:$0xff]  }
  0x9a   :  { %5263 = vmatprep.subr.bf16.mxu1 %v5847_v1  ;;  %v5900_v1 = vld [vmem:[%s7497_s1 + $0x6d8] sm:$0xff]  }
  0x9b   :  { %5242 = vmatpush3.bf16.msra.mxu0 %v5846_v62  ;;  %v5897_v62 = vld [vmem:[%s7497_s1 + $0x690] sm:$0xff]  }
  0x9c   :  { %5243 = vmatprep.subr.bf16.mxu0 %v5849_v5  ;;  %v5904_v5 = vld [vmem:[%s7497_s1 + $0x6e0] sm:$0xff]  }
  0x9d   :  { %5264 = vmatpush3.bf16.msra.mxu1 %v5848_v2  ;;  %v5901_v2 = vld [vmem:[%s7497_s1 + $0x698] sm:$0xff]  }
  0x9e   :  { %5265 = vmatprep.subr.bf16.mxu1 %v5851_v9  ;;  %v5908_v9 = vld [vmem:[%s7497_s1 + $0x6e8] sm:$0xff]  }
  0x9f   :  { %5244 = vmatpush3.bf16.msra.mxu0 %v5850_v6  ;;  %v5905_v6 = vld [vmem:[%s7497_s1 + $0x6a0] sm:$0xff]  }
  0xa0   :  { %5273 = vmatprep.subr.bf16.mxu0 %v5853_v13  ;;  %v5912_v13 = vld [vmem:[%s7497_s1 + $0x6f0] sm:$0xff]  }
  0xa1   :  { %5266 = vmatpush3.bf16.msra.mxu1 %v5852_v10  ;;  %v5909_v10 = vld [vmem:[%s7497_s1 + $0x6a8] sm:$0xff]  }
  0xa2   :  { %3889 = vmatmul.mubr.bf16.vlgmr.msra.gmra.mrb[16].mxu0 %v948_v12  ;;  %5295 = vmatprep.subr.bf16.mxu1 %v5855_v16  ;;  %v25_v12 = vld [vmem:[%s7496_s0 + $0x18] sm:$0xff]  ;;  %v5911_v16 = vld [vmem:[%s7497_s1 + $0x630] sm:$0xff]  }
  0xa3   :  { %5274 = vmatpush3.bf16.msra.mxu0 %v5854_v14  ;;  %3968 = vmatprep.mubr.bf16.mxu0 %v969_v15  ;;  %v981_v14 = vrot.slane %v25_v12, %v6257_v41  ;;  %v974_v15 = vcombine.high %v25_v12, %v25_v12  ;;  %v5950_v12 = vld [vmem:[%s7497_s1 + $0x7b8] sm:$0xff]  }
  0xa4   :  { %3929 = vmatmul.mubr.bf16.vlgmr.msra.gmra.mrb[16].mxu1 %v970_v18  ;;  %5275 = vmatprep.subr.bf16.mxu0 %v5857_v19 }
  0xa5   :  { %5296 = vmatpush3.bf16.msra.mxu1 %v5856_v17  ;;  %4008 = vmatprep.mubr.bf16.mxu1 %v973_v21  ;;  %v5914_v17 = vld [vmem:[%s7497_s1 + $0x678] sm:$0xff]   ;;  %v989_v18 = vcombine.high %v981_v14, %v981_v14  ;;  %v6861_v19 = vrot.slane %v974_v15, %v6257_v41  ;;  %v5952_v15 = vld [vmem:[%s7497_s1 + $0x800] sm:$0xff]  }
  0xa6   :  { %5297 = vmatprep.subr.bf16.mxu1 %v5859_v22  ;;  %v5916_v21 = vld [vmem:[%s7497_s1 + $0x6f8] sm:$0xff]  }
  0xa7   :  { %5276 = vmatpush3.bf16.msra.mxu0 %v5858_v20  ;;  %v5913_v20 = vld [vmem:[%s7497_s1 + $0x6b0] sm:$0xff]   ;;  %v1011_v22 = vrot.slane %v989_v18, %v6257_v41 }
  0xa8   :  { %5277 = vmatprep.subr.bf16.mxu0 %v5861_v24  ;;  %v5915_v24 = vld [vmem:[%s7497_s1 + $0x638] sm:$0xff]  }
  0xa9   :  { %5298 = vmatpush3.bf16.msra.mxu1 %v5860_v23  ;;  %v990_v23 = vcombine.high %v6861_v19, %v6861_v19 }
  0xaa   :  { %5299 = vmatprep.subr.bf16.mxu1 %v5863_v26  ;;  %v5918_v26 = vld [vmem:[%s7497_s1 + $0x740] sm:$0xff]  }
  0xab   :  { %5278 = vmatpush3.bf16.msra.mxu0 %v5862_v25  ;;  %v997_v25 = vrot.slane %v981_v14, %v6257_v41  ;;  %v5951_v14 = vld [vmem:[%s7497_s1 + $0x840] sm:$0xff]  }
  0xac   :  { %5279 = vmatprep.subr.bf16.mxu0 %v5865_v28  ;;  %v5917_v28 = vld [vmem:[%s7497_s1 + $0x6b8] sm:$0xff]  }
  0xad   :  { %5300 = vmatpush3.bf16.msra.mxu1 %v5864_v27  ;;  %v1021_v27 = vcombine.high %v1011_v22, %v1011_v22 }
  0xae   :  { %5301 = vmatprep.subr.bf16.mxu1 %v5867_v30  ;;  %v5920_v30 = vld [vmem:[%s7497_s1 + $0x7c0] sm:$0xff]  }
  0xaf   :  { %5280 = vmatpush3.bf16.msra.mxu0 %v5866_v29  ;;  %v1018_v29 = vrot.slane %v990_v23, %v6257_v41  ;;  %v5959_v23 = vld [vmem:[%s7497_s1 + $0x850] sm:$0xff]  }
  0xb0   :  { %5281 = vmatprep.subr.bf16.mxu0 %v5869_v32  ;;  %v1019_v32 = vcombine.high %v997_v25, %v997_v25 }
  0xb1   :  { %5302 = vmatpush3.bf16.msra.mxu1 %v5868_v31  ;;  %v5919_v31 = vld [vmem:[%s7497_s1 + $0x700] sm:$0xff]  }
  0xb2   :  { %5303 = vmatprep.subr.bf16.mxu1 %v5871_v34  ;;  %v5921_v34 = vld [vmem:[%s7497_s1 + $0x780] sm:$0xff]  }
  0xb3   :  { %5282 = vmatpush3.bf16.msra.mxu0 %v5870_v33  ;;  %v5922_v33 = vld [vmem:[%s7497_s1 + $0x748] sm:$0xff]  }
  0xb4   :  { %5283 = vmatprep.subr.bf16.mxu0 %v5873_v36  ;;  %v5924_v36 = vld [vmem:[%s7497_s1 + $0x7c8] sm:$0xff]  }
  0xb5   :  { %5304 = vmatpush3.bf16.msra.mxu1 %v5872_v35  ;;  %v1022_v35 = vcombine.high %v1018_v29, %v1018_v29 }
  0xb6   :  { %5305 = vmatprep.subr.bf16.mxu1 %v5875_v38  ;;  %v5926_v38 = vld [vmem:[%s7497_s1 + $0x750] sm:$0xff]  }
  0xb7   :  { %5284 = vmatpush3.bf16.msra.mxu0 %v5874_v37  ;;  %v5923_v37 = vld [vmem:[%s7497_s1 + $0x708] sm:$0xff]  }
  0xb8   :  { %5285 = vmatprep.subr.bf16.mxu0 %v5877_v40  ;;  %v5928_v40 = vld [vmem:[%s7497_s1 + $0x7d0] sm:$0xff]  }
  0xb9   :  { %5306 = vmatpush3.bf16.msra.mxu1 %v5876_v39  ;;  %v5925_v39 = vld [vmem:[%s7497_s1 + $0x788] sm:$0xff]  }
  0xba   :  { %5307 = vmatprep.subr.bf16.mxu1 %v5879_v43  ;;  %v5930_v43 = vld [vmem:[%s7497_s1 + $0x758] sm:$0xff]  }
  0xbb   :  { %5286 = vmatpush3.bf16.msra.mxu0 %v5878_v42  ;;  %v5927_v42 = vld [vmem:[%s7497_s1 + $0x710] sm:$0xff]  }
  0xbc   :  { %5287 = vmatprep.subr.bf16.mxu0 %v5881_v45  ;;  %v5931_v45 = vld [vmem:[%s7497_s1 + $0x718] sm:$0xff]  }
  0xbd   :  { %5308 = vmatpush3.bf16.msra.mxu1 %v5880_v44  ;;  %v5929_v44 = vld [vmem:[%s7497_s1 + $0x790] sm:$0xff]  }
  0xbe   :  { %5309 = vmatprep.subr.bf16.mxu1 %v5883_v47  ;;  %v5933_v47 = vld [vmem:[%s7497_s1 + $0x798] sm:$0xff]  }
  0xbf   :  { %5288 = vmatpush3.bf16.msra.mxu0 %v5882_v46  ;;  %v5932_v46 = vld [vmem:[%s7497_s1 + $0x7d8] sm:$0xff]  }
  0xc0   :  { %5317 = vmatprep.subr.bf16.mxu0 %v5886_v50  ;;  %v5936_v50 = vld [vmem:[%s7497_s1 + $0x7e0] sm:$0xff]  }
  0xc1   :  { %5310 = vmatpush3.bf16.msra.mxu1 %v5885_v48  ;;  %v5934_v48 = vld [vmem:[%s7497_s1 + $0x760] sm:$0xff]  }
  0xc2   :  { %3969 = vmatmul.mubr.bf16.vlgmr.msra.gmra.mrb[20].mxu0 %v955_v49  ;;  %5339 = vmatprep.subr.bf16.mxu1 %v5888_v52  ;;  %v5935_v49 = vld [vmem:[%s7497_s1 + $0x720] sm:$0xff]   ;;  %v5938_v52 = vld [vmem:[%s7497_s1 + $0x768] sm:$0xff]  }
  0xc3   :  { %5318 = vmatpush3.bf16.msra.mxu0 %v5887_v51  ;;  %4048 = vmatprep.mubr.bf16.mxu0 %v1011_v22  ;;  %v5937_v51 = vld [vmem:[%s7497_s1 + $0x7a0] sm:$0xff]   ;;  %v5958_v22 = vld [vmem:[%s7497_s1 + $0x888] sm:$0xff]  }
  0xc4   :  { %4009 = vmatmul.mubr.bf16.vlgmr.msra.gmra.mrb[20].mxu1 %v971_v54  ;;  %5319 = vmatprep.subr.bf16.mxu0 %v5890_v55  ;;  %v5940_v54 = vld [vmem:[%s7497_s1 + $0x7e8] sm:$0xff]  }
  0xc5   :  { %5340 = vmatpush3.bf16.msra.mxu1 %v5889_v53  ;;  %4088 = vmatprep.mubr.bf16.mxu1 %v1021_v27  ;;  %v5939_v53 = vld [vmem:[%s7497_s1 + $0x728] sm:$0xff]   ;;  %v5963_v27 = vld [vmem:[%s7497_s1 + $0x858] sm:$0xff]  }
  0xc6   :  { %5341 = vmatprep.subr.bf16.mxu1 %v5892_v57  ;;  %v5941_v55 = vld [vmem:[%s7497_s1 + $0x7a8] sm:$0xff]   ;;  %v5942_v57 = vld [vmem:[%s7497_s1 + $0x770] sm:$0xff]  }
  0xc7   :  { %5320 = vmatpush3.bf16.msra.mxu0 %v5891_v56  ;;  %v4658_v56 = vld [vmem:[%s7498_s2] ss:$0 sm:$0xff] }
  0xc8   :  { %5321 = vmatprep.subr.bf16.mxu0 %v5894_v59  ;;  %v5943_v59 = vld [vmem:[%s7497_s1 + $0x730] sm:$0xff]  }
  0xc9   :  { %5342 = vmatpush3.bf16.msra.mxu1 %v5893_v58 }
  0xca   :  { %5343 = vmatprep.subr.bf16.mxu1 %v5896_v61  ;;  %v5944_v61 = vld [vmem:[%s7497_s1 + $0x7f0] sm:$0xff]  }
  0xcb   :  { %5322 = vmatpush3.bf16.msra.mxu0 %v5895_v60 }
  0xcc   :  { %5323 = vmatprep.subr.bf16.mxu0 %v5898_v63 }
  0xcd   :  { %5344 = vmatpush3.bf16.msra.mxu1 %v5897_v62 }
  0xce   :  { %5345 = vmatprep.subr.bf16.mxu1 %v5900_v1  ;;  %v5945_v1 = vld [vmem:[%s7497_s1 + $0x7b0] sm:$0xff]  }
  0xcf   :  { %5324 = vmatpush3.bf16.msra.mxu0 %v5899_v0 }
  0xd0   :  { %5325 = vmatprep.subr.bf16.mxu0 %v5902_v3 }
  0xd1   :  { %5346 = vmatpush3.bf16.msra.mxu1 %v5901_v2  ;;  %v5946_v2 = vld [vmem:[%s7497_s1 + $0x778] sm:$0xff]  }
  0xd2   :  { %5347 = vmatprep.subr.bf16.mxu1 %v5904_v5 }
  0xd3   :  { %5326 = vmatpush3.bf16.msra.mxu0 %v5903_v4 }
  0xd4   :  { %5327 = vmatprep.subr.bf16.mxu0 %v5906_v7  ;;  %v5947_v7 = vld [vmem:[%s7497_s1 + $0x738] sm:$0xff]  }
  0xd5   :  { %5348 = vmatpush3.bf16.msra.mxu1 %v5905_v6 }
  0xd6   :  { %5349 = vmatprep.subr.bf16.mxu1 %v5908_v9  ;;  %v5948_v9 = vld [vmem:[%s7497_s1 + $0x7f8] sm:$0xff]  }
  0xd7   :  { %5328 = vmatpush3.bf16.msra.mxu0 %v5907_v8 }
  0xd8   :  { %5329 = vmatprep.subr.bf16.mxu0 %v5910_v11 }
  0xd9   :  { %5350 = vmatpush3.bf16.msra.mxu1 %v5909_v10 }
  0xda   :  { %5351 = vmatprep.subr.bf16.mxu1 %v5912_v13  ;;  %v1004_v13 = vrot.slane %v6861_v19, %v6257_v41  ;;  %v5955_v19 = vld [vmem:[%s7497_s1 + $0x848] sm:$0xff]  }
  0xdb   :  { %5330 = vmatpush3.bf16.msra.mxu0 %v5911_v16  ;;  %v5953_v16 = vld [vmem:[%s7497_s1 + $0x8c0] sm:$0xff]  }
  0xdc   :  { %5331 = vmatprep.subr.bf16.mxu0 %v5914_v17  ;;  %v5954_v17 = vld [vmem:[%s7497_s1 + $0x880] sm:$0xff]   ;;  %v1020_v18 = vcombine.high %v1004_v13, %v1004_v13 }
  0xdd   :  { %5352 = vmatpush3.bf16.msra.mxu1 %v5913_v20  ;;  %v5956_v20 = vld [vmem:[%s7497_s1 + $0x808] sm:$0xff]  }
  0xde   :  { %5353 = vmatprep.subr.bf16.mxu1 %v5916_v21  ;;  %v5957_v21 = vld [vmem:[%s7497_s1 + $0x8c8] sm:$0xff]  }
  0xdf   :  { %5332 = vmatpush3.bf16.msra.mxu0 %v5915_v24  ;;  %v5960_v24 = vld [vmem:[%s7497_s1 + $0x810] sm:$0xff]  }
  0xe0   :  { %5361 = vmatprep.subr.bf16.mxu0 %v5918_v26  ;;  %v5962_v26 = vld [vmem:[%s7497_s1 + $0x890] sm:$0xff]  }
  0xe1   :  { %5354 = vmatpush3.bf16.msra.mxu1 %v5917_v28  ;;  %v5964_v28 = vld [vmem:[%s7497_s1 + $0x818] sm:$0xff]  }
  0xe2   :  { %4049 = vmatmul.mubr.bf16.vlgmr.msra.gmra.mrb[24].mxu0 %v997_v25  ;;  %5383 = vmatprep.subr.bf16.mxu1 %v5920_v30  ;;  %v5961_v25 = vld [vmem:[%s7497_s1 + $0x8d0] sm:$0xff]   ;;  %v5966_v30 = vld [vmem:[%s7497_s1 + $0x898] sm:$0xff]  }
  0xe3   :  { %5362 = vmatpush3.bf16.msra.mxu0 %v5919_v31  ;;  %4128 = vmatprep.mubr.bf16.mxu0 %v1018_v29  ;;  %v5965_v29 = vld [vmem:[%s7497_s1 + $0x8d8] sm:$0xff]   ;;  %v5967_v31 = vld [vmem:[%s7497_s1 + $0x860] sm:$0xff]  }
  0xe4   :  { %4089 = vmatmul.mubr.bf16.vlgmr.msra.gmra.mrb[24].mxu1 %v1019_v32  ;;  %5363 = vmatprep.subr.bf16.mxu0 %v5922_v33  ;;  %v5968_v32 = vld [vmem:[%s7497_s1 + $0x820] sm:$0xff]  }
  0xe5   :  { %5384 = vmatpush3.bf16.msra.mxu1 %v5921_v34  ;;  %4168 = vmatprep.mubr.bf16.mxu1 %v1022_v35  ;;  %v5969_v33 = vld [vmem:[%s7497_s1 + $0x8e0] sm:$0xff]   ;;  %v5971_v35 = vld [vmem:[%s7497_s1 + $0x868] sm:$0xff]  }
  0xe6   :  { %5385 = vmatprep.subr.bf16.mxu1 %v5924_v36  ;;  %v5970_v34 = vld [vmem:[%s7497_s1 + $0x8a0] sm:$0xff]   ;;  %v5972_v36 = vld [vmem:[%s7497_s1 + $0x828] sm:$0xff]  }
  0xe7   :  { %5364 = vmatpush3.bf16.msra.mxu0 %v5923_v37  ;;  %v5973_v37 = vld [vmem:[%s7497_s1 + $0x8e8] sm:$0xff]  }
  0xe8   :  { %5365 = vmatprep.subr.bf16.mxu0 %v5926_v38  ;;  %v5974_v38 = vld [vmem:[%s7497_s1 + $0x8a8] sm:$0xff]  }
  0xe9   :  { %5386 = vmatpush3.bf16.msra.mxu1 %v5925_v39  ;;  %v5975_v39 = vld [vmem:[%s7497_s1 + $0x870] sm:$0xff]  }
  0xea   :  { %5387 = vmatprep.subr.bf16.mxu1 %v5928_v40 }
  0xeb   :  { %5366 = vmatpush3.bf16.msra.mxu0 %v5927_v42  ;;  %v5976_v42 = vld [vmem:[%s7497_s1 + $0x830] sm:$0xff]  }
  0xec   :  { %5367 = vmatprep.subr.bf16.mxu0 %v5930_v43  ;;  %v5977_v43 = vld [vmem:[%s7497_s1 + $0x8f0] sm:$0xff]  }
  0xed   :  { %5388 = vmatpush3.bf16.msra.mxu1 %v5929_v44 }
  0xee   :  { %5389 = vmatprep.subr.bf16.mxu1 %v5932_v46 }
  0xef   :  { %5368 = vmatpush3.bf16.msra.mxu0 %v5931_v45  ;;  %v26_v45 = vld [vmem:[%s7496_s0 + $0x20] sm:$0xff] }
  0xf0   :  { %5369 = vmatprep.subr.bf16.mxu0 %v5934_v48 }
  0xf1   :  { %5390 = vmatpush3.bf16.msra.mxu1 %v5933_v47 }
  0xf2   :  { %5391 = vmatprep.subr.bf16.mxu1 %v5936_v50  ;;  %v5979_v50 = vld [vmem:[%s7497_s1 + $0x878] sm:$0xff]  }
  0xf3   :  { %5370 = vmatpush3.bf16.msra.mxu0 %v5935_v49  ;;  %v5978_v49 = vld [vmem:[%s7497_s1 + $0x8b0] sm:$0xff]  }
  0xf4   :  { %5371 = vmatprep.subr.bf16.mxu0 %v5938_v52  ;;  %v1023_v52 = vcombine.high %v26_v45, %v26_v45 }
  0xf5   :  { %v5069_v58 = vpop.f32.mrb[0].mxu0  ;;  %5392 = vmatpush3.bf16.msra.mxu1 %v5937_v51  ;;  %v1030_v51 = vrot.slane %v26_v45, %v6257_v41 }
  0xf6   :  { %v5070_v60 = vpop.f32.mrb[1].mxu0  ;;  %5393 = vmatprep.subr.bf16.mxu1 %v5940_v54 }
  0xf7   :  { %v5071_v62 = vadd.f32 %v5070_v60, %v5069_v58  ;;  %v5072_v63 = vpop.f32.mrb[2].mxu0  ;;  %v5091_v0 = vpop.f32.mrb[0].mxu1  ;;  %5372 = vmatpush3.bf16.msra.mxu0 %v5939_v53  ;;  %v1038_v58 = vcombine.high %v1030_v51, %v1030_v51  ;;  %v5981_v60 = vld [vmem:[%s7497_s1 + $0x8f8] sm:$0xff]  }
  0xf8   :  { %v5073_v3 = vpop.f32.mrb[3].mxu0  ;;  %v5092_v4 = vpop.f32.mrb[1].mxu1  ;;  %5373 = vmatprep.subr.bf16.mxu0 %v5942_v57  ;;  %v5980_v57 = vld [vmem:[%s7497_s1 + $0x838] sm:$0xff]  }
  0xf9   :  { %v3571_v5 = vadd.f32 %v5071_v62, %v4658_v56  ;;  %v5093_v6 = vadd.f32 %v5092_v4, %v5091_v0  ;;  %5394 = vmatpush3.bf16.msra.mxu1 %v5941_v55  ;;  %v5094_v8 = vpop.f32.mrb[2].mxu1  ;;  %v7082_v62 = vrot.slane %v1023_v52, %v6257_v41  ;;  %v1060_v0 = vrot.slane %v1038_v58, %v6257_v41  ;;  %v5983_v3 = vld [vmem:[%s7497_s1 + $0x940] sm:$0xff]   ;;  %v6015_v52 = vld [vmem:[%s7497_s1 + $0x9b8] sm:$0xff]  }
  0xfa   :  { %5395 = vmatprep.subr.bf16.mxu1 %v5944_v61  ;;  %v5095_v10 = vpop.f32.mrb[3].mxu1 }
  0xfb   :  { %v6976_v11 = vadd.f32 %v5093_v6, %v3571_v5  ;;  %5374 = vmatpush3.bf16.msra.mxu0 %v5943_v59  ;;  %v1039_v4 = vcombine.high %v7082_v62, %v7082_v62  ;;  %v1070_v5 = vcombine.high %v1060_v0, %v1060_v0  ;;  %v5984_v6 = vld [vmem:[%s7497_s1 + $0x900] sm:$0xff]  }
  0xfc   :  { %5375 = vmatprep.subr.bf16.mxu0 %v5946_v2  ;;  %v1046_v2 = vrot.slane %v1030_v51, %v6257_v41 }
  0xfd   :  { %5396 = vmatpush3.bf16.msra.mxu1 %v5945_v1  ;;  %v5982_v1 = vld [vmem:[%s7497_s1 + $0x8b8] sm:$0xff]   ;;  %v1067_v8 = vrot.slane %v1039_v4, %v6257_v41 }
  0xfe   :  { %5397 = vmatprep.subr.bf16.mxu1 %v5948_v9  ;;  %v5986_v9 = vld [vmem:[%s7497_s1 + $0x980] sm:$0xff]   ;;  %v1068_v10 = vcombine.high %v1046_v2, %v1046_v2  ;;  %v6029_v4 = vld [vmem:[%s7497_s1 + $0xa18] sm:$0xff]  }
  0xff   :  { %5376 = vmatpush3.bf16.msra.mxu0 %v5947_v7  ;;  %v5985_v7 = vld [vmem:[%s7497_s1 + $0x9c0] sm:$0xff]  }
 0x100   :  { %5405 = vmatprep.subr.bf16.mxu0 %v5951_v14  ;;  %v5989_v14 = vld [vmem:[%s7497_s1 + $0x9c8] sm:$0xff]  }
 0x101   :  { %5398 = vmatpush3.bf16.msra.mxu1 %v5950_v12  ;;  %v5988_v12 = vld [vmem:[%s7497_s1 + $0x908] sm:$0xff]  }
 0x102   :  { %4129 = vmatmul.mubr.bf16.vlgmr.msra.gmra.mrb[28].mxu0 %v1004_v13  ;;  %5427 = vmatprep.subr.bf16.mxu1 %v5953_v16  ;;  %v1071_v13 = vcombine.high %v1067_v8, %v1067_v8  ;;  %v5991_v16 = vld [vmem:[%s7497_s1 + $0x950] sm:$0xff]  }
 0x103   :  { %5406 = vmatpush3.bf16.msra.mxu0 %v5952_v15  ;;  %4208 = vmatprep.mubr.bf16.mxu0 %v1060_v0  ;;  %v5990_v15 = vld [vmem:[%s7497_s1 + $0x988] sm:$0xff]   ;;  %v6025_v0 = vld [vmem:[%s7497_s1 + $0xa10] sm:$0xff]  }
 0x104   :  { %4169 = vmatmul.mubr.bf16.vlgmr.msra.gmra.mrb[28].mxu1 %v1020_v18  ;;  %5407 = vmatprep.subr.bf16.mxu0 %v5955_v19  ;;  %v5993_v18 = vld [vmem:[%s7497_s1 + $0x9d0] sm:$0xff]  }
 0x105   :  { %5428 = vmatpush3.bf16.msra.mxu1 %v5954_v17  ;;  %4248 = vmatprep.mubr.bf16.mxu1 %v1070_v5  ;;  %v5992_v17 = vld [vmem:[%s7497_s1 + $0x910] sm:$0xff]   ;;  %v6030_v5 = vld [vmem:[%s7497_s1 + $0xad8] sm:$0xff]  }
 0x106   :  { %5429 = vmatprep.subr.bf16.mxu1 %v5957_v21  ;;  %v5994_v19 = vld [vmem:[%s7497_s1 + $0x990] sm:$0xff]   ;;  %v5996_v21 = vld [vmem:[%s7497_s1 + $0x918] sm:$0xff]  }
 0x107   :  { %5408 = vmatpush3.bf16.msra.mxu0 %v5956_v20  ;;  %v5995_v20 = vld [vmem:[%s7497_s1 + $0x958] sm:$0xff]  }
 0x108   :  { %5409 = vmatprep.subr.bf16.mxu0 %v5959_v23  ;;  %v5998_v23 = vld [vmem:[%s7497_s1 + $0x998] sm:$0xff]  }
 0x109   :  { %5430 = vmatpush3.bf16.msra.mxu1 %v5958_v22  ;;  %v5997_v22 = vld [vmem:[%s7497_s1 + $0x9d8] sm:$0xff]  }
 0x10a   :  { %5431 = vmatprep.subr.bf16.mxu1 %v5961_v25  ;;  %v6000_v25 = vld [vmem:[%s7497_s1 + $0x920] sm:$0xff]  }
 0x10b   :  { %5410 = vmatpush3.bf16.msra.mxu0 %v5960_v24  ;;  %v5999_v24 = vld [vmem:[%s7497_s1 + $0x960] sm:$0xff]  }
 0x10c   :  { %5411 = vmatprep.subr.bf16.mxu0 %v5963_v27  ;;  %v6002_v27 = vld [vmem:[%s7497_s1 + $0x9a0] sm:$0xff]  }
 0x10d   :  { %5432 = vmatpush3.bf16.msra.mxu1 %v5962_v26  ;;  %v6001_v26 = vld [vmem:[%s7497_s1 + $0x9e0] sm:$0xff]  }
 0x10e   :  { %5433 = vmatprep.subr.bf16.mxu1 %v5965_v29  ;;  %v6004_v29 = vld [vmem:[%s7497_s1 + $0x928] sm:$0xff]  }
 0x10f   :  { %5412 = vmatpush3.bf16.msra.mxu0 %v5964_v28  ;;  %v6003_v28 = vld [vmem:[%s7497_s1 + $0x968] sm:$0xff]  }
 0x110   :  { %5413 = vmatprep.subr.bf16.mxu0 %v5967_v31  ;;  %v6006_v31 = vld [vmem:[%s7497_s1 + $0x9a8] sm:$0xff]  }
 0x111   :  { %5434 = vmatpush3.bf16.msra.mxu1 %v5966_v30  ;;  %v6005_v30 = vld [vmem:[%s7497_s1 + $0x9e8] sm:$0xff]  }
 0x112   :  { %5435 = vmatprep.subr.bf16.mxu1 %v5969_v33 }
 0x113   :  { %5414 = vmatpush3.bf16.msra.mxu0 %v5968_v32  ;;  %v6007_v32 = vld [vmem:[%s7497_s1 + $0x970] sm:$0xff]  }
 0x114   :  { %5415 = vmatprep.subr.bf16.mxu0 %v5971_v35 }
 0x115   :  { %v5113_v40 = vpop.f32.mrb[4].mxu0  ;;  %5436 = vmatpush3.bf16.msra.mxu1 %v5970_v34  ;;  %v6008_v34 = vld [vmem:[%s7497_s1 + $0x930] sm:$0xff]  }
 0x116   :  { %v5114_v44 = vpop.f32.mrb[5].mxu0  ;;  %5437 = vmatprep.subr.bf16.mxu1 %v5973_v37 }
 0x117   :  { %v5115_v46 = vadd.f32 %v5114_v44, %v5113_v40  ;;  %v5116_v47 = vpop.f32.mrb[6].mxu0  ;;  %v5135_v48 = vpop.f32.mrb[4].mxu1  ;;  %5416 = vmatpush3.bf16.msra.mxu0 %v5972_v36  ;;  %v6009_v36 = vld [vmem:[%s7497_s1 + $0x9f0] sm:$0xff]  }
 0x118   :  { %v5117_v53 = vpop.f32.mrb[7].mxu0  ;;  %v5136_v54 = vpop.f32.mrb[5].mxu1  ;;  %5417 = vmatprep.subr.bf16.mxu0 %v5975_v39  ;;  %v6010_v40 = vld [vmem:[%s7497_s1 + $0x9b0] sm:$0xff]   ;;  %v6012_v47 = vld [vmem:[%s7497_s1 + $0x938] sm:$0xff]  }
 0x119   :  { %v3651_v55 = vadd.f32 %v5115_v46, %v6976_v11  ;;  %v5137_v56 = vadd.f32 %v5136_v54, %v5135_v48  ;;  %5438 = vmatpush3.bf16.msra.mxu1 %v5974_v38  ;;  %v5138_v59 = vpop.f32.mrb[6].mxu1  ;;  %v5987_v11 = vld [vmem:[%s7497_s1 + $0x948] sm:$0xff]   ;;  %v1053_v53 = vrot.slane %v7082_v62, %v6257_v41  ;;  %v6016_v54 = vld [vmem:[%s7497_s1 + $0xa40] sm:$0xff]  }
 0x11a   :  { %5439 = vmatprep.subr.bf16.mxu1 %v5977_v43  ;;  %v5139_v61 = vpop.f32.mrb[7].mxu1  ;;  %v6020_v59 = vld [vmem:[%s7497_s1 + $0xa48] sm:$0xff]  }
 0x11b   :  { %v7084_v63 = vadd.f32 %v5137_v56, %v3651_v55  ;;  %5418 = vmatpush3.bf16.msra.mxu0 %v5976_v42  ;;  %v6011_v42 = vld [vmem:[%s7497_s1 + $0x978] sm:$0xff]   ;;  %v6017_v55 = vld [vmem:[%s7497_s1 + $0xa00] sm:$0xff]   ;;  %v1069_v58 = vcombine.high %v1053_v53, %v1053_v53  ;;  %v6022_v61 = vld [vmem:[%s7497_s1 + $0xac8] sm:$0xff]  }
 0x11c   :  { %5419 = vmatprep.subr.bf16.mxu0 %v5979_v50  ;;  %v6018_v56 = vld [vmem:[%s7497_s1 + $0xac0] sm:$0xff]   ;;  %v6023_v62 = vld [vmem:[%s7497_s1 + $0xa88] sm:$0xff]  }
 0x11d   :  { %5440 = vmatpush3.bf16.msra.mxu1 %v5978_v49  ;;  %v6013_v49 = vld [vmem:[%s7497_s1 + $0x9f8] sm:$0xff]  }
 0x11e   :  { %5441 = vmatprep.subr.bf16.mxu1 %v5981_v60  ;;  %v6021_v60 = vld [vmem:[%s7497_s1 + $0xa08] sm:$0xff]  }
 0x11f   :  { %5420 = vmatpush3.bf16.msra.mxu0 %v5980_v57  ;;  %v6019_v57 = vld [vmem:[%s7497_s1 + $0xa80] sm:$0xff]  }
 0x120   :  { %5449 = vmatprep.subr.bf16.mxu0 %v5983_v3  ;;  %v6028_v3 = vld [vmem:[%s7497_s1 + $0xa58] sm:$0xff]  }
 0x121   :  { %5442 = vmatpush3.bf16.msra.mxu1 %v5982_v1  ;;  %v6026_v1 = vld [vmem:[%s7497_s1 + $0xad0] sm:$0xff]  }
 0x122   :  { %4209 = vmatmul.mubr.bf16.vlgmr.msra.gmra.mrb[32].mxu0 %v1046_v2  ;;  %5471 = vmatprep.subr.bf16.mxu1 %v5985_v7  ;;  %v6027_v2 = vld [vmem:[%s7497_s1 + $0xa90] sm:$0xff]   ;;  %v6032_v7 = vld [vmem:[%s7497_s1 + $0xa60] sm:$0xff]  }
 0x123   :  { %5450 = vmatpush3.bf16.msra.mxu0 %v5984_v6  ;;  %4288 = vmatprep.mubr.bf16.mxu0 %v1067_v8  ;;  %v6031_v6 = vld [vmem:[%s7497_s1 + $0xa98] sm:$0xff]   ;;  %v6033_v8 = vld [vmem:[%s7497_s1 + $0xa20] sm:$0xff]  }
 0x124   :  { %4249 = vmatmul.mubr.bf16.vlgmr.msra.gmra.mrb[32].mxu1 %v1068_v10  ;;  %5451 = vmatprep.subr.bf16.mxu0 %v5987_v11  ;;  %v6035_v10 = vld [vmem:[%s7497_s1 + $0xaa0] sm:$0xff]   ;;  %v6036_v11 = vld [vmem:[%s7497_s1 + $0xa68] sm:$0xff]  }
 0x125   :  { %5472 = vmatpush3.bf16.msra.mxu1 %v5986_v9  ;;  %4328 = vmatprep.mubr.bf16.mxu1 %v1071_v13  ;;  %v6034_v9 = vld [vmem:[%s7497_s1 + $0xae0] sm:$0xff]   ;;  %v6038_v13 = vld [vmem:[%s7497_s1 + $0xae8] sm:$0xff]  }
 0x126   :  { %5473 = vmatprep.subr.bf16.mxu1 %v5989_v14  ;;  %v6039_v14 = vld [vmem:[%s7497_s1 + $0xaa8] sm:$0xff]  }
 0x127   :  { %5452 = vmatpush3.bf16.msra.mxu0 %v5988_v12  ;;  %v6037_v12 = vld [vmem:[%s7497_s1 + $0xa28] sm:$0xff]  }
 0x128   :  { %5453 = vmatprep.subr.bf16.mxu0 %v5991_v16 }
 0x129   :  { %5474 = vmatpush3.bf16.msra.mxu1 %v5990_v15  ;;  %v6040_v15 = vld [vmem:[%s7497_s1 + $0xa70] sm:$0xff]  }
 0x12a   :  { %5475 = vmatprep.subr.bf16.mxu1 %v5993_v18 }
 0x12b   :  { %5454 = vmatpush3.bf16.msra.mxu0 %v5992_v17  ;;  %v6041_v17 = vld [vmem:[%s7497_s1 + $0xa30] sm:$0xff]  }
 0x12c   :  { %5455 = vmatprep.subr.bf16.mxu0 %v5995_v20 }
 0x12d   :  { %5476 = vmatpush3.bf16.msra.mxu1 %v5994_v19  ;;  %v6042_v19 = vld [vmem:[%s7497_s1 + $0xaf0] sm:$0xff]  }
 0x12e   :  { %5477 = vmatprep.subr.bf16.mxu1 %v5997_v22 }
 0x12f   :  { %5456 = vmatpush3.bf16.msra.mxu0 %v5996_v21 }
 0x130   :  { %5457 = vmatprep.subr.bf16.mxu0 %v5999_v24  ;;  %v27_v24 = vld [vmem:[%s7496_s0 + $0x28] sm:$0xff] }
 0x131   :  { %5478 = vmatpush3.bf16.msra.mxu1 %v5998_v23  ;;  %v6044_v23 = vld [vmem:[%s7497_s1 + $0xa78] sm:$0xff]  }
 0x132   :  { %5479 = vmatprep.subr.bf16.mxu1 %v6001_v26 }
 0x133   :  { %5458 = vmatpush3.bf16.msra.mxu0 %v6000_v25 }
 0x134   :  { %5459 = vmatprep.subr.bf16.mxu0 %v6003_v28  ;;  %v1072_v28 = vcombine.high %v27_v24, %v27_v24 }
 0x135   :  { %v5157_v33 = vpop.f32.mrb[8].mxu0  ;;  %5480 = vmatpush3.bf16.msra.mxu1 %v6002_v27  ;;  %v1079_v27 = vrot.slane %v27_v24, %v6257_v41 }
 0x136   :  { %v5158_v35 = vpop.f32.mrb[9].mxu0  ;;  %5481 = vmatprep.subr.bf16.mxu1 %v6005_v30 }
 0x137   :  { %v5159_v37 = vadd.f32 %v5158_v35, %v5157_v33  ;;  %v5160_v38 = vpop.f32.mrb[10].mxu0  ;;  %v5179_v39 = vpop.f32.mrb[8].mxu1  ;;  %5460 = vmatpush3.bf16.msra.mxu0 %v6004_v29  ;;  %v6046_v33 = vld [vmem:[%s7497_s1 + $0xaf8] sm:$0xff]  }
 0x138   :  { %v5161_v43 = vpop.f32.mrb[11].mxu0  ;;  %v5180_v44 = vpop.f32.mrb[9].mxu1  ;;  %5461 = vmatprep.subr.bf16.mxu0 %v6007_v32  ;;  %v6045_v38 = vld [vmem:[%s7497_s1 + $0xa38] sm:$0xff]  }
 0x139   :  { %v3731_v45 = vadd.f32 %v5159_v37, %v7084_v63  ;;  %v5181_v46 = vadd.f32 %v5180_v44, %v5179_v39  ;;  %5482 = vmatpush3.bf16.msra.mxu1 %v6006_v31  ;;  %v5182_v48 = vpop.f32.mrb[10].mxu1  ;;  %v6024_v63 = vld [vmem:[%s7497_s1 + $0xa50] sm:$0xff]   ;;  %v6047_v44 = vld [vmem:[%s7497_s1 + $0xab8] sm:$0xff]  }
 0x13a   :  { %5483 = vmatprep.subr.bf16.mxu1 %v6009_v36  ;;  %v5183_v50 = vpop.f32.mrb[11].mxu1  ;;  %v6043_v31 = vld [vmem:[%s7497_s1 + $0xab0] sm:$0xff]   ;;  %v7291_v36 = vrot.slane %v1072_v28, %v6257_v41  ;;  %v6049_v48 = vld [vmem:[%s7497_s1 + $0xb00] sm:$0xff]   ;;  %v6080_v28 = vld [vmem:[%s7497_s1 + $0xbb8] sm:$0xff]  }
 0x13b   :  { %v7188_v51 = vadd.f32 %v5181_v46, %v3731_v45  ;;  %5462 = vmatpush3.bf16.msra.mxu0 %v6008_v34  ;;  %v1087_v34 = vcombine.high %v1079_v27, %v1079_v27  ;;  %v6050_v46 = vld [vmem:[%s7497_s1 + $0xbc0] sm:$0xff]   ;;  %v6052_v50 = vld [vmem:[%s7497_s1 + $0xb48] sm:$0xff]  }
 0x13c   :  { %5463 = vmatprep.subr.bf16.mxu0 %v6011_v42  ;;  %v6048_v42 = vld [vmem:[%s7497_s1 + $0xb40] sm:$0xff]   ;;  %v1088_v43 = vcombine.high %v7291_v36, %v7291_v36 }
 0x13d   :  { %5484 = vmatpush3.bf16.msra.mxu1 %v6010_v40  ;;  %v1109_v39 = vrot.slane %v1087_v34, %v6257_v41  ;;  %v1095_v40 = vrot.slane %v1079_v27, %v6257_v41  ;;  %v1102_v27 = vrot.slane %v7291_v36, %v6257_v41 }
 0x13e   :  { %5485 = vmatprep.subr.bf16.mxu1 %v6013_v49 }
 0x13f   :  { %5464 = vmatpush3.bf16.msra.mxu0 %v6012_v47  ;;  %v1119_v45 = vcombine.high %v1109_v39, %v1109_v39  ;;  %v1116_v47 = vrot.slane %v1088_v43, %v6257_v41  ;;  %v1117_v49 = vcombine.high %v1095_v40, %v1095_v40 }
 0x140   :  { %5493 = vmatprep.subr.bf16.mxu0 %v6016_v54  ;;  %v6053_v54 = vld [vmem:[%s7497_s1 + $0xb08] sm:$0xff]  }
 0x141   :  { %5486 = vmatpush3.bf16.msra.mxu1 %v6015_v52  ;;  %v1120_v52 = vcombine.high %v1116_v47, %v1116_v47 }
 0x142   :  { %4289 = vmatmul.mubr.bf16.vlgmr.msra.gmra.mrb[36].mxu0 %v1053_v53  ;;  %5515 = vmatprep.subr.bf16.mxu1 %v6018_v56  ;;  %v6054_v53 = vld [vmem:[%s7497_s1 + $0xbc8] sm:$0xff]  }
 0x143   :  { %5494 = vmatpush3.bf16.msra.mxu0 %v6017_v55  ;;  %4368 = vmatprep.mubr.bf16.mxu0 %v1109_v39  ;;  %v6056_v55 = vld [vmem:[%s7497_s1 + $0xb50] sm:$0xff]   ;;  %v6055_v56 = vld [vmem:[%s7497_s1 + $0xb88] sm:$0xff]  }
 0x144   :  { %4329 = vmatmul.mubr.bf16.vlgmr.msra.gmra.mrb[36].mxu1 %v1069_v58  ;;  %5495 = vmatprep.subr.bf16.mxu0 %v6020_v59  ;;  %v6057_v58 = vld [vmem:[%s7497_s1 + $0xb10] sm:$0xff]   ;;  %v6060_v59 = vld [vmem:[%s7497_s1 + $0xb58] sm:$0xff]  }
 0x145   :  { %5516 = vmatpush3.bf16.msra.mxu1 %v6019_v57  ;;  %4408 = vmatprep.mubr.bf16.mxu1 %v1119_v45  ;;  %v6058_v57 = vld [vmem:[%s7497_s1 + $0xbd0] sm:$0xff]  }
 0x146   :  { %5517 = vmatprep.subr.bf16.mxu1 %v6022_v61  ;;  %v6062_v61 = vld [vmem:[%s7497_s1 + $0xbd8] sm:$0xff]  }
 0x147   :  { %5496 = vmatpush3.bf16.msra.mxu0 %v6021_v60  ;;  %v6059_v60 = vld [vmem:[%s7497_s1 + $0xb90] sm:$0xff]  }
 0x148   :  { %5497 = vmatprep.subr.bf16.mxu0 %v6024_v63  ;;  %v6064_v63 = vld [vmem:[%s7497_s1 + $0xb60] sm:$0xff]  }
 0x149   :  { %5518 = vmatpush3.bf16.msra.mxu1 %v6023_v62  ;;  %v6061_v62 = vld [vmem:[%s7497_s1 + $0xb18] sm:$0xff]  }
 0x14a   :  { %5519 = vmatprep.subr.bf16.mxu1 %v6026_v1  ;;  %v6066_v1 = vld [vmem:[%s7497_s1 + $0xbe0] sm:$0xff]  }
 0x14b   :  { %5498 = vmatpush3.bf16.msra.mxu0 %v6025_v0  ;;  %v6063_v0 = vld [vmem:[%s7497_s1 + $0xb98] sm:$0xff]  }
 0x14c   :  { %5499 = vmatprep.subr.bf16.mxu0 %v6028_v3  ;;  %v6068_v3 = vld [vmem:[%s7497_s1 + $0xb68] sm:$0xff]  }
 0x14d   :  { %5520 = vmatpush3.bf16.msra.mxu1 %v6027_v2  ;;  %v6065_v2 = vld [vmem:[%s7497_s1 + $0xb20] sm:$0xff]  }
 0x14e   :  { %5521 = vmatprep.subr.bf16.mxu1 %v6030_v5  ;;  %v6070_v5 = vld [vmem:[%s7497_s1 + $0xbe8] sm:$0xff]  }
 0x14f   :  { %5500 = vmatpush3.bf16.msra.mxu0 %v6029_v4  ;;  %v6067_v4 = vld [vmem:[%s7497_s1 + $0xba0] sm:$0xff]  }
 0x150   :  { %5501 = vmatprep.subr.bf16.mxu0 %v6032_v7  ;;  %v6072_v7 = vld [vmem:[%s7497_s1 + $0xb70] sm:$0xff]  }
 0x151   :  { %5522 = vmatpush3.bf16.msra.mxu1 %v6031_v6  ;;  %v6069_v6 = vld [vmem:[%s7497_s1 + $0xb28] sm:$0xff]  }
 0x152   :  { %5523 = vmatprep.subr.bf16.mxu1 %v6034_v9  ;;  %v6071_v9 = vld [vmem:[%s7497_s1 + $0xba8] sm:$0xff]  }
 0x153   :  { %5502 = vmatpush3.bf16.msra.mxu0 %v6033_v8 }
 0x154   :  { %5503 = vmatprep.subr.bf16.mxu0 %v6036_v11  ;;  %v6074_v11 = vld [vmem:[%s7497_s1 + $0xbf0] sm:$0xff]  }
 0x155   :  { %v5201_v16 = vpop.f32.mrb[12].mxu0  ;;  %5524 = vmatpush3.bf16.msra.mxu1 %v6035_v10 }
 0x156   :  { %v5202_v18 = vpop.f32.mrb[13].mxu0  ;;  %5525 = vmatprep.subr.bf16.mxu1 %v6038_v13 }
 0x157   :  { %v5203_v20 = vadd.f32 %v5202_v18, %v5201_v16  ;;  %v5204_v21 = vpop.f32.mrb[14].mxu0  ;;  %v5223_v22 = vpop.f32.mrb[12].mxu1  ;;  %5504 = vmatpush3.bf16.msra.mxu0 %v6037_v12  ;;  %v6076_v16 = vld [vmem:[%s7497_s1 + $0xb78] sm:$0xff]  }
 0x158   :  { %v5205_v25 = vpop.f32.mrb[15].mxu0  ;;  %v5224_v26 = vpop.f32.mrb[13].mxu1  ;;  %5505 = vmatprep.subr.bf16.mxu0 %v6040_v15  ;;  %v6073_v15 = vld [vmem:[%s7497_s1 + $0xb30] sm:$0xff]  }
 0x159   :  { %v3811_v29 = vadd.f32 %v5203_v20, %v7188_v51  ;;  %v5225_v30 = vadd.f32 %v5224_v26, %v5223_v22  ;;  %5526 = vmatpush3.bf16.msra.mxu1 %v6039_v14  ;;  %v5226_v32 = vpop.f32.mrb[14].mxu1  ;;  %v6051_v51 = vld [vmem:[%s7497_s1 + $0xb80] sm:$0xff]   ;;  %v6075_v21 = vld [vmem:[%s7497_s1 + $0xbb0] sm:$0xff]   ;;  %v6077_v26 = vld [vmem:[%s7497_s1 + $0xb38] sm:$0xff]  }
 0x15a   :  { %5527 = vmatprep.subr.bf16.mxu1 %v6042_v19  ;;  %v5227_v35 = vpop.f32.mrb[15].mxu1 }
 0x15b   :  { %v7293_v37 = vadd.f32 %v5225_v30, %v3811_v29  ;;  %5506 = vmatpush3.bf16.msra.mxu0 %v6041_v17  ;;  %v6081_v29 = vld [vmem:[%s7497_s1 + $0xc00] sm:$0xff]   ;;  %v6118_v30 = vmov 0.0  }
 0x15c   :  { %5507 = vmatprep.subr.bf16.mxu0 %v6044_v23  ;;  %v6078_v23 = vld [vmem:[%s7497_s1 + $0xbf8] sm:$0xff]  }
 0x15d   :  { %5528 = vmatpush3.bf16.msra.mxu1 %v6043_v31  ;;  %v1118_v31 = vcombine.high %v1102_v27, %v1102_v27 }
 0x15e   :  { %5529 = vmatprep.subr.bf16.mxu1 %v6046_v33 }
 0x15f   :  { %5508 = vmatpush3.bf16.msra.mxu0 %v6045_v38 }
 0x160   :  { %5537 = vmatprep.subr.bf16.mxu0 %v6048_v42 }
 0x161   :  { %5530 = vmatpush3.bf16.msra.mxu1 %v6047_v44 }
 0x162   :  { %4369 = vmatmul.mubr.bf16.vlgmr.msra.gmra.mrb[40].mxu0 %v1095_v40  ;;  %5559 = vmatprep.subr.bf16.mxu1 %v6050_v46 }
 0x163   :  { %5538 = vmatpush3.bf16.msra.mxu0 %v6049_v48  ;;  %4448 = vmatprep.mubr.bf16.mxu0 %v1116_v47 }
 0x164   :  { %4409 = vmatmul.mubr.bf16.vlgmr.msra.gmra.mrb[40].mxu1 %v1117_v49  ;;  %5539 = vmatprep.subr.bf16.mxu0 %v6052_v50 }
 0x165   :  { %5560 = vmatpush3.bf16.msra.mxu1 %v6051_v51  ;;  %4488 = vmatprep.mubr.bf16.mxu1 %v1120_v52 }
 0x166   :  { %5561 = vmatprep.subr.bf16.mxu1 %v6054_v53 }
 0x167   :  { %5540 = vmatpush3.bf16.msra.mxu0 %v6053_v54 }
 0x168   :  { %5541 = vmatprep.subr.bf16.mxu0 %v6056_v55 }
 0x169   :  { %5562 = vmatpush3.bf16.msra.mxu1 %v6055_v56 }
 0x16a   :  { %5563 = vmatprep.subr.bf16.mxu1 %v6058_v57 }
 0x16b   :  { %5542 = vmatpush3.bf16.msra.mxu0 %v6057_v58 }
 0x16c   :  { %5543 = vmatprep.subr.bf16.mxu0 %v6060_v59 }
 0x16d   :  { %5564 = vmatpush3.bf16.msra.mxu1 %v6059_v60 }
 0x16e   :  { %5565 = vmatprep.subr.bf16.mxu1 %v6062_v61 }
 0x16f   :  { %5544 = vmatpush3.bf16.msra.mxu0 %v6061_v62 }
 0x170   :  { %5545 = vmatprep.subr.bf16.mxu0 %v6064_v63 }
 0x171   :  { %5566 = vmatpush3.bf16.msra.mxu1 %v6063_v0 }
 0x172   :  { %5567 = vmatprep.subr.bf16.mxu1 %v6066_v1 }
 0x173   :  { %5546 = vmatpush3.bf16.msra.mxu0 %v6065_v2 }
 0x174   :  { %5547 = vmatprep.subr.bf16.mxu0 %v6068_v3 }
 0x175   :  { %v5245_v8 = vpop.f32.mrb[16].mxu0  ;;  %5568 = vmatpush3.bf16.msra.mxu1 %v6067_v4 }
 0x176   :  { %v5246_v10 = vpop.f32.mrb[17].mxu0  ;;  %5569 = vmatprep.subr.bf16.mxu1 %v6070_v5 }
 0x177   :  { %v5247_v12 = vadd.f32 %v5246_v10, %v5245_v8  ;;  %v5248_v13 = vpop.f32.mrb[18].mxu0  ;;  %v5267_v14 = vpop.f32.mrb[16].mxu1  ;;  %5548 = vmatpush3.bf16.msra.mxu0 %v6069_v6 }
 0x178   :  { %v5249_v17 = vpop.f32.mrb[19].mxu0  ;;  %v5268_v18 = vpop.f32.mrb[17].mxu1  ;;  %5549 = vmatprep.subr.bf16.mxu0 %v6072_v7 }
 0x179   :  { %v3891_v19 = vadd.f32 %v5247_v12, %v7293_v37  ;;  %v5269_v20 = vadd.f32 %v5268_v18, %v5267_v14  ;;  %5570 = vmatpush3.bf16.msra.mxu1 %v6071_v9  ;;  %v5270_v22 = vpop.f32.mrb[18].mxu1 }
 0x17a   :  { %5571 = vmatprep.subr.bf16.mxu1 %v6074_v11  ;;  %v5271_v24 = vpop.f32.mrb[19].mxu1 }
 0x17b   :  { %v3931_v25 = vadd.f32 %v5269_v20, %v3891_v19  ;;  %5550 = vmatpush3.bf16.msra.mxu0 %v6073_v15 }
 0x17c   :  { %5551 = vmatprep.subr.bf16.mxu0 %v6076_v16 }
 0x17d   :  { %5572 = vmatpush3.bf16.msra.mxu1 %v6075_v21 }
 0x17e   :  { %5573 = vmatprep.subr.bf16.mxu1 %v6078_v23 }
 0x17f   :  { %5552 = vmatpush3.bf16.msra.mxu0 %v6077_v26 }
 0x180   :  { %5607 = vmatprep.subr.bf16.mxu0 %v6118_v30 }
 0x181   :  { %5574 = vmatpush3.bf16.msra.mxu1 %v6080_v28 }
 0x182   :  { %10 = vsyncpa [#allocation3], 0  ;;  %4449 = vmatmul.mubr.bf16.vlgmr.msra.gmra.mrb[44].mxu0 %v1102_v27  ;;  %v6082_v32 = vld [vmem:[%s7497_s1 + $0xc08] sm:$0xff]   ;;  %vm6119_vm0 = vmmov 0   ;;  %v6083_v33 = vld [vmem:[%s7497_s1 + $0xc10] sm:$0xff]   ;;  %v6120_v11 = vmov 0.0|0.0  }
 0x183   :  { %5608 = vmatpush3.bf16.msra.mxu0 %v6081_v29  ;;  %5623 = vmatprep.mubr.msk.bf16.mxu0 %vm6119_vm0, %v6118_v30  ;;  %v6084_v34 = vld [vmem:[%s7497_s1 + $0xc18] sm:$0xff]   ;;  %v6085_v35 = vld [vmem:[%s7497_s1 + $0xc20] sm:$0xff]   ;;  %v6086_v36 = vld [vmem:[%s7497_s1 + $0xc28] sm:$0xff]   ;;  %vm4629_vm1 = vcmask 1041408   ;;  %s6121_s9 = smov [#allocation2]  }
 0x184   :  { %4489 = vmatmul.mubr.bf16.vlgmr.msra.gmra.mrb[44].mxu1 %v1118_v31  ;;  %5609 = vmatprep.subr.bf16.mxu0 %v6118_v30  ;;  %v6087_v43 = vld [vmem:[%s7497_s1 + $0xc30] sm:$0xff]   ;;  %v6088_v51 = vld [vmem:[%s7497_s1 + $0xc38] sm:$0xff]   ;;  %v4537_v4 = vld [vmem:[%s7499_s3 + $0x8] sm:$0xff]  ;;  %s4650_s10 = sshll.u32 %s6121_s9, 4  ;;  %s4651_s10 = int_to_ptr.vmem [resolvable:$true] %s4650_s10 }
 0x185   :  { %5659 = vmatprep.mubr.msk.f32.mxu1 %vm6119_vm0, %v6118_v30  ;;  %v4659_v52 = vld.sshfl [vmem:[%s7496_s0 + $0x30] sm:$0x1 pattern:$0x75316420]  ;;  %5662 = vmatprep.subr.bf16.mxu1 %v6120_v11  ;;  %v4539_v16 = vld [vmem:[%s7499_s3 + $0x18] sm:$0xff]  ;;  %v4540_v19 = vld [vmem:[%s7499_s3 + $0x20] sm:$0xff]  ;;  %p6098_p1 = scmp.lt.s32.totalorder %s4651_s10, %s4651_s10 }
 0x186   :  { %v1134_v53 = vrot.slane %v4659_v52, %v6257_v41  ;;  %v4536_v41 = vld [vmem:[%s7499_s3] sm:$0xff]  ;;  %v4538_v15 = vld [vmem:[%s7499_s3 + $0x10] sm:$0xff]  ;;  %v4541_v20 = vld [vmem:[%s7499_s3 + $0x28] sm:$0xff] }
 0x187   :  { %5610 = vmatpush3.bf16.msra.mxu0 %v6082_v32  ;;  %v5663_v8 = vpack.c.bf16 %v4537_v4, %v4536_v41  ;;  %v5666_v18 = vpack.c.bf16 %v4539_v16, %v4538_v15  ;;  %v5669_v22 = vpack.c.bf16 %v4541_v20, %v4540_v19  ;;  %v4542_v23 = vld [vmem:[%s7499_s3 + $0x30] sm:$0xff]  ;;  %v4543_v24 = vld [vmem:[%s7499_s3 + $0x38] sm:$0xff]  ;;  %v4544_v26 = vld [vmem:[%s7499_s3 + $0x40] sm:$0xff] }
 0x188   :  { %5611 = vmatprep.subr.bf16.mxu0 %v6118_v30  ;;  %v4545_v27 = vld [vmem:[%s7499_s3 + $0x48] sm:$0xff]  ;;  %v4546_v29 = vld [vmem:[%s7499_s3 + $0x50] sm:$0xff]  ;;  %v4548_v32 = vld [vmem:[%s7499_s3 + $0x60] sm:$0xff] }
 0x189   :  { %5664 = vmatpush3.bf16.msra.mxu1 %v5663_v8  ;;  %v5675_v28 = vpack.c.bf16 %v4545_v27, %v4544_v26  ;;  %v5052_v27 = vld [vmem:[%s7500_s4] ss:$0 sm:$0xff]  ;;  %s6093_s4 = scalar_lea.vmem %s4651_s10, 32 }
 0x18a   :  { %5665 = vmatprep.subr.bf16.mxu1 %v6120_v11  ;;  %p6094_p0 = scmp.ne.s32.totalorder %s4651_s10, %s6093_s4  ;;  %p6099_p2 = scmp.lt.s32.totalorder %s6093_s4, %s6093_s4 }
 0x18b   :  { %5612 = vmatpush3.bf16.msra.mxu0 %v6083_v33  ;;  %v4549_v33 = vld [vmem:[%s7499_s3 + $0x68] sm:$0xff] }
 0x18c   :  { %5613 = vmatprep.subr.bf16.mxu0 %v6118_v30  ;;  %p6100_p3 = por %p6099_p2, %p6098_p1 }
 0x18d   :  { %5667 = vmatpush3.bf16.msra.mxu1 %v5666_v18 }
 0x18e   :  { %5668 = vmatprep.subr.bf16.mxu1 %v6120_v11  ;;  %p6101_p4 = pnand %p6100_p3, %p6094_p0 }
 0x18f   :  { %5614 = vmatpush3.bf16.msra.mxu0 %v6084_v34  ;;  %v5681_v34 = vpack.c.bf16 %v4549_v33, %v4548_v32 }
 0x190   :  { %5615 = vmatprep.subr.bf16.mxu0 %v6118_v30 }
 0x191   :  { %5670 = vmatpush3.bf16.msra.mxu1 %v5669_v22 }
 0x192   :  { %5671 = vmatprep.subr.bf16.mxu1 %v6120_v11 }
 0x193   :  { %5616 = vmatpush3.bf16.msra.mxu0 %v6085_v35  ;;  %v4550_v35 = vld [vmem:[%s7499_s3 + $0x70] sm:$0xff] }
 0x194   :  { %5617 = vmatprep.subr.bf16.mxu0 %v6118_v30 }
 0x195   :  { %v5289_v37 = vpop.f32.mrb[20].mxu0 }
 0x196   :  { %v5290_v38 = vpop.f32.mrb[21].mxu0 }
 0x197   :  { %v5291_v39 = vadd.f32 %v5290_v38, %v5289_v37  ;;  %v5292_v40 = vpop.f32.mrb[22].mxu0  ;;  %v5311_v42 = vpop.f32.mrb[20].mxu1  ;;  %5618 = vmatpush3.bf16.msra.mxu0 %v6086_v36  ;;  %v4551_v36 = vld [vmem:[%s7499_s3 + $0x78] sm:$0xff] }
 0x198   :  { %v5293_v44 = vpop.f32.mrb[23].mxu0  ;;  %v5312_v45 = vpop.f32.mrb[21].mxu1  ;;  %5619 = vmatprep.subr.bf16.mxu0 %v6118_v30  ;;  %v5684_v37 = vpack.c.bf16 %v4551_v36, %v4550_v35 }
 0x199   :  { %v3971_v46 = vadd.f32 %v5291_v39, %v3931_v25  ;;  %v5313_v47 = vadd.f32 %v5312_v45, %v5311_v42  ;;  %v5314_v48 = vpop.f32.mrb[22].mxu1  ;;  %v5672_v25 = vpack.c.bf16 %v4543_v24, %v4542_v23 }
 0x19a   :  { %v5315_v49 = vpop.f32.mrb[23].mxu1 }
 0x19b   :  { %v4011_v50 = vadd.f32 %v5313_v47, %v3971_v46  ;;  %5620 = vmatpush3.bf16.msra.mxu0 %v6087_v43  ;;  %5673 = vmatpush3.bf16.msra.mxu1 %v5672_v25 }
 0x19c   :  { %5621 = vmatprep.subr.bf16.mxu0 %v6118_v30  ;;  %5674 = vmatprep.subr.bf16.mxu1 %v6120_v11  ;;  %v4547_v30 = vld [vmem:[%s7499_s3 + $0x58] sm:$0xff] }
 0x19d   :  { %v5678_v31 = vpack.c.bf16 %v4547_v30, %v4546_v29 }
 0x19f   :  { %5622 = vmatpush3.bf16.msra.mxu0 %v6088_v51  ;;  %5676 = vmatpush3.bf16.msra.mxu1 %v5675_v28 }
 0x1a0   :  { %5677 = vmatprep.subr.bf16.mxu1 %v6120_v11 }
 0x1a2   :  { %5624 = vmatmul.mubr.bf16.vlgmr.msra.gmra.mrb[48].mxu0 %v1134_v53 }
 0x1a3   :  { %5679 = vmatpush3.bf16.msra.mxu1 %v5678_v31 }
 0x1a4   :  { %5680 = vmatprep.subr.bf16.mxu1 %v6120_v11 }
 0x1a7   :  { %5682 = vmatpush3.bf16.msra.mxu1 %v5681_v34 }
 0x1a8   :  { %5683 = vmatprep.subr.bf16.mxu1 %v6120_v11 }
 0x1ab   :  { %5685 = vmatpush3.bf16.msra.mxu1 %v5684_v37 }
 0x1b5   :  { %v5333_v54 = vpop.f32.mrb[24].mxu0 }
 0x1b6   :  { %v5334_v55 = vpop.f32.mrb[25].mxu0 }
 0x1b7   :  { %v5335_v56 = vadd.f32 %v5334_v55, %v5333_v54  ;;  %v5336_v57 = vpop.f32.mrb[26].mxu0  ;;  %v5355_v58 = vpop.f32.mrb[24].mxu1 }
 0x1b8   :  { %v5337_v59 = vpop.f32.mrb[27].mxu0  ;;  %v5356_v60 = vpop.f32.mrb[25].mxu1 }
 0x1b9   :  { %v4051_v61 = vadd.f32 %v5335_v56, %v4011_v50  ;;  %v5357_v62 = vadd.f32 %v5356_v60, %v5355_v58  ;;  %v5358_v63 = vpop.f32.mrb[26].mxu1 }
 0x1ba   :  { %v5359_v0 = vpop.f32.mrb[27].mxu1 }
 0x1bb   :  { %v4091_v1 = vadd.f32 %v5357_v62, %v4051_v61 }
 0x1d5   :  { %v5377_v2 = vpop.f32.mrb[28].mxu0 }
 0x1d6   :  { %v5378_v3 = vpop.f32.mrb[29].mxu0 }
 0x1d7   :  { %v5379_v5 = vadd.f32 %v5378_v3, %v5377_v2  ;;  %v5380_v6 = vpop.f32.mrb[30].mxu0  ;;  %v5399_v7 = vpop.f32.mrb[28].mxu1 }
 0x1d8   :  { %v5381_v9 = vpop.f32.mrb[31].mxu0  ;;  %v5400_v10 = vpop.f32.mrb[29].mxu1 }
 0x1d9   :  { %v4131_v12 = vadd.f32 %v5379_v5, %v4091_v1  ;;  %v5401_v13 = vadd.f32 %v5400_v10, %v5399_v7  ;;  %v5402_v14 = vpop.f32.mrb[30].mxu1 }
 0x1da   :  { %v5403_v17 = vpop.f32.mrb[31].mxu1 }
 0x1db   :  { %v4171_v21 = vadd.f32 %v5401_v13, %v4131_v12 }
 0x1f5   :  { %v5421_v38 = vpop.f32.mrb[32].mxu0 }
 0x1f6   :  { %v5422_v39 = vpop.f32.mrb[33].mxu0 }
 0x1f7   :  { %v5423_v40 = vadd.f32 %v5422_v39, %v5421_v38  ;;  %v5424_v42 = vpop.f32.mrb[34].mxu0  ;;  %v5443_v43 = vpop.f32.mrb[32].mxu1 }
 0x1f8   :  { %v5425_v44 = vpop.f32.mrb[35].mxu0  ;;  %v5444_v45 = vpop.f32.mrb[33].mxu1 }
 0x1f9   :  { %v4211_v46 = vadd.f32 %v5423_v40, %v4171_v21  ;;  %v5445_v47 = vadd.f32 %v5444_v45, %v5443_v43  ;;  %v5446_v48 = vpop.f32.mrb[34].mxu1 }
 0x1fa   :  { %v5447_v49 = vpop.f32.mrb[35].mxu1 }
 0x1fb   :  { %v4251_v50 = vadd.f32 %v5445_v47, %v4211_v46 }
 0x215   :  { %v5465_v51 = vpop.f32.mrb[36].mxu0 }
 0x216   :  { %v5466_v52 = vpop.f32.mrb[37].mxu0 }
 0x217   :  { %v5467_v53 = vadd.f32 %v5466_v52, %v5465_v51  ;;  %v5468_v54 = vpop.f32.mrb[38].mxu0  ;;  %v5487_v55 = vpop.f32.mrb[36].mxu1 }
 0x218   :  { %v5469_v56 = vpop.f32.mrb[39].mxu0  ;;  %v5488_v57 = vpop.f32.mrb[37].mxu1 }
 0x219   :  { %v4291_v58 = vadd.f32 %v5467_v53, %v4251_v50  ;;  %v5489_v59 = vadd.f32 %v5488_v57, %v5487_v55  ;;  %v5490_v60 = vpop.f32.mrb[38].mxu1 }
 0x21a   :  { %v5491_v61 = vpop.f32.mrb[39].mxu1 }
 0x21b   :  { %v4331_v62 = vadd.f32 %v5489_v59, %v4291_v58 }
 0x235   :  { %v5509_v63 = vpop.f32.mrb[40].mxu0 }
 0x236   :  { %v5510_v0 = vpop.f32.mrb[41].mxu0 }
 0x237   :  { %v5511_v1 = vadd.f32 %v5510_v0, %v5509_v63  ;;  %v5512_v2 = vpop.f32.mrb[42].mxu0  ;;  %v5531_v3 = vpop.f32.mrb[40].mxu1 }
 0x238   :  { %v5513_v41 = vpop.f32.mrb[43].mxu0  ;;  %v5532_v4 = vpop.f32.mrb[41].mxu1 }
 0x239   :  { %v4371_v5 = vadd.f32 %v5511_v1, %v4331_v62  ;;  %v5533_v6 = vadd.f32 %v5532_v4, %v5531_v3  ;;  %v5534_v7 = vpop.f32.mrb[42].mxu1 }
 0x23a   :  { %v5535_v8 = vpop.f32.mrb[43].mxu1 }
 0x23b   :  { %v4411_v9 = vadd.f32 %v5533_v6, %v4371_v5 }
 0x255   :  { %v5553_v10 = vpop.f32.mrb[44].mxu0 }
 0x256   :  { %v5554_v11 = vpop.f32.mrb[45].mxu0 }
 0x257   :  { %v5555_v12 = vadd.f32 %v5554_v11, %v5553_v10  ;;  %v5556_v13 = vpop.f32.mrb[46].mxu0  ;;  %v5575_v14 = vpop.f32.mrb[44].mxu1 }
 0x258   :  { %v5557_v15 = vpop.f32.mrb[47].mxu0  ;;  %v5576_v16 = vpop.f32.mrb[45].mxu1 }
 0x259   :  { %v4451_v17 = vadd.f32 %v5555_v12, %v4411_v9  ;;  %v5577_v18 = vadd.f32 %v5576_v16, %v5575_v14  ;;  %v5578_v19 = vpop.f32.mrb[46].mxu1 }
 0x25a   :  { %v5579_v20 = vpop.f32.mrb[47].mxu1 }
 0x25b   :  { %v4491_v21 = vadd.f32 %v5577_v18, %v4451_v17 }
 0x275   :  { %v4530_v22 = vpop.f32.mrb[48].mxu0 }
 0x276   :  { %v4531_v23 = vadd.f32 %v4530_v22, %v4491_v21  ;;  %v5625_v24 = vpop.f32.mrb[49].mxu0 }
 0x277   :  { %v4533_v25 = vpop.f32.mrb[50].mxu0 }
 0x278   :  { %v5626_v26 = vpop.f32.mrb[51].mxu0  ;;  %5660 = vmatmul.mubr.f32.vlgmr.msra.gmra.mrb[48].mxu1 %v4531_v23 }
 0x34b   :  { %v4625_v28 = vpop.f32.mrb[48].mxu1 }
 0x34c   :  { %v4626_v29 = vadd.f32 %v5052_v27, %v4625_v28  ;;  %v5661_v30 = vpop.f32.mrb[49].mxu1 }
 0x34e   :  { %v4630_v31 = vsel %vm4629_vm1, %v4626_v29, -inf }
 0x34f   :  { %4631 = vmax.xlane.f32.xlu0 %v4630_v31 }
 0x3dc   :  { %v4632_v32 = vpop.xlane.xlu0 %4631 }
 0x3dd   :  { %v4633_v33 = vsub.f32 %v4626_v29, %v4632_v32 }
 0x3df   :  { %v4634_v34 = vmul.f32 1.442695, %v4633_v33 }
 0x3e1   :  { %6089 = vpow2.f32 %v4634_v34 }
 0x3eb   :  { %v6090_v35 = vpop.eup %6089 }
 0x3ec   :  { %v4636_v36 = vsel %vm4629_vm1, %v6090_v35, 0.0 }
 0x3ed   :  { %4637 = vadd.xlane.f32.xlu0 %v4636_v36 }
 0x47a   :  { %v4638_v37 = vpop.xlane.xlu0 %4637 }
 0x47b   :  { %6091 = vlog2.f32 %v4638_v37 }
 0x485   :  { %v6092_v38 = vpop.eup %6091 }
 0x486   :  { %v4640_v39 = vmul.f32 0.6931472, %v6092_v38 }
 0x488   :  { %v4641_v40 = vadd.f32 %v4640_v39, %v4632_v32 }
 0x48a   :  { %v4642_v42 = vsub.f32 %v4626_v29, %v4641_v40 }
 0x48c   :  { %4643 = vst [vmem:[#allocation2] sm:$0x3] %v4642_v42 }
 0x48d   :  { %6104 = shalt.err (!%p6101_p4)
}
 0x48e   :  { %s6105_s13 = scalar_lea.hbm %s7501_s5, 32 }
 0x48f   :  { %p6106_p5 = scmp.ne.s32.totalorder %s7501_s5, %s6105_s13  ;;  %p6109_p6 = scmp.lt.u32.totalorder %s6105_s13, %s7501_s5 }
 0x491   :  { %p6111_p7 = pnand %p6109_p6, %p6106_p5 }
 0x493   :  { %6114 = shalt.err (!%p6111_p7)
}
 0x494   :  { %4653 = dma.vmem_to_hbm [thread:$0]  %s4651_s10, 32, %s7501_s5, [#allocation3]  }
 0x495   :  { %6115 = dma.done.wait [#allocation3], 32  }
 0x496   :  { %6116 = vsyncadd [#allocation3], 4294967264 }
 0x497   :  { %4657 = vsyncpa [#allocation3], 1 }

// kernel: _lambda_.4
= control target key start
LH: loop header
LB: loop body
LE: loop exit
PB: predicated region body
PF: predicated region fallthrough
CT: control target
= control target key end

     0   :  { %s17206_s12 = smov 0   ;;  %s19415_s0 = inlined_call_operand.vmem [shape: bf16[2,342,64], index: 0, kind: input, shape index: {}]   ;;  %s19416_s1 = inlined_call_operand.vmem [shape: bf16[1600,128], index: 1, kind: input, shape index: {}]   ;;  %s19417_s2 = inlined_call_operand.vmem [shape: f32[1,128], index: 2, kind: input, shape index: {}]   ;;  %s19418_s3 = inlined_call_operand.vmem [shape: bf16[2,7,7,128], index: 3, kind: output, shape index: {}]  }
   0x1 LB: > { %s13492_s13 = sadd.s32 4294967295, %s17184_s12   ;;  %p13496_p0 = scmp.ge.s32.totalorder %s17184_s12, 1  ;;  %s17184_s12 = sphi %s17206_s12, %s13_s12  }
   0x2   : > { %p137_p1 = scmp.lt.s32.totalorder %s17184_s12, 3 }
   0x4   : > { %p138_p2 = pnand %p13496_p0, %p137_p1 }
   0x6   : > { %141 = sbr.rel (%p138_p2) target bundleno = 1195 (0x4ab), region = 32 }
   0xd   : > { %v16667_v0 = vld [vmem:[%s19416_s1] sm:$0xff]   ;;  %p161_p3 = scmp.lt.s32.totalorder %s13492_s13, 1  ;;  %v16669_v2 = vld [vmem:[%s19416_s1 + $0x8] sm:$0xff]   ;;  %v16671_v4 = vld [vmem:[%s19416_s1 + $0x10] sm:$0xff]   ;;  %vm316_vm0 = vcmask 523264   ;;  %vm4968_vm1 = vcmask 1044480  }
   0xe   : > { %v16668_v1 = vld [vmem:[%s19416_s1 + $0x180] sm:$0xff]   ;;  %14921 = vmatprep.subr.bf16.mxu1 %v16667_v0  ;;  %v16670_v3 = vld [vmem:[%s19416_s1 + $0x188] sm:$0xff]   ;;  %v16672_v5 = vld [vmem:[%s19416_s1 + $0x190] sm:$0xff]   ;;  %vm7022_vm2 = vsmask.f32 4352  ;;  %vm1255_vm4 = vcmask 1046528  }
   0xf   : > { %s19461_s13 = smov (!%p161_p3, %s13492_s13), 1  ;;  %15401 = vmatprep.subr.bf16.mxu0 %v16668_v1  ;;  %14922 = vmatpush3.bf16.msra.mxu1 %v16667_v0  ;;  %v16673_v6 = vld [vmem:[%s19416_s1 + $0x18] sm:$0xff]   ;;  %v16679_v14 = vld [vmem:[%s19416_s1 + $0x20] sm:$0xff]   ;;  %v16688_v29 = vld [vmem:[%s19416_s1 + $0x28] sm:$0xff]   ;;  %vm678_vm3 = vsmask.f32 7424 }
  0x10   : > { %15402 = vmatpush3.bf16.msra.mxu0 %v16668_v1  ;;  %14923 = vmatprep.subr.bf16.mxu1 %v16669_v2  ;;  %s16657_s24 = smul.u32 172, %s19461_s13  ;;  %v16674_v7 = vld [vmem:[%s19416_s1 + $0x198] sm:$0xff]   ;;  %v16690_v32 = vld [vmem:[%s19416_s1 + $0x1a0] sm:$0xff]   ;;  %v16691_v34 = vld [vmem:[%s19416_s1 + $0x1a8] sm:$0xff]   ;;  %vm1736_vm5 = vsmask.f32 6400 }
  0x11   : > { %15403 = vmatprep.subr.bf16.mxu0 %v16670_v3  ;;  %v16696_v40 = vld [vmem:[%s19416_s1 + $0x1b0] sm:$0xff]   ;;  %v16697_v43 = vld [vmem:[%s19416_s1 + $0x1b8] sm:$0xff]   ;;  %vm2329_vm6 = vcmask 1045504   ;;  %vm4366_vm7 = vsmask.f32 5376  ;;  %vm13377_vm9 = vcmask 1043456  }
  0x12   : > { %s17244_s6 = scalar_lea.vmem %s19415_s0, %s16657_s24  ;;  %v16702_v53 = vld [vmem:[%s19416_s1 + $0x30] sm:$0xff]   ;;  %vm13378_vm8 = vsmask.f32 3328 }
  0x13   : > { %14924 = vmatpush3.bf16.msra.mxu1 %v16669_v2  ;;  %v16675_v8 = vld [vmem:[%s17244_s6] sm:$0xff]   ;;  %v16676_v9 = vld [vmem:[%s17244_s6 + $0x10] sm:$0xf8]   ;;  %v16677_v10 = vld [vmem:[%s17244_s6 + $0x18] sm:$0xff]  }
  0x14   : > { %15404 = vmatpush3.bf16.msra.mxu0 %v16670_v3  ;;  %14925 = vmatprep.subr.bf16.mxu1 %v16671_v4  ;;  %v6536_v11 = vrot.slane %v16676_v9, 3  ;;  %v6537_v12 = vrot.slane %v16677_v10, 3  ;;  %v16678_v13 = vld [vmem:[%s17244_s6 + $0x8] sm:$0xff]   ;;  %v16680_v16 = vld [vmem:[%s17244_s6 + $0x20] sm:$0xff]   ;;  %v16681_v17 = vld [vmem:[%s17244_s6 + $0x10] sm:$0xff]  }
  0x15   : > { %15405 = vmatprep.subr.bf16.mxu0 %v16672_v5  ;;  %14929 = vmatprep.mubr.msk.bf16.mxu1 %vm316_vm0, %v16675_v8  ;;  %v6539_v18 = vrot.slane %v16680_v16, 3  ;;  %v16682_v19 = vld [vmem:[%s17244_s6 + $0x28] sm:$0xff]   ;;  %v16684_v22 = vld [vmem:[%s17244_s6 + $0x30] sm:$0xff]   ;;  %v16683_v24 = vld [vmem:[%s17244_s6 + $0x18] sm:$0xff]  }
  0x16   : > { %v6538_v15 = vsel %vm4968_vm1, %v6536_v11, %v6537_v12  ;;  %v6541_v21 = vrot.slane %v16682_v19, 3  ;;  %v6543_v25 = vrot.slane %v16684_v22, 3  ;;  %v16686_v26 = vld [vmem:[%s17244_s6 + $0x38] sm:$0xff]   ;;  %v16685_v27 = vld [vmem:[%s17244_s6 + $0x20] sm:$0xff]   ;;  %v16693_v35 = vld [vmem:[%s17244_s6 + $0x48] sm:$0xff]  }
  0x17   : > { %14926 = vmatpush3.bf16.msra.mxu1 %v16671_v4  ;;  %15409 = vmatprep.mubr.msk.bf16.mxu0 %vm316_vm0, %v6538_v15  ;;  %v6540_v20 = vsel %vm4968_vm1, %v6537_v12, %v6539_v18  ;;  %v6545_v28 = vrot.slane %v16686_v26, 3  ;;  %v16689_v30 = vld [vmem:[%s17244_s6 + $0x40] sm:$0xff]   ;;  %v16687_v36 = vld [vmem:[%s17244_s6 + $0x28] sm:$0xff]   ;;  %v6549_v38 = vrot.slane %v16693_v35, 3  ;;  %v17288_v39 = vld [vmem:[%s17244_s6 + $0x50] sm:$0xff]  }
  0x18   : > { %15406 = vmatpush3.bf16.msra.mxu0 %v16672_v5  ;;  %14927 = vmatprep.subr.bf16.mxu1 %v16673_v6  ;;  %v6542_v23 = vsel %vm4968_vm1, %v6539_v18, %v6541_v21  ;;  %v6544_v31 = vsel %vm4968_vm1, %v6541_v21, %v6543_v25  ;;  %v6547_v37 = vrot.slane %v16689_v30, 3  ;;  %v16692_v41 = vld [vmem:[%s17244_s6 + $0x30] sm:$0xff]   ;;  %v19419_v46 = vrot.slane %v17288_v39, 3  ;;  %v16700_v47 = vld [vmem:[%s17244_s6 + $0x18] sm:$0xff]   ;;  %v16703_v54 = vld [vmem:[%s17244_s6 + $0x20] sm:$0xff]  }
  0x19   : > { %15407 = vmatprep.subr.bf16.mxu0 %v16674_v7  ;;  %v6546_v33 = vsel %vm4968_vm1, %v6543_v25, %v6545_v28  ;;  %v16699_v45 = vld [vmem:[%s17244_s6 + $0x10] sm:$0xf8]   ;;  %v16694_v50 = vld [vmem:[%s17244_s6 + $0x38] sm:$0xff]   ;;  %v7032_v51 = vshrl.u32 %v16700_v47, 16  ;;  %v7035_v52 = vshll.u32 %v16700_v47, 16  ;;  %v16698_v55 = vld [vmem:[%s17244_s6 + $0x40] sm:$0xff]  }
  0x1a   : > { %v6548_v42 = vsel %vm4968_vm1, %v6545_v28, %v6547_v37  ;;  %v6550_v44 = vsel %vm4968_vm1, %v6547_v37, %v6549_v38  ;;  %v7024_v48 = vshrl.u32 %v16699_v45, 16  ;;  %v7027_v49 = vshll.u32 %v16699_v45, 16  ;;  %v16705_v3 = vld [vmem:[%s17244_s6 + $0x28] sm:$0xff]   ;;  %v16709_v12 = vld [vmem:[%s17244_s6 + $0x38] sm:$0xff]   ;;  %v16704_v19 = vld [vmem:[%s17244_s6 + $0x50] sm:$0xff]  }
  0x1b   : > { %14928 = vmatpush3.bf16.msra.mxu1 %v16673_v6  ;;  %v7034_v58 = vrot.slane %v7032_v51, 3  ;;  %v7037_v59 = vrot.slane %v7035_v52, 4  ;;  %v7041_v60 = vshrl.u32 %v16703_v54, 16  ;;  %v7044_v61 = vshll.u32 %v16703_v54, 16  ;;  %v16711_v18 = vld [vmem:[%s19416_s1 + $0x38] sm:$0xff]   ;;  %v16716_v35 = vld [vmem:[%s17244_s6 + $0x50] sm:$0xff]   ;;  %vm19242_vm10 = vmand %vm13377_vm9, %vm13378_vm8 }
  0x1c   : > { %15408 = vmatpush3.bf16.msra.mxu0 %v16674_v7  ;;  %14961 = vmatprep.subr.bf16.mxu1 %v16679_v14  ;;  %v7026_v56 = vrot.slane %v7024_v48, 3  ;;  %v7029_v57 = vrot.slane %v7027_v49, 4  ;;  %v6552_v63 = vsel %vm4968_vm1, %v6549_v38, %v19419_v46  ;;  %v7050_v5 = vshrl.u32 %v16705_v3, 16  ;;  %v16707_v7 = vld [vmem:[%s17244_s6 + $0x30] sm:$0xff]   ;;  %v16719_v45 = vld [vmem:[%s17244_s6 + $0x58] sm:$0xff]   ;;  %v17347_v49 = vld [vmem:[%s19416_s1 + $0x40] sm:$0xff]  }
  0x1d   : > { %15441 = vmatprep.subr.bf16.mxu0 %v16690_v32  ;;  %v7038_v0 = vor.u32 %v7037_v59, %v7034_v58  ;;  %v7043_v1 = vrot.slane %v7041_v60, 3  ;;  %v7046_v2 = vrot.slane %v7044_v61, 4  ;;  %v7053_v6 = vshll.u32 %v16705_v3, 16  ;;  %v16722_v61 = vld [vmem:[%s17244_s6 + $0x60] sm:$0xff]  }
  0x1e   : > { %14930 = vmatmul.mubr.msk.bf16.vlgmr.msra.gmra.mrb[0].mxu1 %vm316_vm0, %v16678_v13  ;;  %v7030_v62 = vor.u32 %v7029_v57, %v7026_v56  ;;  %v7052_v9 = vrot.slane %v7050_v5, 3  ;;  %v7059_v11 = vshrl.u32 %v16707_v7, 16  ;;  %v7062_v13 = vshll.u32 %v16707_v7, 16  ;;  %v16710_v56 = vld [vmem:[%s17244_s6 + $0x68] sm:$0xff]   ;;  %v16713_v57 = vld [vmem:[%s17244_s6 + $0x70] sm:$0xff]  }
  0x1f   : > { %15410 = vmatmul.mubr.msk.bf16.vlgmr.msra.gmra.mrb[0].mxu0 %vm316_vm0, %v6540_v20  ;;  %14962 = vmatpush3.bf16.msra.mxu1 %v16679_v14  ;;  %v7047_v8 = vor.u32 %v7046_v2, %v7043_v1  ;;  %v7055_v10 = vrot.slane %v7053_v6, 4  ;;  %v16701_v14 = vld [vmem:[%s17244_s6 + $0x48] sm:$0xff]   ;;  %v7068_v16 = vshrl.u32 %v16709_v12, 16  ;;  %v7095_v47 = vshrl.u32 %v16716_v35, 16  ;;  %v16720_v5 = vld [vmem:[%s17244_s6 + $0x10] sm:$0xff]  }
  0x20   : > { %14933 = vmatprep.mubr.msk.bf16.mxu1 %vm316_vm0, %v16681_v17  ;;  %15413 = vmatprep.mubr.msk.bf16.mxu0 %vm316_vm0, %v6542_v23  ;;  %v7039_v4 = vsel %vm7022_vm2, %v7030_v62, %v7038_v0  ;;  %v7071_v17 = vshll.u32 %v16709_v12, 16  ;;  %v7061_v20 = vrot.slane %v7059_v11, 3  ;;  %v7064_v22 = vrot.slane %v7062_v13, 4  ;;  %v16712_v23 = vld [vmem:[%s17244_s6 + $0x40] sm:$0xff]   ;;  %v16724_v1 = vld [vmem:[%s17244_s6 + $0x68] sm:$0xff]   ;;  %v17367_v12 = vld [vmem:[%s17244_s6 + $0x18] sm:$0xff]  }
  0x21   : > { %14963 = vmatprep.subr.bf16.mxu1 %v16688_v29  ;;  %15442 = vmatpush3.bf16.msra.mxu0 %v16690_v32  ;;  %v7056_v15 = vor.u32 %v7055_v10, %v7052_v9  ;;  %v7048_v21 = vsel %vm7022_vm2, %v7038_v0, %v7047_v8  ;;  %v7070_v25 = vrot.slane %v7068_v16, 3  ;;  %v7080_v30 = vshll.u32 %v16712_v23, 16  ;;  %v16706_v32 = vld [vmem:[%s17244_s6 + $0x58] sm:$0xff]  }
  0x22   : > { %15443 = vmatprep.subr.bf16.mxu0 %v16691_v34  ;;  %v7073_v26 = vrot.slane %v7071_v17, 4  ;;  %v7065_v28 = vor.u32 %v7064_v22, %v7061_v20  ;;  %v7098_v48 = vshll.u32 %v16716_v35, 16  ;;  %v7104_v54 = vshrl.u32 %v16719_v45, 16  ;;  %v16715_v10 = vld [vmem:[%s17244_s6 + $0x78] sm:$0x3f]  }
  0x23   : > { %14964 = vmatpush3.bf16.msra.mxu1 %v16688_v29  ;;  %v7077_v29 = vshrl.u32 %v16712_v23, 16  ;;  %v7097_v58 = vrot.slane %v7095_v47, 3  ;;  %v7116_v9 = vshll.u32 %v16722_v61, 16  ;;  %v7122_v13 = vshrl.u32 %v16724_v1, 16  ;;  %v16728_v22 = vld [vmem:[%s17244_s6 + $0x78] sm:$0xff]  }
  0x24   : > { %14965 = vmatprep.subr.bf16.mxu1 %v16702_v53  ;;  %v7066_v37 = vsel %vm7022_vm2, %v7056_v15, %v7065_v28  ;;  %v7100_v59 = vrot.slane %v7098_v48, 4  ;;  %v7106_v3 = vrot.slane %v7104_v54, 3  ;;  %v695_v17 = vshll.u32 %v16720_v5, 16 }
  0x25   : > { %15444 = vmatpush3.bf16.msra.mxu0 %v16691_v34  ;;  %v7079_v38 = vrot.slane %v7077_v29, 3  ;;  %v699_v20 = vshrl.u32 %v16720_v5, 16  ;;  %v707_v48 = vshrl.u32 %v17367_v12, 16 }
  0x26   : > { %14934 = vmatmul.mubr.msk.bf16.gmra.mrb[4].mxu1 %vm316_vm0, %v16683_v24  ;;  %15445 = vmatprep.subr.bf16.mxu0 %v16696_v40  ;;  %v7057_v24 = vsel %vm7022_vm2, %v7047_v8, %v7056_v15  ;;  %v7101_v6 = vor.u32 %v7100_v59, %v7097_v58  ;;  %v7113_v8 = vshrl.u32 %v16722_v61, 16  ;;  %v7125_v15 = vshll.u32 %v16724_v1, 16  ;;  %v16735_v61 = vld [vmem:[%s17244_s6 + $0x88] sm:$0xff]   ;;  %v16739_v1 = vld [vmem:[%s19416_s1 + $0x1d8] sm:$0xff]  }
  0x27   : > { %15414 = vmatmul.mubr.msk.bf16.gmra.mrb[4].mxu0 %vm316_vm0, %v6544_v31  ;;  %14937 = vmatprep.mubr.msk.bf16.mxu1 %vm316_vm0, %v16685_v27  ;;  %v16714_v27 = vld [vmem:[%s17244_s6 + $0x48] sm:$0xff]  }
  0x28   : > { %15417 = vmatprep.mubr.msk.bf16.mxu0 %vm316_vm0, %v6546_v33  ;;  %14966 = vmatpush3.bf16.msra.mxu1 %v16702_v53  ;;  %v7086_v31 = vshrl.u32 %v16714_v27, 16  ;;  %v7074_v33 = vor.u32 %v7073_v26, %v7070_v25  ;;  %v7089_v34 = vshll.u32 %v16714_v27, 16  ;;  %v703_v25 = vshll.u32 %v17367_v12, 16  ;;  %v16725_v27 = vld [vmem:[%s17244_s6 + $0x20] sm:$0xff]  }
  0x29   : > { %15446 = vmatpush3.bf16.msra.mxu0 %v16696_v40  ;;  %14967 = vmatprep.subr.bf16.mxu1 %v16711_v18  ;;  %v7082_v40 = vrot.slane %v7080_v30, 4  ;;  %v7124_v26 = vrot.slane %v7122_v13, 3  ;;  %v7127_v29 = vrot.slane %v7125_v15, 4  ;;  %v17377_v30 = vld [vmem:[%s17244_s6 + $0x28] sm:$0xff]  }
  0x2a   : > { %15447 = vmatprep.subr.bf16.mxu0 %v16697_v43  ;;  %v16737_v12 = vld [vmem:[%s17244_s6 + $0x90] ss:$0 sps:$4 sm:$0x33]  }
  0x2b   : > { %v7083_v51 = vor.u32 %v7082_v40, %v7079_v38 }
  0x2c   : > { %14968 = vmatpush3.bf16.msra.mxu1 %v16711_v18 }
  0x2d   : > { %15448 = vmatpush3.bf16.msra.mxu0 %v16697_v43  ;;  %v7075_v43 = vsel %vm7022_vm2, %v7065_v28, %v7074_v33  ;;  %15001 = vmatprep.subr.bf16.mxu1 %v17347_v49  ;;  %v7084_v62 = vsel %vm7022_vm2, %v7074_v33, %v7083_v51 }
  0x2e   : > { %14938 = vmatmul.mubr.msk.bf16.gmra.mrb[8].mxu1 %vm316_vm0, %v16687_v36  ;;  %v16708_v36 = vld [vmem:[%s17244_s6 + $0x60] sm:$0xff]  }
  0x2f   : > { %15418 = vmatmul.mubr.msk.bf16.gmra.mrb[8].mxu0 %vm316_vm0, %v6548_v42  ;;  %14941 = vmatprep.mubr.msk.bf16.mxu1 %vm316_vm0, %v16692_v41  ;;  %v7088_v41 = vrot.slane %v7086_v31, 3  ;;  %v16717_v42 = vld [vmem:[%s17244_s6] sm:$0xff]   ;;  %v697_v31 = vrot.slane %v695_v17, 1 }
  0x30   : > { %15421 = vmatprep.mubr.msk.bf16.mxu0 %vm316_vm0, %v6550_v44  ;;  %v7091_v44 = vrot.slane %v7089_v34, 4  ;;  %v682_v52 = vshll.u32 %v16717_v42, 16 }
  0x31   : > { %v701_v40 = vor.u32 %v699_v20, %v697_v31 }
  0x32   : > { %v7092_v53 = vor.u32 %v7091_v44, %v7088_v41  ;;  %v684_v0 = vrot.slane %v682_v52, 1  ;;  %v705_v41 = vrot.slane %v703_v25, 1  ;;  %v711_v44 = vshll.u32 %v16725_v27, 16  ;;  %v16738_v52 = vld [vmem:[%s19416_s1 + $0x1d0] sm:$0xff]   ;;  %v16736_v25 = vld [vmem:[%s17244_s6 + $0x40] sm:$0xff]  }
  0x34   : > { %v7093_v2 = vsel %vm7022_vm2, %v7083_v51, %v7092_v53  ;;  %v7102_v18 = vsel %vm7022_vm2, %v7092_v53, %v7101_v6  ;;  %v715_v51 = vshrl.u32 %v16725_v27, 16  ;;  %v706_v58 = vsel %vm678_vm3, %v701_v40, %v705_v41  ;;  %v16752_v40 = vld [vmem:[%s19416_s1 + $0x58] sm:$0xff]  }
  0x36   : > { %14942 = vmatmul.mubr.msk.bf16.gmra.mrb[12].mxu1 %vm316_vm0, %v16694_v50  ;;  %v16718_v50 = vld [vmem:[%s17244_s6 + $0x8] sm:$0xff]  }
  0x37   : > { %15422 = vmatmul.mubr.msk.bf16.gmra.mrb[12].mxu0 %vm316_vm0, %v6552_v63  ;;  %14945 = vmatprep.mubr.msk.bf16.mxu1 %vm316_vm0, %v16698_v55  ;;  %v7107_v55 = vshll.u32 %v16719_v45, 16  ;;  %v687_v60 = vshll.u32 %v16718_v50, 16  ;;  %v680_v63 = vshrl.u32 %v16717_v42, 16  ;;  %v691_v16 = vshrl.u32 %v16718_v50, 16 }
  0x38   : > { %15449 = vmatprep.mubr.msk.bf16.mxu0 %vm316_vm0, %v7039_v4  ;;  %v7128_v42 = vor.u32 %v7127_v29, %v7124_v26  ;;  %v719_v45 = vshll.u32 %v17377_v30, 16  ;;  %v7170_v29 = vshll.u32 %v16737_v12, 16 }
  0x39   : > { %v7109_v4 = vrot.slane %v7107_v55, 4  ;;  %v689_v7 = vrot.slane %v687_v60, 1  ;;  %v685_v11 = vor.u32 %v684_v0, %v680_v63  ;;  %v16729_v0 = vld [vmem:[%s17244_s6 + $0x30] sm:$0xff]  }
  0x3a   : > { %v721_v63 = vrot.slane %v719_v45, 1  ;;  %v727_v13 = vshll.u32 %v16729_v0, 16 }
  0x3b   : > { %v690_v23 = vsel %vm678_vm3, %v685_v11, %v689_v7  ;;  %v693_v33 = vor.u32 %v691_v16, %v689_v7  ;;  %v7161_v11 = vshll.u32 %v16735_v61, 16  ;;  %v16743_v16 = vld [vmem:[%s19416_s1 + $0x50] sm:$0xff]  }
  0x3d   : > { %v698_v47 = vsel %vm678_vm3, %v693_v33, %v697_v31 }
  0x3e   : > { %14946 = vmatmul.mubr.msk.bf16.gmra.mrb[16].mxu1 %vm316_vm0, %v16701_v14  ;;  %v7110_v14 = vor.u32 %v7109_v4, %v7106_v3  ;;  %v723_v3 = vshrl.u32 %v17377_v30, 16  ;;  %v16734_v4 = vld [vmem:[%s17244_s6 + $0x38] sm:$0xff]   ;;  %v16740_v30 = vld [vmem:[%s17244_s6 + $0x48] sm:$0xff]  }
  0x3f   : > { %15450 = vmatmul.mubr.msk.bf16.vlgmr.msra.gmra.mrb[0].mxu0 %vm316_vm0, %v7048_v21  ;;  %14949 = vmatprep.mubr.msk.bf16.mxu1 %vm316_vm0, %v16704_v19  ;;  %v7115_v19 = vrot.slane %v7113_v8, 3  ;;  %v16726_v21 = vld [vmem:[%s17244_s6 + $0x70] sm:$0xff]   ;;  %v735_v15 = vshll.u32 %v16734_v4, 16 }
  0x40   : > { %15453 = vmatprep.mubr.msk.bf16.mxu0 %vm316_vm0, %v7057_v24  ;;  %v7118_v24 = vrot.slane %v7116_v9, 4  ;;  %v7111_v28 = vsel %vm7022_vm2, %v7101_v6, %v7110_v14  ;;  %v7131_v34 = vshrl.u32 %v16726_v21, 16  ;;  %v7134_v35 = vshll.u32 %v16726_v21, 16 }
  0x41   : > { %v725_v26 = vor.u32 %v723_v3, %v721_v63  ;;  %v737_v27 = vrot.slane %v735_v15, 1  ;;  %v16749_v3 = vld [vmem:[%s17244_s6 + $0x68] sm:$0xff]  }
  0x42   : > { %v7119_v38 = vor.u32 %v7118_v24, %v7115_v19  ;;  %v7133_v50 = vrot.slane %v7131_v34, 3  ;;  %v7136_v54 = vrot.slane %v7134_v35, 4  ;;  %v729_v24 = vrot.slane %v727_v13, 1 }
  0x43   : > { %v743_v34 = vshll.u32 %v16736_v25, 16 }
  0x44   : > { %v7120_v53 = vsel %vm7022_vm2, %v7110_v14, %v7119_v38  ;;  %v7129_v59 = vsel %vm7022_vm2, %v7119_v38, %v7128_v42  ;;  %v7137_v5 = vor.u32 %v7136_v54, %v7133_v50  ;;  %v730_v35 = vsel %vm678_vm3, %v725_v26, %v729_v24  ;;  %v16745_v54 = vld [vmem:[%s17244_s6 + $0x58] sm:$0xff]  }
  0x45   : > { %v747_v38 = vshrl.u32 %v16736_v25, 16  ;;  %v787_v25 = vshrl.u32 %v16749_v3, 16 }
  0x46   : > { %14950 = vmatmul.mubr.msk.bf16.gmra.mrb[20].mxu1 %vm316_vm0, %v16706_v32  ;;  %v16732_v32 = vld [vmem:[%s19416_s1 + $0x1c0] sm:$0xff]   ;;  %v7138_v17 = vsel %vm7022_vm2, %v7128_v42, %v7137_v5 }
  0x47   : > { %15454 = vmatmul.mubr.msk.bf16.gmra.mrb[4].mxu0 %vm316_vm0, %v7066_v37  ;;  %14953 = vmatprep.mubr.msk.bf16.mxu1 %vm316_vm0, %v16708_v36  ;;  %v7140_v36 = vshrl.u32 %v16728_v22, 16  ;;  %v16733_v37 = vld [vmem:[%s19416_s1 + $0x1c8] sm:$0xff]  }
  0x48   : > { %15457 = vmatprep.mubr.msk.bf16.mxu0 %vm316_vm0, %v7075_v43  ;;  %15481 = vmatprep.subr.bf16.mxu0 %v16732_v32  ;;  %v7143_v43 = vshll.u32 %v16728_v22, 16 }
  0x49   : > { %15482 = vmatpush3.bf16.msra.mxu0 %v16732_v32  ;;  %v7142_v55 = vrot.slane %v7140_v36, 3  ;;  %v739_v36 = vshrl.u32 %v16734_v4, 16 }
  0x4a   : > { %15483 = vmatprep.subr.bf16.mxu0 %v16733_v37  ;;  %v7145_v60 = vrot.slane %v7143_v43, 4  ;;  %v7172_v43 = vrot.slane %v7170_v29, 4 }
  0x4b   : > { %v741_v50 = vor.u32 %v739_v36, %v737_v27  ;;  %v16755_v36 = vld [vmem:[%s17244_s6 + $0x44] sm:$0xff]  }
  0x4c   : > { %v7146_v9 = vor.u32 %v7145_v60, %v7142_v55 }
  0x4d   : > { %15484 = vmatpush3.bf16.msra.mxu0 %v16733_v37 }
  0x4e   : > { %14954 = vmatmul.mubr.msk.bf16.gmra.mrb[24].mxu1 %vm316_vm0, %v16710_v56  ;;  %v16730_v56 = vld [vmem:[%s19416_s1 + $0x48] sm:$0xff]   ;;  %15485 = vmatprep.subr.bf16.mxu0 %v16738_v52  ;;  %v7147_v21 = vsel %vm7022_vm2, %v7137_v5, %v7146_v9 }
  0x4f   : > { %15458 = vmatmul.mubr.msk.bf16.gmra.mrb[8].mxu0 %vm316_vm0, %v7084_v62  ;;  %14957 = vmatprep.mubr.msk.bf16.mxu1 %vm316_vm0, %v16713_v57  ;;  %v16731_v57 = vld [vmem:[%s17244_s6 + $0x80] sm:$0xff]   ;;  %v713_v62 = vrot.slane %v711_v44, 1  ;;  %v751_v44 = vshll.u32 %v16740_v30, 16 }
  0x50   : > { %15461 = vmatprep.mubr.msk.bf16.mxu0 %vm316_vm0, %v7093_v2  ;;  %v709_v2 = vor.u32 %v707_v48, %v705_v41  ;;  %v7149_v7 = vshrl.u32 %v16731_v57, 16  ;;  %v7152_v8 = vshll.u32 %v16731_v57, 16  ;;  %v16742_v48 = vld [vmem:[%s17244_s6 + $0x50] sm:$0xff]  }
  0x51   : > { %v717_v6 = vor.u32 %v715_v51, %v713_v62  ;;  %15486 = vmatpush3.bf16.msra.mxu0 %v16738_v52  ;;  %v759_v55 = vshll.u32 %v16742_v48, 16  ;;  %v16741_v57 = vld [vmem:[%s17244_s6 + $0x14] sm:$0xff]  }
  0x52   : > { %15487 = vmatprep.subr.bf16.mxu0 %v16739_v1  ;;  %v714_v14 = vsel %vm678_vm3, %v709_v2, %v713_v62  ;;  %v7151_v19 = vrot.slane %v7149_v7, 3  ;;  %v7154_v20 = vrot.slane %v7152_v8, 4  ;;  %v767_v62 = vshll.u32 %v16745_v54, 16 }
  0x54   : > { %v7155_v31 = vor.u32 %v7154_v20, %v7151_v19  ;;  %v769_v5 = vrot.slane %v767_v62, 1  ;;  %v16748_v19 = vld [vmem:[%s17244_s6 + $0x2c] sm:$0xff]   ;;  %v16772_v20 = vld [vmem:[%s19416_s1 + $0x1e0] sm:$0xff]  }
  0x55   : > { %15488 = vmatpush3.bf16.msra.mxu0 %v16739_v1  ;;  %v17450_v1 = vld [vmem:[%s19416_s1 + $0x60] sm:$0xff]  }
  0x56   : > { %14958 = vmatmul.mubr.msk.bf16.gmra.mrb[28].mxu1 %vm316_vm0, %v16715_v10  ;;  %v7158_v10 = vshrl.u32 %v16735_v61, 16  ;;  %v7156_v41 = vsel %vm7022_vm2, %v7146_v9, %v7155_v31  ;;  %v763_v61 = vshrl.u32 %v16742_v48, 16  ;;  %v771_v9 = vshrl.u32 %v16745_v54, 16  ;;  %15521 = vmatprep.subr.bf16.mxu0 %v16772_v20  ;;  %v16760_v48 = vld [vmem:[%s17244_s6 + $0x10] sm:$0xff]  }
  0x57   : > { %15462 = vmatmul.mubr.msk.bf16.gmra.mrb[12].mxu0 %vm316_vm0, %v7102_v18  ;;  %14969 = vmatprep.mubr.msk.bf16.mxu1 %vm316_vm0, %v690_v23  ;;  %v722_v18 = vsel %vm678_vm3, %v717_v6, %v721_v63  ;;  %v7163_v23 = vrot.slane %v7161_v11, 4  ;;  %v16747_v63 = vld [vmem:[%s17244_s6 + $0x60] sm:$0xff]  }
  0x58   : > { %15465 = vmatprep.mubr.msk.bf16.mxu0 %vm316_vm0, %v7111_v28  ;;  %v7160_v22 = vrot.slane %v7158_v10, 3  ;;  %v7167_v28 = vshrl.u32 %v16737_v12, 16  ;;  %v16744_v6 = vld [vmem:[%s17244_s6 + $0x1c] sm:$0xff]   ;;  %v775_v7 = vshll.u32 %v16747_v63, 16  ;;  %v783_v10 = vshll.u32 %v16749_v3, 16  ;;  %v16746_v12 = vld [vmem:[%s17244_s6 + $0x24] sm:$0xff]  }
  0x59   : > { %v779_v13 = vshrl.u32 %v16747_v63, 16  ;;  %v773_v15 = vor.u32 %v771_v9, %v769_v5  ;;  %v16768_v3 = vld [vmem:[%s17244_s6 + $0x74] sm:$0xff]  }
  0x5a   : > { %v7164_v33 = vor.u32 %v7163_v23, %v7160_v22  ;;  %v7169_v37 = vrot.slane %v7167_v28, 3  ;;  %v16773_v22 = vld [vmem:[%s19416_s1 + $0x1e8] sm:$0xff]  }
  0x5c   : > { %v7165_v45 = vsel %vm7022_vm2, %v7155_v31, %v7164_v33  ;;  %v7173_v51 = vor.u32 %v7172_v43, %v7169_v37  ;;  %v16778_v31 = vld [vmem:[%s19416_s1 + $0x1f0] sm:$0xff]  }
  0x5e   : > { %14970 = vmatmul.mubr.msk.bf16.vlgmr.msra.gmra.mrb[0].mxu1 %vm316_vm0, %v698_v47  ;;  %v745_v47 = vrot.slane %v743_v34, 1  ;;  %v16753_v34 = vld [vmem:[%s17244_s6 + $0x3c] sm:$0xff]  }
  0x5f   : > { %15466 = vmatmul.mubr.msk.bf16.gmra.mrb[16].mxu0 %vm316_vm0, %v7120_v53  ;;  %15002 = vmatpush3.bf16.msra.mxu1 %v17347_v49  ;;  %v731_v49 = vshrl.u32 %v16729_v0, 16  ;;  %v753_v53 = vrot.slane %v751_v44, 1  ;;  %v761_v0 = vrot.slane %v759_v55, 1  ;;  %v16762_v55 = vld [vmem:[%s17244_s6 + $0x5c] sm:$0xff]  }
  0x60   : > { %14973 = vmatprep.mubr.msk.bf16.mxu1 %vm316_vm0, %v706_v58  ;;  %15469 = vmatprep.mubr.msk.bf16.mxu0 %vm316_vm0, %v7129_v59  ;;  %v749_v52 = vor.u32 %v747_v38, %v745_v47  ;;  %v755_v58 = vshrl.u32 %v16740_v30, 16  ;;  %v7174_v59 = vsel %vm7022_vm2, %v7164_v33, %v7173_v51  ;;  %v16758_v38 = vld [vmem:[%s17244_s6 + $0x8] sm:$0xff]   ;;  %v16759_v51 = vld [vmem:[%s17244_s6 + $0x54] sm:$0xff]  }
  0x61   : > { %15003 = vmatprep.subr.bf16.mxu1 %v16730_v56  ;;  %v733_v32 = vor.u32 %v731_v49, %v729_v24  ;;  %v765_v4 = vor.u32 %v763_v61, %v761_v0  ;;  %v777_v49 = vrot.slane %v775_v7, 1  ;;  %v16750_v24 = vld [vmem:[%s17244_s6 + $0x34] sm:$0xff]   ;;  %v1257_v44 = vrot.slane %v16758_v38, 1  ;;  %v16770_v61 = vld [vmem:[%s19416_s1 + $0x68] sm:$0xff]  }
  0x62   : > { %v754_v60 = vsel %vm678_vm3, %v749_v52, %v753_v53  ;;  %v757_v2 = vor.u32 %v755_v58, %v753_v53  ;;  %v16763_v52 = vld [vmem:[%s17244_s6 + $0x18] sm:$0xff]   ;;  %v1259_v53 = vrot.slane %v16760_v48, 1  ;;  %v16764_v58 = vld [vmem:[%s17244_s6 + $0x64] sm:$0xff]  }
  0x63   : > { %15004 = vmatpush3.bf16.msra.mxu1 %v16730_v56  ;;  %v738_v42 = vsel %vm678_vm3, %v733_v32, %v737_v27  ;;  %v746_v56 = vsel %vm678_vm3, %v741_v50, %v745_v47  ;;  %v770_v11 = vsel %vm678_vm3, %v765_v4, %v769_v5  ;;  %v778_v23 = vsel %vm678_vm3, %v773_v15, %v777_v49  ;;  %v16756_v47 = vld [vmem:[%s17244_s6 + $0x4c] sm:$0xff]   ;;  %v16793_v7 = vld [vmem:[%s19416_s1 + $0x78] sm:$0xff]  }
  0x64   : > { %15005 = vmatprep.subr.bf16.mxu1 %v16743_v16  ;;  %v762_v8 = vsel %vm678_vm3, %v757_v2, %v761_v0  ;;  %v1261_v54 = vrot.slane %v16763_v52, 1  ;;  %v16784_v0 = vld [vmem:[%s19416_s1 + $0x70] sm:$0xff]   ;;  %v16781_v15 = vld [vmem:[%s17244_s6 + $0x18] sm:$0xf8]  }
  0x65   : > { %v16766_v2 = vld [vmem:[%s17244_s6 + $0x6c] sm:$0xff]  }
  0x66   : > { %14974 = vmatmul.mubr.msk.bf16.gmra.mrb[4].mxu1 %vm316_vm0, %v714_v14  ;;  %v16751_v14 = vld [vmem:[%s17244_s6 + $0x70] sm:$0xff]  }
  0x67   : > { %15470 = vmatmul.mubr.msk.bf16.gmra.mrb[20].mxu0 %vm316_vm0, %v7138_v17  ;;  %14977 = vmatprep.mubr.msk.bf16.mxu1 %vm316_vm0, %v722_v18  ;;  %v781_v17 = vor.u32 %v779_v13, %v777_v49  ;;  %v16754_v18 = vld [vmem:[%s17244_s6 + $0x78] sm:$0x7f]   ;;  %v795_v27 = vshrl.u32 %v16751_v14, 16  ;;  %v16769_v5 = vld [vmem:[%s17244_s6 + $0x30] sm:$0xff]   ;;  %v16776_v13 = vld [vmem:[%s17244_s6 + $0x40] sm:$0xff]  }
  0x68   : > { %15473 = vmatprep.mubr.msk.bf16.mxu0 %vm316_vm0, %v7147_v21  ;;  %15006 = vmatpush3.bf16.msra.mxu1 %v16743_v16  ;;  %v785_v16 = vrot.slane %v783_v10, 1  ;;  %v791_v21 = vshll.u32 %v16751_v14, 16  ;;  %v799_v28 = vshll.u32 %v16754_v18, 16  ;;  %v16771_v10 = vld [vmem:[%s17244_s6 + $0x7c] sm:$0xff]   ;;  %v16780_v14 = vld [vmem:[%s17244_s6 + $0x48] sm:$0xff]   ;;  %v16819_v52 = vld [vmem:[%s19416_s1 + $0x210] sm:$0xff]  }
  0x69   : > { %15007 = vmatprep.subr.bf16.mxu1 %v16752_v40 }
  0x6a   : > { %v786_v26 = vsel %vm678_vm3, %v781_v17, %v785_v16  ;;  %v793_v29 = vrot.slane %v791_v21, 1  ;;  %v789_v30 = vor.u32 %v787_v25, %v785_v16  ;;  %v801_v33 = vrot.slane %v799_v28, 1  ;;  %v16782_v17 = vld [vmem:[%s17244_s6 + $0x20] sm:$0xff]   ;;  %v16783_v25 = vld [vmem:[%s17244_s6 + $0x50] sm:$0xff]   ;;  %v16786_v28 = vld [vmem:[%s17244_s6 + $0x58] sm:$0xff]  }
  0x6b   : > { %v8077_v21 = vrot.slane %v16781_v15, 3 }
  0x6c   : > { %15008 = vmatpush3.bf16.msra.mxu1 %v16752_v40  ;;  %v797_v32 = vor.u32 %v795_v27, %v793_v29  ;;  %v794_v37 = vsel %vm678_vm3, %v789_v30, %v793_v29  ;;  %v16785_v27 = vld [vmem:[%s17244_s6 + $0x28] sm:$0xff]   ;;  %v16787_v30 = vld [vmem:[%s17244_s6 + $0x30] sm:$0xff]  }
  0x6d   : > { %15041 = vmatprep.subr.bf16.mxu1 %v17450_v1 }
  0x6e   : > { %14978 = vmatmul.mubr.msk.bf16.gmra.mrb[8].mxu1 %vm316_vm0, %v730_v35  ;;  %v16779_v35 = vld [vmem:[%s19416_s1 + $0x1f8] sm:$0xff]   ;;  %v802_v40 = vsel %vm678_vm3, %v797_v32, %v801_v33  ;;  %v8080_v32 = vrot.slane %v16785_v27, 3 }
  0x6f   : > { %15474 = vmatmul.mubr.msk.bf16.gmra.mrb[24].mxu0 %vm316_vm0, %v7156_v41  ;;  %14981 = vmatprep.mubr.msk.bf16.mxu1 %vm316_vm0, %v738_v42  ;;  %v16757_v41 = vld [vmem:[%s17244_s6] sm:$0xfe]   ;;  %v803_v42 = vshrl.u32 %v16754_v18, 16 }
  0x70   : > { %15477 = vmatprep.mubr.msk.bf16.mxu0 %vm316_vm0, %v7165_v45  ;;  %v1256_v43 = vrot.slane %v16757_v41, 1  ;;  %v16813_v18 = vld [vmem:[%s19416_s1 + $0x200] sm:$0xff]   ;;  %v16790_v41 = vld [vmem:[%s17244_s6 + $0x68] sm:$0xff]  }
  0x71   : > { %v805_v45 = vor.u32 %v803_v42, %v801_v33  ;;  %v1277_v33 = vrot.slane %v16786_v28, 1  ;;  %v16791_v42 = vld [vmem:[%s17244_s6 + $0x40] sm:$0xff]   ;;  %v1281_v48 = vrot.slane %v16790_v41, 1  ;;  %v17637_v41 = vld [vmem:[%s17244_s6 + $0x78] sm:$0xff]  }
  0x72   : > { %v1258_v50 = vsel %vm1255_vm4, %v1256_v43, %v1257_v44 }
  0x76   : > { %14982 = vmatmul.mubr.msk.bf16.gmra.mrb[12].mxu1 %vm316_vm0, %v746_v56  ;;  %v1260_v56 = vsel %vm1255_vm4, %v1257_v44, %v1259_v53  ;;  %v16814_v44 = vld [vmem:[%s19416_s1 + $0x208] sm:$0xff]  }
  0x77   : > { %15478 = vmatmul.mubr.msk.bf16.gmra.mrb[28].mxu0 %vm316_vm0, %v7174_v59  ;;  %14985 = vmatprep.mubr.msk.bf16.mxu1 %vm316_vm0, %v754_v60  ;;  %v16767_v59 = vld [vmem:[%s17244_s6 + $0x28] sm:$0xff]   ;;  %v1262_v60 = vsel %vm1255_vm4, %v1259_v53, %v1261_v54  ;;  %v16792_v53 = vld [vmem:[%s17244_s6 + $0x70] sm:$0xff]  }
  0x78   : > { %15489 = vmatprep.mubr.msk.bf16.mxu0 %vm316_vm0, %v16741_v57  ;;  %v16765_v57 = vld [vmem:[%s17244_s6 + $0x20] sm:$0xff]   ;;  %v1265_v63 = vrot.slane %v16767_v59, 1  ;;  %v17595_v59 = vld [vmem:[%s17244_s6 + $0x78] sm:$0x7f]  }
  0x79   : > { %v1263_v62 = vrot.slane %v16765_v57, 1 }
  0x7b   : > { %v1264_v4 = vsel %vm1255_vm4, %v1261_v54, %v1263_v62  ;;  %v16798_v54 = vld [vmem:[%s17244_s6] sm:$0xfe]  }
  0x7e   : > { %14986 = vmatmul.mubr.msk.bf16.gmra.mrb[16].mxu1 %vm316_vm0, %v762_v8  ;;  %v1267_v8 = vrot.slane %v16769_v5, 1  ;;  %v16801_v5 = vld [vmem:[%s17244_s6 + $0x10] sm:$0xff]  }
  0x7f   : > { %15490 = vmatmul.mubr.msk.bf16.vlgmr.msra.gmra.mrb[0].mxu0 %vm316_vm0, %v16744_v6  ;;  %14989 = vmatprep.mubr.msk.bf16.mxu1 %vm316_vm0, %v770_v11  ;;  %v16774_v6 = vld [vmem:[%s17244_s6 + $0x38] sm:$0xff]   ;;  %v17540_v11 = vld [vmem:[%s19416_s1 + $0x80] sm:$0xff]  }
  0x80   : > { %15493 = vmatprep.mubr.msk.bf16.mxu0 %vm316_vm0, %v16746_v12  ;;  %15522 = vmatpush3.bf16.msra.mxu0 %v16772_v20  ;;  %v1269_v9 = vrot.slane %v16774_v6, 1  ;;  %v16775_v12 = vld [vmem:[%s17244_s6 + $0x84] sm:$0xff]   ;;  %v1268_v49 = vsel %vm1255_vm4, %v1265_v63, %v1267_v8  ;;  %v1273_v20 = vrot.slane %v16780_v14, 1  ;;  %v1285_v6 = vrot.slane %v17595_v59, 1 }
  0x81   : > { %15523 = vmatprep.subr.bf16.mxu0 %v16773_v22 }
  0x82   : > { %v1270_v16 = vsel %vm1255_vm4, %v1267_v8, %v1269_v9  ;;  %v16797_v8 = vld [vmem:[%s17244_s6 + $0x58] sm:$0xff]  }
  0x83   : > { %v8092_v27 = vrot.slane %v16797_v8, 3  ;;  %v16811_v8 = vld [vmem:[%s19416_s1 + $0x88] sm:$0xff]  }
  0x84   : > { %15524 = vmatpush3.bf16.msra.mxu0 %v16773_v22  ;;  %v8078_v22 = vrot.slane %v16782_v17, 3  ;;  %v1758_v17 = vshll.u32 %v16801_v5, 16 }
  0x85   : > { %15525 = vmatprep.subr.bf16.mxu0 %v16778_v31 }
  0x86   : > { %14990 = vmatmul.mubr.msk.bf16.gmra.mrb[20].mxu1 %vm316_vm0, %v778_v23  ;;  %v8079_v29 = vsel %vm4968_vm1, %v8077_v21, %v8078_v22 }
  0x87   : > { %15494 = vmatmul.mubr.msk.bf16.gmra.mrb[4].mxu0 %vm316_vm0, %v16748_v19  ;;  %14993 = vmatprep.mubr.msk.bf16.mxu1 %vm316_vm0, %v786_v26  ;;  %v1271_v19 = vrot.slane %v16776_v13, 1 }
  0x88   : > { %15497 = vmatprep.mubr.msk.bf16.mxu0 %vm316_vm0, %v16750_v24  ;;  %15526 = vmatpush3.bf16.msra.mxu0 %v16778_v31  ;;  %v16777_v24 = vld [vmem:[%s17244_s6 + $0x8c] sm:$0x3f]   ;;  %v1275_v31 = vrot.slane %v16783_v25, 1  ;;  %v16806_v25 = vld [vmem:[%s17244_s6 + $0x20] sm:$0xff]  }
  0x89   : > { %15527 = vmatprep.subr.bf16.mxu0 %v16779_v35  ;;  %v1272_v23 = vsel %vm1255_vm4, %v1269_v9, %v1271_v19  ;;  %v1274_v26 = vsel %vm1255_vm4, %v1271_v19, %v1273_v20 }
  0x8a   : > { %v1278_v38 = vsel %vm1255_vm4, %v1275_v31, %v1277_v33 }
  0x8c   : > { %15528 = vmatpush3.bf16.msra.mxu0 %v16779_v35  ;;  %v1276_v35 = vsel %vm1255_vm4, %v1273_v20, %v1275_v31 }
  0x8d   : > { %15561 = vmatprep.subr.bf16.mxu0 %v16813_v18 }
  0x8e   : > { %14994 = vmatmul.mubr.msk.bf16.gmra.mrb[24].mxu1 %vm316_vm0, %v794_v37  ;;  %v8081_v37 = vsel %vm4968_vm1, %v8078_v22, %v8080_v32 }
  0x8f   : > { %15498 = vmatmul.mubr.msk.bf16.gmra.mrb[8].mxu0 %vm316_vm0, %v16753_v34  ;;  %14997 = vmatprep.mubr.msk.bf16.mxu1 %vm316_vm0, %v802_v40  ;;  %v8082_v34 = vrot.slane %v16787_v30, 3  ;;  %v16789_v40 = vld [vmem:[%s17244_s6 + $0x38] sm:$0xff]  }
  0x90   : > { %15501 = vmatprep.mubr.msk.bf16.mxu0 %vm316_vm0, %v16755_v36  ;;  %v16788_v36 = vld [vmem:[%s17244_s6 + $0x60] sm:$0xff]  }
  0x91   : > { %v8083_v43 = vsel %vm4968_vm1, %v8080_v32, %v8082_v34  ;;  %v1760_v32 = vrot.slane %v1758_v17, 2 }
  0x96   : > { %14998 = vmatmul.mubr.msk.bf16.gmra.mrb[32].mxu1 %vm316_vm0, %v805_v45  ;;  %v1279_v45 = vrot.slane %v16788_v36, 1 }
  0x97   : > { %15502 = vmatmul.mubr.msk.bf16.gmra.mrb[12].mxu0 %vm316_vm0, %v16756_v47  ;;  %15009 = vmatprep.mubr.msk.bf16.mxu1 %vm316_vm0, %v1258_v50  ;;  %v8084_v47 = vrot.slane %v16789_v40, 3  ;;  %v8086_v50 = vrot.slane %v16791_v42, 3  ;;  %v1776_v40 = vshll.u32 %v16806_v25, 16 }
  0x98   : > { %15505 = vmatprep.mubr.msk.bf16.mxu0 %vm316_vm0, %v16759_v51  ;;  %v16799_v51 = vld [vmem:[%s17244_s6 + $0x8] sm:$0xff]  }
  0x99   : > { %v8085_v57 = vsel %vm4968_vm1, %v8082_v34, %v8084_v47  ;;  %v16810_v34 = vld [vmem:[%s17244_s6 + $0x30] sm:$0xff]  }
  0x9e   : > { %15010 = vmatmul.mubr.msk.bf16.vlgmr.msra.gmra.mrb[0].mxu1 %vm316_vm0, %v1260_v56  ;;  %v16794_v56 = vld [vmem:[%s17244_s6 + $0x48] sm:$0xff]  }
  0x9f   : > { %15506 = vmatmul.mubr.msk.bf16.gmra.mrb[16].mxu0 %vm316_vm0, %v16762_v55  ;;  %15042 = vmatpush3.bf16.msra.mxu1 %v17450_v1  ;;  %v1266_v1 = vsel %vm1255_vm4, %v1263_v62, %v1265_v63  ;;  %v1280_v55 = vsel %vm1255_vm4, %v1277_v33, %v1279_v45  ;;  %v1746_v62 = vshrl.u32 %v16799_v51, 16  ;;  %v16820_v63 = vld [vmem:[%s19416_s1 + $0x218] sm:$0xff]  }
  0xa0   : > { %15013 = vmatprep.mubr.msk.bf16.mxu1 %vm316_vm0, %v1262_v60  ;;  %15509 = vmatprep.mubr.msk.bf16.mxu0 %vm316_vm0, %v16764_v58  ;;  %v1282_v58 = vsel %vm1255_vm4, %v1279_v45, %v1281_v48  ;;  %v17598_v60 = vld [vmem:[%s17244_s6 + $0x50] sm:$0xff]   ;;  %v17643_v45 = vld [vmem:[%s17244_s6 + $0x88] sm:$0xff]  }
  0xa1   : > { %15043 = vmatprep.subr.bf16.mxu1 %v16770_v61  ;;  %v1748_v9 = vrot.slane %v1746_v62, 1 }
  0xa3   : > { %15044 = vmatpush3.bf16.msra.mxu1 %v16770_v61  ;;  %v8087_v61 = vsel %vm4968_vm1, %v8084_v47, %v8086_v50 }
  0xa4   : > { %15045 = vmatprep.subr.bf16.mxu1 %v16784_v0 }
  0xa6   : > { %15014 = vmatmul.mubr.msk.bf16.gmra.mrb[4].mxu1 %vm316_vm0, %v1264_v4  ;;  %v1741_v4 = vshll.u32 %v16798_v54, 16 }
  0xa7   : > { %15510 = vmatmul.mubr.msk.bf16.gmra.mrb[20].mxu0 %vm316_vm0, %v16766_v2  ;;  %15017 = vmatprep.mubr.msk.bf16.mxu1 %vm316_vm0, %v1266_v1  ;;  %v1738_v2 = vshrl.u32 %v16798_v54, 16  ;;  %v8088_v1 = vrot.slane %v16794_v56, 3  ;;  %v1794_v54 = vshll.u32 %v16810_v34, 16  ;;  %v8100_v56 = vrot.slane %v17637_v41, 3 }
  0xa8   : > { %15513 = vmatprep.mubr.msk.bf16.mxu0 %vm316_vm0, %v16768_v3  ;;  %15046 = vmatpush3.bf16.msra.mxu1 %v16784_v0  ;;  %v1283_v0 = vrot.slane %v16792_v53, 1  ;;  %v1749_v3 = vshll.u32 %v16799_v51, 16  ;;  %v1743_v15 = vrot.slane %v1741_v4, 2  ;;  %v16815_v51 = vld [vmem:[%s17244_s6 + $0x38] sm:$0xff]  }
  0xa9   : > { %15047 = vmatprep.subr.bf16.mxu1 %v16793_v7  ;;  %v1740_v13 = vrot.slane %v1738_v2, 1  ;;  %v8089_v19 = vsel %vm4968_vm1, %v8086_v50, %v8088_v1  ;;  %v1791_v50 = vshrl.u32 %v16810_v34, 16  ;;  %v1800_v2 = vshrl.u32 %v16815_v51, 16 }
  0xaa   : > { %v1284_v14 = vsel %vm1255_vm4, %v1281_v48, %v1283_v0  ;;  %v1286_v20 = vsel %vm1255_vm4, %v1283_v0, %v1285_v6  ;;  %v8104_v0 = vrot.slane %v17643_v45, 3  ;;  %v1796_v4 = vrot.slane %v1794_v54, 2 }
  0xab   : > { %v1744_v30 = vor.u32 %v1743_v15, %v1740_v13  ;;  %v1802_v13 = vrot.slane %v1800_v2, 1 }
  0xac   : > { %15048 = vmatpush3.bf16.msra.mxu1 %v16793_v7  ;;  %v8090_v7 = vrot.slane %v17598_v60, 3 }
  0xad   : > { %15081 = vmatprep.subr.bf16.mxu1 %v17540_v11 }
  0xae   : > { %15018 = vmatmul.mubr.msk.bf16.gmra.mrb[8].mxu1 %vm316_vm0, %v1268_v49  ;;  %v1751_v49 = vrot.slane %v1749_v3, 2  ;;  %v8091_v21 = vsel %vm4968_vm1, %v8088_v1, %v8090_v7  ;;  %v8093_v47 = vsel %vm4968_vm1, %v8090_v7, %v8092_v27 }
  0xaf   : > { %15514 = vmatmul.mubr.msk.bf16.gmra.mrb[24].mxu0 %vm316_vm0, %v16771_v10  ;;  %15021 = vmatprep.mubr.msk.bf16.mxu1 %vm316_vm0, %v1270_v16  ;;  %v17613_v10 = vld [vmem:[%s17244_s6 + $0x60] sm:$0xff]   ;;  %v1755_v16 = vshrl.u32 %v16801_v5, 16  ;;  %v1803_v5 = vshll.u32 %v16815_v51, 16 }
  0xb0   : > { %15517 = vmatprep.mubr.msk.bf16.mxu0 %vm316_vm0, %v16775_v12  ;;  %v16804_v12 = vld [vmem:[%s17244_s6 + $0x18] sm:$0xff]   ;;  %v1752_v28 = vor.u32 %v1751_v49, %v1748_v9 }
  0xb1   : > { %v1764_v22 = vshrl.u32 %v16804_v12, 16  ;;  %v1757_v31 = vrot.slane %v1755_v16, 1 }
  0xb2   : > { %v1753_v48 = vsel %vm1736_vm5, %v1744_v30, %v1752_v28  ;;  %v16826_v30 = vld [vmem:[%s17244_s6 + $0x28] sm:$0xff]  }
  0xb3   : > { %v1761_v59 = vor.u32 %v1760_v32, %v1757_v31 }
  0xb5   : > { %v1762_v7 = vsel %vm1736_vm5, %v1752_v28, %v1761_v59 }
  0xb6   : > { %15022 = vmatmul.mubr.msk.bf16.gmra.mrb[12].mxu1 %vm316_vm0, %v1272_v23  ;;  %v1767_v23 = vshll.u32 %v16804_v12, 16 }
  0xb7   : > { %15518 = vmatmul.mubr.msk.bf16.gmra.mrb[32].mxu0 %vm316_vm0, %v16777_v24  ;;  %15025 = vmatprep.mubr.msk.bf16.mxu1 %vm316_vm0, %v1274_v26  ;;  %v17624_v24 = vld [vmem:[%s17244_s6 + $0x70] sm:$0xff]   ;;  %v16808_v26 = vld [vmem:[%s17244_s6 + $0x28] sm:$0xff]  }
  0xb8   : > { %15529 = vmatprep.mubr.msk.bf16.mxu0 %vm316_vm0, %v8079_v29  ;;  %v8094_v29 = vrot.slane %v17613_v10, 3  ;;  %v1769_v36 = vrot.slane %v1767_v23, 2  ;;  %v1782_v42 = vshrl.u32 %v16808_v26, 16  ;;  %v16821_v10 = vld [vmem:[%s17244_s6 + $0x48] sm:$0xff]   ;;  %v16824_v23 = vld [vmem:[%s17244_s6 + $0x50] sm:$0xff]  }
  0xb9   : > { %v1821_v28 = vshll.u32 %v16821_v10, 16  ;;  %v1827_v41 = vshrl.u32 %v16824_v23, 16 }
  0xba   : > { %v1784_v60 = vrot.slane %v1782_v42, 1  ;;  %v1830_v42 = vshll.u32 %v16824_v23, 16  ;;  %v16832_v23 = vld [vmem:[%s17244_s6 + $0x40] sm:$0xff]  }
  0xbe   : > { %15026 = vmatmul.mubr.msk.bf16.gmra.mrb[16].mxu1 %vm316_vm0, %v1276_v35  ;;  %v1766_v35 = vrot.slane %v1764_v22, 1  ;;  %v1818_v22 = vshrl.u32 %v16821_v10, 16 }
  0xbf   : > { %15530 = vmatmul.mubr.msk.bf16.vlgmr.msra.gmra.mrb[0].mxu0 %vm316_vm0, %v8081_v37  ;;  %15029 = vmatprep.mubr.msk.bf16.mxu1 %vm316_vm0, %v1278_v38  ;;  %v8098_v37 = vrot.slane %v17624_v24, 3  ;;  %v1773_v38 = vshrl.u32 %v16806_v25, 16 }
  0xc0   : > { %15533 = vmatprep.mubr.msk.bf16.mxu0 %vm316_vm0, %v8083_v43  ;;  %15562 = vmatpush3.bf16.msra.mxu0 %v16813_v18  ;;  %v17618_v18 = vld [vmem:[%s17244_s6 + $0x68] sm:$0xff]   ;;  %v17640_v43 = vld [vmem:[%s17244_s6 + $0x80] sm:$0xff]   ;;  %v1770_v3 = vor.u32 %v1769_v36, %v1766_v35  ;;  %v1820_v32 = vrot.slane %v1818_v22, 1 }
  0xc1   : > { %15563 = vmatprep.subr.bf16.mxu0 %v16814_v44  ;;  %v8096_v33 = vrot.slane %v17618_v18, 3  ;;  %v1775_v53 = vrot.slane %v1773_v38, 1  ;;  %v1805_v18 = vrot.slane %v1803_v5, 2  ;;  %v8101_v36 = vsel %vm4968_vm1, %v8098_v37, %v8100_v56  ;;  %v16829_v5 = vld [vmem:[%s17244_s6 + $0x60] sm:$0xff]  }
  0xc2   : > { %v1771_v15 = vsel %vm1736_vm5, %v1761_v59, %v1770_v3  ;;  %v1832_v59 = vrot.slane %v1830_v42, 2 }
  0xc3   : > { %v8097_v12 = vsel %vm4968_vm1, %v8094_v29, %v8096_v33  ;;  %v8099_v16 = vsel %vm4968_vm1, %v8096_v33, %v8098_v37  ;;  %v16827_v37 = vld [vmem:[%s17244_s6 + $0x58] sm:$0xff]   ;;  %v1806_v54 = vor.u32 %v1805_v18, %v1802_v13 }
  0xc4   : > { %15564 = vmatpush3.bf16.msra.mxu0 %v16814_v44  ;;  %v1785_v44 = vshll.u32 %v16808_v26, 16  ;;  %v1839_v2 = vshll.u32 %v16827_v37, 16 }
  0xc5   : > { %15565 = vmatprep.subr.bf16.mxu0 %v16819_v52 }
  0xc6   : > { %15030 = vmatmul.mubr.msk.bf16.gmra.mrb[20].mxu1 %vm316_vm0, %v1280_v55  ;;  %v1778_v55 = vrot.slane %v1776_v40, 2  ;;  %v1787_v62 = vrot.slane %v1785_v44, 2  ;;  %v8581_v44 = vshrl.u32 %v16826_v30, 16 }
  0xc7   : > { %15534 = vmatmul.mubr.msk.bf16.gmra.mrb[4].mxu0 %vm316_vm0, %v8085_v57  ;;  %15033 = vmatprep.mubr.msk.bf16.mxu1 %vm316_vm0, %v1282_v58  ;;  %v8102_v57 = vrot.slane %v17640_v43, 3  ;;  %v16817_v58 = vld [vmem:[%s17244_s6 + $0x40] sm:$0xff]   ;;  %v16830_v43 = vld [vmem:[%s17244_s6 + $0x38] sm:$0xff]  }
  0xc8   : > { %15537 = vmatprep.mubr.msk.bf16.mxu0 %vm316_vm0, %v8087_v61  ;;  %15566 = vmatpush3.bf16.msra.mxu0 %v16819_v52  ;;  %v8095_v52 = vsel %vm4968_vm1, %v8092_v27, %v8094_v29  ;;  %v17656_v61 = vld [vmem:[%s17244_s6 + $0x90] sm:$0xff]   ;;  %v1809_v1 = vshrl.u32 %v16817_v58, 16  ;;  %v1812_v49 = vshll.u32 %v16817_v58, 16  ;;  %v1779_v17 = vor.u32 %v1778_v55, %v1775_v53 }
  0xc9   : > { %15567 = vmatprep.subr.bf16.mxu0 %v16820_v63  ;;  %v8106_v9 = vrot.slane %v17656_v61, 3  ;;  %v1788_v25 = vor.u32 %v1787_v62, %v1784_v60  ;;  %v16825_v27 = vld [vmem:[%s19416_s1 + $0x90] sm:$0xff]   ;;  %v8103_v40 = vsel %vm4968_vm1, %v8100_v56, %v8102_v57  ;;  %v8584_v53 = vshll.u32 %v16826_v30, 16  ;;  %v17715_v62 = vld [vmem:[%s19416_s1 + $0xa0] sm:$0xff]  }
  0xca   : > { %v1814_v26 = vrot.slane %v1812_v49, 2  ;;  %v1780_v31 = vsel %vm1736_vm5, %v1770_v3, %v1779_v17  ;;  %v16828_v56 = vld [vmem:[%s17244_s6 + $0x30] sm:$0xff]   ;;  %v1829_v58 = vrot.slane %v1827_v41, 1  ;;  %v8583_v60 = vrot.slane %v8581_v44, 3 }
  0xcb   : > { %v1789_v38 = vsel %vm1736_vm5, %v1779_v17, %v1788_v25  ;;  %v8593_v10 = vshll.u32 %v16828_v56, 16  ;;  %v1841_v49 = vrot.slane %v1839_v2, 2  ;;  %v8599_v22 = vshrl.u32 %v16830_v43, 16  ;;  %v16833_v30 = vld [vmem:[%s17244_s6 + $0x70] sm:$0xff]  }
  0xcc   : > { %15568 = vmatpush3.bf16.msra.mxu0 %v16820_v63  ;;  %v1793_v63 = vrot.slane %v1791_v50, 1  ;;  %v1833_v61 = vor.u32 %v1832_v59, %v1829_v58  ;;  %v1863_v44 = vshrl.u32 %v16833_v30, 16  ;;  %v16855_v58 = vld [vmem:[%s19416_s1 + $0x228] sm:$0xff]  }
  0xcd   : > { %v8595_v18 = vrot.slane %v8593_v10, 4 }
  0xce   : > { %15034 = vmatmul.mubr.msk.bf16.gmra.mrb[24].mxu1 %vm316_vm0, %v1284_v14  ;;  %v16822_v14 = vld [vmem:[%s17244_s6 + $0x18] sm:$0xf8]   ;;  %v1797_v24 = vor.u32 %v1796_v4, %v1793_v63  ;;  %v1836_v63 = vshrl.u32 %v16827_v37, 16  ;;  %v8586_v4 = vrot.slane %v8584_v53, 4 }
  0xcf   : > { %15538 = vmatmul.mubr.msk.bf16.gmra.mrb[8].mxu0 %vm316_vm0, %v8089_v19  ;;  %15037 = vmatprep.mubr.msk.bf16.mxu1 %vm316_vm0, %v1286_v20  ;;  %v17676_v19 = vrot.slane %v1809_v1, 1  ;;  %v8564_v29 = vshrl.u32 %v16822_v14, 16  ;;  %v8567_v33 = vshll.u32 %v16822_v14, 16  ;;  %v8105_v1 = vsel %vm4968_vm1, %v8102_v57, %v8104_v0 }
  0xd0   : > { %15541 = vmatprep.mubr.msk.bf16.mxu0 %vm316_vm0, %v8091_v21  ;;  %v16823_v21 = vld [vmem:[%s17244_s6 + $0x20] sm:$0xff]   ;;  %v1798_v3 = vsel %vm1736_vm5, %v1788_v25, %v1797_v24  ;;  %v1838_v13 = vrot.slane %v1836_v63, 1  ;;  %v1845_v14 = vshrl.u32 %v16829_v5, 16 }
  0xd1   : > { %v8572_v34 = vshrl.u32 %v16823_v21, 16  ;;  %v8575_v35 = vshll.u32 %v16823_v21, 16  ;;  %v8566_v50 = vrot.slane %v8564_v29, 3  ;;  %v8569_v51 = vrot.slane %v8567_v33, 4 }
  0xd2   : > { %v1815_v57 = vor.u32 %v1814_v26, %v17676_v19  ;;  %v1848_v21 = vshll.u32 %v16829_v5, 16 }
  0xd3   : > { %v8577_v55 = vrot.slane %v8575_v35, 4  ;;  %v8608_v35 = vshrl.u32 %v16832_v23, 16 }
  0xd4   : > { %v1816_v25 = vsel %vm1736_vm5, %v1806_v54, %v1815_v57 }
  0xd6   : > { %15038 = vmatmul.mubr.msk.bf16.gmra.mrb[36].mxu1 %vm316_vm0, %v1285_v6  ;;  %v17661_v6 = vld [vmem:[%s17244_s6 + $0x98] ss:$0 sps:$4 sm:$0x11]  }
  0xd7   : > { %15542 = vmatmul.mubr.msk.bf16.gmra.mrb[12].mxu0 %vm316_vm0, %v8093_v47  ;;  %15049 = vmatprep.mubr.msk.bf16.mxu1 %vm316_vm0, %v1753_v48  ;;  %v8108_v20 = vrot.slane %v17661_v6, 3  ;;  %v16834_v47 = vld [vmem:[%s19416_s1 + $0x98] sm:$0xff]   ;;  %v1823_v48 = vrot.slane %v1821_v28, 2  ;;  %v8602_v28 = vshll.u32 %v16830_v43, 16 }
  0xd8   : > { %15545 = vmatprep.mubr.msk.bf16.mxu0 %vm316_vm0, %v8095_v52  ;;  %v8574_v52 = vrot.slane %v8572_v34, 3  ;;  %v8601_v34 = vrot.slane %v8599_v22, 3  ;;  %v16838_v43 = vld [vmem:[%s17244_s6 + $0x58] sm:$0xff]  }
  0xd9   : > { %v1824_v45 = vor.u32 %v1823_v48, %v1820_v32  ;;  %v8109_v19 = vsel %vm4968_vm1, %v8106_v9, %v8108_v20  ;;  %v1850_v32 = vrot.slane %v1848_v21, 2  ;;  %v8604_v6 = vrot.slane %v8602_v28, 4  ;;  %v16839_v28 = vld [vmem:[%s17244_s6] sm:$0xfc]  }
  0xda   : > { %v8578_v17 = vor.u32 %v8577_v55, %v8574_v52  ;;  %v8587_v20 = vor.u32 %v8586_v4, %v8583_v60  ;;  %v8635_v22 = vshrl.u32 %v16838_v43, 16 }
  0xdb   : > { %v1825_v26 = vsel %vm1736_vm5, %v1815_v57, %v1824_v45  ;;  %v1834_v48 = vsel %vm1736_vm5, %v1824_v45, %v1833_v61  ;;  %v8605_v4 = vor.u32 %v8604_v6, %v8601_v34  ;;  %v17790_v34 = vld [vmem:[%s19416_s1 + $0x240] sm:$0xff]  }
  0xde   : > { %15050 = vmatmul.mubr.msk.bf16.vlgmr.msra.gmra.mrb[0].mxu1 %vm316_vm0, %v1762_v7  ;;  %v1807_v7 = vsel %vm1736_vm5, %v1797_v24, %v1806_v54  ;;  %v1866_v24 = vshll.u32 %v16833_v30, 16  ;;  %v16837_v54 = vld [vmem:[%s17244_s6 + $0x50] sm:$0xff]  }
  0xdf   : > { %15546 = vmatmul.mubr.msk.bf16.gmra.mrb[16].mxu0 %vm316_vm0, %v8097_v12  ;;  %15082 = vmatpush3.bf16.msra.mxu1 %v17540_v11  ;;  %v17692_v11 = vld [vmem:[%s19416_s1 + $0x220] sm:$0xff]   ;;  %v8107_v12 = vsel %vm4968_vm1, %v8104_v0, %v8106_v9  ;;  %v8611_v9 = vshll.u32 %v16832_v23, 16  ;;  %v8629_v10 = vshll.u32 %v16837_v54, 16  ;;  %v8638_v23 = vshll.u32 %v16838_v43, 16 }
  0xe0   : > { %15053 = vmatprep.mubr.msk.bf16.mxu1 %vm316_vm0, %v1771_v15  ;;  %15549 = vmatprep.mubr.msk.bf16.mxu0 %vm316_vm0, %v8099_v16  ;;  %v16831_v15 = vld [vmem:[%s17244_s6 + $0x68] sm:$0xff]   ;;  %v8570_v16 = vor.u32 %v8569_v51, %v8566_v50  ;;  %v16836_v50 = vld [vmem:[%s17244_s6 + $0x78] sm:$0xff]   ;;  %v8588_v51 = vsel %vm7022_vm2, %v8578_v17, %v8587_v20  ;;  %v1868_v59 = vrot.slane %v1866_v24, 2 }
  0xe1   : > { %15083 = vmatprep.subr.bf16.mxu1 %v16811_v8  ;;  %15601 = vmatprep.subr.bf16.mxu0 %v17692_v11  ;;  %v1854_v29 = vshrl.u32 %v16831_v15, 16  ;;  %v1857_v33 = vshll.u32 %v16831_v15, 16  ;;  %v8613_v37 = vrot.slane %v8611_v9, 4  ;;  %v1872_v2 = vshrl.u32 %v16836_v50, 16  ;;  %v16846_v9 = vld [vmem:[%s17244_s6 + $0x70] sm:$0xff]  }
  0xe2   : > { %v8640_v6 = vrot.slane %v8638_v23, 4  ;;  %v8662_v24 = vshrl.u32 %v16846_v9, 16 }
  0xe3   : > { %15084 = vmatpush3.bf16.msra.mxu1 %v16811_v8  ;;  %v8590_v8 = vshrl.u32 %v16828_v56, 16  ;;  %v1859_v42 = vrot.slane %v1857_v33, 2  ;;  %v1865_v56 = vrot.slane %v1863_v44, 1  ;;  %v8637_v33 = vrot.slane %v8635_v22, 3 }
  0xe4   : > { %15085 = vmatprep.subr.bf16.mxu1 %v16825_v27 }
  0xe5   : > { %v8592_v0 = vrot.slane %v8590_v8, 3  ;;  %v1869_v21 = vor.u32 %v1868_v59, %v1865_v56  ;;  %v8641_v44 = vor.u32 %v8640_v6, %v8637_v33 }
  0xe6   : > { %15054 = vmatmul.mubr.msk.bf16.gmra.mrb[4].mxu1 %vm316_vm0, %v1780_v31  ;;  %v8579_v31 = vsel %vm7022_vm2, %v8570_v16, %v8578_v17  ;;  %v8631_v17 = vrot.slane %v8629_v10, 4 }
  0xe7   : > { %15550 = vmatmul.mubr.msk.bf16.gmra.mrb[20].mxu0 %vm316_vm0, %v8101_v36  ;;  %15057 = vmatprep.mubr.msk.bf16.mxu1 %vm316_vm0, %v1789_v38  ;;  %v1842_v36 = vor.u32 %v1841_v49, %v1838_v13  ;;  %v1856_v38 = vrot.slane %v1854_v29, 1  ;;  %v8596_v41 = vor.u32 %v8595_v18, %v8592_v0  ;;  %v1874_v49 = vrot.slane %v1872_v2, 1  ;;  %v16861_v18 = vld [vmem:[%s19416_s1 + $0x238] sm:$0xff]  }
  0xe8   : > { %15553 = vmatprep.mubr.msk.bf16.mxu0 %vm316_vm0, %v8103_v40  ;;  %15086 = vmatpush3.bf16.msra.mxu1 %v16825_v27  ;;  %v1847_v27 = vrot.slane %v1845_v14, 1  ;;  %v16835_v40 = vld [vmem:[%s17244_s6 + $0x48] sm:$0xff]  }
  0xe9   : > { %15087 = vmatprep.subr.bf16.mxu1 %v16834_v47  ;;  %v1843_v52 = vsel %vm1736_vm5, %v1833_v61, %v1842_v36  ;;  %v8617_v53 = vshrl.u32 %v16835_v40, 16  ;;  %v8597_v55 = vsel %vm7022_vm2, %v8587_v20, %v8596_v41  ;;  %v8620_v60 = vshll.u32 %v16835_v40, 16 }
  0xea   : > { %v1851_v63 = vor.u32 %v1850_v32, %v1847_v27  ;;  %v1860_v5 = vor.u32 %v1859_v42, %v1856_v38  ;;  %v8606_v45 = vsel %vm7022_vm2, %v8596_v41, %v8605_v4  ;;  %v2330_v40 = vrot.slane %v16839_v28, 2 }
  0xeb   : > { %v8622_v13 = vrot.slane %v8620_v60, 4 }
  0xec   : > { %15088 = vmatpush3.bf16.msra.mxu1 %v16834_v47  ;;  %v8610_v47 = vrot.slane %v8608_v35, 3  ;;  %v1852_v57 = vsel %vm1736_vm5, %v1842_v36, %v1851_v63  ;;  %v1861_v0 = vsel %vm1736_vm5, %v1851_v63, %v1860_v5  ;;  %v1870_v32 = vsel %vm1736_vm5, %v1860_v5, %v1869_v21  ;;  %v16850_v63 = vld [vmem:[%s17244_s6 + $0x80] sm:$0xff]  }
  0xed   : > { %15121 = vmatprep.subr.bf16.mxu1 %v17715_v62  ;;  %v8680_v10 = vshrl.u32 %v16850_v63, 16 }
  0xee   : > { %15058 = vmatmul.mubr.msk.bf16.gmra.mrb[8].mxu1 %vm316_vm0, %v1798_v3  ;;  %v1875_v3 = vshll.u32 %v16836_v50, 16  ;;  %v8614_v8 = vor.u32 %v8613_v37, %v8610_v47  ;;  %v16842_v37 = vld [vmem:[%s17244_s6 + $0x10] sm:$0xff]   ;;  %v8665_v50 = vshll.u32 %v16846_v9, 16  ;;  %v16859_v9 = vld [vmem:[%s17244_s6 + $0x98] ss:$0 sps:$4 sm:$0x33]  }
  0xef   : > { %15554 = vmatmul.mubr.msk.bf16.gmra.mrb[24].mxu0 %vm316_vm0, %v8105_v1  ;;  %15061 = vmatprep.mubr.msk.bf16.mxu1 %vm316_vm0, %v1807_v7  ;;  %v8619_v1 = vrot.slane %v8617_v53, 3  ;;  %v8626_v7 = vshrl.u32 %v16837_v54, 16  ;;  %v16848_v53 = vld [vmem:[%s17244_s6 + $0x78] sm:$0xff]   ;;  %v2333_v2 = vrot.slane %v16842_v37, 2  ;;  %v17850_v37 = vld [vmem:[%s19416_s1 + $0xc0] sm:$0xff]  }
  0xf0   : > { %15557 = vmatprep.mubr.msk.bf16.mxu0 %vm316_vm0, %v8107_v12  ;;  %v16860_v12 = vld [vmem:[%s19416_s1 + $0x230] sm:$0xff]   ;;  %v1877_v14 = vrot.slane %v1875_v3, 2  ;;  %v8615_v16 = vsel %vm7022_vm2, %v8605_v4, %v8614_v8  ;;  %v8667_v60 = vrot.slane %v8665_v50, 4  ;;  %v8671_v3 = vshrl.u32 %v16848_v53, 16 }
  0xf1   : > { %v8628_v15 = vrot.slane %v8626_v7, 3 }
  0xf2   : > { %v1878_v27 = vor.u32 %v1877_v14, %v1874_v49  ;;  %v16853_v49 = vld [vmem:[%s17244_s6 + $0x88] sm:$0xff]  }
  0xf3   : > { %v8689_v23 = vshrl.u32 %v16853_v49, 16 }
  0xf4   : > { %v1879_v61 = vsel %vm1736_vm5, %v1869_v21, %v1878_v27 }
  0xf6   : > { %15062 = vmatmul.mubr.msk.bf16.gmra.mrb[12].mxu1 %vm316_vm0, %v1816_v25  ;;  %v8623_v25 = vor.u32 %v8622_v13, %v8619_v1  ;;  %v8674_v1 = vshll.u32 %v16848_v53, 16  ;;  %v16849_v13 = vld [vmem:[%s17244_s6 + $0x28] sm:$0xff]   ;;  %v16858_v53 = vld [vmem:[%s17244_s6 + $0x40] sm:$0xff]  }
  0xf7   : > { %15558 = vmatmul.mubr.msk.bf16.gmra.mrb[36].mxu0 %vm316_vm0, %v8109_v19  ;;  %15065 = vmatprep.mubr.msk.bf16.mxu1 %vm316_vm0, %v1825_v26  ;;  %v8632_v19 = vor.u32 %v8631_v17, %v8628_v15  ;;  %v16840_v26 = vld [vmem:[%s17244_s6 + $0x8] sm:$0xff]   ;;  %v2339_v22 = vrot.slane %v16849_v13, 2 }
  0xf8   : > { %15569 = vmatprep.mubr.msk.bf16.mxu0 %vm316_vm0, %v8579_v31  ;;  %v16844_v31 = vld [vmem:[%s17244_s6 + $0x68] sm:$0xff]   ;;  %v8624_v35 = vsel %vm7022_vm2, %v8614_v8, %v8623_v25  ;;  %v2331_v41 = vrot.slane %v16840_v26, 2  ;;  %v16847_v8 = vld [vmem:[%s17244_s6 + $0x20] sm:$0xff]  }
  0xf9   : > { %v8633_v20 = vsel %vm7022_vm2, %v8623_v25, %v8632_v19  ;;  %v8653_v42 = vshrl.u32 %v16844_v31, 16  ;;  %v8656_v47 = vshll.u32 %v16844_v31, 16  ;;  %v8642_v54 = vsel %vm7022_vm2, %v8632_v19, %v8641_v44  ;;  %v16865_v19 = vld [vmem:[%s19416_s1 + $0xb0] sm:$0xff]  }
  0xfa   : > { %v2334_v43 = vsel %vm2329_vm6, %v2331_v41, %v2333_v2  ;;  %v2337_v21 = vrot.slane %v16847_v8, 2  ;;  %v8692_v25 = vshll.u32 %v16853_v49, 16 }
  0xfb   : > { %v8658_v56 = vrot.slane %v8656_v47, 4  ;;  %v8710_v47 = vshll.u32 %v16859_v9, 16 }
  0xfc   : > { %v8694_v33 = vrot.slane %v8692_v25, 4  ;;  %v16876_v25 = vld [vmem:[%s17244_s6 + $0x78] sm:$0xff]  }
  0xfe   : > { %15066 = vmatmul.mubr.msk.bf16.gmra.mrb[16].mxu1 %vm316_vm0, %v1834_v48 }
  0xff   : > { %15570 = vmatmul.mubr.msk.bf16.vlgmr.msra.gmra.mrb[0].mxu0 %vm316_vm0, %v8588_v51  ;;  %15069 = vmatprep.mubr.msk.bf16.mxu1 %vm316_vm0, %v1843_v52  ;;  %v16845_v51 = vld [vmem:[%s17244_s6 + $0x18] sm:$0xff]   ;;  %v8655_v52 = vrot.slane %v8653_v42, 3 }
 0x100   : > { %15573 = vmatprep.mubr.msk.bf16.mxu0 %vm316_vm0, %v8597_v55  ;;  %15602 = vmatpush3.bf16.msra.mxu0 %v17692_v11  ;;  %v16841_v11 = vld [vmem:[%s17244_s6 + $0x60] sm:$0xff]   ;;  %v2332_v55 = vsel %vm2329_vm6, %v2330_v40, %v2331_v41  ;;  %v2335_v5 = vrot.slane %v16845_v51, 2 }
 0x101   : > { %15603 = vmatprep.subr.bf16.mxu0 %v16855_v58  ;;  %v8644_v29 = vshrl.u32 %v16841_v11, 16  ;;  %v8647_v30 = vshll.u32 %v16841_v11, 16  ;;  %v8659_v4 = vor.u32 %v8658_v56, %v8655_v52 }
 0x102   : > { %v2336_v15 = vsel %vm2329_vm6, %v2333_v2, %v2335_v5  ;;  %v2338_v31 = vsel %vm2329_vm6, %v2335_v5, %v2337_v21  ;;  %v2345_v2 = vrot.slane %v16858_v53, 2  ;;  %v16886_v53 = vld [vmem:[%s17244_s6 + $0x6c] sm:$0xff]  }
 0x103   : > { %v8646_v36 = vrot.slane %v8644_v29, 3  ;;  %v8649_v38 = vrot.slane %v8647_v30, 4  ;;  %v16851_v29 = vld [vmem:[%s17244_s6 + $0x30] sm:$0xff]  }
 0x104   : > { %15604 = vmatpush3.bf16.msra.mxu0 %v16855_v58  ;;  %v8664_v58 = vrot.slane %v8662_v24, 3  ;;  %v2341_v40 = vrot.slane %v16851_v29, 2  ;;  %v17910_v29 = vld [vmem:[%s19416_s1 + $0x260] sm:$0xff]  }
 0x105   : > { %15605 = vmatprep.subr.bf16.mxu0 %v16860_v12  ;;  %v8650_v48 = vor.u32 %v8649_v38, %v8646_v36  ;;  %v16874_v38 = vld [vmem:[%s19416_s1 + $0xb8] sm:$0xff]  }
 0x106   : > { %15070 = vmatmul.mubr.msk.bf16.gmra.mrb[20].mxu1 %vm316_vm0, %v1852_v57  ;;  %v8668_v7 = vor.u32 %v8667_v60, %v8664_v58  ;;  %v8673_v57 = vrot.slane %v8671_v3, 3  ;;  %v2342_v52 = vsel %vm2329_vm6, %v2339_v22, %v2341_v40  ;;  %v8712_v60 = vrot.slane %v8710_v47, 4 }
 0x107   : > { %15574 = vmatmul.mubr.msk.bf16.gmra.mrb[4].mxu0 %vm316_vm0, %v8606_v45  ;;  %15073 = vmatprep.mubr.msk.bf16.mxu1 %vm316_vm0, %v1861_v0  ;;  %v8651_v59 = vsel %vm7022_vm2, %v8641_v44, %v8650_v48  ;;  %v8660_v14 = vsel %vm7022_vm2, %v8650_v48, %v8659_v4  ;;  %v8676_v45 = vrot.slane %v8674_v1, 4  ;;  %v16857_v0 = vld [vmem:[%s17244_s6 + $0x90] sm:$0xff]   ;;  %v8707_v44 = vshrl.u32 %v16859_v9, 16 }
 0x108   : > { %15577 = vmatprep.mubr.msk.bf16.mxu0 %vm316_vm0, %v8615_v16  ;;  %15606 = vmatpush3.bf16.msra.mxu0 %v16860_v12  ;;  %v8683_v12 = vshll.u32 %v16850_v63, 16  ;;  %v8669_v11 = vsel %vm7022_vm2, %v8659_v4, %v8668_v7  ;;  %v8682_v16 = vrot.slane %v8680_v10, 3  ;;  %v8698_v28 = vshrl.u32 %v16857_v0, 16  ;;  %v16864_v1 = vld [vmem:[%s17244_s6 + $0x50] sm:$0xff]   ;;  %v16863_v10 = vld [vmem:[%s17244_s6 + $0x1c] sm:$0xff]  }
 0x109   : > { %15607 = vmatprep.subr.bf16.mxu0 %v16861_v18  ;;  %v8701_v30 = vshll.u32 %v16857_v0, 16  ;;  %v2349_v13 = vrot.slane %v16864_v1, 2 }
 0x10a   : > { %v8685_v17 = vrot.slane %v8683_v12, 4  ;;  %v8700_v6 = vrot.slane %v8698_v28, 3  ;;  %v16867_v12 = vld [vmem:[%s17244_s6 + $0x58] sm:$0xff]  }
 0x10b   : > { %v8703_v36 = vrot.slane %v8701_v30, 4  ;;  %v16872_v28 = vld [vmem:[%s17244_s6 + $0x3c] sm:$0xff]   ;;  %v16875_v30 = vld [vmem:[%s17244_s6 + $0x44] sm:$0xff]  }
 0x10c   : > { %15608 = vmatpush3.bf16.msra.mxu0 %v16861_v18  ;;  %v16852_v18 = vld [vmem:[%s19416_s1 + $0xa8] sm:$0xff]   ;;  %v8686_v26 = vor.u32 %v8685_v17, %v8682_v16 }
 0x10d   : > { %15641 = vmatprep.subr.bf16.mxu0 %v17790_v34  ;;  %v8704_v48 = vor.u32 %v8703_v36, %v8700_v6 }
 0x10e   : > { %15074 = vmatmul.mubr.msk.bf16.gmra.mrb[24].mxu1 %vm316_vm0, %v1870_v32  ;;  %v8691_v32 = vrot.slane %v8689_v23, 3  ;;  %v16873_v23 = vld [vmem:[%s17244_s6 + $0x70] sm:$0xff]  }
 0x10f   : > { %15578 = vmatmul.mubr.msk.bf16.gmra.mrb[8].mxu0 %vm316_vm0, %v8624_v35  ;;  %15077 = vmatprep.mubr.msk.bf16.mxu1 %vm316_vm0, %v1879_v61  ;;  %v2340_v61 = vsel %vm2329_vm6, %v2337_v21, %v2339_v22  ;;  %v16870_v21 = vld [vmem:[%s17244_s6 + $0x34] sm:$0xff]  }
 0x110   : > { %15581 = vmatprep.mubr.msk.bf16.mxu0 %vm316_vm0, %v8633_v20  ;;  %v8695_v42 = vor.u32 %v8694_v33, %v8691_v32 }
 0x112   : > { %v8696_v56 = vsel %vm7022_vm2, %v8686_v26, %v8695_v42  ;;  %v8705_v63 = vsel %vm7022_vm2, %v8695_v42, %v8704_v48  ;;  %v16882_v42 = vld [vmem:[%s17244_s6 + $0x18] sm:$0xff]  }
 0x116   : > { %15078 = vmatmul.mubr.msk.bf16.gmra.mrb[40].mxu1 %vm316_vm0, %v1878_v27  ;;  %v8677_v27 = vor.u32 %v8676_v45, %v8673_v57  ;;  %v16866_v57 = vld [vmem:[%s17244_s6 + $0x24] sm:$0xff]  }
 0x117   : > { %15582 = vmatmul.mubr.msk.bf16.gmra.mrb[12].mxu0 %vm316_vm0, %v8642_v54  ;;  %15089 = vmatprep.mubr.msk.bf16.mxu1 %vm316_vm0, %v2332_v55  ;;  %v16862_v54 = vld [vmem:[%s17244_s6 + $0x48] sm:$0xff]   ;;  %v16869_v45 = vld [vmem:[%s17244_s6 + $0x60] sm:$0xff]  }
 0x118   : > { %15585 = vmatprep.mubr.msk.bf16.mxu0 %vm316_vm0, %v8651_v59  ;;  %v8678_v35 = vsel %vm7022_vm2, %v8668_v7, %v8677_v27  ;;  %v8687_v20 = vsel %vm7022_vm2, %v8677_v27, %v8686_v26  ;;  %v8709_v59 = vrot.slane %v8707_v44, 3  ;;  %v2347_v3 = vrot.slane %v16862_v54, 2  ;;  %v16885_v44 = vld [vmem:[%s17244_s6 + $0x20] sm:$0xff]   ;;  %v16887_v54 = vld [vmem:[%s17244_s6 + $0x28] sm:$0xff]  }
 0x119   : > { %v2353_v16 = vrot.slane %v16869_v45, 2  ;;  %v2359_v26 = vrot.slane %v16876_v25, 2  ;;  %v2817_v1 = vrot.slane %v16887_v54, 1  ;;  %v16893_v25 = vld [vmem:[%s17244_s6 + $0x84] sm:$0xff]   ;;  %v16899_v54 = vld [vmem:[%s17244_s6 + $0x94] sm:$0x3f]  }
 0x11a   : > { %v8713_v4 = vor.u32 %v8712_v60, %v8709_v59  ;;  %v2348_v8 = vsel %vm2329_vm6, %v2345_v2, %v2347_v3  ;;  %v2350_v49 = vsel %vm2329_vm6, %v2347_v3, %v2349_v13  ;;  %v16891_v59 = vld [vmem:[%s17244_s6 + $0x38] sm:$0xff]   ;;  %v16892_v60 = vld [vmem:[%s19416_s1 + $0xc8] sm:$0xff]  }
 0x11b   : > { %v17954_v3 = vld [vmem:[%s17244_s6 + $0x48] sm:$0xff]  }
 0x11c   : > { %v8714_v7 = vsel %vm7022_vm2, %v8704_v48, %v8713_v4  ;;  %v2813_v48 = vrot.slane %v16882_v42, 1  ;;  %v17958_v4 = vld [vmem:[%s17244_s6 + $0x50] sm:$0xff]  }
 0x11e   : > { %15090 = vmatmul.mubr.msk.bf16.vlgmr.msra.gmra.mrb[0].mxu1 %vm316_vm0, %v2334_v43  ;;  %v2351_v43 = vrot.slane %v16867_v12, 2  ;;  %v16888_v12 = vld [vmem:[%s17244_s6 + $0x74] sm:$0xff]  }
 0x11f   : > { %15586 = vmatmul.mubr.msk.bf16.gmra.mrb[16].mxu0 %vm316_vm0, %v8660_v14  ;;  %15122 = vmatpush3.bf16.msra.mxu1 %v17715_v62  ;;  %v16856_v62 = vld [vmem:[%s17244_s6 + $0x38] sm:$0xff]   ;;  %v16868_v14 = vld [vmem:[%s17244_s6 + $0x2c] sm:$0xff]  }
 0x120   : > { %15093 = vmatprep.mubr.msk.bf16.mxu1 %vm316_vm0, %v2336_v15  ;;  %15589 = vmatprep.mubr.msk.bf16.mxu0 %vm316_vm0, %v8669_v11  ;;  %v2343_v41 = vrot.slane %v16856_v62, 2  ;;  %v2352_v0 = vsel %vm2329_vm6, %v2349_v13, %v2351_v43  ;;  %v16871_v15 = vld [vmem:[%s17244_s6 + $0x68] sm:$0xff]   ;;  %v2354_v22 = vsel %vm2329_vm6, %v2351_v43, %v2353_v16  ;;  %v2821_v13 = vrot.slane %v16891_v59, 1  ;;  %v16890_v43 = vld [vmem:[%s17244_s6 + $0x7c] sm:$0xff]  }
 0x121   : > { %15123 = vmatprep.subr.bf16.mxu1 %v16852_v18  ;;  %v16895_v11 = vld [vmem:[%s19416_s1 + $0x248] sm:$0xff]   ;;  %v2355_v17 = vrot.slane %v16871_v15, 2 }
 0x122   : > { %v2344_v58 = vsel %vm2329_vm6, %v2341_v40, %v2343_v41  ;;  %v2346_v5 = vsel %vm2329_vm6, %v2343_v41, %v2345_v2  ;;  %v16878_v40 = vld [vmem:[%s17244_s6 + $0x54] sm:$0xff]   ;;  %v16881_v41 = vld [vmem:[%s17244_s6 + $0x5c] sm:$0xff]  }
 0x123   : > { %15124 = vmatpush3.bf16.msra.mxu1 %v16852_v18  ;;  %v16900_v18 = vld [vmem:[%s19416_s1 + $0x250] sm:$0xff]   ;;  %v2356_v27 = vsel %vm2329_vm6, %v2353_v16, %v2355_v17  ;;  %v17984_v16 = vld [vmem:[%s17244_s6 + $0x58] sm:$0xff]  }
 0x124   : > { %15125 = vmatprep.subr.bf16.mxu1 %v16865_v19 }
 0x126   : > { %15094 = vmatmul.mubr.msk.bf16.gmra.mrb[4].mxu1 %vm316_vm0, %v2338_v31  ;;  %v16877_v31 = vld [vmem:[%s17244_s6 + $0x4c] sm:$0xff]  }
 0x127   : > { %15590 = vmatmul.mubr.msk.bf16.gmra.mrb[20].mxu0 %vm316_vm0, %v8678_v35  ;;  %15097 = vmatprep.mubr.msk.bf16.mxu1 %vm316_vm0, %v2340_v61  ;;  %v16879_v35 = vld [vmem:[%s17244_s6 + $0x8] sm:$0xfe]   ;;  %v16880_v61 = vld [vmem:[%s17244_s6 + $0x10] sm:$0xff]  }
 0x128   : > { %15593 = vmatprep.mubr.msk.bf16.mxu0 %vm316_vm0, %v8687_v20  ;;  %15126 = vmatpush3.bf16.msra.mxu1 %v16865_v19  ;;  %v2357_v19 = vrot.slane %v16873_v23, 2  ;;  %v2810_v36 = vrot.slane %v16879_v35, 1 }
 0x129   : > { %v17845_v24 = vpop.f32.mrb[28].mxu1  ;;  %15127 = vmatprep.subr.bf16.mxu1 %v16874_v38 }
 0x12a   : > { %v17852_v50 = vpop.f32.mrb[29].mxu1  ;;  %v2358_v62 = vsel %vm2329_vm6, %v2355_v17, %v2357_v19  ;;  %v2360_v33 = vsel %vm2329_vm6, %v2357_v19, %v2359_v26  ;;  %v17987_v17 = vld [vmem:[%s17244_s6 + $0x2c] sm:$0xff]  }
 0x12b   : > { %v14960_v51 = vpop.f32.mrb[30].mxu1 }
 0x12c   : > { %557 = vst [vmem:[#allocation2 + $0xf8] sm:$0xf] %v14960_v51  ;;  %v17857_v55 = vpop.f32.mrb[31].mxu1  ;;  %15128 = vmatpush3.bf16.msra.mxu1 %v16874_v38  ;;  %v2811_v38 = vrot.slane %v16880_v61, 1  ;;  %v2815_v51 = vrot.slane %v16885_v44, 1  ;;  %v9633_v44 = vshrl.u32 %v17987_v17, 16 }
 0x12d   : > { %15161 = vmatprep.subr.bf16.mxu1 %v17850_v37 }
 0x12e   : > { %15098 = vmatmul.mubr.msk.bf16.gmra.mrb[8].mxu1 %vm316_vm0, %v2342_v52  ;;  %v2812_v47 = vsel %vm1255_vm4, %v2810_v36, %v2811_v38  ;;  %v16884_v52 = vld [vmem:[%s17244_s6 + $0x64] sm:$0xff]   ;;  %v2816_v2 = vsel %vm1255_vm4, %v2813_v48, %v2815_v51 }
 0x12f   : > { %15594 = vmatmul.mubr.msk.bf16.gmra.mrb[24].mxu0 %vm316_vm0, %v8696_v56  ;;  %15101 = vmatprep.mubr.msk.bf16.mxu1 %vm316_vm0, %v2344_v58  ;;  %v16889_v56 = vld [vmem:[%s17244_s6 + $0x30] sm:$0xff]   ;;  %v2814_v58 = vsel %vm1255_vm4, %v2811_v38, %v2813_v48  ;;  %v18028_v48 = vld [vmem:[%s17244_s6 + $0x3c] sm:$0xff]  }
 0x130   : > { %15597 = vmatprep.mubr.msk.bf16.mxu0 %vm316_vm0, %v8705_v63  ;;  %v17950_v63 = vld [vmem:[%s17244_s6 + $0x40] sm:$0xff]  }
 0x133   : > { %v1070_v35 = vld [vmem:[#allocation2 + $0xf8] sm:$0xf] }
 0x136   : > { %15102 = vmatmul.mubr.msk.bf16.gmra.mrb[12].mxu1 %vm316_vm0, %v2346_v5  ;;  %v17961_v5 = vld [vmem:[%s17244_s6 + $0x1c] sm:$0xff]  }
 0x137   : > { %15598 = vmatmul.mubr.msk.bf16.gmra.mrb[40].mxu0 %vm316_vm0, %v8714_v7  ;;  %15105 = vmatprep.mubr.msk.bf16.mxu1 %vm316_vm0, %v2348_v8  ;;  %v17966_v7 = vld [vmem:[%s17244_s6 + $0x24] sm:$0xff]   ;;  %v2819_v8 = vrot.slane %v16889_v56, 1  ;;  %v9614_v45 = vshrl.u32 %v17961_v5, 16 }
 0x138   : > { %15609 = vmatprep.mubr.msk.bf16.mxu0 %vm316_vm0, %v16863_v10  ;;  %v16906_v10 = vld [vmem:[%s19416_s1 + $0xd0] sm:$0xff]  }
 0x139   : > { %v2820_v15 = vsel %vm1255_vm4, %v2817_v1, %v2819_v8  ;;  %v2822_v38 = vsel %vm1255_vm4, %v2819_v8, %v2821_v13 }
 0x13e   : > { %15106 = vmatmul.mubr.msk.bf16.gmra.mrb[16].mxu1 %vm316_vm0, %v2350_v49  ;;  %v2827_v49 = vrot.slane %v17958_v4, 1 }
 0x13f   : > { %15610 = vmatmul.mubr.msk.bf16.vlgmr.msra.gmra.mrb[0].mxu0 %vm316_vm0, %v16866_v57  ;;  %15109 = vmatprep.mubr.msk.bf16.mxu1 %vm316_vm0, %v2352_v0  ;;  %v2825_v57 = vrot.slane %v17954_v3, 1  ;;  %v9616_v0 = vshll.u32 %v17961_v5, 16  ;;  %v18052_v5 = vld [vmem:[%s17244_s6 + $0x78] sm:$0xff]  }
 0x140   : > { %15613 = vmatprep.mubr.msk.bf16.mxu0 %vm316_vm0, %v16868_v14  ;;  %15642 = vmatpush3.bf16.msra.mxu0 %v17790_v34  ;;  %v16901_v34 = vld [vmem:[%s19416_s1 + $0x258] sm:$0xff]   ;;  %v2818_v14 = vsel %vm1255_vm4, %v2815_v51, %v2817_v1 }
 0x141   : > { %15643 = vmatprep.subr.bf16.mxu0 %v16895_v11 }
 0x144   : > { %15644 = vmatpush3.bf16.msra.mxu0 %v16895_v11  ;;  %v9621_v11 = vshll.u32 %v17966_v7, 16 }
 0x145   : > { %15645 = vmatprep.subr.bf16.mxu0 %v16900_v18 }
 0x146   : > { %15110 = vmatmul.mubr.msk.bf16.gmra.mrb[20].mxu1 %vm316_vm0, %v2354_v22  ;;  %v16915_v22 = vld [vmem:[%s19416_s1 + $0xd8] sm:$0xff]  }
 0x147   : > { %15614 = vmatmul.mubr.msk.bf16.gmra.mrb[4].mxu0 %vm316_vm0, %v16870_v21  ;;  %15113 = vmatprep.mubr.msk.bf16.mxu1 %vm316_vm0, %v2356_v27  ;;  %v17991_v21 = vld [vmem:[%s17244_s6 + $0x60] sm:$0xff]   ;;  %v9618_v27 = vrot.slane %v9616_v0, 1 }
 0x148   : > { %15617 = vmatprep.mubr.msk.bf16.mxu0 %vm316_vm0, %v16872_v28  ;;  %15646 = vmatpush3.bf16.msra.mxu0 %v16900_v18  ;;  %v9625_v18 = vshrl.u32 %v17966_v7, 16  ;;  %v18002_v28 = vld [vmem:[%s17244_s6 + $0x34] sm:$0xff]  }
 0x149   : > { %15647 = vmatprep.subr.bf16.mxu0 %v16901_v34  ;;  %v9641_v59 = vshrl.u32 %v18002_v28, 16 }
 0x14a   : > { %v17915_v32 = vpop.f32.mrb[28].mxu0 }
 0x14b   : > { %v17920_v6 = vpop.f32.mrb[29].mxu0 }
 0x14c   : > { %15648 = vmatpush3.bf16.msra.mxu0 %v16901_v34  ;;  %v17923_v9 = vpop.f32.mrb[30].mxu0  ;;  %v18007_v34 = vld [vmem:[%s19416_s1 + $0xe0] sm:$0xff]  }
 0x14d   : > { %15681 = vmatprep.subr.bf16.mxu0 %v17910_v29  ;;  %v17926_v20 = vpop.f32.mrb[31].mxu0 }
 0x14e   : > { %15114 = vmatmul.mubr.msk.bf16.gmra.mrb[24].mxu1 %vm316_vm0, %v2358_v62  ;;  %v9623_v62 = vrot.slane %v9621_v11, 1  ;;  %v18078_v11 = vld [vmem:[%s17244_s6 + $0x5c] sm:$0xff]  }
 0x14f   : > { %15618 = vmatmul.mubr.msk.bf16.gmra.mrb[8].mxu0 %vm316_vm0, %v16875_v30  ;;  %15117 = vmatprep.mubr.msk.bf16.mxu1 %vm316_vm0, %v2360_v33  ;;  %v16897_v30 = vld [vmem:[%s17244_s6 + $0x8c] sm:$0xff]   ;;  %v9629_v33 = vshll.u32 %v17987_v17, 16 }
 0x150   : > { %15621 = vmatprep.mubr.msk.bf16.mxu0 %vm316_vm0, %v16877_v31  ;;  %v2829_v31 = vrot.slane %v17984_v16, 1  ;;  %v16921_v17 = vld [vmem:[%s17244_s6 + $0x10] sm:$0xff]  }
 0x151   : > { %v9631_v56 = vrot.slane %v9629_v33, 1  ;;  %v9677_v33 = vshll.u32 %v18078_v11, 16 }
 0x156   : > { %15118 = vmatmul.mubr.msk.bf16.gmra.mrb[44].mxu1 %vm316_vm0, %v2359_v26 }
 0x157   : > { %15622 = vmatmul.mubr.msk.bf16.gmra.mrb[12].mxu0 %vm316_vm0, %v16878_v40  ;;  %15129 = vmatprep.mubr.msk.bf16.mxu1 %vm316_vm0, %v2812_v47  ;;  %v18025_v47 = vld [vmem:[%s17244_s6 + $0x68] sm:$0xff]  }
 0x158   : > { %15625 = vmatprep.mubr.msk.bf16.mxu0 %vm316_vm0, %v16881_v41  ;;  %v2833_v1 = vrot.slane %v18025_v47, 1 }
 0x15e   : > { %15130 = vmatmul.mubr.msk.bf16.vlgmr.msra.gmra.mrb[0].mxu1 %vm316_vm0, %v2814_v58 }
 0x15f   : > { %15626 = vmatmul.mubr.msk.bf16.gmra.mrb[16].mxu0 %vm316_vm0, %v16884_v52  ;;  %15162 = vmatpush3.bf16.msra.mxu1 %v17850_v37  ;;  %v2823_v37 = vrot.slane %v17950_v63, 1  ;;  %v9637_v52 = vshll.u32 %v18002_v28, 16  ;;  %v9649_v63 = vshrl.u32 %v18028_v48, 16 }
 0x160   : > { %15133 = vmatprep.mubr.msk.bf16.mxu1 %vm316_vm0, %v2816_v2  ;;  %15629 = vmatprep.mubr.msk.bf16.mxu0 %vm316_vm0, %v16886_v53  ;;  %v18038_v53 = vld [vmem:[%s17244_s6 + $0x4c] sm:$0xff]  }
 0x161   : > { %15163 = vmatprep.subr.bf16.mxu1 %v16892_v60  ;;  %v2824_v42 = vsel %vm1255_vm4, %v2821_v13, %v2823_v37  ;;  %v9639_v58 = vrot.slane %v9637_v52, 1  ;;  %v18049_v2 = vld [vmem:[%s17244_s6 + $0x70] sm:$0xff]  }
 0x162   : > { %v18063_v13 = vld [vmem:[%s17244_s6 + $0x54] sm:$0xff]  }
 0x163   : > { %15164 = vmatpush3.bf16.msra.mxu1 %v16892_v60  ;;  %v9645_v60 = vshll.u32 %v18028_v48, 16  ;;  %v9673_v4 = vshrl.u32 %v18063_v13, 16  ;;  %v16923_v48 = vld [vmem:[%s17244_s6 + $0x18] sm:$0xff]  }
 0x164   : > { %15165 = vmatprep.subr.bf16.mxu1 %v16906_v10 }
 0x165   : > { %v9647_v0 = vrot.slane %v9645_v60, 1  ;;  %v3308_v60 = vshrl.u32 %v16923_v48, 16 }
 0x166   : > { %15134 = vmatmul.mubr.msk.bf16.gmra.mrb[4].mxu1 %vm316_vm0, %v2818_v14 }
 0x167   : > { %15630 = vmatmul.mubr.msk.bf16.gmra.mrb[20].mxu0 %vm316_vm0, %v16888_v12  ;;  %15137 = vmatprep.mubr.msk.bf16.mxu1 %vm316_vm0, %v2820_v15  ;;  %v9661_v12 = vshll.u32 %v18038_v53, 16  ;;  %v2835_v15 = vrot.slane %v18049_v2, 1 }
 0x168   : > { %15633 = vmatprep.mubr.msk.bf16.mxu0 %vm316_vm0, %v16890_v43  ;;  %15166 = vmatpush3.bf16.msra.mxu1 %v16906_v10  ;;  %v2826_v10 = vsel %vm1255_vm4, %v2823_v37, %v2825_v57  ;;  %v2828_v43 = vsel %vm1255_vm4, %v2825_v57, %v2827_v49  ;;  %v2837_v37 = vrot.slane %v18052_v5, 1 }
 0x169   : > { %v14999_v23 = vpop.f32.mrb[32].mxu1  ;;  %15167 = vmatprep.subr.bf16.mxu1 %v16915_v22 }
 0x16a   : > { %v18010_v19 = vadd.f32 %v14999_v23, %v17845_v24  ;;  %v1024_v26 = vpop.f32.mrb[33].mxu1  ;;  %v2831_v24 = vrot.slane %v17991_v21, 1  ;;  %v9669_v23 = vshll.u32 %v18063_v13, 16 }
 0x16b   : > { %v18016_v61 = vadd.f32 %v1024_v26, %v17852_v50  ;;  %v15000_v36 = vpop.f32.mrb[34].mxu1  ;;  %v18031_v50 = vld [vmem:[%s17244_s6 + $0x44] sm:$0xff]   ;;  %v9635_v26 = vor.u32 %v9633_v44, %v9631_v56  ;;  %v9643_v44 = vor.u32 %v9641_v59, %v9639_v58 }
 0x16c   : > { %v1102_v40 = vadd.f32 %v15000_v36, %v1070_v35  ;;  %v1027_v41 = vpop.f32.mrb[35].mxu1  ;;  %15168 = vmatpush3.bf16.msra.mxu1 %v16915_v22  ;;  %v9653_v8 = vshll.u32 %v18031_v50, 16  ;;  %v9657_v57 = vshrl.u32 %v18031_v50, 16  ;;  %v9665_v22 = vshrl.u32 %v18038_v53, 16  ;;  %v16940_v53 = vld [vmem:[%s19416_s1 + $0x270] sm:$0xff]  }
 0x16d   : > { %v18034_v51 = vadd.f32 %v1027_v41, %v17857_v55  ;;  %15201 = vmatprep.subr.bf16.mxu1 %v18007_v34  ;;  %v9619_v55 = vor.u32 %v9618_v27, %v9614_v45  ;;  %v18072_v45 = vld [vmem:[%s17244_s6 + $0x80] sm:$0x7f]   ;;  %v18090_v27 = vrot.slane %v9661_v12, 1  ;;  %v3299_v35 = vshrl.u32 %v16921_v17, 16 }
 0x16e   : > { %1134 = vst [vmem:[#allocation2 + $0xf8] sm:$0xf] %v1102_v40  ;;  %15138 = vmatmul.mubr.msk.bf16.gmra.mrb[8].mxu1 %vm316_vm0, %v2822_v38  ;;  %v9655_v3 = vrot.slane %v9653_v8, 1  ;;  %v2839_v28 = vrot.slane %v18072_v45, 1  ;;  %v2830_v36 = vsel %vm1255_vm4, %v2827_v49, %v2829_v31  ;;  %v3302_v38 = vshll.u32 %v16921_v17, 16  ;;  %v16936_v40 = vld [vmem:[%s19416_s1 + $0x268] sm:$0xff]  }
 0x16f   : > { %15634 = vmatmul.mubr.msk.bf16.gmra.mrb[24].mxu0 %vm316_vm0, %v16893_v25  ;;  %15141 = vmatprep.mubr.msk.bf16.mxu1 %vm316_vm0, %v2824_v42  ;;  %v9624_v14 = vsel %vm678_vm3, %v9619_v55, %v9623_v62  ;;  %v9627_v25 = vor.u32 %v9625_v18, %v9623_v62  ;;  %v2832_v18 = vsel %vm1255_vm4, %v2829_v31, %v2831_v24  ;;  %v18113_v49 = vld [vmem:[%s17244_s6 + $0x64] sm:$0xff]   ;;  %v18117_v16 = vrot.slane %v9669_v23, 1  ;;  %v16941_v8 = vld [vmem:[%s19416_s1 + $0x278] sm:$0xff]  }
 0x170   : > { %15637 = vmatprep.mubr.msk.bf16.mxu0 %vm316_vm0, %v16897_v30  ;;  %v16920_v30 = vld [vmem:[%s17244_s6 + $0x8] sm:$0xfe]   ;;  %v9640_v62 = vsel %vm678_vm3, %v9635_v26, %v9639_v58  ;;  %v18119_v31 = vrot.slane %v9677_v33, 1  ;;  %v3301_v47 = vrot.slane %v3299_v35, 1  ;;  %v9651_v50 = vor.u32 %v9649_v63, %v9647_v0  ;;  %v18151_v17 = vld [vmem:[%s19416_s1 + $0x280] sm:$0xff]   ;;  %v18154_v23 = vld [vmem:[%s17244_s6 + $0x74] sm:$0xff]  }
 0x171   : > { %v9632_v7 = vsel %vm678_vm3, %v9627_v25, %v9631_v56  ;;  %v3291_v41 = vshrl.u32 %v16920_v30, 16  ;;  %v3294_v42 = vshll.u32 %v16920_v30, 16  ;;  %v3304_v52 = vrot.slane %v3302_v38, 2 }
 0x172   : > { %v9681_v55 = vshrl.u32 %v18078_v11, 16  ;;  %v2834_v56 = vsel %vm1255_vm4, %v2831_v24, %v2833_v1  ;;  %v9648_v58 = vsel %vm678_vm3, %v9643_v44, %v9647_v0  ;;  %v9656_v59 = vsel %vm678_vm3, %v9651_v50, %v9655_v3  ;;  %v16926_v0 = vld [vmem:[%s17244_s6 + $0x20] sm:$0xff]  }
 0x173   : > { %v3293_v21 = vrot.slane %v3291_v41, 1  ;;  %v3296_v24 = vrot.slane %v3294_v42, 2  ;;  %v9659_v12 = vor.u32 %v9657_v57, %v9655_v3  ;;  %v9667_v63 = vor.u32 %v9665_v22, %v18090_v27  ;;  %v16928_v57 = vld [vmem:[%s17244_s6 + $0x28] sm:$0xff]  }
 0x174   : > { %v3310_v11 = vrot.slane %v3308_v60, 1  ;;  %v2838_v3 = vsel %vm1255_vm4, %v2835_v15, %v2837_v37  ;;  %v2840_v30 = vsel %vm1255_vm4, %v2837_v37, %v2839_v28  ;;  %v3320_v5 = vshll.u32 %v16926_v0, 16 }
 0x175   : > { %v9664_v22 = vsel %vm678_vm3, %v9659_v12, %v18090_v27  ;;  %v9672_v2 = vsel %vm678_vm3, %v9667_v63, %v18117_v16  ;;  %v9675_v38 = vor.u32 %v9673_v4, %v18117_v16  ;;  %v9683_v41 = vor.u32 %v9681_v55, %v18119_v31  ;;  %v16932_v4 = vld [vmem:[%s17244_s6 + $0x38] sm:$0xff]   ;;  %v16937_v12 = vld [vmem:[%s17244_s6 + $0x40] sm:$0xff]  }
 0x176   : > { %15142 = vmatmul.mubr.msk.bf16.gmra.mrb[12].mxu1 %vm316_vm0, %v2826_v10  ;;  %v9689_v10 = vshrl.u32 %v18113_v49, 16  ;;  %v3329_v42 = vshll.u32 %v16928_v57, 16  ;;  %v9705_v55 = vshrl.u32 %v18154_v23, 16 }
 0x177   : > { %15638 = vmatmul.mubr.msk.bf16.gmra.mrb[44].mxu0 %vm316_vm0, %v16899_v54  ;;  %15145 = vmatprep.mubr.msk.bf16.mxu1 %vm316_vm0, %v2828_v43  ;;  %v9685_v54 = vshll.u32 %v18113_v49, 16  ;;  %v3311_v43 = vshll.u32 %v16923_v48, 16  ;;  %v3305_v49 = vor.u32 %v3304_v52, %v3301_v47  ;;  %v16929_v48 = vld [vmem:[%s17244_s6 + $0x7c] sm:$0xff]   ;;  %v9680_v50 = vsel %vm678_vm3, %v9675_v38, %v18119_v31 }
 0x178   : > { %15649 = vmatprep.mubr.msk.bf16.mxu0 %vm316_vm0, %v9624_v14  ;;  %v16925_v14 = vld [vmem:[%s17244_s6 + $0x6c] sm:$0xff]   ;;  %v9709_v45 = vshll.u32 %v16929_v48, 16 }
 0x179   : > { %v3313_v33 = vrot.slane %v3311_v43, 2  ;;  %v9693_v27 = vshll.u32 %v16925_v14, 16  ;;  %v9697_v37 = vshrl.u32 %v16925_v14, 16  ;;  %v3347_v43 = vshll.u32 %v16932_v4, 16  ;;  %v16934_v14 = vld [vmem:[%s17244_s6 + $0x8c] sm:$0xff]  }
 0x17b   : > { %v3314_v31 = vor.u32 %v3313_v33, %v3310_v11  ;;  %v16939_v33 = vld [vmem:[%s17244_s6 + $0x48] sm:$0xff]   ;;  %v3349_v38 = vrot.slane %v3347_v43, 2 }
 0x17d   : > { %v3315_v63 = vsel %vm1736_vm5, %v3305_v49, %v3314_v31 }
 0x17e   : > { %15146 = vmatmul.mubr.msk.bf16.gmra.mrb[16].mxu1 %vm316_vm0, %v2830_v36 }
 0x17f   : > { %15650 = vmatmul.mubr.msk.bf16.vlgmr.msra.gmra.mrb[0].mxu0 %vm316_vm0, %v9632_v7  ;;  %15149 = vmatprep.mubr.msk.bf16.mxu1 %vm316_vm0, %v2832_v18  ;;  %v3317_v7 = vshrl.u32 %v16926_v0, 16  ;;  %v9701_v18 = vshll.u32 %v18154_v23, 16  ;;  %v18210_v0 = vld [vmem:[%s17244_s6 + $0x94] sm:$0x7f]  }
 0x180   : > { %15653 = vmatprep.mubr.msk.bf16.mxu0 %vm316_vm0, %v9640_v62  ;;  %15682 = vmatpush3.bf16.msra.mxu0 %v17910_v29  ;;  %v2836_v29 = vsel %vm1255_vm4, %v2833_v1, %v2835_v15  ;;  %v9687_v1 = vrot.slane %v9685_v54, 1  ;;  %v16930_v15 = vld [vmem:[%s17244_s6 + $0x30] sm:$0xff]   ;;  %v3326_v62 = vshrl.u32 %v16928_v57, 16  ;;  %v9713_v57 = vshrl.u32 %v16929_v48, 16 }
 0x181   : > { %15683 = vmatprep.subr.bf16.mxu0 %v16936_v40  ;;  %v3335_v44 = vshrl.u32 %v16930_v15, 16  ;;  %v3338_v13 = vshll.u32 %v16930_v15, 16  ;;  %v9703_v52 = vrot.slane %v9701_v18, 1 }
 0x182   : > { %v9688_v54 = vsel %vm678_vm3, %v9683_v41, %v9687_v1  ;;  %v9691_v16 = vor.u32 %v9689_v10, %v9687_v1  ;;  %v3328_v60 = vrot.slane %v3326_v62, 1  ;;  %v3344_v10 = vshrl.u32 %v16932_v4, 16  ;;  %v16946_v41 = vld [vmem:[%s19416_s1 + $0xf0] sm:$0xff]  }
 0x184   : > { %15684 = vmatpush3.bf16.msra.mxu0 %v16936_v40  ;;  %v3297_v40 = vor.u32 %v3296_v24, %v3293_v21  ;;  %v3337_v21 = vrot.slane %v3335_v44, 1  ;;  %v3340_v24 = vrot.slane %v3338_v13, 2  ;;  %v3346_v18 = vrot.slane %v3344_v10, 1  ;;  %v1551_v10 = vld [vmem:[#allocation2 + $0xf8] sm:$0xf] }
 0x185   : > { %15685 = vmatprep.subr.bf16.mxu0 %v16940_v53  ;;  %v3362_v44 = vshrl.u32 %v16939_v33, 16  ;;  %v3365_v13 = vshll.u32 %v16939_v33, 16 }
 0x186   : > { %15150 = vmatmul.mubr.msk.bf16.gmra.mrb[20].mxu1 %vm316_vm0, %v2834_v56  ;;  %v9695_v56 = vrot.slane %v9693_v27, 1  ;;  %v3356_v27 = vshll.u32 %v16937_v12, 16  ;;  %v3341_v62 = vor.u32 %v3340_v24, %v3337_v21  ;;  %v16945_v24 = vld [vmem:[%s17244_s6 + $0x58] sm:$0xff]  }
 0x187   : > { %15654 = vmatmul.mubr.msk.bf16.gmra.mrb[4].mxu0 %vm316_vm0, %v9648_v58  ;;  %15153 = vmatprep.mubr.msk.bf16.mxu1 %vm316_vm0, %v2836_v29  ;;  %v3319_v58 = vrot.slane %v3317_v7, 1  ;;  %v3322_v29 = vrot.slane %v3320_v5, 2  ;;  %v9707_v5 = vor.u32 %v9705_v55, %v9703_v52 }
 0x188   : > { %15657 = vmatprep.mubr.msk.bf16.mxu0 %vm316_vm0, %v9656_v59  ;;  %15686 = vmatpush3.bf16.msra.mxu0 %v16940_v53  ;;  %v3306_v53 = vsel %vm1736_vm5, %v3297_v40, %v3305_v49  ;;  %v18196_v59 = vld [vmem:[%s17244_s6 + $0x84] sm:$0xff]   ;;  %v9699_v47 = vor.u32 %v9697_v37, %v9695_v56  ;;  %v9696_v11 = vsel %vm678_vm3, %v9691_v16, %v9695_v56  ;;  %v9725_v40 = vshll.u32 %v16934_v14, 16 }
 0x189   : > { %15687 = vmatprep.subr.bf16.mxu0 %v16941_v8  ;;  %v9717_v1 = vshll.u32 %v18196_v59, 16  ;;  %v9721_v15 = vshrl.u32 %v18196_v59, 16  ;;  %v9733_v49 = vshll.u32 %v18210_v0, 16  ;;  %v3358_v48 = vrot.slane %v3356_v27, 2  ;;  %v16955_v59 = vld [vmem:[%s19416_s1 + $0xf8] sm:$0xff]  }
 0x18a   : > { %v18156_v25 = vpop.f32.mrb[32].mxu0  ;;  %v9727_v4 = vrot.slane %v9725_v40, 1  ;;  %v3350_v16 = vor.u32 %v3349_v38, %v3346_v18  ;;  %v16943_v27 = vld [vmem:[%s17244_s6 + $0x1c] sm:$0xfe]   ;;  %v9737_v18 = vshrl.u32 %v18210_v0, 16  ;;  %v16952_v0 = vld [vmem:[%s17244_s6 + $0x70] sm:$0xff]  }
 0x18b   : > { %v18164_v26 = vpop.f32.mrb[33].mxu0  ;;  %v9719_v37 = vrot.slane %v9717_v1, 1  ;;  %v18246_v1 = vld [vmem:[%s19416_s1 + $0x100] sm:$0xff]   ;;  %v10189_v40 = vrot.slane %v16943_v27, 1 }
 0x18c   : > { %15688 = vmatpush3.bf16.msra.mxu0 %v16941_v8  ;;  %v18173_v35 = vpop.f32.mrb[34].mxu0  ;;  %v3331_v8 = vrot.slane %v3329_v42, 2 }
 0x18d   : > { %19422 = vst [vmem:[#allocation3_spill] sm:$0xff] %v18173_v35  ;;  %15721 = vmatprep.subr.bf16.mxu0 %v18151_v17  ;;  %v18179_v36 = vpop.f32.mrb[35].mxu0 }
 0x18e   : > { %15154 = vmatmul.mubr.msk.bf16.gmra.mrb[24].mxu1 %vm316_vm0, %v2838_v3  ;;  %v9704_v3 = vsel %vm678_vm3, %v9699_v47, %v9703_v52  ;;  %v3332_v7 = vor.u32 %v3331_v8, %v3328_v60  ;;  %v9723_v52 = vor.u32 %v9721_v15, %v9719_v37  ;;  %v3364_v60 = vrot.slane %v3362_v44, 1 }
 0x18f   : > { %15658 = vmatmul.mubr.msk.bf16.gmra.mrb[8].mxu0 %vm316_vm0, %v9664_v22  ;;  %15157 = vmatprep.mubr.msk.bf16.mxu1 %vm316_vm0, %v2840_v30  ;;  %v16933_v22 = vld [vmem:[%s19416_s1 + $0xe8] sm:$0xff]   ;;  %v3353_v30 = vshrl.u32 %v16937_v12, 16 }
 0x190   : > { %15661 = vmatprep.mubr.msk.bf16.mxu0 %vm316_vm0, %v9672_v2  ;;  %v9711_v2 = vrot.slane %v9709_v45, 1  ;;  %v3342_v56 = vsel %vm1736_vm5, %v3332_v7, %v3341_v62 }
 0x192   : > { %v9715_v42 = vor.u32 %v9713_v57, %v9711_v2 }
 0x196   : > { %15158 = vmatmul.mubr.msk.bf16.gmra.mrb[48].mxu1 %vm316_vm0, %v2839_v28  ;;  %v3323_v28 = vor.u32 %v3322_v29, %v3319_v58  ;;  %v9720_v58 = vsel %vm678_vm3, %v9715_v42, %v9719_v37  ;;  %v9729_v29 = vshrl.u32 %v16934_v14, 16  ;;  %v16948_v14 = vld [vmem:[%s17244_s6 + $0x60] sm:$0xff]  }
 0x197   : > { %15662 = vmatmul.mubr.msk.bf16.gmra.mrb[12].mxu0 %vm316_vm0, %v9680_v50  ;;  %15169 = vmatprep.mubr.msk.bf16.mxu1 %vm316_vm0, %v3306_v53  ;;  %v16942_v50 = vld [vmem:[%s17244_s6 + $0x50] sm:$0xff]   ;;  %v3389_v37 = vshrl.u32 %v16948_v14, 16  ;;  %v3392_v38 = vshll.u32 %v16948_v14, 16 }
 0x198   : > { %15665 = vmatprep.mubr.msk.bf16.mxu0 %vm316_vm0, %v9688_v54  ;;  %v3324_v23 = vsel %vm1736_vm5, %v3314_v31, %v3323_v28  ;;  %v3333_v53 = vsel %vm1736_vm5, %v3323_v28, %v3332_v7  ;;  %v9712_v54 = vsel %vm678_vm3, %v9707_v5, %v9711_v2  ;;  %v9735_v31 = vrot.slane %v9733_v49, 1 }
 0x199   : > { %v3371_v47 = vshrl.u32 %v16942_v50, 16  ;;  %v3374_v8 = vshll.u32 %v16942_v50, 16  ;;  %v9731_v21 = vor.u32 %v9729_v29, %v9727_v4  ;;  %v3367_v28 = vrot.slane %v3365_v13, 2  ;;  %v16949_v29 = vld [vmem:[%s17244_s6 + $0x34] sm:$0xff]  }
 0x19a   : > { %v3380_v7 = vshrl.u32 %v16945_v24, 16  ;;  %v3383_v5 = vshll.u32 %v16945_v24, 16  ;;  %v3391_v44 = vrot.slane %v3389_v37, 1  ;;  %v16953_v24 = vld [vmem:[%s17244_s6 + $0x44] sm:$0xff]  }
 0x19b   : > { %v3376_v2 = vrot.slane %v3374_v8, 2  ;;  %v9736_v15 = vsel %vm678_vm3, %v9731_v21, %v9735_v31  ;;  %v16954_v8 = vld [vmem:[%s17244_s6 + $0x78] sm:$0xff]  }
 0x19c   : > { %v3385_v42 = vrot.slane %v3383_v5, 2  ;;  %v16980_v5 = vld [vmem:[%s19416_s1 + $0x290] sm:$0xff]  }
 0x19e   : > { %15170 = vmatmul.mubr.msk.bf16.vlgmr.msra.gmra.mrb[0].mxu1 %vm316_vm0, %v3315_v63 }
 0x19f   : > { %15666 = vmatmul.mubr.msk.bf16.gmra.mrb[16].mxu0 %vm316_vm0, %v9696_v11  ;;  %15202 = vmatpush3.bf16.msra.mxu1 %v18007_v34  ;;  %v3355_v34 = vrot.slane %v3353_v30, 1  ;;  %v9728_v30 = vsel %vm678_vm3, %v9723_v52, %v9727_v4  ;;  %v3410_v52 = vshll.u32 %v16952_v0, 16 }
 0x1a0   : > { %15173 = vmatprep.mubr.msk.bf16.mxu1 %vm316_vm0, %v3324_v23  ;;  %15669 = vmatprep.mubr.msk.bf16.mxu0 %vm316_vm0, %v9704_v3  ;;  %v3351_v23 = vsel %vm1736_vm5, %v3341_v62, %v3350_v16  ;;  %v3373_v3 = vrot.slane %v3371_v47, 1  ;;  %v3407_v47 = vshrl.u32 %v16952_v0, 16 }
 0x1a1   : > { %15203 = vmatprep.subr.bf16.mxu1 %v16933_v22  ;;  %v3359_v55 = vor.u32 %v3358_v48, %v3355_v34  ;;  %v16947_v34 = vld [vmem:[%s17244_s6 + $0x2c] sm:$0xff]  }
 0x1a2   : > { %v3377_v62 = vor.u32 %v3376_v2, %v3373_v3  ;;  %v16950_v48 = vld [vmem:[%s17244_s6 + $0x68] sm:$0xff]  }
 0x1a3   : > { %15204 = vmatpush3.bf16.msra.mxu1 %v16933_v22  ;;  %v3360_v33 = vsel %vm1736_vm5, %v3350_v16, %v3359_v55  ;;  %v3401_v4 = vshll.u32 %v16950_v48, 16  ;;  %v10192_v16 = vrot.slane %v16947_v34, 1  ;;  %v16981_v34 = vld [vmem:[%s19416_s1 + $0x298] sm:$0xff]  }
 0x1a4   : > { %15205 = vmatprep.subr.bf16.mxu1 %v16946_v41 }
 0x1a6   : > { %15174 = vmatmul.mubr.msk.bf16.gmra.mrb[4].mxu1 %vm316_vm0, %v3333_v53  ;;  %v9739_v53 = vor.u32 %v9737_v18, %v9735_v31  ;;  %v16956_v18 = vld [vmem:[%s17244_s6 + $0x4c] sm:$0xff]  }
 0x1a7   : > { %15670 = vmatmul.mubr.msk.bf16.gmra.mrb[20].mxu0 %vm316_vm0, %v9712_v54  ;;  %15177 = vmatprep.mubr.msk.bf16.mxu1 %vm316_vm0, %v3342_v56  ;;  %v3394_v56 = vrot.slane %v3392_v38, 2 }
 0x1a8   : > { %15673 = vmatprep.mubr.msk.bf16.mxu0 %vm316_vm0, %v9720_v58  ;;  %15206 = vmatpush3.bf16.msra.mxu1 %v16946_v41  ;;  %v3382_v41 = vrot.slane %v3380_v7, 1  ;;  %v10198_v7 = vrot.slane %v16953_v24, 1  ;;  %v16965_v24 = vld [vmem:[%s17244_s6 + $0x6c] sm:$0xff]  }
 0x1a9   : > { %v15039_v45 = vpop.f32.mrb[36].mxu1  ;;  %15207 = vmatprep.subr.bf16.mxu1 %v16955_v59  ;;  %v3395_v31 = vor.u32 %v3394_v56, %v3391_v44  ;;  %v16960_v56 = vld [vmem:[%s17244_s6 + $0x8] sm:$0xfc]  }
 0x1aa   : > { %v18249_v12 = vadd.f32 %v15039_v45, %v18010_v19  ;;  %v1505_v43 = vpop.f32.mrb[37].mxu1  ;;  %v3386_v13 = vor.u32 %v3385_v42, %v3382_v41 }
 0x1ab   : > { %v18253_v63 = vadd.f32 %v1505_v43, %v18016_v61  ;;  %v15040_v11 = vpop.f32.mrb[38].mxu1  ;;  %v16944_v61 = vld [vmem:[%s17244_s6 + $0x24] sm:$0xff]  }
 0x1ac   : > { %v1583_v57 = vadd.f32 %v15040_v11, %v1551_v10  ;;  %v1508_v22 = vpop.f32.mrb[39].mxu1  ;;  %15208 = vmatpush3.bf16.msra.mxu1 %v16955_v59  ;;  %v10190_v49 = vrot.slane %v16944_v61, 1  ;;  %v3398_v59 = vshrl.u32 %v16950_v48, 16  ;;  %v3387_v45 = vsel %vm1736_vm5, %v3377_v62, %v3386_v13  ;;  %v16957_v10 = vld [vmem:[%s17244_s6 + $0x80] sm:$0xff]  }
 0x1ad   : > { %v18259_v19 = vadd.f32 %v1508_v22, %v18034_v51  ;;  %15241 = vmatprep.subr.bf16.mxu1 %v18246_v1  ;;  %v3368_v51 = vor.u32 %v3367_v28, %v3364_v60  ;;  %v16951_v60 = vld [vmem:[%s17244_s6 + $0x3c] sm:$0xff]   ;;  %v3403_v28 = vrot.slane %v3401_v4, 2  ;;  %v3396_v14 = vsel %vm1736_vm5, %v3386_v13, %v3395_v31 }
 0x1ae   : > { %1615 = vst [vmem:[#allocation2 + $0xf8] sm:$0xf] %v1583_v57  ;;  %15178 = vmatmul.mubr.msk.bf16.gmra.mrb[8].mxu1 %vm316_vm0, %v3351_v23  ;;  %v10191_v58 = vsel %vm1255_vm4, %v10189_v40, %v10190_v49  ;;  %v3400_v21 = vrot.slane %v3398_v59, 1  ;;  %v10193_v43 = vsel %vm1255_vm4, %v10190_v49, %v10192_v16  ;;  %v3409_v11 = vrot.slane %v3407_v47, 1  ;;  %v16976_v57 = vld [vmem:[%s19416_s1 + $0x288] sm:$0xff]   ;;  %v16958_v49 = vld [vmem:[%s17244_s6 + $0x54] sm:$0xff]  }
 0x1af   : > { %15674 = vmatmul.mubr.msk.bf16.gmra.mrb[24].mxu0 %vm316_vm0, %v9728_v30  ;;  %15181 = vmatprep.mubr.msk.bf16.mxu1 %vm316_vm0, %v3360_v33  ;;  %v3369_v50 = vsel %vm1736_vm5, %v3359_v55, %v3368_v51  ;;  %v3378_v54 = vsel %vm1736_vm5, %v3368_v51, %v3377_v62  ;;  %v10194_v55 = vrot.slane %v16949_v29, 1  ;;  %v3412_v23 = vrot.slane %v3410_v52, 2  ;;  %v16959_v29 = vld [vmem:[%s17244_s6 + $0x5c] sm:$0xff]   ;;  %v16962_v52 = vld [vmem:[%s17244_s6 + $0x64] sm:$0xff]  }
 0x1b0   : > { %15677 = vmatprep.mubr.msk.bf16.mxu0 %vm316_vm0, %v9736_v15  ;;  %v3416_v22 = vshrl.u32 %v16954_v8, 16  ;;  %v3419_v30 = vshll.u32 %v16954_v8, 16  ;;  %v3404_v33 = vor.u32 %v3403_v28, %v3400_v21  ;;  %v3425_v2 = vshrl.u32 %v16957_v10, 16  ;;  %v16963_v28 = vld [vmem:[%s17244_s6 + $0x18] sm:$0xff]  }
 0x1b1   : > { %v10195_v3 = vsel %vm1255_vm4, %v10192_v16, %v10194_v55  ;;  %v3428_v15 = vshll.u32 %v16957_v10, 16  ;;  %v10196_v27 = vrot.slane %v16951_v60, 1  ;;  %v3413_v61 = vor.u32 %v3412_v23, %v3409_v11  ;;  %v16961_v16 = vld [vmem:[%s17244_s6 + $0x10] sm:$0xff]   ;;  %v16966_v10 = vld [vmem:[%s17244_s6 + $0x20] sm:$0xff]  }
 0x1b2   : > { %v3418_v37 = vrot.slane %v3416_v22, 1  ;;  %v3421_v51 = vrot.slane %v3419_v30, 2  ;;  %v3405_v62 = vsel %vm1736_vm5, %v3395_v31, %v3404_v33  ;;  %v3427_v38 = vrot.slane %v3425_v2, 1  ;;  %v16967_v11 = vld [vmem:[%s17244_s6 + $0x74] sm:$0xff]   ;;  %v16969_v2 = vld [vmem:[%s17244_s6 + $0x7c] sm:$0xff]  }
 0x1b3   : > { %v3430_v40 = vrot.slane %v3428_v15, 2  ;;  %v10197_v41 = vsel %vm1255_vm4, %v10194_v55, %v10196_v27  ;;  %v3414_v42 = vsel %vm1736_vm5, %v3404_v33, %v3413_v61  ;;  %v10200_v48 = vrot.slane %v16956_v18, 1  ;;  %v16968_v33 = vld [vmem:[%s17244_s6 + $0x28] sm:$0xff]   ;;  %v16970_v15 = vld [vmem:[%s17244_s6 + $0x30] sm:$0xff]  }
 0x1b4   : > { %v3422_v44 = vor.u32 %v3421_v51, %v3418_v37  ;;  %v10204_v60 = vrot.slane %v16959_v29, 1  ;;  %v3882_v8 = vrot.slane %v16960_v56, 2  ;;  %v10206_v21 = vrot.slane %v16962_v52, 1 }
 0x1b5   : > { %v10201_v59 = vsel %vm1255_vm4, %v10198_v7, %v10200_v48  ;;  %v3887_v22 = vrot.slane %v16966_v10, 2  ;;  %v10210_v30 = vrot.slane %v16967_v11, 1  ;;  %v3889_v18 = vrot.slane %v16968_v33, 2  ;;  %v16987_v33 = vld [vmem:[%s17244_s6 + $0x60] sm:$0xff]  }
 0x1b6   : > { %15182 = vmatmul.mubr.msk.bf16.gmra.mrb[12].mxu1 %vm316_vm0, %v3369_v50  ;;  %v3431_v50 = vor.u32 %v3430_v40, %v3427_v38  ;;  %v10207_v23 = vsel %vm1255_vm4, %v10204_v60, %v10206_v21  ;;  %v3891_v38 = vrot.slane %v16970_v15, 2  ;;  %v16985_v40 = vld [vmem:[%s19416_s1 + $0x110] sm:$0xff]   ;;  %v3903_v15 = vrot.slane %v16987_v33, 2 }
 0x1b7   : > { %15678 = vmatmul.mubr.msk.bf16.gmra.mrb[48].mxu0 %vm316_vm0, %v9739_v53  ;;  %15185 = vmatprep.mubr.msk.bf16.mxu1 %vm316_vm0, %v3378_v54  ;;  %v10202_v53 = vrot.slane %v16958_v49, 1  ;;  %v18316_v54 = vld [vmem:[%s19416_s1 + $0x2a0] sm:$0xff]  }
 0x1b8   : > { %15689 = vmatprep.mubr.msk.bf16.mxu0 %vm316_vm0, %v10191_v58  ;;  %v3423_v58 = vsel %vm1736_vm5, %v3413_v61, %v3422_v44  ;;  %v3432_v4 = vsel %vm1736_vm5, %v3422_v44, %v3431_v50  ;;  %v16971_v61 = vld [vmem:[%s17244_s6 + $0x84] sm:$0xff]  }
 0x1b9   : > { %v10203_v47 = vsel %vm1255_vm4, %v10200_v48, %v10202_v53  ;;  %v10214_v49 = vrot.slane %v16971_v61, 1  ;;  %v3892_v48 = vsel %vm2329_vm6, %v3889_v18, %v3891_v38  ;;  %v16988_v61 = vld [vmem:[%s17244_s6 + $0x34] sm:$0xff]  }
 0x1be   : > { %15186 = vmatmul.mubr.msk.bf16.gmra.mrb[16].mxu1 %vm316_vm0, %v3387_v45  ;;  %v3883_v45 = vrot.slane %v16961_v16, 2  ;;  %v18387_v16 = vld [vmem:[%s19416_s1 + $0x120] sm:$0xff]  }
 0x1bf   : > { %15690 = vmatmul.mubr.msk.bf16.vlgmr.msra.gmra.mrb[0].mxu0 %vm316_vm0, %v10193_v43  ;;  %15189 = vmatprep.mubr.msk.bf16.mxu1 %vm316_vm0, %v3396_v14  ;;  %v10205_v43 = vsel %vm1255_vm4, %v10202_v53, %v10204_v60  ;;  %v16994_v53 = vld [vmem:[%s19416_s1 + $0x118] sm:$0xff]  }
 0x1c0   : > { %15693 = vmatprep.mubr.msk.bf16.mxu0 %vm316_vm0, %v10195_v3  ;;  %15722 = vmatpush3.bf16.msra.mxu0 %v18151_v17  ;;  %v10199_v17 = vsel %vm1255_vm4, %v10196_v27, %v10198_v7  ;;  %v3884_v14 = vsel %vm2329_vm6, %v3882_v8, %v3883_v45  ;;  %v3885_v3 = vrot.slane %v16963_v28, 2  ;;  %v16979_v8 = vld [vmem:[%s17244_s6 + $0x48] sm:$0xff]  }
 0x1c1   : > { %15723 = vmatprep.subr.bf16.mxu0 %v16976_v57 }
 0x1c2   : > { %v3886_v27 = vsel %vm2329_vm6, %v3883_v45, %v3885_v3  ;;  %v3888_v37 = vsel %vm2329_vm6, %v3885_v3, %v3887_v22 }
 0x1c4   : > { %15724 = vmatpush3.bf16.msra.mxu0 %v16976_v57  ;;  %v10208_v57 = vrot.slane %v16965_v24, 1  ;;  %v16982_v24 = vld [vmem:[%s17244_s6 + $0x50] sm:$0xff]  }
 0x1c5   : > { %15725 = vmatprep.subr.bf16.mxu0 %v16980_v5  ;;  %v3899_v3 = vrot.slane %v16982_v24, 2  ;;  %v16997_v24 = vld [vmem:[%s17244_s6 + $0x54] sm:$0xff]  }
 0x1c6   : > { %15190 = vmatmul.mubr.msk.bf16.gmra.mrb[20].mxu1 %vm316_vm0, %v3405_v62  ;;  %v10209_v7 = vsel %vm1255_vm4, %v10206_v21, %v10208_v57  ;;  %v10211_v51 = vsel %vm1255_vm4, %v10208_v57, %v10210_v30  ;;  %v10212_v62 = vrot.slane %v16969_v2, 1  ;;  %v16983_v57 = vld [vmem:[%s17244_s6 + $0x24] sm:$0xff]  }
 0x1c7   : > { %15694 = vmatmul.mubr.msk.bf16.gmra.mrb[4].mxu0 %vm316_vm0, %v10197_v41  ;;  %15193 = vmatprep.mubr.msk.bf16.mxu1 %vm316_vm0, %v3414_v42  ;;  %v16972_v41 = vld [vmem:[%s17244_s6 + $0x38] sm:$0xff]   ;;  %v16974_v42 = vld [vmem:[%s17244_s6 + $0x8c] sm:$0xff]  }
 0x1c8   : > { %15697 = vmatprep.mubr.msk.bf16.mxu0 %vm316_vm0, %v10199_v17  ;;  %15726 = vmatpush3.bf16.msra.mxu0 %v16980_v5  ;;  %v16973_v5 = vld [vmem:[%s19416_s1 + $0x108] sm:$0xff]   ;;  %v16977_v17 = vld [vmem:[%s17244_s6 + $0x40] sm:$0xff]   ;;  %v10213_v44 = vsel %vm1255_vm4, %v10210_v30, %v10212_v62  ;;  %v3893_v56 = vrot.slane %v16972_v41, 2 }
 0x1c9   : > { %15727 = vmatprep.subr.bf16.mxu0 %v16981_v34  ;;  %v3895_v29 = vrot.slane %v16977_v17, 2  ;;  %v16990_v41 = vld [vmem:[%s17244_s6 + $0x3c] sm:$0xff]  }
 0x1ca   : > { %v18319_v0 = vpop.f32.mrb[36].mxu0  ;;  %v3894_v28 = vsel %vm2329_vm6, %v3891_v38, %v3893_v56  ;;  %v18437_v17 = vld [vmem:[%s17244_s6 + $0x80] sm:$0xff]  }
 0x1cb   : > { %v18323_v13 = vpop.f32.mrb[37].mxu0  ;;  %v3896_v11 = vsel %vm2329_vm6, %v3893_v56, %v3895_v29 }
 0x1cc   : > { %15728 = vmatpush3.bf16.msra.mxu0 %v16981_v34  ;;  %v18328_v31 = vpop.f32.mrb[38].mxu0  ;;  %v3890_v34 = vsel %vm2329_vm6, %v3887_v22, %v3889_v18  ;;  %v16984_v22 = vld [vmem:[%s17244_s6 + $0x58] sm:$0xff]   ;;  %v17015_v18 = vld [vmem:[%s19416_s1 + $0x2a8] sm:$0xff]  }
 0x1cd   : > { %19423 = vst [vmem:[#allocation4_spill] sm:$0xff] %v18328_v31  ;;  %15761 = vmatprep.subr.bf16.mxu0 %v18316_v54  ;;  %v18333_v55 = vpop.f32.mrb[39].mxu0  ;;  %v3901_v2 = vrot.slane %v16984_v22, 2 }
 0x1ce   : > { %15194 = vmatmul.mubr.msk.bf16.gmra.mrb[24].mxu1 %vm316_vm0, %v3423_v58  ;;  %v10216_v58 = vrot.slane %v16974_v42, 1  ;;  %v16993_v42 = vld [vmem:[%s17244_s6 + $0x78] sm:$0xff]  }
 0x1cf   : > { %15698 = vmatmul.mubr.msk.bf16.gmra.mrb[8].mxu0 %vm316_vm0, %v10201_v59  ;;  %15197 = vmatprep.mubr.msk.bf16.mxu1 %vm316_vm0, %v3432_v4 }
 0x1d0   : > { %15701 = vmatprep.mubr.msk.bf16.mxu0 %vm316_vm0, %v10203_v47  ;;  %v2144_v47 = vld [vmem:[#allocation2 + $0xf8] sm:$0xf] }
 0x1d6   : > { %15198 = vmatmul.mubr.msk.bf16.gmra.mrb[52].mxu1 %vm316_vm0, %v3431_v50  ;;  %v10215_v50 = vsel %vm1255_vm4, %v10212_v62, %v10214_v49  ;;  %v16999_v62 = vld [vmem:[%s17244_s6 + $0x8] sm:$0xfc]  }
 0x1d7   : > { %15702 = vmatmul.mubr.msk.bf16.gmra.mrb[12].mxu0 %vm316_vm0, %v10205_v43  ;;  %15209 = vmatprep.mubr.msk.bf16.mxu1 %vm316_vm0, %v3884_v14  ;;  %v10217_v14 = vsel %vm1255_vm4, %v10214_v49, %v10216_v58  ;;  %v17000_v49 = vld [vmem:[%s17244_s6 + $0x10] sm:$0xff]  }
 0x1d8   : > { %15705 = vmatprep.mubr.msk.bf16.mxu0 %vm316_vm0, %v10207_v23  ;;  %v3897_v23 = vrot.slane %v16979_v8, 2  ;;  %v16995_v8 = vld [vmem:[%s17244_s6 + $0x4c] sm:$0xff]  }
 0x1da   : > { %v3900_v30 = vsel %vm2329_vm6, %v3897_v23, %v3899_v3 }
 0x1de   : > { %15210 = vmatmul.mubr.msk.bf16.vlgmr.msra.gmra.mrb[0].mxu1 %vm316_vm0, %v3886_v27  ;;  %v16986_v27 = vld [vmem:[%s17244_s6 + $0x2c] sm:$0xff]  }
 0x1df   : > { %15706 = vmatmul.mubr.msk.bf16.gmra.mrb[16].mxu0 %vm316_vm0, %v10209_v7  ;;  %15242 = vmatpush3.bf16.msra.mxu1 %v18246_v1  ;;  %v16978_v1 = vld [vmem:[%s17244_s6 + $0x94] sm:$0x7f]   ;;  %v16989_v7 = vld [vmem:[%s17244_s6 + $0x68] sm:$0xff]  }
 0x1e0   : > { %15213 = vmatprep.mubr.msk.bf16.mxu1 %vm316_vm0, %v3888_v37  ;;  %15709 = vmatprep.mubr.msk.bf16.mxu0 %vm316_vm0, %v10211_v51  ;;  %v10218_v4 = vrot.slane %v16978_v1, 1  ;;  %v3902_v37 = vsel %vm2329_vm6, %v3899_v3, %v3901_v2  ;;  %v3904_v51 = vsel %vm2329_vm6, %v3901_v2, %v3903_v15  ;;  %v3905_v38 = vrot.slane %v16989_v7, 2  ;;  %v16992_v1 = vld [vmem:[%s17244_s6 + $0x44] sm:$0xff]  }
 0x1e1   : > { %15243 = vmatprep.subr.bf16.mxu1 %v16973_v5 }
 0x1e3   : > { %15244 = vmatpush3.bf16.msra.mxu1 %v16973_v5  ;;  %v16991_v5 = vld [vmem:[%s17244_s6 + $0x70] sm:$0xff]  }
 0x1e4   : > { %15245 = vmatprep.subr.bf16.mxu1 %v16985_v40 }
 0x1e6   : > { %15214 = vmatmul.mubr.msk.bf16.gmra.mrb[4].mxu1 %vm316_vm0, %v3890_v34  ;;  %v17020_v34 = vld [vmem:[%s19416_s1 + $0x2b0] sm:$0xff]  }
 0x1e7   : > { %15710 = vmatmul.mubr.msk.bf16.gmra.mrb[20].mxu0 %vm316_vm0, %v10213_v44  ;;  %15217 = vmatprep.mubr.msk.bf16.mxu1 %vm316_vm0, %v3892_v48  ;;  %v4368_v44 = vshrl.u32 %v16999_v62, 16  ;;  %v4371_v48 = vshll.u32 %v16999_v62, 16 }
 0x1e8   : > { %15713 = vmatprep.mubr.msk.bf16.mxu0 %vm316_vm0, %v10215_v50  ;;  %15246 = vmatpush3.bf16.msra.mxu1 %v16985_v40  ;;  %v3907_v40 = vrot.slane %v16991_v5, 2  ;;  %v17002_v50 = vld [vmem:[%s17244_s6 + $0x18] sm:$0xff]  }
 0x1e9   : > { %v15079_v59 = vpop.f32.mrb[40].mxu1  ;;  %15247 = vmatprep.subr.bf16.mxu1 %v16994_v53 }
 0x1ea   : > { %v18390_v52 = vadd.f32 %v15079_v59, %v18249_v12  ;;  %v2098_v60 = vpop.f32.mrb[41].mxu1  ;;  %v3908_v56 = vsel %vm2329_vm6, %v3905_v38, %v3907_v40  ;;  %v3911_v59 = vrot.slane %v18437_v17, 2 }
 0x1eb   : > { %v18394_v45 = vadd.f32 %v2098_v60, %v18253_v63  ;;  %v15080_v21 = vpop.f32.mrb[42].mxu1  ;;  %v10219_v63 = vsel %vm1255_vm4, %v10216_v58, %v10218_v4  ;;  %v17021_v58 = vld [vmem:[%s19416_s1 + $0x2b8] sm:$0xff]   ;;  %v17005_v60 = vld [vmem:[%s17244_s6 + $0x20] sm:$0xff]  }
 0x1ec   : > { %v2176_v10 = vadd.f32 %v15080_v21, %v2144_v47  ;;  %v2101_v43 = vpop.f32.mrb[43].mxu1  ;;  %15248 = vmatpush3.bf16.msra.mxu1 %v16994_v53  ;;  %v3906_v53 = vsel %vm2329_vm6, %v3903_v15, %v3905_v38  ;;  %v4385_v47 = vshrl.u32 %v17002_v50, 16  ;;  %v4388_v21 = vshll.u32 %v17002_v50, 16  ;;  %v17009_v15 = vld [vmem:[%s17244_s6 + $0x30] sm:$0xff]   ;;  %v17001_v38 = vld [vmem:[%s17244_s6 + $0x64] sm:$0xff]  }
 0x1ed   : > { %v18401_v12 = vadd.f32 %v2101_v43, %v18259_v19  ;;  %15281 = vmatprep.subr.bf16.mxu1 %v18387_v16  ;;  %v3898_v19 = vsel %vm2329_vm6, %v3895_v29, %v3897_v23  ;;  %v3909_v29 = vrot.slane %v16993_v42, 2  ;;  %v4373_v43 = vrot.slane %v4371_v48, 3 }
 0x1ee   : > { %2208 = vst [vmem:[#allocation2 + $0xf8] sm:$0xf] %v2176_v10  ;;  %15218 = vmatmul.mubr.msk.bf16.gmra.mrb[8].mxu1 %vm316_vm0, %v3894_v28  ;;  %v18459_v28 = vld [vmem:[%s19416_s1 + $0x2c0] sm:$0xff]   ;;  %v4370_v10 = vrot.slane %v4368_v44, 2  ;;  %v4397_v2 = vshll.u32 %v17005_v60, 16  ;;  %v4390_v5 = vrot.slane %v4388_v21, 3 }
 0x1ef   : > { %15714 = vmatmul.mubr.msk.bf16.gmra.mrb[24].mxu0 %vm316_vm0, %v10217_v14  ;;  %15221 = vmatprep.mubr.msk.bf16.mxu1 %vm316_vm0, %v3896_v11  ;;  %v4415_v17 = vshll.u32 %v17009_v15, 16 }
 0x1f0   : > { %15717 = vmatprep.mubr.msk.bf16.mxu0 %vm316_vm0, %v10219_v63  ;;  %v3910_v63 = vsel %vm2329_vm6, %v3907_v40, %v3909_v29  ;;  %v4399_v40 = vrot.slane %v4397_v2, 3  ;;  %v18506_v2 = vld [vmem:[%s17244_s6 + $0x2c] sm:$0xff]  }
 0x1f6   : > { %15222 = vmatmul.mubr.msk.bf16.gmra.mrb[12].mxu1 %vm316_vm0, %v3898_v19  ;;  %v3912_v19 = vsel %vm2329_vm6, %v3909_v29, %v3911_v59 }
 0x1f7   : > { %15718 = vmatmul.mubr.msk.bf16.gmra.mrb[52].mxu0 %vm316_vm0, %v10218_v4  ;;  %15225 = vmatprep.mubr.msk.bf16.mxu1 %vm316_vm0, %v3900_v30  ;;  %v4379_v4 = vshll.u32 %v17000_v49, 16  ;;  %v4394_v30 = vshrl.u32 %v17005_v60, 16 }
 0x1f8   : > { %15729 = vmatprep.mubr.msk.bf16.mxu0 %vm316_vm0, %v16983_v57  ;;  %v17007_v57 = vld [vmem:[%s17244_s6 + $0x28] sm:$0xff]  }
 0x1f9   : > { %v4381_v23 = vrot.slane %v4379_v4, 3  ;;  %v4406_v62 = vshll.u32 %v17007_v57, 16  ;;  %v17006_v4 = vld [vmem:[%s17244_s6 + $0x74] sm:$0xff]  }
 0x1fb   : > { %v4408_v50 = vrot.slane %v4406_v62, 3 }
 0x1fe   : > { %15226 = vmatmul.mubr.msk.bf16.gmra.mrb[16].mxu1 %vm316_vm0, %v3902_v37  ;;  %v4403_v37 = vshrl.u32 %v17007_v57, 16 }
 0x1ff   : > { %15730 = vmatmul.mubr.msk.bf16.vlgmr.msra.gmra.mrb[0].mxu0 %vm316_vm0, %v16986_v27  ;;  %15229 = vmatprep.mubr.msk.bf16.mxu1 %vm316_vm0, %v3904_v51  ;;  %v4387_v27 = vrot.slane %v4385_v47, 2  ;;  %v16998_v51 = vld [vmem:[%s17244_s6 + $0x5c] sm:$0xff]  }
 0x200   : > { %15733 = vmatprep.mubr.msk.bf16.mxu0 %vm316_vm0, %v16988_v61  ;;  %15762 = vmatpush3.bf16.msra.mxu0 %v18316_v54  ;;  %v4376_v54 = vshrl.u32 %v17000_v49, 16  ;;  %v4374_v61 = vor.u32 %v4373_v43, %v4370_v10  ;;  %v4412_v49 = vshrl.u32 %v17009_v15, 16  ;;  %v4405_v48 = vrot.slane %v4403_v37, 2  ;;  %v17026_v15 = vld [vmem:[%s19416_s1 + $0x130] sm:$0xff]  }
 0x201   : > { %15763 = vmatprep.subr.bf16.mxu0 %v17015_v18 }
 0x202   : > { %v4378_v14 = vrot.slane %v4376_v54, 2  ;;  %v4417_v54 = vrot.slane %v4415_v17, 3 }
 0x204   : > { %15764 = vmatpush3.bf16.msra.mxu0 %v17015_v18  ;;  %v4382_v7 = vor.u32 %v4381_v23, %v4378_v14  ;;  %v4396_v18 = vrot.slane %v4394_v30, 2  ;;  %v18499_v14 = vld [vmem:[%s17244_s6 + $0x24] sm:$0xff]  }
 0x205   : > { %15765 = vmatprep.subr.bf16.mxu0 %v17020_v34 }
 0x206   : > { %15230 = vmatmul.mubr.msk.bf16.gmra.mrb[20].mxu1 %vm316_vm0, %v3906_v53  ;;  %v4383_v42 = vsel %vm4366_vm7, %v4374_v61, %v4382_v7  ;;  %v4400_v44 = vor.u32 %v4399_v40, %v4396_v18  ;;  %v17004_v53 = vld [vmem:[%s17244_s6 + $0x6c] sm:$0xff]   ;;  %v11121_v18 = vshll.u32 %v18499_v14, 16  ;;  %v11126_v40 = vshll.u32 %v18506_v2, 16 }
 0x207   : > { %15734 = vmatmul.mubr.msk.bf16.gmra.mrb[4].mxu0 %vm316_vm0, %v16990_v41  ;;  %15233 = vmatprep.mubr.msk.bf16.mxu1 %vm316_vm0, %v3908_v56  ;;  %v17011_v41 = vld [vmem:[%s17244_s6 + $0x38] sm:$0xff]   ;;  %v4414_v56 = vrot.slane %v4412_v49, 2 }
 0x208   : > { %15737 = vmatprep.mubr.msk.bf16.mxu0 %vm316_vm0, %v16992_v1  ;;  %15766 = vmatpush3.bf16.msra.mxu0 %v17020_v34  ;;  %v17016_v34 = vld [vmem:[%s17244_s6 + $0x40] sm:$0xff]   ;;  %v4391_v1 = vor.u32 %v4390_v5, %v4387_v27  ;;  %v4424_v29 = vshll.u32 %v17011_v41, 16  ;;  %v17025_v49 = vld [vmem:[%s17244_s6 + $0x58] sm:$0xff]  }
 0x209   : > { %15767 = vmatprep.subr.bf16.mxu0 %v17021_v58  ;;  %v4430_v47 = vshrl.u32 %v17016_v34, 16  ;;  %v4433_v21 = vshll.u32 %v17016_v34, 16  ;;  %v17008_v27 = vld [vmem:[%s17244_s6 + $0x7c] sm:$0xff]  }
 0x20a   : > { %v18462_v11 = vpop.f32.mrb[40].mxu0  ;;  %v4392_v60 = vsel %vm4366_vm7, %v4382_v7, %v4391_v1  ;;  %v4401_v10 = vsel %vm4366_vm7, %v4391_v1, %v4400_v44  ;;  %v4426_v57 = vrot.slane %v4424_v29, 3  ;;  %v17010_v7 = vld [vmem:[%s17244_s6 + $0x84] sm:$0xff]   ;;  %v17013_v1 = vld [vmem:[%s17244_s6 + $0x8c] sm:$0xff]   ;;  %v4457_v29 = vshrl.u32 %v17025_v49, 16 }
 0x20b   : > { %v18465_v3 = vpop.f32.mrb[41].mxu0  ;;  %v4432_v61 = vrot.slane %v4430_v47, 2  ;;  %v2625_v47 = vld [vmem:[#allocation2 + $0xf8] sm:$0xf] }
 0x20c   : > { %15768 = vmatpush3.bf16.msra.mxu0 %v17021_v58  ;;  %v18469_v22 = vpop.f32.mrb[42].mxu0  ;;  %v4421_v58 = vshrl.u32 %v17011_v41, 16  ;;  %v17035_v41 = vld [vmem:[%s19416_s1 + $0x138] sm:$0xff]  }
 0x20d   : > { %19424 = vst [vmem:[#allocation5_spill] sm:$0xff] %v18469_v22  ;;  %15801 = vmatprep.subr.bf16.mxu0 %v18459_v28  ;;  %v18472_v33 = vpop.f32.mrb[43].mxu0 }
 0x20e   : > { %15234 = vmatmul.mubr.msk.bf16.gmra.mrb[24].mxu1 %vm316_vm0, %v3910_v63  ;;  %v4409_v63 = vor.u32 %v4408_v50, %v4405_v48  ;;  %v4423_v23 = vrot.slane %v4421_v58, 2  ;;  %v17028_v48 = vld [vmem:[%s17244_s6 + $0x60] sm:$0xff]   ;;  %v11119_v58 = vshrl.u32 %v18499_v14, 16 }
 0x20f   : > { %15738 = vmatmul.mubr.msk.bf16.gmra.mrb[8].mxu0 %vm316_vm0, %v16995_v8  ;;  %15237 = vmatprep.mubr.msk.bf16.mxu1 %vm316_vm0, %v3912_v19  ;;  %v17012_v8 = vld [vmem:[%s19416_s1 + $0x128] sm:$0xff]   ;;  %v4418_v19 = vor.u32 %v4417_v54, %v4414_v56  ;;  %v18530_v50 = vld [vmem:[%s19416_s1 + $0x140] sm:$0xff]   ;;  %v17017_v54 = vld [vmem:[%s17244_s6 + $0x94] sm:$0xff]  }
 0x210   : > { %15741 = vmatprep.mubr.msk.bf16.mxu0 %vm316_vm0, %v16997_v24  ;;  %v17022_v24 = vld [vmem:[%s17244_s6 + $0x50] sm:$0xff]   ;;  %v4410_v62 = vsel %vm4366_vm7, %v4400_v44, %v4409_v63 }
 0x211   : > { %v4448_v37 = vshrl.u32 %v17022_v24, 16 }
 0x216   : > { %15238 = vmatmul.mubr.msk.bf16.gmra.mrb[56].mxu1 %vm316_vm0, %v3911_v59  ;;  %v17018_v59 = vld [vmem:[%s17244_s6 + $0x48] sm:$0xff]  }
 0x217   : > { %15742 = vmatmul.mubr.msk.bf16.gmra.mrb[12].mxu0 %vm316_vm0, %v16998_v51  ;;  %15249 = vmatprep.mubr.msk.bf16.mxu1 %vm316_vm0, %v4383_v42  ;;  %v4439_v43 = vshrl.u32 %v17018_v59, 16  ;;  %v4442_v30 = vshll.u32 %v17018_v59, 16  ;;  %v4451_v51 = vshll.u32 %v17022_v24, 16  ;;  %v4427_v42 = vor.u32 %v4426_v57, %v4423_v23 }
 0x218   : > { %15745 = vmatprep.mubr.msk.bf16.mxu0 %vm316_vm0, %v17001_v38  ;;  %v4419_v38 = vsel %vm4366_vm7, %v4409_v63, %v4418_v19  ;;  %v4450_v24 = vrot.slane %v4448_v37, 2  ;;  %v11123_v23 = vrot.slane %v11121_v18, 1  ;;  %v11128_v57 = vrot.slane %v11126_v40, 1 }
 0x219   : > { %v4441_v5 = vrot.slane %v4439_v43, 2  ;;  %v4444_v44 = vrot.slane %v4442_v30, 3  ;;  %v4453_v63 = vrot.slane %v4451_v51, 3  ;;  %v4469_v30 = vshll.u32 %v17028_v48, 16 }
 0x21a   : > { %v4459_v37 = vrot.slane %v4457_v29, 2  ;;  %v17034_v29 = vld [vmem:[%s17244_s6 + $0x78] sm:$0xff]  }
 0x21e   : > { %15250 = vmatmul.mubr.msk.bf16.vlgmr.msra.gmra.mrb[0].mxu1 %vm316_vm0, %v4392_v60 }
 0x21f   : > { %15746 = vmatmul.mubr.msk.bf16.gmra.mrb[16].mxu0 %vm316_vm0, %v17004_v53  ;;  %15282 = vmatpush3.bf16.msra.mxu1 %v18387_v16  ;;  %v4435_v16 = vrot.slane %v4433_v21, 3 }
 0x220   : > { %15253 = vmatprep.mubr.msk.bf16.mxu1 %vm316_vm0, %v4401_v10  ;;  %15749 = vmatprep.mubr.msk.bf16.mxu0 %vm316_vm0, %v17006_v4  ;;  %v4460_v4 = vshll.u32 %v17025_v49, 16  ;;  %v17027_v10 = vld [vmem:[%s17244_s6 + $0x34] sm:$0xff]  }
 0x221   : > { %15283 = vmatprep.subr.bf16.mxu1 %v17012_v8  ;;  %v4436_v17 = vor.u32 %v4435_v16, %v4432_v61  ;;  %v17019_v61 = vld [vmem:[%s17244_s6 + $0x9c] sm:$0x3f]  }
 0x222   : > { %v17029_v16 = vld [vmem:[%s17244_s6 + $0x3c] sm:$0xff]   ;;  %v4462_v51 = vrot.slane %v4460_v4, 3 }
 0x223   : > { %15284 = vmatpush3.bf16.msra.mxu1 %v17012_v8  ;;  %v4428_v8 = vsel %vm4366_vm7, %v4418_v19, %v4427_v42  ;;  %v4437_v21 = vsel %vm4366_vm7, %v4427_v42, %v4436_v17  ;;  %v4445_v19 = vor.u32 %v4444_v44, %v4441_v5  ;;  %v11138_v42 = vshrl.u32 %v17027_v10, 16 }
 0x224   : > { %15285 = vmatprep.subr.bf16.mxu1 %v17026_v15 }
 0x225   : > { %v4446_v18 = vsel %vm4366_vm7, %v4436_v17, %v4445_v19  ;;  %v17031_v17 = vld [vmem:[%s17244_s6 + $0x44] sm:$0xff]  }
 0x226   : > { %15254 = vmatmul.mubr.msk.bf16.gmra.mrb[4].mxu1 %vm316_vm0, %v4410_v62  ;;  %v11130_v62 = vshrl.u32 %v18506_v2, 16 }
 0x227   : > { %15750 = vmatmul.mubr.msk.bf16.gmra.mrb[20].mxu0 %vm316_vm0, %v17008_v27  ;;  %15257 = vmatprep.mubr.msk.bf16.mxu1 %vm316_vm0, %v4419_v38  ;;  %v11124_v27 = vor.u32 %v11123_v23, %v11119_v58  ;;  %v17032_v38 = vld [vmem:[%s17244_s6 + $0x70] sm:$0xff]   ;;  %v17037_v23 = vld [vmem:[%s17244_s6 + $0x80] sm:$0xff]  }
 0x228   : > { %15753 = vmatprep.mubr.msk.bf16.mxu0 %vm316_vm0, %v17010_v7  ;;  %15286 = vmatpush3.bf16.msra.mxu1 %v17026_v15  ;;  %v4454_v15 = vor.u32 %v4453_v63, %v4450_v24  ;;  %v17030_v7 = vld [vmem:[%s17244_s6 + $0x68] sm:$0xff]   ;;  %v4484_v2 = vshrl.u32 %v17032_v38, 16  ;;  %v11132_v4 = vor.u32 %v11130_v62, %v11128_v57  ;;  %v11154_v63 = vshrl.u32 %v17031_v17, 16 }
 0x229   : > { %v15119_v34 = vpop.f32.mrb[44].mxu1  ;;  %15287 = vmatprep.subr.bf16.mxu1 %v17035_v41  ;;  %v11129_v5 = vsel %vm678_vm3, %v11124_v27, %v11128_v57  ;;  %v4478_v44 = vshll.u32 %v17030_v7, 16  ;;  %v18564_v58 = vld [vmem:[%s17244_s6 + $0x4c] sm:$0xff]   ;;  %v4493_v27 = vshrl.u32 %v17034_v29, 16 }
 0x22a   : > { %v18533_v53 = vadd.f32 %v15119_v34, %v18390_v52  ;;  %v2579_v56 = vpop.f32.mrb[45].mxu1  ;;  %v4455_v40 = vsel %vm4366_vm7, %v4445_v19, %v4454_v15  ;;  %v11142_v34 = vshll.u32 %v17029_v16, 16  ;;  %v11158_v19 = vshll.u32 %v18564_v58, 16 }
 0x22b   : > { %v18538_v59 = vadd.f32 %v2579_v56, %v18394_v45  ;;  %v15120_v60 = vpop.f32.mrb[46].mxu1  ;;  %v4466_v45 = vshrl.u32 %v17028_v48, 16  ;;  %v4463_v48 = vor.u32 %v4462_v51, %v4459_v37  ;;  %v4480_v24 = vrot.slane %v4478_v44, 3  ;;  %v17061_v44 = vld [vmem:[%s19416_s1 + $0x2d0] sm:$0xff]  }
 0x22c   : > { %v2657_v43 = vadd.f32 %v15120_v60, %v2625_v47  ;;  %v2582_v52 = vpop.f32.mrb[47].mxu1  ;;  %15288 = vmatpush3.bf16.msra.mxu1 %v17035_v41  ;;  %v4471_v41 = vrot.slane %v4469_v30, 3  ;;  %v4502_v37 = vshrl.u32 %v17037_v23, 16  ;;  %v4505_v51 = vshll.u32 %v17037_v23, 16  ;;  %v17043_v23 = vld [vmem:[%s17244_s6 + $0x6c] sm:$0xff]  }
 0x22d   : > { %v18544_v14 = vadd.f32 %v2582_v52, %v18401_v12  ;;  %15321 = vmatprep.subr.bf16.mxu1 %v18530_v50  ;;  %v11134_v12 = vshll.u32 %v17027_v10, 16  ;;  %v4468_v49 = vrot.slane %v4466_v45, 2  ;;  %v4464_v10 = vsel %vm4366_vm7, %v4454_v15, %v4463_v48  ;;  %v17057_v15 = vld [vmem:[%s19416_s1 + $0x2c8] sm:$0xff]  }
 0x22e   : > { %2689 = vst [vmem:[#allocation2 + $0xf8] sm:$0xf] %v2657_v43  ;;  %15258 = vmatmul.mubr.msk.bf16.gmra.mrb[8].mxu1 %vm316_vm0, %v4428_v8  ;;  %v11144_v8 = vrot.slane %v11142_v34, 1  ;;  %v11146_v43 = vshrl.u32 %v17029_v16, 16  ;;  %v11150_v52 = vshll.u32 %v17031_v17, 16  ;;  %v4486_v45 = vrot.slane %v4484_v2, 2 }
 0x22f   : > { %15754 = vmatmul.mubr.msk.bf16.gmra.mrb[24].mxu0 %vm316_vm0, %v17013_v1  ;;  %15261 = vmatprep.mubr.msk.bf16.mxu1 %vm316_vm0, %v4437_v21  ;;  %v4475_v1 = vshrl.u32 %v17030_v7, 16  ;;  %v11136_v56 = vrot.slane %v11134_v12, 1  ;;  %v4472_v47 = vor.u32 %v4471_v41, %v4468_v49  ;;  %v4496_v7 = vshll.u32 %v17034_v29, 16  ;;  %v17036_v16 = vld [vmem:[%s17244_s6 + $0x54] sm:$0xff]  }
 0x230   : > { %15757 = vmatprep.mubr.msk.bf16.mxu0 %vm316_vm0, %v17017_v54  ;;  %v4487_v54 = vshll.u32 %v17032_v38, 16  ;;  %v11152_v62 = vrot.slane %v11150_v52, 1  ;;  %v11148_v38 = vor.u32 %v11146_v43, %v11144_v8  ;;  %v4495_v49 = vrot.slane %v4493_v27, 2 }
 0x231   : > { %v11140_v60 = vor.u32 %v11138_v42, %v11136_v56  ;;  %v4477_v21 = vrot.slane %v4475_v1, 2  ;;  %v11137_v57 = vsel %vm678_vm3, %v11132_v4, %v11136_v56  ;;  %v4498_v42 = vrot.slane %v4496_v7, 3  ;;  %v17038_v1 = vld [vmem:[%s17244_s6 + $0x5c] sm:$0xff]  }
 0x232   : > { %v4489_v30 = vrot.slane %v4487_v54, 3  ;;  %v11156_v41 = vor.u32 %v11154_v63, %v11152_v62  ;;  %v11162_v34 = vshrl.u32 %v18564_v58, 16  ;;  %v4504_v56 = vrot.slane %v4502_v37, 2  ;;  %v17042_v37 = vld [vmem:[%s17244_s6 + $0x10] sm:$0xff]  }
 0x233   : > { %v11145_v12 = vsel %vm678_vm3, %v11140_v60, %v11144_v8  ;;  %v4507_v17 = vrot.slane %v4505_v51, 3  ;;  %v11170_v2 = vshrl.u32 %v17036_v16, 16  ;;  %v11174_v4 = vshll.u32 %v17038_v1, 16  ;;  %v17062_v60 = vld [vmem:[%s19416_s1 + $0x2d8] sm:$0xff]  }
 0x235   : > { %v4508_v43 = vor.u32 %v4507_v17, %v4504_v56  ;;  %v11176_v63 = vrot.slane %v11174_v4, 1  ;;  %v17048_v56 = vld [vmem:[%s17244_s6 + $0x7c] sm:$0xff]  }
 0x236   : > { %15262 = vmatmul.mubr.msk.bf16.gmra.mrb[12].mxu1 %vm316_vm0, %v4446_v18  ;;  %v4481_v18 = vor.u32 %v4480_v24, %v4477_v21  ;;  %v17039_v21 = vld [vmem:[%s17244_s6 + $0x88] ss:$0 sps:$4 sm:$0x11]  }
 0x237   : > { %15758 = vmatmul.mubr.msk.bf16.gmra.mrb[56].mxu0 %vm316_vm0, %v17019_v61  ;;  %15265 = vmatprep.mubr.msk.bf16.mxu1 %vm316_vm0, %v4455_v40  ;;  %v4473_v61 = vsel %vm4366_vm7, %v4463_v48, %v4472_v47  ;;  %v4490_v40 = vor.u32 %v4489_v30, %v4486_v45  ;;  %v11166_v48 = vshll.u32 %v17036_v16, 16  ;;  %v17040_v24 = vld [vmem:[%s17244_s6 + $0x64] sm:$0xff]   ;;  %v4511_v27 = vshll.u32 %v17039_v21, 16 }
 0x238   : > { %15769 = vmatprep.mubr.msk.bf16.mxu0 %vm316_vm0, %v11129_v5  ;;  %v11160_v5 = vrot.slane %v11158_v19, 1  ;;  %v4482_v54 = vsel %vm4366_vm7, %v4472_v47, %v4481_v18  ;;  %v4499_v47 = vor.u32 %v4498_v42, %v4495_v49  ;;  %v18605_v45 = vld [vmem:[%s19416_s1 + $0x2e0] sm:$0xff]   ;;  %v17041_v16 = vld [vmem:[%s17244_s6 + $0x8] sm:$0xf8]  }
 0x239   : > { %v4491_v29 = vsel %vm4366_vm7, %v4481_v18, %v4490_v40  ;;  %v11168_v8 = vrot.slane %v11166_v48, 1 }
 0x23a   : > { %v11161_v58 = vsel %vm678_vm3, %v11156_v41, %v11160_v5  ;;  %v4500_v19 = vsel %vm4366_vm7, %v4490_v40, %v4499_v47  ;;  %v4509_v7 = vsel %vm4366_vm7, %v4499_v47, %v4508_v43  ;;  %v17046_v41 = vld [vmem:[%s17244_s6 + $0x74] sm:$0xff]   ;;  %v11206_v47 = vshll.u32 %v17048_v56, 16 }
 0x23b   : > { %v11172_v52 = vor.u32 %v11170_v2, %v11168_v8  ;;  %v17044_v2 = vld [vmem:[%s17244_s6 + $0x18] sm:$0xff]  }
 0x23c   : > { %v4972_v21 = vrot.slane %v17044_v2, 3  ;;  %v17053_v2 = vld [vmem:[%s17244_s6 + $0x38] sm:$0xff]  }
 0x23d   : > { %v11177_v18 = vsel %vm678_vm3, %v11172_v52, %v11176_v63 }
 0x23e   : > { %15266 = vmatmul.mubr.msk.bf16.gmra.mrb[16].mxu1 %vm316_vm0, %v4464_v10  ;;  %v11164_v10 = vor.u32 %v11162_v34, %v11160_v5  ;;  %v4513_v5 = vrot.slane %v4511_v27, 3  ;;  %v4969_v34 = vrot.slane %v17041_v16, 3  ;;  %v17051_v16 = vld [vmem:[%s17244_s6 + $0x30] sm:$0xff]  }
 0x23f   : > { %15770 = vmatmul.mubr.msk.bf16.vlgmr.msra.gmra.mrb[0].mxu0 %vm316_vm0, %v11137_v57  ;;  %15269 = vmatprep.mubr.msk.bf16.mxu1 %vm316_vm0, %v4473_v61  ;;  %v11182_v57 = vshll.u32 %v17040_v24, 16 }
 0x240   : > { %15773 = vmatprep.mubr.msk.bf16.mxu0 %vm316_vm0, %v11145_v12  ;;  %15802 = vmatpush3.bf16.msra.mxu0 %v18459_v28  ;;  %v11153_v28 = vsel %vm678_vm3, %v11148_v38, %v11152_v62  ;;  %v11169_v12 = vsel %vm678_vm3, %v11164_v10, %v11168_v8  ;;  %v11186_v62 = vshrl.u32 %v17040_v24, 16  ;;  %v11190_v38 = vshll.u32 %v17043_v23, 16  ;;  %v17050_v10 = vld [vmem:[%s17244_s6 + $0x84] sm:$0xff]  }
 0x241   : > { %15803 = vmatprep.subr.bf16.mxu0 %v17057_v15  ;;  %v11184_v49 = vrot.slane %v11182_v57, 1  ;;  %v4514_v17 = vsel %vm4366_vm7, %v4508_v43, %v4513_v5  ;;  %v11202_v8 = vshrl.u32 %v17046_v41, 16  ;;  %v17049_v57 = vld [vmem:[%s17244_s6 + $0x28] sm:$0xff]  }
 0x242   : > { %v11192_v48 = vrot.slane %v11190_v38, 1  ;;  %v17054_v5 = vld [vmem:[%s19416_s1 + $0x148] sm:$0xff]  }
 0x244   : > { %15804 = vmatpush3.bf16.msra.mxu0 %v17057_v15  ;;  %v11178_v15 = vshrl.u32 %v17038_v1, 16  ;;  %v4970_v1 = vrot.slane %v17042_v37, 3 }
 0x245   : > { %15805 = vmatprep.subr.bf16.mxu0 %v17061_v44 }
 0x246   : > { %15270 = vmatmul.mubr.msk.bf16.gmra.mrb[20].mxu1 %vm316_vm0, %v4482_v54  ;;  %v11180_v42 = vor.u32 %v11178_v15, %v11176_v63  ;;  %v11198_v54 = vshll.u32 %v17046_v41, 16  ;;  %v4973_v27 = vsel %vm4968_vm1, %v4970_v1, %v4972_v21  ;;  %v11210_v15 = vshrl.u32 %v17048_v56, 16 }
 0x247   : > { %15774 = vmatmul.mubr.msk.bf16.gmra.mrb[4].mxu0 %vm316_vm0, %v11153_v28  ;;  %15273 = vmatprep.mubr.msk.bf16.mxu1 %vm316_vm0, %v4491_v29  ;;  %v4971_v29 = vsel %vm4968_vm1, %v4969_v34, %v4970_v1  ;;  %v4978_v1 = vrot.slane %v17051_v16, 3 }
 0x248   : > { %15777 = vmatprep.mubr.msk.bf16.mxu0 %vm316_vm0, %v11161_v58  ;;  %15806 = vmatpush3.bf16.msra.mxu0 %v17061_v44  ;;  %v11188_v44 = vor.u32 %v11186_v62, %v11184_v49  ;;  %v11185_v28 = vsel %vm678_vm3, %v11180_v42, %v11184_v49  ;;  %v11194_v58 = vshrl.u32 %v17043_v23, 16  ;;  %v11200_v24 = vrot.slane %v11198_v54, 1  ;;  %v17055_v42 = vld [vmem:[%s17244_s6 + $0x94] sm:$0xff]  }
 0x249   : > { %15807 = vmatprep.subr.bf16.mxu0 %v17062_v60  ;;  %v11208_v23 = vrot.slane %v11206_v47, 1  ;;  %v11218_v62 = vshrl.u32 %v17050_v10, 16  ;;  %v4976_v49 = vrot.slane %v17049_v57, 3  ;;  %v11230_v54 = vshll.u32 %v17055_v42, 16 }
 0x24a   : > { %v18607_v30 = vpop.f32.mrb[44].mxu0  ;;  %v11193_v4 = vsel %vm678_vm3, %v11188_v44, %v11192_v48  ;;  %v11196_v43 = vor.u32 %v11194_v58, %v11192_v48  ;;  %v11204_v63 = vor.u32 %v11202_v8, %v11200_v24  ;;  %v17067_v44 = vld [vmem:[%s19416_s1 + $0x150] sm:$0xff]   ;;  %v11234_v8 = vshrl.u32 %v17055_v42, 16 }
 0x24b   : > { %v18610_v61 = vpop.f32.mrb[45].mxu0  ;;  %v11212_v34 = vor.u32 %v11210_v15, %v11208_v23 }
 0x24c   : > { %15808 = vmatpush3.bf16.msra.mxu0 %v17062_v60  ;;  %v18616_v51 = vpop.f32.mrb[46].mxu0  ;;  %v17047_v60 = vld [vmem:[%s17244_s6 + $0x20] sm:$0xff]  }
 0x24d   : > { %19425 = vst [vmem:[#allocation6_spill] sm:$0xff] %v18616_v51  ;;  %15841 = vmatprep.subr.bf16.mxu0 %v18605_v45  ;;  %v18620_v40 = vpop.f32.mrb[47].mxu0  ;;  %v4974_v52 = vrot.slane %v17047_v60, 3 }
 0x24e   : > { %15274 = vmatmul.mubr.msk.bf16.gmra.mrb[24].mxu1 %vm316_vm0, %v4500_v19  ;;  %v17052_v19 = vld [vmem:[%s17244_s6 + $0x8c] sm:$0xff]  }
 0x24f   : > { %15778 = vmatmul.mubr.msk.bf16.gmra.mrb[8].mxu0 %vm316_vm0, %v11169_v12  ;;  %15277 = vmatprep.mubr.msk.bf16.mxu1 %vm316_vm0, %v4509_v7  ;;  %v11214_v12 = vshll.u32 %v17050_v10, 16  ;;  %v11201_v7 = vsel %vm678_vm3, %v11196_v43, %v11200_v24  ;;  %v4975_v37 = vsel %vm4968_vm1, %v4972_v21, %v4974_v52  ;;  %v11222_v38 = vshll.u32 %v17052_v19, 16  ;;  %v17076_v21 = vld [vmem:[%s19416_s1 + $0x158] sm:$0xff]  }
 0x250   : > { %15781 = vmatprep.mubr.msk.bf16.mxu0 %vm316_vm0, %v11177_v18  ;;  %v11209_v18 = vsel %vm678_vm3, %v11204_v63, %v11208_v23  ;;  %v11226_v58 = vshrl.u32 %v17052_v19, 16  ;;  %v4980_v24 = vrot.slane %v17053_v2, 3  ;;  %v11232_v10 = vrot.slane %v11230_v54, 1  ;;  %v17066_v54 = vld [vmem:[%s17244_s6 + $0x58] sm:$0xff]  }
 0x251   : > { %v11216_v41 = vrot.slane %v11214_v12, 1  ;;  %v11224_v56 = vrot.slane %v11222_v38, 1 }
 0x252   : > { %v11236_v23 = vor.u32 %v11234_v8, %v11232_v10 }
 0x253   : > { %v11220_v48 = vor.u32 %v11218_v62, %v11216_v41  ;;  %v11228_v43 = vor.u32 %v11226_v58, %v11224_v56  ;;  %v17069_v58 = vld [vmem:[%s17244_s6 + $0x60] sm:$0xff]  }
 0x255   : > { %v11225_v60 = vsel %vm678_vm3, %v11220_v48, %v11224_v56 }
 0x256   : > { %15278 = vmatmul.mubr.msk.bf16.gmra.mrb[60].mxu1 %vm316_vm0, %v4514_v17  ;;  %v17059_v17 = vld [vmem:[%s17244_s6 + $0x9c] sm:$0x7f]  }
 0x257   : > { %15782 = vmatmul.mubr.msk.bf16.gmra.mrb[12].mxu0 %vm316_vm0, %v11185_v28  ;;  %15289 = vmatprep.mubr.msk.bf16.mxu1 %vm316_vm0, %v4971_v29  ;;  %v11217_v28 = vsel %vm678_vm3, %v11212_v34, %v11216_v41  ;;  %v4979_v29 = vsel %vm4968_vm1, %v4976_v49, %v4978_v1  ;;  %v11238_v47 = vshll.u32 %v17059_v17, 16  ;;  %v17063_v41 = vld [vmem:[%s17244_s6 + $0x50] sm:$0xff]  }
 0x258   : > { %15785 = vmatprep.mubr.msk.bf16.mxu0 %vm316_vm0, %v11193_v4  ;;  %v17058_v4 = vld [vmem:[%s17244_s6 + $0x40] sm:$0xff]   ;;  %v17065_v34 = vld [vmem:[%s17244_s6 + $0x2c] sm:$0xff]  }
 0x259   : > { %v11240_v19 = vrot.slane %v11238_v47, 1  ;;  %v11695_v56 = vrot.slane %v17065_v34, 1  ;;  %v4990_v47 = vrot.slane %v17069_v58, 3  ;;  %v17078_v34 = vld [vmem:[%s17244_s6 + $0x80] sm:$0xff]  }
 0x25b   : > { %v11241_v42 = vsel %vm678_vm3, %v11236_v23, %v11240_v19  ;;  %v17073_v23 = vld [vmem:[%s17244_s6 + $0x70] sm:$0xff]  }
 0x25e   : > { %15290 = vmatmul.mubr.msk.bf16.vlgmr.msra.gmra.mrb[0].mxu1 %vm316_vm0, %v4973_v27  ;;  %v18675_v27 = vld [vmem:[%s19416_s1 + $0x160] sm:$0xff]  }
 0x25f   : > { %15786 = vmatmul.mubr.msk.bf16.gmra.mrb[16].mxu0 %vm316_vm0, %v11201_v7  ;;  %15322 = vmatpush3.bf16.msra.mxu1 %v18530_v50  ;;  %v4977_v50 = vsel %vm4968_vm1, %v4974_v52, %v4976_v49  ;;  %v4982_v52 = vrot.slane %v17058_v4, 3  ;;  %v3105_v7 = vld [vmem:[#allocation2 + $0xf8] sm:$0xf] }
 0x260   : > { %15293 = vmatprep.mubr.msk.bf16.mxu1 %vm316_vm0, %v4975_v37  ;;  %15789 = vmatprep.mubr.msk.bf16.mxu0 %vm316_vm0, %v11209_v18  ;;  %v4981_v37 = vsel %vm4968_vm1, %v4978_v1, %v4980_v24  ;;  %v17060_v18 = vld [vmem:[%s17244_s6 + $0x48] sm:$0xff]  }
 0x261   : > { %15323 = vmatprep.subr.bf16.mxu1 %v17054_v5  ;;  %v4983_v49 = vsel %vm4968_vm1, %v4980_v24, %v4982_v52  ;;  %v4984_v1 = vrot.slane %v17060_v18, 3  ;;  %v4994_v18 = vrot.slane %v17073_v23, 3 }
 0x263   : > { %15324 = vmatpush3.bf16.msra.mxu1 %v17054_v5  ;;  %v11233_v5 = vsel %vm678_vm3, %v11228_v43, %v11232_v10  ;;  %v17071_v10 = vld [vmem:[%s17244_s6 + $0x68] sm:$0xff]  }
 0x264   : > { %15325 = vmatprep.subr.bf16.mxu1 %v17067_v44 }
 0x266   : > { %15294 = vmatmul.mubr.msk.bf16.gmra.mrb[4].mxu1 %vm316_vm0, %v4977_v50  ;;  %v4985_v50 = vsel %vm4968_vm1, %v4982_v52, %v4984_v1 }
 0x267   : > { %15790 = vmatmul.mubr.msk.bf16.gmra.mrb[20].mxu0 %vm316_vm0, %v11217_v28  ;;  %15297 = vmatprep.mubr.msk.bf16.mxu1 %vm316_vm0, %v4979_v29  ;;  %v17068_v29 = vld [vmem:[%s17244_s6 + $0x34] sm:$0xff]  }
 0x268   : > { %15793 = vmatprep.mubr.msk.bf16.mxu0 %vm316_vm0, %v11225_v60  ;;  %15326 = vmatpush3.bf16.msra.mxu1 %v17067_v44  ;;  %v4986_v44 = vrot.slane %v17063_v41, 3  ;;  %v17070_v60 = vld [vmem:[%s17244_s6 + $0x3c] sm:$0xff]   ;;  %v11697_v8 = vrot.slane %v17068_v29, 1  ;;  %v17080_v29 = vld [vmem:[%s17244_s6 + $0x88] ss:$0 sps:$4 sm:$0x11]  }
 0x269   : > { %v15159_v63 = vpop.f32.mrb[48].mxu1  ;;  %15327 = vmatprep.subr.bf16.mxu1 %v17076_v21 }
 0x26a   : > { %v18678_v57 = vadd.f32 %v15159_v63, %v18533_v53  ;;  %v3059_v12 = vpop.f32.mrb[49].mxu1  ;;  %v4987_v28 = vsel %vm4968_vm1, %v4984_v1, %v4986_v44  ;;  %v11698_v43 = vsel %vm1255_vm4, %v11695_v56, %v11697_v8  ;;  %v17072_v63 = vld [vmem:[%s17244_s6 + $0x44] sm:$0xff]  }
 0x26b   : > { %v18681_v15 = vadd.f32 %v3059_v12, %v18538_v59  ;;  %v15160_v16 = vpop.f32.mrb[50].mxu1  ;;  %v17064_v59 = vld [vmem:[%s17244_s6 + $0x24] sm:$0xfe]   ;;  %v17074_v12 = vld [vmem:[%s17244_s6 + $0x4c] sm:$0xff]  }
 0x26c   : > { %v3137_v62 = vadd.f32 %v15160_v16, %v3105_v7  ;;  %v3062_v38 = vpop.f32.mrb[51].mxu1  ;;  %15328 = vmatpush3.bf16.msra.mxu1 %v17076_v21  ;;  %v11694_v48 = vrot.slane %v17064_v59, 1  ;;  %v11699_v21 = vrot.slane %v17070_v60, 1  ;;  %v17098_v7 = vld [vmem:[%s19416_s1 + $0x2e8] sm:$0xff]   ;;  %v4992_v16 = vrot.slane %v17071_v10, 3  ;;  %v17077_v59 = vld [vmem:[%s17244_s6 + $0x54] sm:$0xff]  }
 0x26d   : > { %v18689_v53 = vadd.f32 %v3062_v38, %v18544_v14  ;;  %15361 = vmatprep.subr.bf16.mxu1 %v18675_v27  ;;  %v11242_v14 = vshrl.u32 %v17059_v17, 16  ;;  %v4988_v17 = vrot.slane %v17066_v54, 3  ;;  %v17102_v38 = vld [vmem:[%s19416_s1 + $0x2f0] sm:$0xff]  }
 0x26e   : > { %3169 = vst [vmem:[#allocation2 + $0xf8] sm:$0xf] %v3137_v62  ;;  %15298 = vmatmul.mubr.msk.bf16.gmra.mrb[8].mxu1 %vm316_vm0, %v4981_v37  ;;  %v11696_v4 = vsel %vm1255_vm4, %v11694_v48, %v11695_v56  ;;  %v11701_v37 = vrot.slane %v17072_v63, 1  ;;  %v11703_v62 = vrot.slane %v17074_v12, 1  ;;  %v11705_v48 = vrot.slane %v17077_v59, 1  ;;  %v17084_v10 = vld [vmem:[%s17244_s6 + $0x6c] sm:$0xff]  }
 0x26f   : > { %15794 = vmatmul.mubr.msk.bf16.gmra.mrb[24].mxu0 %vm316_vm0, %v11233_v5  ;;  %15301 = vmatprep.mubr.msk.bf16.mxu1 %vm316_vm0, %v4983_v49  ;;  %v11244_v2 = vor.u32 %v11242_v14, %v11240_v19  ;;  %v4989_v24 = vsel %vm4968_vm1, %v4986_v44, %v4988_v17  ;;  %v4991_v52 = vsel %vm4968_vm1, %v4988_v17, %v4990_v47  ;;  %v17075_v49 = vld [vmem:[%s17244_s6 + $0x78] sm:$0xff]   ;;  %v4998_v56 = vrot.slane %v17078_v34, 3  ;;  %v17081_v17 = vld [vmem:[%s17244_s6 + $0x64] sm:$0xff]  }
 0x270   : > { %15797 = vmatprep.mubr.msk.bf16.mxu0 %vm316_vm0, %v11241_v42  ;;  %v11700_v19 = vsel %vm1255_vm4, %v11697_v8, %v11699_v21  ;;  %v4993_v5 = vsel %vm4968_vm1, %v4990_v47, %v4992_v16  ;;  %v11702_v41 = vsel %vm1255_vm4, %v11699_v21, %v11701_v37  ;;  %v4995_v42 = vsel %vm4968_vm1, %v4992_v16, %v4994_v18  ;;  %v17079_v14 = vld [vmem:[%s17244_s6 + $0x5c] sm:$0xff]   ;;  %v17082_v8 = vld [vmem:[%s17244_s6 + $0x10] sm:$0xfc]  }
 0x271   : > { %v11704_v1 = vsel %vm1255_vm4, %v11701_v37, %v11703_v62  ;;  %v4996_v44 = vrot.slane %v17075_v49, 3  ;;  %v17083_v47 = vld [vmem:[%s17244_s6 + $0x18] sm:$0xff]   ;;  %v11709_v63 = vrot.slane %v17081_v17, 1  ;;  %v5451_v23 = vrot.slane %v17082_v8, 2  ;;  %v17085_v16 = vld [vmem:[%s17244_s6 + $0x20] sm:$0xff]   ;;  %v17108_v8 = vld [vmem:[%s19416_s1 + $0x170] sm:$0xff]  }
 0x272   : > { %v11711_v12 = vrot.slane %v17084_v10, 1  ;;  %v17089_v49 = vld [vmem:[%s17244_s6 + $0x7c] sm:$0xff]  }
 0x273   : > { %v4999_v60 = vsel %vm4968_vm1, %v4996_v44, %v4998_v56  ;;  %v11715_v34 = vrot.slane %v17089_v49, 1  ;;  %v17094_v10 = vld [vmem:[%s17244_s6 + $0x40] sm:$0xff]  }
 0x276   : > { %15302 = vmatmul.mubr.msk.bf16.gmra.mrb[12].mxu1 %vm316_vm0, %v4985_v50  ;;  %v11707_v50 = vrot.slane %v17079_v14, 1  ;;  %v17090_v14 = vld [vmem:[%s17244_s6 + $0x30] sm:$0xff]  }
 0x277   : > { %15798 = vmatmul.mubr.msk.bf16.gmra.mrb[60].mxu0 %vm316_vm0, %v11244_v2  ;;  %15305 = vmatprep.mubr.msk.bf16.mxu1 %vm316_vm0, %v4987_v28  ;;  %v18747_v2 = vld [vmem:[%s19416_s1 + $0x300] sm:$0xff]   ;;  %v4997_v28 = vsel %vm4968_vm1, %v4994_v18, %v4996_v44 }
 0x278   : > { %15809 = vmatprep.mubr.msk.bf16.mxu0 %vm316_vm0, %v11696_v4  ;;  %v11706_v4 = vsel %vm1255_vm4, %v11703_v62, %v11705_v48  ;;  %v11710_v37 = vsel %vm1255_vm4, %v11707_v50, %v11709_v63  ;;  %v17087_v62 = vld [vmem:[%s17244_s6 + $0x74] sm:$0xff]   ;;  %v17091_v44 = vld [vmem:[%s17244_s6 + $0x84] sm:$0xff]  }
 0x27e   : > { %15306 = vmatmul.mubr.msk.bf16.gmra.mrb[16].mxu1 %vm316_vm0, %v4989_v24  ;;  %v11708_v24 = vsel %vm1255_vm4, %v11705_v48, %v11707_v50  ;;  %v17092_v48 = vld [vmem:[%s17244_s6 + $0x38] sm:$0xff]  }
 0x27f   : > { %15810 = vmatmul.mubr.msk.bf16.vlgmr.msra.gmra.mrb[0].mxu0 %vm316_vm0, %v11698_v43  ;;  %15309 = vmatprep.mubr.msk.bf16.mxu1 %vm316_vm0, %v4991_v52  ;;  %v5000_v52 = vrot.slane %v17080_v29, 3  ;;  %v17095_v29 = vld [vmem:[%s19416_s1 + $0x168] sm:$0xff]   ;;  %v5460_v17 = vrot.slane %v17092_v48, 2 }
 0x280   : > { %15813 = vmatprep.mubr.msk.bf16.mxu0 %vm316_vm0, %v11700_v19  ;;  %15842 = vmatpush3.bf16.msra.mxu0 %v18605_v45  ;;  %v17103_v45 = vld [vmem:[%s19416_s1 + $0x2f8] sm:$0xff]   ;;  %v5452_v19 = vrot.slane %v17083_v47, 2 }
 0x281   : > { %15843 = vmatprep.subr.bf16.mxu0 %v17098_v7 }
 0x282   : > { %v5453_v18 = vsel %vm2329_vm6, %v5451_v23, %v5452_v19  ;;  %v17099_v23 = vld [vmem:[%s17244_s6 + $0x48] sm:$0xff]  }
 0x284   : > { %15844 = vmatpush3.bf16.msra.mxu0 %v17098_v7  ;;  %v5001_v7 = vsel %vm4968_vm1, %v4998_v56, %v5000_v52 }
 0x285   : > { %15845 = vmatprep.subr.bf16.mxu0 %v17102_v38 }
 0x286   : > { %15310 = vmatmul.mubr.msk.bf16.gmra.mrb[20].mxu1 %vm316_vm0, %v4993_v5  ;;  %v17088_v5 = vld [vmem:[%s17244_s6 + $0x28] sm:$0xff]  }
 0x287   : > { %15814 = vmatmul.mubr.msk.bf16.gmra.mrb[4].mxu0 %vm316_vm0, %v11702_v41  ;;  %15313 = vmatprep.mubr.msk.bf16.mxu1 %vm316_vm0, %v4995_v42  ;;  %v5454_v41 = vrot.slane %v17085_v16, 2  ;;  %v11713_v42 = vrot.slane %v17087_v62, 1  ;;  %v5456_v59 = vrot.slane %v17088_v5, 2  ;;  %v17106_v16 = vld [vmem:[%s17244_s6 + $0x2c] sm:$0xff]  }
 0x288   : > { %15817 = vmatprep.mubr.msk.bf16.mxu0 %vm316_vm0, %v11704_v1  ;;  %15846 = vmatpush3.bf16.msra.mxu0 %v17102_v38  ;;  %v11712_v38 = vsel %vm1255_vm4, %v11709_v63, %v11711_v12 }
 0x289   : > { %15847 = vmatprep.subr.bf16.mxu0 %v17103_v45  ;;  %v5455_v1 = vsel %vm2329_vm6, %v5452_v19, %v5454_v41  ;;  %v5457_v56 = vsel %vm2329_vm6, %v5454_v41, %v5456_v59  ;;  %v11716_v50 = vsel %vm1255_vm4, %v11713_v42, %v11715_v34  ;;  %v18809_v19 = vld [vmem:[%s17244_s6 + $0x9c] sm:$0x7f]  }
 0x28a   : > { %v18749_v54 = vpop.f32.mrb[48].mxu0  ;;  %v11723_v5 = vrot.slane %v18809_v19, 1 }
 0x28b   : > { %v18753_v58 = vpop.f32.mrb[49].mxu0 }
 0x28c   : > { %15848 = vmatpush3.bf16.msra.mxu0 %v17103_v45  ;;  %v18760_v21 = vpop.f32.mrb[50].mxu0  ;;  %v11714_v45 = vsel %vm1255_vm4, %v11711_v12, %v11713_v42  ;;  %v17105_v12 = vld [vmem:[%s17244_s6 + $0x24] sm:$0xfe]  }
 0x28d   : > { %19426 = vst [vmem:[#allocation7_spill] sm:$0xff] %v18760_v21  ;;  %15881 = vmatprep.subr.bf16.mxu0 %v18747_v2  ;;  %v18765_v43 = vpop.f32.mrb[51].mxu0  ;;  %v12175_v49 = vshrl.u32 %v17105_v12, 16  ;;  %v12178_v42 = vshll.u32 %v17105_v12, 16 }
 0x28e   : > { %15314 = vmatmul.mubr.msk.bf16.gmra.mrb[24].mxu1 %vm316_vm0, %v4997_v28  ;;  %v17093_v28 = vld [vmem:[%s17244_s6 + $0x8c] sm:$0xff]  }
 0x28f   : > { %15818 = vmatmul.mubr.msk.bf16.gmra.mrb[8].mxu0 %vm316_vm0, %v11706_v4  ;;  %15317 = vmatprep.mubr.msk.bf16.mxu1 %vm316_vm0, %v4999_v60  ;;  %v5458_v4 = vrot.slane %v17090_v14, 2  ;;  %v11717_v60 = vrot.slane %v17091_v44, 1  ;;  %v11719_v47 = vrot.slane %v17093_v28, 1  ;;  %v17101_v28 = vld [vmem:[%s17244_s6 + $0x50] sm:$0xff]  }
 0x290   : > { %15821 = vmatprep.mubr.msk.bf16.mxu0 %vm316_vm0, %v11708_v24 }
 0x291   : > { %v5459_v24 = vsel %vm2329_vm6, %v5456_v59, %v5458_v4  ;;  %v11718_v52 = vsel %vm1255_vm4, %v11715_v34, %v11717_v60  ;;  %v5461_v63 = vsel %vm2329_vm6, %v5458_v4, %v5460_v17  ;;  %v12183_v59 = vshrl.u32 %v17106_v16, 16 }
 0x292   : > { %v12186_v34 = vshll.u32 %v17106_v16, 16 }
 0x296   : > { %15318 = vmatmul.mubr.msk.bf16.gmra.mrb[64].mxu1 %vm316_vm0, %v5001_v7  ;;  %v11720_v7 = vsel %vm1255_vm4, %v11717_v60, %v11719_v47 }
 0x297   : > { %15822 = vmatmul.mubr.msk.bf16.gmra.mrb[12].mxu0 %vm316_vm0, %v11710_v37  ;;  %15329 = vmatprep.mubr.msk.bf16.mxu1 %vm316_vm0, %v5453_v18  ;;  %v17117_v37 = vld [vmem:[%s19416_s1 + $0x178] sm:$0xff]   ;;  %v5462_v18 = vrot.slane %v17094_v10, 2 }
 0x298   : > { %15825 = vmatprep.mubr.msk.bf16.mxu0 %vm316_vm0, %v11712_v38  ;;  %v5464_v38 = vrot.slane %v17099_v23, 2  ;;  %v17109_v10 = vld [vmem:[%s17244_s6 + $0x34] sm:$0xff]  }
 0x299   : > { %v12192_v19 = vshrl.u32 %v17109_v10, 16  ;;  %v12195_v12 = vshll.u32 %v17109_v10, 16  ;;  %v17118_v10 = vld [vmem:[%s17244_s6 + $0x54] sm:$0xff]  }
 0x29a   : > { %v5465_v60 = vsel %vm2329_vm6, %v5462_v18, %v5464_v38 }
 0x29e   : > { %15330 = vmatmul.mubr.msk.bf16.vlgmr.msra.gmra.mrb[0].mxu1 %vm316_vm0, %v5455_v1 }
 0x29f   : > { %15826 = vmatmul.mubr.msk.bf16.gmra.mrb[16].mxu0 %vm316_vm0, %v11714_v45  ;;  %15362 = vmatpush3.bf16.msra.mxu1 %v18675_v27  ;;  %v17096_v27 = vld [vmem:[%s17244_s6 + $0x94] sm:$0xff]  }
 0x2a0   : > { %15333 = vmatprep.mubr.msk.bf16.mxu1 %vm316_vm0, %v5457_v56  ;;  %15829 = vmatprep.mubr.msk.bf16.mxu0 %vm316_vm0, %v11716_v50  ;;  %v11721_v62 = vrot.slane %v17096_v27, 1  ;;  %v3697_v45 = vld [vmem:[#allocation2 + $0xf8] sm:$0xf]  ;;  %v5463_v56 = vsel %vm2329_vm6, %v5460_v17, %v5462_v18  ;;  %v12180_v27 = vrot.slane %v12178_v42, 2  ;;  %v17111_v17 = vld [vmem:[%s17244_s6 + $0x3c] sm:$0xff]   ;;  %v12194_v42 = vrot.slane %v12192_v19, 1 }
 0x2a1   : > { %15363 = vmatprep.subr.bf16.mxu1 %v17095_v29  ;;  %v12204_v18 = vshll.u32 %v17111_v17, 16  ;;  %v17114_v19 = vld [vmem:[%s17244_s6 + $0x78] sm:$0xff]  }
 0x2a2   : > { %v11722_v50 = vsel %vm1255_vm4, %v11719_v47, %v11721_v62  ;;  %v18842_v47 = vld [vmem:[%s19416_s1 + $0x180] sm:$0xff]  }
 0x2a3   : > { %15364 = vmatpush3.bf16.msra.mxu1 %v17095_v29 }
 0x2a4   : > { %15365 = vmatprep.subr.bf16.mxu1 %v17108_v8 }
 0x2a6   : > { %15334 = vmatmul.mubr.msk.bf16.gmra.mrb[4].mxu1 %vm316_vm0, %v5459_v24  ;;  %v12177_v24 = vrot.slane %v12175_v49, 1  ;;  %v17107_v49 = vld [vmem:[%s17244_s6 + $0x60] sm:$0xff]  }
 0x2a7   : > { %15830 = vmatmul.mubr.msk.bf16.gmra.mrb[20].mxu0 %vm316_vm0, %v11718_v52  ;;  %15337 = vmatprep.mubr.msk.bf16.mxu1 %vm316_vm0, %v5461_v63  ;;  %v12185_v52 = vrot.slane %v12183_v59, 1  ;;  %v12188_v63 = vrot.slane %v12186_v34, 2  ;;  %v12197_v59 = vrot.slane %v12195_v12, 2  ;;  %v17110_v34 = vld [vmem:[%s17244_s6 + $0x68] sm:$0xff]  }
 0x2a8   : > { %15833 = vmatprep.mubr.msk.bf16.mxu0 %vm316_vm0, %v11720_v7  ;;  %15366 = vmatpush3.bf16.msra.mxu1 %v17108_v8  ;;  %v11724_v8 = vsel %vm1255_vm4, %v11721_v62, %v11723_v5  ;;  %v12181_v7 = vor.u32 %v12180_v27, %v12177_v24 }
 0x2a9   : > { %v15199_v41 = vpop.f32.mrb[52].mxu1  ;;  %15367 = vmatprep.subr.bf16.mxu1 %v17117_v37  ;;  %v12189_v16 = vor.u32 %v12188_v63, %v12185_v52  ;;  %v17112_v52 = vld [vmem:[%s17244_s6 + $0x70] sm:$0xff]  }
 0x2aa   : > { %v18823_v1 = vadd.f32 %v15199_v41, %v18678_v57  ;;  %v3651_v14 = vpop.f32.mrb[53].mxu1  ;;  %v17104_v57 = vld [vmem:[%s17244_s6 + $0x58] sm:$0xff]  }
 0x2ab   : > { %v18826_v44 = vadd.f32 %v3651_v14, %v18681_v15  ;;  %v15200_v48 = vpop.f32.mrb[54].mxu1  ;;  %v5468_v23 = vrot.slane %v17104_v57, 2  ;;  %v17113_v14 = vld [vmem:[%s17244_s6 + $0x44] sm:$0xff]  }
 0x2ac   : > { %v3729_v29 = vadd.f32 %v15200_v48, %v3697_v45  ;;  %v3654_v4 = vpop.f32.mrb[55].mxu1  ;;  %15368 = vmatpush3.bf16.msra.mxu1 %v17117_v37  ;;  %v12201_v37 = vshrl.u32 %v17111_v17, 16  ;;  %v12190_v45 = vsel %vm1736_vm5, %v12181_v7, %v12189_v16 }
 0x2ad   : > { %v18836_v15 = vadd.f32 %v3654_v4, %v18689_v53  ;;  %15921 = vmatprep.subr.bf16.mxu1 %v18842_v47  ;;  %v5466_v53 = vrot.slane %v17101_v28, 2  ;;  %v12198_v28 = vor.u32 %v12197_v59, %v12194_v42  ;;  %v12210_v4 = vshrl.u32 %v17113_v14, 16 }
 0x2ae   : > { %3761 = vst [vmem:[#allocation2 + $0xf8] sm:$0xf] %v3729_v29  ;;  %15338 = vmatmul.mubr.msk.bf16.gmra.mrb[8].mxu1 %vm316_vm0, %v5463_v56  ;;  %v12203_v48 = vrot.slane %v12201_v37, 1  ;;  %v12206_v56 = vrot.slane %v12204_v18, 2  ;;  %v5472_v29 = vrot.slane %v17110_v34, 2  ;;  %v17120_v18 = vld [vmem:[%s17244_s6 + $0x5c] sm:$0xff]  }
 0x2af   : > { %15834 = vmatmul.mubr.msk.bf16.gmra.mrb[24].mxu0 %vm316_vm0, %v11722_v50  ;;  %15341 = vmatprep.mubr.msk.bf16.mxu1 %vm316_vm0, %v5465_v60  ;;  %v5467_v62 = vsel %vm2329_vm6, %v5464_v38, %v5466_v53  ;;  %v5469_v41 = vsel %vm2329_vm6, %v5466_v53, %v5468_v23  ;;  %v17115_v50 = vld [vmem:[%s17244_s6 + $0x4c] sm:$0xff]   ;;  %v5470_v38 = vrot.slane %v17107_v49, 2  ;;  %v12213_v60 = vshll.u32 %v17113_v14, 16 }
 0x2b0   : > { %15837 = vmatprep.mubr.msk.bf16.mxu0 %vm316_vm0, %v11724_v8  ;;  %v12207_v8 = vor.u32 %v12206_v56, %v12203_v48  ;;  %v12219_v57 = vshrl.u32 %v17115_v50, 16  ;;  %v12222_v24 = vshll.u32 %v17115_v50, 16  ;;  %v12212_v17 = vrot.slane %v12210_v4, 1  ;;  %v17116_v48 = vld [vmem:[%s17244_s6 + $0x80] sm:$0xff]   ;;  %v18883_v4 = vld [vmem:[%s17244_s6 + $0x88] sm:$0xff]  }
 0x2b1   : > { %v5471_v27 = vsel %vm2329_vm6, %v5468_v23, %v5470_v38  ;;  %v5473_v63 = vsel %vm2329_vm6, %v5470_v38, %v5472_v29  ;;  %v12215_v53 = vrot.slane %v12213_v60, 2  ;;  %v12228_v23 = vshrl.u32 %v17118_v10, 16  ;;  %v17121_v38 = vld [vmem:[%s17244_s6 + $0x64] sm:$0xff]   ;;  %v17122_v60 = vld [vmem:[%s17244_s6 + $0x10] sm:$0xfc]  }
 0x2b2   : > { %v12208_v12 = vsel %vm1736_vm5, %v12198_v28, %v12207_v8  ;;  %v12221_v7 = vrot.slane %v12219_v57, 1  ;;  %v12224_v37 = vrot.slane %v12222_v24, 2  ;;  %v12231_v49 = vshll.u32 %v17118_v10, 16  ;;  %v17123_v24 = vld [vmem:[%s17244_s6 + $0x18] sm:$0xff]   ;;  %v17124_v10 = vld [vmem:[%s17244_s6 + $0x6c] sm:$0xff]  }
 0x2b3   : > { %v5476_v42 = vrot.slane %v17114_v19, 2  ;;  %v12237_v34 = vshrl.u32 %v17120_v18, 16  ;;  %v12240_v14 = vshll.u32 %v17120_v18, 16  ;;  %v12230_v56 = vrot.slane %v12228_v23, 1 }
 0x2b4   : > { %v12225_v59 = vor.u32 %v12224_v37, %v12221_v7  ;;  %v12233_v50 = vrot.slane %v12231_v49, 2  ;;  %v12249_v19 = vshll.u32 %v17121_v38, 16  ;;  %v5939_v7 = vshll.u32 %v17122_v60, 16 }
 0x2b5   : > { %v5944_v37 = vshrl.u32 %v17123_v24, 16  ;;  %v5947_v18 = vshll.u32 %v17123_v24, 16  ;;  %v12258_v23 = vshll.u32 %v17124_v10, 16 }
 0x2b6   : > { %15342 = vmatmul.mubr.msk.bf16.gmra.mrb[12].mxu1 %vm316_vm0, %v5467_v62  ;;  %v17136_v62 = vld [vmem:[%s19416_s1 + $0x308] sm:$0xff]  }
 0x2b7   : > { %15838 = vmatmul.mubr.msk.bf16.gmra.mrb[64].mxu0 %vm316_vm0, %v11723_v5  ;;  %15345 = vmatprep.mubr.msk.bf16.mxu1 %vm316_vm0, %v5469_v41  ;;  %v12199_v5 = vsel %vm1736_vm5, %v12189_v16, %v12198_v28  ;;  %v5474_v16 = vrot.slane %v17112_v52, 2  ;;  %v12216_v41 = vor.u32 %v12215_v53, %v12212_v17  ;;  %v12239_v52 = vrot.slane %v12237_v34, 1 }
 0x2b8   : > { %15849 = vmatprep.mubr.msk.bf16.mxu0 %vm316_vm0, %v12190_v45  ;;  %v17140_v45 = vld [vmem:[%s19416_s1 + $0x310] sm:$0xff]   ;;  %v12234_v17 = vor.u32 %v12233_v50, %v12230_v56  ;;  %v12246_v53 = vshrl.u32 %v17121_v38, 16  ;;  %v12251_v56 = vrot.slane %v12249_v19, 2  ;;  %v5941_v38 = vrot.slane %v5939_v7, 3 }
 0x2b9   : > { %v5475_v28 = vsel %vm2329_vm6, %v5472_v29, %v5474_v16  ;;  %v5477_v57 = vsel %vm2329_vm6, %v5474_v16, %v5476_v42  ;;  %v5478_v29 = vrot.slane %v17116_v48, 2 }
 0x2ba   : > { %v12248_v34 = vrot.slane %v12246_v53, 1 }
 0x2bb   : > { %v5479_v16 = vsel %vm2329_vm6, %v5476_v42, %v5478_v29  ;;  %v5949_v42 = vrot.slane %v5947_v18, 3 }
 0x2be   : > { %15346 = vmatmul.mubr.msk.bf16.gmra.mrb[16].mxu1 %vm316_vm0, %v5471_v27  ;;  %v12226_v27 = vsel %vm1736_vm5, %v12216_v41, %v12225_v59 }
 0x2bf   : > { %15850 = vmatmul.mubr.msk.bf16.vlgmr.msra.gmra.mrb[0].mxu0 %vm316_vm0, %v12199_v5  ;;  %15349 = vmatprep.mubr.msk.bf16.mxu1 %vm316_vm0, %v5473_v63  ;;  %v12242_v5 = vrot.slane %v12240_v14, 2  ;;  %v17141_v63 = vld [vmem:[%s19416_s1 + $0x318] sm:$0xff]  }
 0x2c0   : > { %15853 = vmatprep.mubr.msk.bf16.mxu0 %vm316_vm0, %v12208_v12  ;;  %15882 = vmatpush3.bf16.msra.mxu0 %v18747_v2  ;;  %v12217_v2 = vsel %vm1736_vm5, %v12207_v8, %v12216_v41  ;;  %v19420_v8 = vrot.slane %v18883_v4, 2  ;;  %v5936_v12 = vshrl.u32 %v17122_v60, 16  ;;  %v12235_v41 = vsel %vm1736_vm5, %v12225_v59, %v12234_v17 }
 0x2c1   : > { %15883 = vmatprep.subr.bf16.mxu0 %v17136_v62  ;;  %v12243_v49 = vor.u32 %v12242_v5, %v12239_v52  ;;  %v12260_v59 = vrot.slane %v12258_v23, 2  ;;  %v17128_v52 = vld [vmem:[%s17244_s6 + $0x7c] sm:$0xff]  }
 0x2c2   : > { %v5481_v48 = vsel %vm2329_vm6, %v5478_v29, %v19420_v8  ;;  %v5938_v50 = vrot.slane %v5936_v12, 2  ;;  %v12273_v23 = vshrl.u32 %v17128_v52, 16  ;;  %v17129_v8 = vld [vmem:[%s17244_s6 + $0x30] sm:$0xff]  }
 0x2c4   : > { %15884 = vmatpush3.bf16.msra.mxu0 %v17136_v62  ;;  %v12255_v62 = vshrl.u32 %v17124_v10, 16  ;;  %v12244_v10 = vsel %vm1736_vm5, %v12234_v17, %v12243_v49  ;;  %v5942_v17 = vor.u32 %v5941_v38, %v5938_v50  ;;  %v17131_v50 = vld [vmem:[%s17244_s6 + $0x38] sm:$0xff]  }
 0x2c5   : > { %15885 = vmatprep.subr.bf16.mxu0 %v17140_v45 }
 0x2c6   : > { %15350 = vmatmul.mubr.msk.bf16.gmra.mrb[20].mxu1 %vm316_vm0, %v5475_v28  ;;  %v17125_v28 = vld [vmem:[%s17244_s6 + $0x20] sm:$0xff]  }
 0x2c7   : > { %15854 = vmatmul.mubr.msk.bf16.gmra.mrb[4].mxu0 %vm316_vm0, %v12217_v2  ;;  %15353 = vmatprep.mubr.msk.bf16.mxu1 %vm316_vm0, %v5477_v57  ;;  %v5946_v2 = vrot.slane %v5944_v37, 2  ;;  %v12257_v57 = vrot.slane %v12255_v62, 1  ;;  %v5953_v29 = vshrl.u32 %v17125_v28, 16  ;;  %v5956_v53 = vshll.u32 %v17125_v28, 16 }
 0x2c8   : > { %15857 = vmatprep.mubr.msk.bf16.mxu0 %vm316_vm0, %v12226_v27  ;;  %15886 = vmatpush3.bf16.msra.mxu0 %v17140_v45  ;;  %v17126_v45 = vld [vmem:[%s17244_s6 + $0x74] sm:$0xff]   ;;  %v17127_v27 = vld [vmem:[%s17244_s6 + $0x28] sm:$0xff]  }
 0x2c9   : > { %15887 = vmatprep.subr.bf16.mxu0 %v17141_v63  ;;  %v12264_v19 = vshrl.u32 %v17126_v45, 16  ;;  %v12267_v12 = vshll.u32 %v17126_v45, 16  ;;  %v5950_v7 = vor.u32 %v5949_v42, %v5946_v2  ;;  %v12261_v37 = vor.u32 %v12260_v59, %v12257_v57  ;;  %v17132_v59 = vld [vmem:[%s17244_s6 + $0x8c] sm:$0xff]  }
 0x2ca   : > { %v18901_v14 = vpop.f32.mrb[52].mxu0  ;;  %v5962_v18 = vshrl.u32 %v17127_v27, 16  ;;  %v5965_v62 = vshll.u32 %v17127_v27, 16  ;;  %v12275_v42 = vrot.slane %v12273_v23, 1  ;;  %v19428_v27 = vrot.slane %v18883_v4, 2 }
 0x2cb   : > { %v18908_v60 = vpop.f32.mrb[53].mxu0  ;;  %v12266_v46 = vrot.slane %v12264_v19, 1  ;;  %v12269_v28 = vrot.slane %v12267_v12, 2  ;;  %v12294_v23 = vshll.u32 %v17132_v59, 16 }
 0x2cc   : > { %15888 = vmatpush3.bf16.msra.mxu0 %v17141_v63  ;;  %v18910_v24 = vpop.f32.mrb[54].mxu0  ;;  %v12252_v63 = vor.u32 %v12251_v56, %v12248_v34  ;;  %v17130_v56 = vld [vmem:[%s17244_s6 + $0x84] sm:$0xff]   ;;  %v5964_v38 = vrot.slane %v5962_v18, 2  ;;  %v5967_v2 = vrot.slane %v5965_v62, 3  ;;  %v12291_v62 = vshrl.u32 %v17132_v59, 16 }
 0x2cd   : > { %19427 = vst [vmem:[#allocation8_spill] sm:$0xff] %v18910_v24  ;;  %v18915_v5 = vpop.f32.mrb[55].mxu0  ;;  %v12282_v19 = vshrl.u32 %v17130_v56, 16  ;;  %v12285_v12 = vshll.u32 %v17130_v56, 16 }
 0x2ce   : > { %15354 = vmatmul.mubr.msk.bf16.gmra.mrb[24].mxu1 %vm316_vm0, %v5479_v16  ;;  %v12276_v16 = vshll.u32 %v17128_v52, 16  ;;  %v12253_v45 = vsel %vm1736_vm5, %v12243_v49, %v12252_v63  ;;  %v12262_v34 = vsel %vm1736_vm5, %v12252_v63, %v12261_v37  ;;  %v12270_v52 = vor.u32 %v12269_v28, %v12266_v46 }
 0x2cf   : > { %15858 = vmatmul.mubr.msk.bf16.gmra.mrb[8].mxu0 %vm316_vm0, %v12235_v41  ;;  %15357 = vmatprep.mubr.msk.bf16.mxu1 %vm316_vm0, %v5481_v48  ;;  %v5955_v41 = vrot.slane %v5953_v29, 2  ;;  %v5958_v48 = vrot.slane %v5956_v53, 3  ;;  %v5971_v29 = vshrl.u32 %v17129_v8, 16  ;;  %v5974_v53 = vshll.u32 %v17129_v8, 16  ;;  %v17134_v8 = vld [vmem:[%s17244_s6 + $0x94] sm:$0xff]  }
 0x2d0   : > { %15861 = vmatprep.mubr.msk.bf16.mxu0 %vm316_vm0, %v12244_v10  ;;  %v5951_v10 = vsel %vm4366_vm7, %v5942_v17, %v5950_v7  ;;  %v12278_v57 = vrot.slane %v12276_v16, 2  ;;  %v5980_v63 = vshrl.u32 %v17131_v50, 16  ;;  %v5983_v17 = vshll.u32 %v17131_v50, 16  ;;  %v17133_v16 = vld [vmem:[%s17244_s6 + $0x40] sm:$0xff]  }
 0x2d1   : > { %v5959_v49 = vor.u32 %v5958_v48, %v5955_v41  ;;  %v5968_v4 = vor.u32 %v5967_v2, %v5964_v38  ;;  %v12271_v46 = vsel %vm1736_vm5, %v12261_v37, %v12270_v52  ;;  %v5973_v41 = vrot.slane %v5971_v29, 2 }
 0x2d2   : > { %v12279_v18 = vor.u32 %v12278_v57, %v12275_v42  ;;  %v5976_v48 = vrot.slane %v5974_v53, 3  ;;  %v12284_v28 = vrot.slane %v12282_v19, 1  ;;  %v5985_v56 = vrot.slane %v5983_v17, 3  ;;  %v17138_v57 = vld [vmem:[%s17244_s6 + $0x9c] sm:$0xff]   ;;  %v17175_v17 = vld [vmem:[%s19416_s1 + $0x188] sm:$0xff]  }
 0x2d3   : > { %v5969_v50 = vsel %vm4366_vm7, %v5959_v49, %v5968_v4  ;;  %v12293_v2 = vrot.slane %v12291_v62, 1  ;;  %v12296_v42 = vrot.slane %v12294_v23, 2  ;;  %v5992_v59 = vshll.u32 %v17133_v16, 16 }
 0x2d4   : > { %v12280_v38 = vsel %vm1736_vm5, %v12270_v52, %v12279_v18  ;;  %v5977_v37 = vor.u32 %v5976_v48, %v5973_v41  ;;  %v12300_v29 = vshrl.u32 %v17134_v8, 16  ;;  %v12303_v53 = vshll.u32 %v17134_v8, 16  ;;  %v17139_v48 = vld [vmem:[%s17244_s6 + $0x50] sm:$0xff]  }
 0x2d5   : > { %v12312_v62 = vshll.u32 %v17138_v57, 16 }
 0x2d6   : > { %15358 = vmatmul.mubr.msk.bf16.gmra.mrb[68].mxu1 %vm316_vm0, %v19428_v27  ;;  %v17137_v27 = vld [vmem:[%s17244_s6 + $0x48] sm:$0xff]   ;;  %v12305_v41 = vrot.slane %v12303_v53, 2 }
 0x2d7   : > { %15862 = vmatmul.mubr.msk.bf16.gmra.mrb[12].mxu0 %vm316_vm0, %v12253_v45  ;;  %15369 = vmatprep.mubr.msk.bf16.mxu1 %vm316_vm0, %v5951_v10  ;;  %v5960_v45 = vsel %vm4366_vm7, %v5950_v7, %v5959_v49  ;;  %v12287_v10 = vrot.slane %v12285_v12, 2  ;;  %v5989_v7 = vshrl.u32 %v17133_v16, 16  ;;  %v5998_v19 = vshrl.u32 %v17137_v27, 16 }
 0x2d8   : > { %15865 = vmatprep.mubr.msk.bf16.mxu0 %vm316_vm0, %v12262_v34  ;;  %v5982_v34 = vrot.slane %v5980_v63, 2  ;;  %v6001_v12 = vshll.u32 %v17137_v27, 16  ;;  %v12297_v63 = vor.u32 %v12296_v42, %v12293_v2  ;;  %v5994_v16 = vrot.slane %v5992_v59, 3  ;;  %v17176_v27 = vld [vmem:[%s19416_s1 + $0x190] sm:$0xff]  }
 0x2d9   : > { %v12288_v49 = vor.u32 %v12287_v10, %v12284_v28  ;;  %v5991_v23 = vrot.slane %v5989_v7, 2  ;;  %v6000_v10 = vrot.slane %v5998_v19, 2  ;;  %v6007_v42 = vshrl.u32 %v17139_v48, 16 }
 0x2da   : > { %v5986_v52 = vor.u32 %v5985_v56, %v5982_v34  ;;  %v6003_v34 = vrot.slane %v6001_v12, 3  ;;  %v17142_v56 = vld [vmem:[%s17244_s6 + $0x58] sm:$0xff]  }
 0x2db   : > { %v12289_v8 = vsel %vm1736_vm5, %v12279_v18, %v12288_v49  ;;  %v5995_v2 = vor.u32 %v5994_v16, %v5991_v23  ;;  %v6016_v59 = vshrl.u32 %v17142_v56, 16 }
 0x2dc   : > { %v5987_v28 = vsel %vm4366_vm7, %v5977_v37, %v5986_v52  ;;  %v6004_v7 = vor.u32 %v6003_v34, %v6000_v10  ;;  %v17147_v34 = vld [vmem:[%s17244_s6 + $0x68] sm:$0xff]  }
 0x2de   : > { %15370 = vmatmul.mubr.msk.bf16.vlgmr.msra.gmra.mrb[0].mxu1 %vm316_vm0, %v5960_v45  ;;  %v5978_v45 = vsel %vm4366_vm7, %v5968_v4, %v5977_v37  ;;  %v12314_v4 = vrot.slane %v12312_v62, 2  ;;  %v6019_v37 = vshll.u32 %v17142_v56, 16  ;;  %v17143_v56 = vld [vmem:[%s17244_s6 + $0x24] sm:$0xfc]  }
 0x2df   : > { %15866 = vmatmul.mubr.msk.bf16.gmra.mrb[16].mxu0 %vm316_vm0, %v12271_v46  ;;  %15925 = vmatpush3.bf16.msra.mxu1 %v18842_v47  ;;  %v12309_v47 = vshrl.u32 %v17138_v57, 16  ;;  %v12302_v46 = vrot.slane %v12300_v29, 1  ;;  %v6010_v57 = vshll.u32 %v17139_v48, 16 }
 0x2e0   : > { %15373 = vmatprep.mubr.msk.bf16.mxu1 %vm316_vm0, %v5969_v50  ;;  %15869 = vmatprep.mubr.msk.bf16.mxu0 %vm316_vm0, %v12280_v38  ;;  %v12298_v50 = vsel %vm1736_vm5, %v12288_v49, %v12297_v63  ;;  %v17177_v49 = vld [vmem:[%s19416_s1 + $0x198] sm:$0xff]   ;;  %v6021_v10 = vrot.slane %v6019_v37, 3 }
 0x2e1   : > { %15922 = vmatprep.subr.bf16.mxu1 %v17175_v17  ;;  %v12311_v38 = vrot.slane %v12309_v47, 1  ;;  %v12306_v18 = vor.u32 %v12305_v41, %v12302_v46  ;;  %v4177_v47 = vld [vmem:[#allocation2 + $0xf8] sm:$0xf]  ;;  %v6012_v46 = vrot.slane %v6010_v57, 3  ;;  %v17145_v41 = vld [vmem:[%s17244_s6 + $0x60] sm:$0xff]  }
 0x2e3   : > { %15926 = vmatpush3.bf16.msra.mxu1 %v17175_v17  ;;  %v12315_v53 = vor.u32 %v12314_v4, %v12311_v38  ;;  %v5996_v17 = vsel %vm4366_vm7, %v5986_v52, %v5995_v2  ;;  %v12307_v16 = vsel %vm1736_vm5, %v12297_v63, %v12306_v18  ;;  %v6028_v38 = vshll.u32 %v17145_v41, 16 }
 0x2e4   : > { %15923 = vmatprep.subr.bf16.mxu1 %v17176_v27  ;;  %v6034_v4 = vshrl.u32 %v17147_v34, 16 }
 0x2e5   : > { %v6030_v37 = vrot.slane %v6028_v38, 3 }
 0x2e6   : > { %15374 = vmatmul.mubr.msk.bf16.gmra.mrb[4].mxu1 %vm316_vm0, %v5978_v45  ;;  %v6009_v45 = vrot.slane %v6007_v42, 2 }
 0x2e7   : > { %15870 = vmatmul.mubr.msk.bf16.gmra.mrb[20].mxu0 %vm316_vm0, %v12289_v8  ;;  %15377 = vmatprep.mubr.msk.bf16.mxu1 %vm316_vm0, %v5987_v28  ;;  %v6018_v28 = vrot.slane %v6016_v59, 2 }
 0x2e8   : > { %15873 = vmatprep.mubr.msk.bf16.mxu0 %vm316_vm0, %v12298_v50  ;;  %15927 = vmatpush3.bf16.msra.mxu1 %v17176_v27  ;;  %v17144_v27 = vld [vmem:[%s17244_s6 + $0x2c] sm:$0xff]   ;;  %v6013_v63 = vor.u32 %v6012_v46, %v6009_v45  ;;  %v6025_v50 = vshrl.u32 %v17145_v41, 16  ;;  %v17148_v45 = vld [vmem:[%s17244_s6 + $0x3c] sm:$0xff]  }
 0x2e9   : > { %v15239_v29 = vpop.f32.mrb[56].mxu1  ;;  %15924 = vmatprep.subr.bf16.mxu1 %v17177_v49  ;;  %v12767_v42 = vrot.slane %v17144_v27, 2 }
 0x2ea   : > { %v18967_v19 = vadd.f32 %v15239_v29, %v18823_v1  ;;  %v4131_v12 = vpop.f32.mrb[57].mxu1  ;;  %v6005_v1 = vsel %vm4366_vm7, %v5995_v2, %v6004_v7  ;;  %v6037_v2 = vshll.u32 %v17147_v34, 16  ;;  %v6014_v57 = vsel %vm4366_vm7, %v6004_v7, %v6013_v63  ;;  %v17149_v29 = vld [vmem:[%s17244_s6 + $0x70] sm:$0xff]  }
 0x2eb   : > { %v18971_v62 = vadd.f32 %v4131_v12, %v18826_v44  ;;  %v15240_v23 = vpop.f32.mrb[58].mxu1  ;;  %v12316_v44 = vsel %vm1736_vm5, %v12306_v18, %v12315_v53  ;;  %v12766_v18 = vrot.slane %v17143_v56, 2  ;;  %v6027_v59 = vrot.slane %v6025_v50, 2  ;;  %v17146_v12 = vld [vmem:[%s17244_s6 + $0x34] sm:$0xff]   ;;  %v17150_v50 = vld [vmem:[%s17244_s6 + $0x44] sm:$0xff]  }
 0x2ec   : > { %v4209_v48 = vadd.f32 %v15240_v23, %v4177_v47  ;;  %v4134_v8 = vpop.f32.mrb[59].mxu1  ;;  %15928 = vmatpush3.bf16.msra.mxu1 %v17177_v49  ;;  %v6039_v47 = vrot.slane %v6037_v2, 3  ;;  %v17151_v23 = vld [vmem:[%s17244_s6 + $0x78] sm:$0xff]   ;;  %v6043_v46 = vshrl.u32 %v17149_v29, 16  ;;  %v6046_v41 = vshll.u32 %v17149_v29, 16  ;;  %v17155_v2 = vld [vmem:[%s17244_s6 + $0x88] sm:$0xff]  }
 0x2ed   : > { %v18978_v52 = vadd.f32 %v4134_v8, %v18836_v15  ;;  %v6022_v15 = vor.u32 %v6021_v10, %v6018_v28  ;;  %v6031_v7 = vor.u32 %v6030_v37, %v6027_v59  ;;  %v6055_v28 = vshll.u32 %v17151_v23, 16 }
 0x2ee   : > { %4241 = vst [vmem:[#allocation2 + $0xf8] sm:$0xf] %v4209_v48  ;;  %15378 = vmatmul.mubr.msk.bf16.gmra.mrb[8].mxu1 %vm316_vm0, %v5996_v17  ;;  %v6036_v17 = vrot.slane %v6034_v4, 2  ;;  %v12769_v48 = vrot.slane %v17146_v12, 2  ;;  %v12771_v10 = vrot.slane %v17148_v45, 2  ;;  %v6048_v56 = vrot.slane %v6046_v41, 3 }
 0x2ef   : > { %15874 = vmatmul.mubr.msk.bf16.gmra.mrb[24].mxu0 %vm316_vm0, %v12307_v16  ;;  %15381 = vmatprep.mubr.msk.bf16.mxu1 %vm316_vm0, %v6005_v1  ;;  %v6023_v49 = vsel %vm4366_vm7, %v6013_v63, %v6022_v15  ;;  %v12768_v16 = vsel %vm2329_vm6, %v12766_v18, %v12767_v42  ;;  %v6052_v1 = vshrl.u32 %v17151_v23, 16  ;;  %v6032_v34 = vsel %vm4366_vm7, %v6022_v15, %v6031_v7 }
 0x2f0   : > { %15877 = vmatprep.mubr.msk.bf16.mxu0 %vm316_vm0, %v12316_v44  ;;  %v6040_v8 = vor.u32 %v6039_v47, %v6036_v17  ;;  %v6045_v44 = vrot.slane %v6043_v46, 2  ;;  %v12770_v27 = vsel %vm2329_vm6, %v12767_v42, %v12769_v48  ;;  %v6057_v4 = vrot.slane %v6055_v28, 3  ;;  %v17154_v46 = vld [vmem:[%s17244_s6 + $0x54] sm:$0xff]   ;;  %v17156_v28 = vld [vmem:[%s17244_s6 + $0x5c] sm:$0xff]  }
 0x2f1   : > { %v6054_v38 = vrot.slane %v6052_v1, 2  ;;  %v12772_v18 = vsel %vm2329_vm6, %v12769_v48, %v12771_v10  ;;  %v12773_v42 = vrot.slane %v17150_v50, 2  ;;  %v6073_v12 = vshll.u32 %v17155_v2, 16 }
 0x2f2   : > { %v6041_v63 = vsel %vm4366_vm7, %v6031_v7, %v6040_v8  ;;  %v6049_v15 = vor.u32 %v6048_v56, %v6045_v44  ;;  %v12779_v56 = vrot.slane %v17156_v28, 2 }
 0x2f3   : > { %v6058_v29 = vor.u32 %v6057_v4, %v6054_v38  ;;  %v12774_v45 = vsel %vm2329_vm6, %v12771_v10, %v12773_v42  ;;  %v6075_v48 = vrot.slane %v6073_v12, 3  ;;  %v12777_v10 = vrot.slane %v17154_v46, 2  ;;  %v17163_v46 = vld [vmem:[%s17244_s6 + $0x68] sm:$0xff]  }
 0x2f4   : > { %v6050_v47 = vsel %vm4366_vm7, %v6040_v8, %v6049_v15  ;;  %v6557_v28 = vrot.slane %v17163_v46, 3 }
 0x2f5   : > { %v6059_v7 = vsel %vm4366_vm7, %v6049_v15, %v6058_v29  ;;  %v12780_v15 = vsel %vm2329_vm6, %v12777_v10, %v12779_v56 }
 0x2f6   : > { %15382 = vmatmul.mubr.msk.bf16.gmra.mrb[12].mxu1 %vm316_vm0, %v6014_v57  ;;  %v17152_v57 = vld [vmem:[%s17244_s6 + $0x4c] sm:$0xff]  }
 0x2f7   : > { %15878 = vmatmul.mubr.msk.bf16.gmra.mrb[68].mxu0 %vm316_vm0, %v12315_v53  ;;  %15385 = vmatprep.mubr.msk.bf16.mxu1 %vm316_vm0, %v6023_v49  ;;  %v17153_v53 = vld [vmem:[%s17244_s6 + $0x80] sm:$0xff]   ;;  %v6070_v49 = vshrl.u32 %v17155_v2, 16  ;;  %v12775_v17 = vrot.slane %v17152_v57, 2 }
 0x2f8   : > { %15889 = vmatprep.mubr.msk.bf16.mxu0 %vm316_vm0, %v12768_v16  ;;  %v6061_v59 = vshrl.u32 %v17153_v53, 16  ;;  %v6064_v37 = vshll.u32 %v17153_v53, 16  ;;  %v17158_v2 = vld [vmem:[%s17244_s6 + $0x64] sm:$0xff]  }
 0x2f9   : > { %v6072_v41 = vrot.slane %v6070_v49, 2  ;;  %v12776_v1 = vsel %vm2329_vm6, %v12773_v42, %v12775_v17  ;;  %v12778_v38 = vsel %vm2329_vm6, %v12775_v17, %v12777_v10  ;;  %v17165_v10 = vld [vmem:[%s17244_s6 + $0x70] sm:$0xff]  }
 0x2fa   : > { %v6063_v23 = vrot.slane %v6061_v59, 2  ;;  %v6066_v16 = vrot.slane %v6064_v37, 3  ;;  %v17160_v59 = vld [vmem:[%s17244_s6 + $0x6c] sm:$0xff]  }
 0x2fb   : > { %v6076_v44 = vor.u32 %v6075_v48, %v6072_v41  ;;  %v12783_v12 = vrot.slane %v17160_v59, 2  ;;  %v17164_v48 = vld [vmem:[%s17244_s6 + $0x7c] sm:$0xff]  }
 0x2fc   : > { %v6067_v8 = vor.u32 %v6066_v16, %v6063_v23  ;;  %v19430_v16 = vrot.slane %v17288_v39, 3 }
 0x2fe   : > { %15386 = vmatmul.mubr.msk.bf16.gmra.mrb[16].mxu1 %vm316_vm0, %v6032_v34  ;;  %v17157_v34 = vld [vmem:[%s17244_s6 + $0x90] ss:$0 sps:$4 sm:$0x11]   ;;  %v6077_v4 = vsel %vm4366_vm7, %v6067_v8, %v6076_v44 }
 0x2ff   : > { %15890 = vmatmul.mubr.msk.bf16.vlgmr.msra.gmra.mrb[0].mxu0 %vm316_vm0, %v12770_v27  ;;  %15389 = vmatprep.mubr.msk.bf16.mxu1 %vm316_vm0, %v6041_v63  ;;  %v6068_v27 = vsel %vm4366_vm7, %v6058_v29, %v6067_v8  ;;  %v6079_v63 = vshll.u32 %v17157_v34, 16  ;;  %v12781_v29 = vrot.slane %v17158_v2, 2  ;;  %v12787_v8 = vrot.slane %v17164_v48, 2 }
 0x300   : > { %15893 = vmatprep.mubr.msk.bf16.mxu0 %vm316_vm0, %v12772_v18  ;;  %v17159_v18 = vld [vmem:[%s17244_s6 + $0x58] sm:$0xff]   ;;  %v6559_v2 = vrot.slane %v17165_v10, 3 }
 0x301   : > { %v6081_v42 = vrot.slane %v6079_v63, 3  ;;  %v6553_v49 = vrot.slane %v17159_v18, 3  ;;  %v12782_v23 = vsel %vm2329_vm6, %v12779_v56, %v12781_v29  ;;  %v12784_v41 = vsel %vm2329_vm6, %v12781_v29, %v12783_v12  ;;  %v17167_v63 = vld [vmem:[%s17244_s6 + $0x78] sm:$0xff]   ;;  %v17169_v29 = vld [vmem:[%s17244_s6 + $0x80] sm:$0xff]  }
 0x303   : > { %v6082_v17 = vsel %vm4366_vm7, %v6076_v44, %v6081_v42  ;;  %v6560_v42 = vsel %vm4968_vm1, %v6557_v28, %v6559_v2 }
 0x306   : > { %15390 = vmatmul.mubr.msk.bf16.gmra.mrb[20].mxu1 %vm316_vm0, %v6050_v47  ;;  %v17161_v47 = vld [vmem:[%s17244_s6 + $0x60] sm:$0xff]  }
 0x307   : > { %15894 = vmatmul.mubr.msk.bf16.gmra.mrb[4].mxu0 %vm316_vm0, %v12774_v45  ;;  %15393 = vmatprep.mubr.msk.bf16.mxu1 %vm316_vm0, %v6059_v7  ;;  %v6554_v45 = vsel %vm4968_vm1, %v19430_v16, %v6553_v49  ;;  %v17162_v7 = vld [vmem:[%s17244_s6 + $0x74] sm:$0xff]   ;;  %v17173_v16 = vld [vmem:[%s17244_s6 + $0x9c] sm:$0xff]  }
 0x308   : > { %15897 = vmatprep.mubr.msk.bf16.mxu0 %vm316_vm0, %v12776_v1  ;;  %v6555_v1 = vrot.slane %v17161_v47, 3  ;;  %v12785_v39 = vrot.slane %v17162_v7, 2  ;;  %v17171_v47 = vld [vmem:[%s17244_s6 + $0x88] sm:$0xff]   ;;  %v12795_v48 = vrot.slane %v17173_v16, 2 }
 0x309   : > { %v6565_v46 = vrot.slane %v17171_v47, 3 }
 0x30a   : > { %v19021_v53 = vpop.f32.mrb[56].mxu0  ;;  %v6556_v34 = vsel %vm4968_vm1, %v6553_v49, %v6555_v1  ;;  %v12786_v44 = vsel %vm2329_vm6, %v12783_v12, %v12785_v39  ;;  %v6558_v56 = vsel %vm4968_vm1, %v6555_v1, %v6557_v28  ;;  %v4779_v28 = vld [vmem:[#allocation2 + $0xf8] sm:$0xf] }
 0x30b   : > { %v19024_v50 = vpop.f32.mrb[57].mxu0 }
 0x30c   : > { %v19030_v57 = vpop.f32.mrb[58].mxu0 }
 0x30d   : > { %19429 = vst [vmem:[#allocation9_spill] sm:$0xff] %v19030_v57  ;;  %v19034_v37 = vpop.f32.mrb[59].mxu0 }
 0x30e   : > { %15394 = vmatmul.mubr.msk.bf16.gmra.mrb[24].mxu1 %vm316_vm0, %v6068_v27  ;;  %v17166_v27 = vld [vmem:[%s17244_s6 + $0x84] sm:$0xff]  }
 0x30f   : > { %15898 = vmatmul.mubr.msk.bf16.gmra.mrb[8].mxu0 %vm316_vm0, %v12778_v38  ;;  %15397 = vmatprep.mubr.msk.bf16.mxu1 %vm316_vm0, %v6077_v4  ;;  %v12788_v38 = vsel %vm2329_vm6, %v12785_v39, %v12787_v8  ;;  %v17168_v4 = vld [vmem:[%s17244_s6 + $0x8c] sm:$0xff]   ;;  %v12789_v18 = vrot.slane %v17166_v27, 2 }
 0x310   : > { %15901 = vmatprep.mubr.msk.bf16.mxu0 %vm316_vm0, %v12780_v15  ;;  %v6561_v15 = vrot.slane %v17167_v63, 3  ;;  %v12791_v59 = vrot.slane %v17168_v4, 2 }
 0x311   : > { %v12790_v49 = vsel %vm2329_vm6, %v12787_v8, %v12789_v18 }
 0x312   : > { %v6562_v12 = vsel %vm4968_vm1, %v6559_v2, %v6561_v15 }
 0x316   : > { %15398 = vmatmul.mubr.msk.bf16.gmra.mrb[72].mxu1 %vm316_vm0, %v6082_v17  ;;  %v17170_v17 = vld [vmem:[%s17244_s6 + $0x94] sm:$0xff]  }
 0x317   : > { %15902 = vmatmul.mubr.msk.bf16.gmra.mrb[12].mxu0 %vm316_vm0, %v12782_v23  ;;  %15425 = vmatprep.mubr.msk.bf16.mxu1 %vm316_vm0, %v6554_v45  ;;  %v12792_v23 = vsel %vm2329_vm6, %v12789_v18, %v12791_v59  ;;  %v6563_v45 = vrot.slane %v17169_v29, 3  ;;  %v12793_v7 = vrot.slane %v17170_v17, 2 }
 0x318   : > { %15905 = vmatprep.mubr.msk.bf16.mxu0 %vm316_vm0, %v12784_v41 }
 0x319   : > { %v6564_v10 = vsel %vm4968_vm1, %v6561_v15, %v6563_v45  ;;  %v12794_v63 = vsel %vm2329_vm6, %v12791_v59, %v12793_v7  ;;  %v12796_v2 = vsel %vm2329_vm6, %v12793_v7, %v12795_v48 }
 0x31e   : > { %15426 = vmatmul.mubr.msk.bf16.vlgmr.msra.gmra.mrb[16].mxu1 %vm316_vm0, %v6556_v34 }
 0x31f   : > { %15906 = vmatmul.mubr.msk.bf16.gmra.mrb[16].mxu0 %vm316_vm0, %v12786_v44  ;;  %15429 = vmatprep.mubr.msk.bf16.mxu1 %vm316_vm0, %v6558_v56  ;;  %v17172_v44 = vld [vmem:[%s17244_s6 + $0x90] ss:$0 sps:$4 sm:$0x11]   ;;  %s16658_s6 = smul.u32 28, %s19461_s13 }
 0x320   : > { %15909 = vmatprep.mubr.msk.bf16.mxu0 %vm316_vm0, %v12788_v38  ;;  %v6566_v38 = vsel %vm4968_vm1, %v6563_v45, %v6565_v46 }
 0x321   : > { %s19229_s10 = scalar_lea.vmem %s19418_s3, %s16658_s6 }
 0x326   : > { %15430 = vmatmul.mubr.msk.bf16.gmra.mrb[20].mxu1 %vm316_vm0, %v6560_v42 }
 0x327   : > { %15910 = vmatmul.mubr.msk.bf16.gmra.mrb[20].mxu0 %vm316_vm0, %v12790_v49  ;;  %15433 = vmatprep.mubr.msk.bf16.mxu1 %vm316_vm0, %v6562_v12 }
 0x328   : > { %15913 = vmatprep.mubr.msk.bf16.mxu0 %vm316_vm0, %v12792_v23 }
 0x329   : > { %v15279_v41 = vpop.f32.mrb[60].mxu1 }
 0x32a   : > { %v4810_v1 = vadd.f32 %v15279_v41, %v18967_v19  ;;  %v4733_v39 = vpop.f32.mrb[61].mxu1  ;;  %v6567_v19 = vrot.slane %v17172_v44, 3 }
 0x32b   : > { %v4808_v8 = vadd.f32 %v4733_v39, %v18971_v62  ;;  %v15280_v34 = vpop.f32.mrb[62].mxu1 }
 0x32c   : > { %v4811_v56 = vadd.f32 %v15280_v34, %v4779_v28  ;;  %v4736_v27 = vpop.f32.mrb[63].mxu1  ;;  %v6568_v62 = vsel %vm4968_vm1, %v6565_v46, %v6567_v19 }
 0x32d   : > { %v4809_v4 = vadd.f32 %v4736_v27, %v18978_v52 }
 0x32e   : > { %4843 = vst [vmem:[#allocation2 + $0xf8] sm:$0xf] %v4811_v56  ;;  %15434 = vmatmul.mubr.msk.bf16.gmra.mrb[24].mxu1 %vm316_vm0, %v6564_v10 }
 0x32f   : > { %15914 = vmatmul.mubr.msk.bf16.gmra.mrb[24].mxu0 %vm316_vm0, %v12794_v63  ;;  %15437 = vmatprep.mubr.msk.bf16.mxu1 %vm316_vm0, %v6566_v38 }
 0x330   : > { %15917 = vmatprep.mubr.msk.bf16.mxu0 %vm316_vm0, %v12796_v2 }
 0x335   : > { %v5266_v47 = vld [vmem:[#allocation2 + $0xf8] sm:$0xf] }
 0x336   : > { %15438 = vmatmul.mubr.msk.bf16.gmra.mrb[76].mxu1 %vm316_vm0, %v6568_v62 }
 0x337   : > { %15918 = vmatmul.mubr.msk.bf16.gmra.mrb[72].mxu0 %vm316_vm0, %v12795_v48 }
 0x34a   : > { %v19093_v18 = vpop.f32.mrb[60].mxu0 }
 0x34b   : > { %v19095_v52 = vpop.f32.mrb[61].mxu0 }
 0x34c   : > { %v19097_v15 = vpop.f32.mrb[62].mxu0 }
 0x34d   : > { %19431 = vst [vmem:[#allocation10_spill] sm:$0xff] %v19097_v15  ;;  %v19099_v59 = vpop.f32.mrb[63].mxu0 }
 0x34e   : > { %19432 = vst [vmem:[#allocation11_spill] sm:$0xff] %v19099_v59 }
 0x369   : > { %v15319_v42 = vpop.f32.mrb[64].mxu1 }
 0x36a   : > { %v5297_v29 = vadd.f32 %v15319_v42, %v4810_v1  ;;  %v5220_v49 = vpop.f32.mrb[65].mxu1 }
 0x36b   : > { %v5295_v12 = vadd.f32 %v5220_v49, %v4808_v8  ;;  %v15320_v17 = vpop.f32.mrb[66].mxu1 }
 0x36c   : > { %v5298_v23 = vadd.f32 %v15320_v17, %v5266_v47  ;;  %v5223_v16 = vpop.f32.mrb[67].mxu1 }
 0x36d   : > { %v5296_v45 = vadd.f32 %v5223_v16, %v4809_v4 }
 0x36e   : > { %5330 = vst [vmem:[#allocation2 + $0xf8] sm:$0xf] %v5298_v23 }
 0x375   : > { %v5746_v10 = vld [vmem:[#allocation2 + $0xf8] sm:$0xf] }
 0x38a   : > { %v19101_v7 = vpop.f32.mrb[64].mxu0 }
 0x38b   : > { %v19103_v46 = vpop.f32.mrb[65].mxu0 }
 0x38c   : > { %19433 = vst [vmem:[#allocation12_spill] sm:$0xff] %v19103_v46  ;;  %v19105_v41 = vpop.f32.mrb[66].mxu0 }
 0x38d   : > { %19434 = vst [vmem:[#allocation13_spill] sm:$0xff] %v19105_v41  ;;  %v19107_v48 = vpop.f32.mrb[67].mxu0 }
 0x38e   : > { %19435 = vst [vmem:[#allocation14_spill] sm:$0xff] %v19107_v48 }
 0x3a9   : > { %v15359_v39 = vpop.f32.mrb[68].mxu1 }
 0x3aa   : > { %v19109_v28 = vadd.f32 %v15359_v39, %v5297_v29  ;;  %v5700_v1 = vpop.f32.mrb[69].mxu1 }
 0x3ab   : > { %v19111_v34 = vadd.f32 %v5700_v1, %v5295_v12  ;;  %v15360_v8 = vpop.f32.mrb[70].mxu1 }
 0x3ac   : > { %v5778_v44 = vadd.f32 %v15360_v8, %v5746_v10  ;;  %v5703_v56 = vpop.f32.mrb[71].mxu1 }
 0x3ad   : > { %v19113_v27 = vadd.f32 %v5703_v56, %v5296_v45 }
 0x3ae   : > { %5810 = vst [vmem:[#allocation2 + $0xf8] sm:$0xf] %v5778_v44 }
 0x3b1   : > { %v15371_v63 = vpop.f32.mrb[0].mxu1 }
 0x3b2   : > { %v6189_v38 = vpop.f32.mrb[1].mxu1 }
 0x3b3   : > { %v15372_v4 = vpop.f32.mrb[2].mxu1 }
 0x3b4   : > { %v6192_v2 = vpop.f32.mrb[3].mxu1 }
 0x3b9   : > { %v15375_v19 = vpop.f32.mrb[4].mxu1 }
 0x3ba   : > { %v6205_v62 = vpop.f32.mrb[5].mxu1 }
 0x3bb   : > { %v15376_v42 = vpop.f32.mrb[6].mxu1 }
 0x3bc   : > { %v6208_v49 = vpop.f32.mrb[7].mxu1 }
 0x3c1   : > { %v15379_v29 = vpop.f32.mrb[8].mxu1 }
 0x3c2   : > { %v6221_v17 = vpop.f32.mrb[9].mxu1 }
 0x3c3   : > { %v15380_v47 = vpop.f32.mrb[10].mxu1 }
 0x3c4   : > { %v6224_v12 = vpop.f32.mrb[11].mxu1 }
 0x3c9   : > { %v15383_v23 = vpop.f32.mrb[12].mxu1 }
 0x3ca   : > { %v19115_v16 = vpop.f32.mrb[13].mxu1  ;;  %v19117_v39 = vpop.f32.mrb[68].mxu0 }
 0x3cb   : > { %19436 = vst [vmem:[#allocation15_spill] sm:$0xff] %v19117_v39  ;;  %v19119_v45 = vpop.f32.mrb[14].mxu1  ;;  %v19121_v1 = vpop.f32.mrb[69].mxu0 }
 0x3cc   : > { %19437 = vst [vmem:[#allocation16_spill] sm:$0xff] %v19121_v1  ;;  %v19123_v8 = vpop.f32.mrb[15].mxu1  ;;  %v19125_v10 = vpop.f32.mrb[70].mxu0 }
 0x3cd   : > { %19438 = vst [vmem:[#allocation17_spill] sm:$0xff] %v19125_v10  ;;  %v19127_v44 = vpop.f32.mrb[71].mxu0 }
 0x3ce   : > { %19439 = vst [vmem:[#allocation18_spill] sm:$0xff] %v19127_v44 }
 0x3d2   : > { %v15891_v56 = vpop.f32.mrb[0].mxu0 }
 0x3d3   : > { %v15931_v41 = vadd.f32 %v15891_v56, %v15371_v63  ;;  %v12903_v15 = vpop.f32.mrb[1].mxu0 }
 0x3d4   : > { %v15934_v57 = vadd.f32 %v12903_v15, %v6189_v38  ;;  %v15892_v24 = vpop.f32.mrb[2].mxu0 }
 0x3d5   : > { %13096 = vst [vmem:[#allocation2 + $0x10] sm:$0xff] %v15931_v41  ;;  %v15937_v21 = vadd.f32 %v15892_v24, %v15372_v4  ;;  %v12906_v51 = vpop.f32.mrb[3].mxu0 }
 0x3d6   : > { %v15940_v22 = vadd.f32 %v12906_v51, %v6192_v2 }
 0x3d7   : > { %13097 = vst [vmem:[#allocation2 + $0x18] sm:$0xff] %v15937_v21 }
 0x3da   : > { %v15895_v31 = vpop.f32.mrb[4].mxu0 }
 0x3db   : > { %v19129_v48 = vadd.f32 %v15895_v31, %v15375_v19  ;;  %v12919_v1 = vpop.f32.mrb[5].mxu0 }
 0x3dc   : > { %v15946_v39 = vadd.f32 %v12919_v1, %v6205_v62  ;;  %v15896_v35 = vpop.f32.mrb[6].mxu0 }
 0x3dd   : > { %13100 = vst [vmem:[#allocation2 + $0x30] sm:$0xff] %v19129_v48  ;;  %v19132_v10 = vadd.f32 %v15896_v35, %v15376_v42  ;;  %v12922_v44 = vpop.f32.mrb[7].mxu0 }
 0x3de   : > { %v13156_v63 = vld [vmem:[#allocation2 + $0x12] sm:$0xff]  ;;  %13098 = vst [vmem:[#allocation2 + $0x20] sm:$0xff] %v15946_v39  ;;  %v15952_v15 = vadd.f32 %v12922_v44, %v6208_v49 }
 0x3df   : > { %v19134_v38 = vmax.f32 %v15934_v57, %v13156_v63  ;;  %13101 = vst [vmem:[#allocation2 + $0x38] sm:$0xff] %v19132_v10 }
 0x3e0   : > { %13099 = vst [vmem:[#allocation2 + $0x28] sm:$0xff] %v15952_v15 }
 0x3e1   : > { %13216 = vst [vmem:[#allocation2] sm:$0xff] %v19134_v38 }
 0x3e2   : > { %v15899_v31 = vpop.f32.mrb[8].mxu0 }
 0x3e3   : > { %v19138_v51 = vadd.f32 %v15899_v31, %v15379_v29  ;;  %v12935_v24 = vpop.f32.mrb[9].mxu0 }
 0x3e4   : > { %v15958_v4 = vadd.f32 %v12935_v24, %v6221_v17  ;;  %v15900_v2 = vpop.f32.mrb[10].mxu0 }
 0x3e5   : > { %v13157_v19 = vld [vmem:[#allocation2 + $0x1a] sm:$0xff]  ;;  %13104 = vst [vmem:[#allocation2 + $0x50] sm:$0xff] %v19138_v51  ;;  %v19141_v35 = vadd.f32 %v15900_v2, %v15380_v47  ;;  %v12938_v62 = vpop.f32.mrb[11].mxu0 }
 0x3e6   : > { %v19143_v42 = vmax.f32 %v15940_v22, %v13157_v19  ;;  %v13160_v57 = vld [vmem:[#allocation2 + $0x32] sm:$0xff]  ;;  %13102 = vst [vmem:[#allocation2 + $0x40] sm:$0xff] %v15958_v4  ;;  %v19145_v49 = vadd.f32 %v12938_v62, %v6224_v12 }
 0x3e7   : > { %v19147_v1 = vmax.f32 %v15946_v39, %v13160_v57  ;;  %v13158_v44 = vld [vmem:[#allocation2 + $0x22] sm:$0xff]  ;;  %v13159_v29 = vld [vmem:[#allocation2 + $0x2a] sm:$0xff]  ;;  %13105 = vst [vmem:[#allocation2 + $0x58] sm:$0xff] %v19141_v35 }
 0x3e8   : > { %13217 = vst [vmem:[#allocation2 + $0x8] sm:$0xff] %v19143_v42  ;;  %v13188_v17 = vmax.f32 %v15931_v41, %v13158_v44  ;;  %v13189_v56 = vmax.f32 %v15937_v21, %v13159_v29  ;;  %13103 = vst [vmem:[#allocation2 + $0x48] sm:$0xff] %v19145_v49  ;;  %v6347_v21 = vld [vmem:[#allocation2 + $0xf8] sm:$0xf] }
 0x3e9   : > { %13220 = vst [vmem:[#allocation2 + $0x20] sm:$0xff] %v19147_v1  ;;  %v15399_v22 = vpop.f32.mrb[72].mxu1 }
 0x3ea   : > { %13218 = vst [vmem:[#allocation2 + $0x10] sm:$0xff] %v13188_v17  ;;  %13219 = vst [vmem:[#allocation2 + $0x18] sm:$0xff] %v13189_v56  ;;  %v19154_v47 = vadd.f32 %v15399_v22, %v19109_v28  ;;  %v15903_v12 = vpop.f32.mrb[12].mxu0  ;;  %v6301_v39 = vpop.f32.mrb[73].mxu1 }
 0x3eb   : > { %v19156_v63 = vadd.f32 %v15903_v12, %v15383_v23  ;;  %v19159_v31 = vadd.f32 %v6301_v39, %v19111_v34  ;;  %v12951_v24 = vpop.f32.mrb[13].mxu0  ;;  %v15400_v41 = vpop.f32.mrb[74].mxu1 }
 0x3ec   : > { %v15970_v2 = vadd.f32 %v12951_v24, %v19115_v16  ;;  %v6379_v19 = vadd.f32 %v15400_v41, %v6347_v21  ;;  %v15904_v62 = vpop.f32.mrb[14].mxu0  ;;  %v6304_v57 = vpop.f32.mrb[75].mxu1 }
 0x3ed   : > { %v13161_v44 = vld [vmem:[#allocation2 + $0x3a] sm:$0xff]  ;;  %13108 = vst [vmem:[#allocation2 + $0x70] sm:$0xff] %v19156_v63  ;;  %v19164_v28 = vadd.f32 %v15904_v62, %v19119_v45  ;;  %v19167_v23 = vadd.f32 %v6304_v57, %v19113_v27  ;;  %v12954_v29 = vpop.f32.mrb[15].mxu0 }
 0x3ee   : > { %v19169_v34 = vmax.f32 %v15952_v15, %v13161_v44  ;;  %v13164_v22 = vld [vmem:[#allocation2 + $0x52] sm:$0xff]  ;;  %13106 = vst [vmem:[#allocation2 + $0x60] sm:$0xff] %v15970_v2  ;;  %6411 = vst [vmem:[#allocation2 + $0xf8] sm:$0xf] %v6379_v19  ;;  %v19172_v16 = vadd.f32 %v12954_v29, %v19123_v8 }
 0x3ef   : > { %v13276_v12 = vld [vmem:[#allocation2 + $0x1] sm:$0xff]  ;;  %v19174_v39 = vmax.f32 %v15958_v4, %v13164_v22  ;;  %v13163_v41 = vld [vmem:[#allocation2 + $0x4a] sm:$0xff]  ;;  %13109 = vst [vmem:[#allocation2 + $0x78] sm:$0xff] %v19164_v28 }
 0x3f0   : > { %v13162_v24 = vld [vmem:[#allocation2 + $0x42] sm:$0xff]  ;;  %v13306_v45 = vmax.f32 %v19134_v38, %v13276_v12  ;;  %13221 = vst [vmem:[#allocation2 + $0x28] sm:$0xff] %v19169_v34  ;;  %v19183_v15 = vmax.f32 %v19132_v10, %v13163_v41  ;;  %13107 = vst [vmem:[#allocation2 + $0x68] sm:$0xff] %v19172_v16 }
 0x3f1   : > { %v19180_v27 = vmax.f32 %v19129_v48, %v13162_v24  ;;  %v13277_v8 = vld [vmem:[#allocation2 + $0x9] sm:$0xff]  ;;  %v13278_v21 = vld [vmem:[#allocation2 + $0x11] sm:$0xff]  ;;  %v13279_v4 = vld [vmem:[#allocation2 + $0x19] sm:$0xff]  ;;  %13224 = vst [vmem:[#allocation2 + $0x40] sm:$0xff] %v19174_v39  ;;  %v15427_v19 = vpop.f32.mrb[16].mxu1 }
 0x3f2   : > { %13336 = vst [vmem:[#allocation2] sm:$0xff] %v13306_v45  ;;  %v13307_v62 = vmax.f32 %v19143_v42, %v13277_v8  ;;  %v13308_v38 = vmax.f32 %v13188_v17, %v13278_v21  ;;  %v13309_v57 = vmax.f32 %v13189_v56, %v13279_v4  ;;  %13223 = vst [vmem:[#allocation2 + $0x38] sm:$0xff] %v19183_v15  ;;  %v15907_v48 = vpop.f32.mrb[16].mxu0  ;;  %v6739_v10 = vpop.f32.mrb[17].mxu1 }
 0x3f3   : > { %13222 = vst [vmem:[#allocation2 + $0x30] sm:$0xff] %v19180_v27  ;;  %v19190_v44 = vadd.f32 %v15907_v48, %v15427_v19  ;;  %v12967_v29 = vpop.f32.mrb[17].mxu0  ;;  %v15428_v22 = vpop.f32.mrb[18].mxu1 }
 0x3f4   : > { %13337 = vst [vmem:[#allocation2 + $0x8] sm:$0xff] %v13307_v62  ;;  %13338 = vst [vmem:[#allocation2 + $0x10] sm:$0xff] %v13308_v38  ;;  %v15982_v12 = vadd.f32 %v12967_v29, %v6739_v10  ;;  %v15908_v24 = vpop.f32.mrb[18].mxu0  ;;  %v6742_v41 = vpop.f32.mrb[19].mxu1 }
 0x3f5   : > { %13339 = vst [vmem:[#allocation2 + $0x18] sm:$0xff] %v13309_v57  ;;  %v13165_v42 = vld [vmem:[#allocation2 + $0x5a] sm:$0xff]  ;;  %13112 = vst [vmem:[#allocation2 + $0x90] sm:$0xff] %v19190_v44  ;;  %v19193_v17 = vadd.f32 %v15908_v24, %v15428_v22  ;;  %v12970_v56 = vpop.f32.mrb[19].mxu0 }
 0x3f6   : > { %v19196_v45 = vmax.f32 %v19145_v49, %v13165_v42  ;;  %v13168_v8 = vld [vmem:[#allocation2 + $0x72] sm:$0xff]  ;;  %13110 = vst [vmem:[#allocation2 + $0x80] sm:$0xff] %v15982_v12  ;;  %v19198_v21 = vadd.f32 %v12970_v56, %v6742_v41 }
 0x3f7   : > { %v13280_v4 = vld [vmem:[#allocation2 + $0x21] sm:$0xff]  ;;  %v19200_v19 = vmax.f32 %v15970_v2, %v13168_v8  ;;  %v13167_v38 = vld [vmem:[#allocation2 + $0x6a] sm:$0xff]  ;;  %13113 = vst [vmem:[#allocation2 + $0x98] sm:$0xff] %v19193_v17  ;;  %v19216_v2 = vld [vmem:[%s19417_s2] ss:$0 sm:$0xff] }
 0x3f8   : > { %v13166_v62 = vld [vmem:[#allocation2 + $0x62] sm:$0xff]  ;;  %v13310_v57 = vmax.f32 %v19147_v1, %v13280_v4  ;;  %13225 = vst [vmem:[#allocation2 + $0x48] sm:$0xff] %v19196_v45  ;;  %v19210_v49 = vmax.f32 %v19141_v35, %v13167_v38  ;;  %13111 = vst [vmem:[#allocation2 + $0x88] sm:$0xff] %v19198_v21 }
 0x3f9   : > { %v19207_v48 = vmax.f32 %v19138_v51, %v13166_v62  ;;  %v13283_v22 = vld [vmem:[#allocation2 + $0x39] sm:$0xff]  ;;  %13228 = vst [vmem:[#allocation2 + $0x60] sm:$0xff] %v19200_v19  ;;  %v15431_v1 = vpop.f32.mrb[20].mxu1 }
 0x3fa   : > { %v13281_v10 = vld [vmem:[#allocation2 + $0x29] sm:$0xff]  ;;  %v13282_v29 = vld [vmem:[#allocation2 + $0x31] sm:$0xff]  ;;  %13340 = vst [vmem:[#allocation2 + $0x20] sm:$0xff] %v13310_v57  ;;  %v13313_v35 = vmax.f32 %v19183_v15, %v13283_v22  ;;  %13227 = vst [vmem:[#allocation2 + $0x58] sm:$0xff] %v19210_v49  ;;  %v15911_v41 = vpop.f32.mrb[20].mxu0  ;;  %v6755_v42 = vpop.f32.mrb[21].mxu1 }
 0x3fb   : > { %v13311_v51 = vmax.f32 %v19169_v34, %v13281_v10  ;;  %v13312_v24 = vmax.f32 %v19180_v27, %v13282_v29  ;;  %13226 = vst [vmem:[#allocation2 + $0x50] sm:$0xff] %v19207_v48  ;;  %v19224_v56 = vadd.f32 %v15911_v41, %v15431_v1  ;;  %v12983_v8 = vpop.f32.mrb[21].mxu0  ;;  %v15432_v4 = vpop.f32.mrb[22].mxu1  ;;  %v13367_v34 = vld [vmem:[#allocation2] ss:$2 sm:$0x7f] }
 0x3fc   : > { %13343 = vst [vmem:[#allocation2 + $0x38] sm:$0xff] %v13313_v35  ;;  %v15994_v27 = vadd.f32 %v12983_v8, %v6755_v42  ;;  %v15912_v15 = vpop.f32.mrb[22].mxu0  ;;  %v6758_v62 = vpop.f32.mrb[23].mxu1  ;;  %v13374_v38 = vadd.f32 %v19216_v2, %v13367_v34  ;;  %v13380_v41 = vld [vmem:[%s19229_s10] sm:$0xf] }
 0x3fd   : > { %13341 = vst [vmem:[#allocation2 + $0x28] sm:$0xff] %v13311_v51  ;;  %13342 = vst [vmem:[#allocation2 + $0x30] sm:$0xff] %v13312_v24  ;;  %v13169_v57 = vld [vmem:[#allocation2 + $0x7a] sm:$0xff]  ;;  %v19233_v10 = vadd.f32 %v15912_v15, %v15432_v4  ;;  %v12986_v29 = vpop.f32.mrb[23].mxu0 }
 0x3fe   : > { %13116 = vst [vmem:[#allocation2 + $0xb0] sm:$0xff] %v19224_v56  ;;  %v19236_v22 = vmax.f32 %v19172_v16, %v13169_v57  ;;  %v13172_v1 = vld [vmem:[#allocation2 + $0x92] sm:$0xff]  ;;  %13114 = vst [vmem:[#allocation2 + $0xa0] sm:$0xff] %v15994_v27  ;;  %v19238_v51 = vadd.f32 %v12986_v29, %v6758_v62  ;;  %v13375_v24 = vmax.f32 %v13374_v38, 0.0 }
 0x3ff   : > { %v13284_v42 = vld [vmem:[#allocation2 + $0x41] sm:$0xff]  ;;  %v19247_v8 = vmax.f32 %v15982_v12, %v13172_v1  ;;  %v13171_v34 = vld [vmem:[#allocation2 + $0x8a] sm:$0xff]  ;;  %13117 = vst [vmem:[#allocation2 + $0xb8] sm:$0xff] %v19233_v10 }
 0x400   : > { %v13170_v4 = vld [vmem:[#allocation2 + $0x82] sm:$0xff]  ;;  %v13314_v16 = vmax.f32 %v19174_v39, %v13284_v42  ;;  %13229 = vst [vmem:[#allocation2 + $0x68] sm:$0xff] %v19236_v22  ;;  %v19256_v62 = vmax.f32 %v19164_v28, %v13171_v34  ;;  %13115 = vst [vmem:[#allocation2 + $0xa8] sm:$0xff] %v19238_v51  ;;  %v13376_v38 = vpack.c.bf16 %v13375_v24, %v13375_v24 }
 0x401   : > { %v19253_v15 = vmax.f32 %v19156_v63, %v13170_v4  ;;  %v13287_v29 = vld [vmem:[#allocation2 + $0x59] sm:$0xff]  ;;  %13232 = vst [vmem:[#allocation2 + $0x80] sm:$0xff] %v19247_v8  ;;  %v15435_v1 = vpop.f32.mrb[24].mxu1 }
 0x402   : > { %v13285_v57 = vld [vmem:[#allocation2 + $0x49] sm:$0xff]  ;;  %v13286_v12 = vld [vmem:[#allocation2 + $0x51] sm:$0xff]  ;;  %13344 = vst [vmem:[#allocation2 + $0x40] sm:$0xff] %v13314_v16  ;;  %v13317_v63 = vmax.f32 %v19210_v49, %v13287_v29  ;;  %13231 = vst [vmem:[#allocation2 + $0x78] sm:$0xff] %v19256_v62  ;;  %v15915_v28 = vpop.f32.mrb[24].mxu0  ;;  %v6771_v24 = vpop.f32.mrb[25].mxu1  ;;  %v13381_v4 = vsel %vm19242_vm10, %v13376_v38, %v13380_v41 }
 0x403   : > { %v13315_v39 = vmax.f32 %v19196_v45, %v13285_v57  ;;  %v13316_v42 = vmax.f32 %v19207_v48, %v13286_v12  ;;  %13230 = vst [vmem:[#allocation2 + $0x70] sm:$0xff] %v19253_v15  ;;  %v19267_v34 = vadd.f32 %v15915_v28, %v15435_v1  ;;  %v12999_v59 = vpop.f32.mrb[25].mxu0  ;;  %v15436_v46 = vpop.f32.mrb[26].mxu1  ;;  %13382 = vst [vmem:[%s19229_s10] sm:$0xf] %v13381_v4 }
 0x404   : > { %v13384_v16 = vld [vmem:[#allocation2 + $0x24] ss:$2 sm:$0x7f]  ;;  %13347 = vst [vmem:[#allocation2 + $0x58] sm:$0xff] %v13317_v63  ;;  %v19270_v45 = vadd.f32 %v12999_v59, %v6771_v24  ;;  %v15916_v48 = vpop.f32.mrb[26].mxu0  ;;  %v6774_v49 = vpop.f32.mrb[27].mxu1 }
 0x405   : > { %13345 = vst [vmem:[#allocation2 + $0x48] sm:$0xff] %v13315_v39  ;;  %13346 = vst [vmem:[#allocation2 + $0x50] sm:$0xff] %v13316_v42  ;;  %v13385_v57 = vadd.f32 %v19216_v2, %v13384_v16  ;;  %v13173_v12 = vld [vmem:[#allocation2 + $0x9a] sm:$0xff]  ;;  %v19274_v29 = vadd.f32 %v15916_v48, %v15436_v46  ;;  %v13002_v41 = vpop.f32.mrb[27].mxu0  ;;  %v14407_v48 = vld [vmem:[%s19229_s10 + $0x4] sm:$0xf] }
 0x406   : > { %13120 = vst [vmem:[#allocation2 + $0xd0] sm:$0xff] %v19267_v34  ;;  %v19277_v38 = vmax.f32 %v19198_v21, %v13173_v12  ;;  %v13176_v1 = vld [vmem:[#allocation2 + $0xb2] sm:$0xff]  ;;  %13118 = vst [vmem:[#allocation2 + $0xc0] sm:$0xff] %v19270_v45  ;;  %v19280_v39 = vadd.f32 %v13002_v41, %v6774_v49 }
 0x407   : > { %19442 = vst [vmem:[#allocation19_spill] sm:$0xff] %v19274_v29  ;;  %v13386_v59 = vmax.f32 %v13385_v57, 0.0  ;;  %v13288_v42 = vld [vmem:[#allocation2 + $0x61] sm:$0xff]  ;;  %v19282_v63 = vmax.f32 %v15994_v27, %v13176_v1  ;;  %v13175_v24 = vld [vmem:[#allocation2 + $0xaa] sm:$0xff]  ;;  %13121 = vst [vmem:[#allocation2 + $0xd8] sm:$0xff] %v19274_v29 }
 0x408   : > { %v13174_v28 = vld [vmem:[#allocation2 + $0xa2] sm:$0xff]  ;;  %v13318_v46 = vmax.f32 %v19200_v19, %v13288_v42  ;;  %13233 = vst [vmem:[#allocation2 + $0x88] sm:$0xff] %v19277_v38  ;;  %v19291_v4 = vmax.f32 %v19193_v17, %v13175_v24  ;;  %13119 = vst [vmem:[#allocation2 + $0xc8] sm:$0xff] %v19280_v39 }
 0x409   : > { %v19288_v21 = vmax.f32 %v19190_v44, %v13174_v28  ;;  %v13387_v16 = vpack.c.bf16 %v13386_v59, %v13386_v59  ;;  %v13291_v57 = vld [vmem:[#allocation2 + $0x79] sm:$0xff]  ;;  %13236 = vst [vmem:[#allocation2 + $0xa0] sm:$0xff] %v19282_v63  ;;  %v15439_v12 = vpop.f32.mrb[76].mxu1 }
 0x40a   : > { %v13289_v27 = vld [vmem:[#allocation2 + $0x69] sm:$0xff]  ;;  %v13290_v49 = vld [vmem:[#allocation2 + $0x71] sm:$0xff]  ;;  %13348 = vst [vmem:[#allocation2 + $0x60] sm:$0xff] %v13318_v46  ;;  %v13321_v44 = vmax.f32 %v19256_v62, %v13291_v57  ;;  %13235 = vst [vmem:[#allocation2 + $0x98] sm:$0xff] %v19291_v4  ;;  %v6864_v17 = vadd.f32 %v15439_v12, %v19154_v47  ;;  %v6787_v1 = vpop.f32.mrb[77].mxu1  ;;  %v19302_v42 = vpop.f32.mrb[72].mxu0 }
 0x40b   : > { %v13319_v19 = vmax.f32 %v19236_v22, %v13289_v27  ;;  %v13320_v41 = vmax.f32 %v19253_v15, %v13290_v49  ;;  %13234 = vst [vmem:[#allocation2 + $0x90] sm:$0xff] %v19288_v21  ;;  %v6833_v59 = vld [vmem:[#allocation2 + $0xf8] sm:$0xf]  ;;  %v6862_v28 = vadd.f32 %v6787_v1, %v19159_v31  ;;  %v15440_v24 = vpop.f32.mrb[78].mxu1  ;;  %v19305_v46 = vpop.f32.mrb[73].mxu0  ;;  %v13390_v22 = vsel %vm19242_vm10, %v13387_v16, %v14407_v48 }
 0x40c   : > { %v13393_v15 = vld [vmem:[#allocation2 + $0x48] ss:$2 sm:$0x7f]  ;;  %13351 = vst [vmem:[#allocation2 + $0x78] sm:$0xff] %v13321_v44  ;;  %v7470_v62 = vadd.f32 %v17915_v32, %v6864_v17  ;;  %v6865_v47 = vadd.f32 %v15440_v24, %v6833_v59  ;;  %v6790_v27 = vpop.f32.mrb[79].mxu1  ;;  %v19310_v49 = vpop.f32.mrb[74].mxu0 }
 0x40d   : > { %13349 = vst [vmem:[#allocation2 + $0x68] sm:$0xff] %v13319_v19  ;;  %13350 = vst [vmem:[#allocation2 + $0x70] sm:$0xff] %v13320_v41  ;;  %v13394_v57 = vadd.f32 %v19216_v2, %v13393_v15  ;;  %v13177_v31 = vld [vmem:[#allocation2 + $0xba] sm:$0xff]  ;;  %v7468_v12 = vadd.f32 %v17920_v6, %v6862_v28  ;;  %v6863_v1 = vadd.f32 %v6790_v27, %v19167_v23  ;;  %v19316_v29 = vpop.f32.mrb[75].mxu0 }
 0x40e   : > { %14408 = vst [vmem:[%s19229_s10 + $0x4] sm:$0xf] %v13390_v22  ;;  %v19319_v16 = vmax.f32 %v19238_v51, %v13177_v31  ;;  %v7919_v32 = vadd.f32 %v18156_v25, %v7470_v62  ;;  %6897 = vst [vmem:[#allocation2 + $0xf8] sm:$0xf] %v6865_v47  ;;  %v13180_v48 = vld [vmem:[#allocation2 + $0xd2] sm:$0xff] }
 0x40f   : > { %v13395_v19 = vmax.f32 %v13394_v57, 0.0  ;;  %v13292_v41 = vld [vmem:[#allocation2 + $0x81] sm:$0xff]  ;;  %v7917_v17 = vadd.f32 %v18164_v26, %v7468_v12  ;;  %v7469_v59 = vadd.f32 %v17926_v20, %v6863_v1  ;;  %v13179_v6 = vld [vmem:[#allocation2 + $0xca] sm:$0xff]  ;;  %v19325_v23 = vmax.f32 %v19270_v45, %v13180_v48 }
 0x410   : > { %v13178_v44 = vld [vmem:[#allocation2 + $0xc2] sm:$0xff]  ;;  %v13322_v28 = vmax.f32 %v19247_v8, %v13292_v41  ;;  %13237 = vst [vmem:[#allocation2 + $0xa8] sm:$0xff] %v19319_v16  ;;  %v8405_v25 = vadd.f32 %v18319_v0, %v7919_v32  ;;  %v13209_v24 = vmax.f32 %v19233_v10, %v13179_v6 }
 0x411   : > { %v13208_v51 = vmax.f32 %v19224_v56, %v13178_v44  ;;  %v14409_v22 = vld [vmem:[%s19229_s10 + $0x8] sm:$0xf]  ;;  %v13295_v26 = vld [vmem:[#allocation2 + $0x99] sm:$0xff]  ;;  %v8403_v20 = vadd.f32 %v18323_v13, %v7917_v17  ;;  %v7918_v47 = vadd.f32 %v18179_v36, %v7469_v59  ;;  %13240 = vst [vmem:[#allocation2 + $0xc0] sm:$0xff] %v19325_v23  ;;  %v13396_v45 = vpack.c.bf16 %v13395_v19, %v13395_v19 }
 0x412   : > { %v13293_v15 = vld [vmem:[#allocation2 + $0x89] sm:$0xff]  ;;  %v13294_v62 = vld [vmem:[#allocation2 + $0x91] sm:$0xff]  ;;  %13352 = vst [vmem:[#allocation2 + $0x80] sm:$0xff] %v13322_v28  ;;  %v13325_v0 = vmax.f32 %v19291_v4, %v13295_v26  ;;  %v9010_v10 = vadd.f32 %v18462_v11, %v8405_v25  ;;  %13239 = vst [vmem:[#allocation2 + $0xb8] sm:$0xff] %v13209_v24 }
 0x413   : > { %v13323_v8 = vmax.f32 %v19277_v38, %v13293_v15  ;;  %v13324_v56 = vmax.f32 %v19288_v21, %v13294_v62  ;;  %13238 = vst [vmem:[#allocation2 + $0xb0] sm:$0xff] %v13208_v51  ;;  %v9008_v27 = vadd.f32 %v18465_v3, %v8403_v20  ;;  %v8404_v13 = vadd.f32 %v18333_v55, %v7918_v47  ;;  %v19444_v15 = vld [vmem:[#allocation11_spill] sm:$0xff]  ;;  %v14413_v26 = vld [vmem:[%s19229_s10 + $0x10] sm:$0xf] }
 0x414   : > { %v13399_v36 = vsel %vm19242_vm10, %v13396_v45, %v14409_v22  ;;  %v13402_v57 = vld [vmem:[#allocation2 + $0x6c] ss:$2 sm:$0x7f]  ;;  %13355 = vst [vmem:[#allocation2 + $0x98] sm:$0xff] %v13325_v0  ;;  %v9459_v38 = vadd.f32 %v18607_v30, %v9010_v10  ;;  %v19446_v47 = vld [vmem:[#allocation15_spill] sm:$0xff] }
 0x415   : > { %13353 = vst [vmem:[#allocation2 + $0x88] sm:$0xff] %v13323_v8  ;;  %13354 = vst [vmem:[#allocation2 + $0x90] sm:$0xff] %v13324_v56  ;;  %v13403_v21 = vadd.f32 %v19216_v2, %v13402_v57  ;;  %v9457_v11 = vadd.f32 %v18610_v61, %v9008_v27  ;;  %v7439_v4 = vld [vmem:[#allocation2 + $0xf8] sm:$0xf]  ;;  %v9009_v3 = vadd.f32 %v18472_v33, %v8404_v13  ;;  %v14411_v61 = vld [vmem:[%s19229_s10 + $0xc] sm:$0xf] }
 0x416   : > { %14410 = vst [vmem:[%s19229_s10 + $0x8] sm:$0xf] %v13399_v36  ;;  %v7471_v55 = vadd.f32 %v17923_v9, %v7439_v4  ;;  %v10035_v31 = vadd.f32 %v18749_v54, %v9459_v38  ;;  %v19447_v56 = vld [vmem:[#allocation16_spill] sm:$0xff]  ;;  %v19449_v13 = vld [vmem:[#allocation18_spill] sm:$0xff] }
 0x417   : > { %v13404_v12 = vmax.f32 %v13403_v21, 0.0  ;;  %v13296_v1 = vld [vmem:[#allocation2 + $0xa1] sm:$0xff]  ;;  %v9458_v32 = vadd.f32 %v18620_v40, %v9009_v3  ;;  %v10033_v48 = vadd.f32 %v18753_v58, %v9457_v11 }
 0x418   : > { %v13326_v30 = vmax.f32 %v19282_v63, %v13296_v1  ;;  %7503 = vst [vmem:[#allocation2 + $0xf8] sm:$0xf] %v7471_v55  ;;  %v10515_v19 = vadd.f32 %v18901_v14, %v10035_v31  ;;  %v19450_v21 = vld [vmem:[#allocation4_spill] sm:$0xff]  ;;  %v19451_v31 = vld [vmem:[#allocation19_spill] sm:$0xff] }
 0x419   : > { %v13405_v41 = vpack.c.bf16 %v13404_v12, %v13404_v12  ;;  %v10513_v33 = vadd.f32 %v18908_v60, %v10033_v48  ;;  %v10034_v9 = vadd.f32 %v18765_v43, %v9458_v32  ;;  %v13299_v17 = vld [vmem:[#allocation2 + $0xb9] sm:$0xff]  ;;  %v19452_v32 = vld [vmem:[#allocation5_spill] sm:$0xff] }
 0x41a   : > { %v13297_v44 = vld [vmem:[#allocation2 + $0xa9] sm:$0xff]  ;;  %v13298_v54 = vld [vmem:[#allocation2 + $0xb1] sm:$0xff]  ;;  %13356 = vst [vmem:[#allocation2 + $0xa0] sm:$0xff] %v13326_v30  ;;  %v10964_v58 = vadd.f32 %v19021_v53, %v10515_v19  ;;  %v13329_v63 = vmax.f32 %v13209_v24, %v13299_v17 }
 0x41b   : > { %v13327_v40 = vmax.f32 %v19319_v16, %v13297_v44  ;;  %v13328_v59 = vmax.f32 %v13208_v51, %v13298_v54  ;;  %v10962_v6 = vadd.f32 %v19024_v50, %v10513_v33  ;;  %v10514_v14 = vadd.f32 %v18915_v5, %v10034_v9  ;;  %v19443_v24 = vld [vmem:[#allocation12_spill] sm:$0xff]  ;;  %v19453_v44 = vld [vmem:[#allocation6_spill] sm:$0xff] }
 0x41c   : > { %v13408_v60 = vsel %vm19242_vm10, %v13405_v41, %v14411_v61  ;;  %v13411_v28 = vld [vmem:[#allocation2 + $0x90] ss:$2 sm:$0x7f]  ;;  %v11540_v43 = vadd.f32 %v19093_v18, %v10964_v58  ;;  %13359 = vst [vmem:[#allocation2 + $0xb8] sm:$0xff] %v13329_v63  ;;  %v19445_v18 = vld [vmem:[#allocation3_spill] sm:$0xff] }
 0x41d   : > { %13357 = vst [vmem:[#allocation2 + $0xa8] sm:$0xff] %v13327_v40  ;;  %13358 = vst [vmem:[#allocation2 + $0xb0] sm:$0xff] %v13328_v59  ;;  %v13412_v16 = vadd.f32 %v19216_v2, %v13411_v28  ;;  %v11538_v53 = vadd.f32 %v19095_v52, %v10962_v6  ;;  %v10963_v51 = vadd.f32 %v19034_v37, %v10514_v14  ;;  %v19448_v52 = vld [vmem:[#allocation14_spill] sm:$0xff]  ;;  %v14415_v40 = vld [vmem:[%s19229_s10 + $0x14] sm:$0xf] }
 0x41e   : > { %14412 = vst [vmem:[%s19229_s10 + $0xc] sm:$0xf] %v13408_v60  ;;  %v12020_v50 = vadd.f32 %v19101_v7, %v11540_v43  ;;  %v19454_v63 = vld [vmem:[#allocation7_spill] sm:$0xff]  ;;  %v19455_v60 = vld [vmem:[#allocation8_spill] sm:$0xff] }
 0x41f   : > { %v13413_v5 = vmax.f32 %v13412_v16, 0.0  ;;  %v7888_v25 = vld [vmem:[#allocation2 + $0xf8] sm:$0xf]  ;;  %v12018_v22 = vadd.f32 %v19443_v24, %v11538_v53  ;;  %v11539_v62 = vadd.f32 %v19444_v15, %v10963_v51  ;;  %v19456_v16 = vld [vmem:[#allocation9_spill] sm:$0xff] }
 0x420   : > { %v7920_v20 = vadd.f32 %v19445_v18, %v7888_v25  ;;  %v12612_v45 = vadd.f32 %v19446_v47, %v12020_v50  ;;  %v19457_v50 = vld [vmem:[#allocation10_spill] sm:$0xff]  ;;  %v19458_v24 = vld [vmem:[#allocation13_spill] sm:$0xff] }
 0x421   : > { %v13414_v8 = vpack.c.bf16 %v13413_v5, %v13413_v5  ;;  %v12610_v0 = vadd.f32 %v19447_v56, %v12018_v22  ;;  %v12019_v10 = vadd.f32 %v19448_v52, %v11539_v62  ;;  %v19459_v62 = vld [vmem:[#allocation17_spill] sm:$0xff] }
 0x422   : > { %7952 = vst [vmem:[#allocation2 + $0xf8] sm:$0xf] %v7920_v20  ;;  %v13092_v37 = vadd.f32 %v19302_v42, %v12612_v45 }
 0x423   : > { %v13417_v7 = vsel %vm19242_vm10, %v13414_v8, %v14413_v26  ;;  %v19381_v27 = vadd.f32 %v19305_v46, %v12610_v0  ;;  %v12611_v36 = vadd.f32 %v19449_v13, %v12019_v10 }
 0x424   : > { %14414 = vst [vmem:[%s19229_s10 + $0x10] sm:$0xf] %v13417_v7  ;;  %13124 = vst [vmem:[#allocation2 + $0xf0] sm:$0xff] %v13092_v37 }
 0x425   : > { %13122 = vst [vmem:[#allocation2 + $0xe0] sm:$0xff] %v19381_v27  ;;  %v13091_v57 = vadd.f32 %v19316_v29, %v12611_v36 }
 0x427   : > { %13123 = vst [vmem:[#allocation2 + $0xe8] sm:$0xff] %v13091_v57 }
 0x429   : > { %v8374_v38 = vld [vmem:[#allocation2 + $0xf8] sm:$0xf] }
 0x42a   : > { %v8406_v11 = vadd.f32 %v19450_v21, %v8374_v38 }
 0x42c   : > { %8438 = vst [vmem:[#allocation2 + $0xf8] sm:$0xf] %v8406_v11  ;;  %v13181_v42 = vld [vmem:[#allocation2 + $0xda] sm:$0xff] }
 0x42d   : > { %v13211_v4 = vmax.f32 %v19280_v39, %v13181_v42 }
 0x42e   : > { %v13182_v3 = vld [vmem:[#allocation2 + $0xe2] sm:$0xff]  ;;  %v13183_v55 = vld [vmem:[#allocation2 + $0xea] sm:$0xff] }
 0x42f   : > { %v13212_v46 = vmax.f32 %v19267_v34, %v13182_v3  ;;  %v13213_v12 = vmax.f32 %v19451_v31, %v13183_v55  ;;  %13241 = vst [vmem:[#allocation2 + $0xc8] sm:$0xff] %v13211_v4  ;;  %v13155_v47 = vld [vmem:[#allocation2 + $0xe8] sm:$0x3] }
 0x431   : > { %13242 = vst [vmem:[#allocation2 + $0xd0] sm:$0xff] %v13212_v46  ;;  %13243 = vst [vmem:[#allocation2 + $0xd8] sm:$0xff] %v13213_v12 }
 0x433   : > { %v8979_v1 = vld [vmem:[#allocation2 + $0xf8] sm:$0xf] }
 0x434   : > { %v9011_v29 = vadd.f32 %v19452_v32, %v8979_v1 }
 0x436   : > { %9043 = vst [vmem:[#allocation2 + $0xf8] sm:$0xf] %v9011_v29  ;;  %v13300_v48 = vld [vmem:[#allocation2 + $0xc1] sm:$0xff] }
 0x437   : > { %v13330_v30 = vmax.f32 %v19325_v23, %v13300_v48 }
 0x438   : > { %v13301_v19 = vld [vmem:[#allocation2 + $0xc9] sm:$0xff]  ;;  %v13302_v41 = vld [vmem:[#allocation2 + $0xd1] sm:$0xff] }
 0x439   : > { %v13331_v39 = vmax.f32 %v13211_v4, %v13301_v19  ;;  %v13332_v61 = vmax.f32 %v13212_v46, %v13302_v41  ;;  %13360 = vst [vmem:[#allocation2 + $0xc0] sm:$0xff] %v13330_v30 }
 0x43b   : > { %13361 = vst [vmem:[#allocation2 + $0xc8] sm:$0xff] %v13331_v39  ;;  %13362 = vst [vmem:[#allocation2 + $0xd0] sm:$0xff] %v13332_v61 }
 0x43d   : > { %v9428_v34 = vld [vmem:[#allocation2 + $0xf8] sm:$0xf] }
 0x43e   : > { %v9460_v33 = vadd.f32 %v19453_v44, %v9428_v34 }
 0x440   : > { %9492 = vst [vmem:[#allocation2 + $0xf8] sm:$0xf] %v9460_v33  ;;  %v13420_v9 = vld [vmem:[#allocation2 + $0xb4] ss:$2 sm:$0x7f] }
 0x441   : > { %v13421_v54 = vadd.f32 %v19216_v2, %v13420_v9 }
 0x443   : > { %v13422_v17 = vmax.f32 %v13421_v54, 0.0 }
 0x445   : > { %v13423_v58 = vpack.c.bf16 %v13422_v17, %v13422_v17 }
 0x447   : > { %v10004_v59 = vld [vmem:[#allocation2 + $0xf8] sm:$0xf]  ;;  %v13426_v23 = vsel %vm19242_vm10, %v13423_v58, %v14415_v40 }
 0x448   : > { %v10036_v6 = vadd.f32 %v19454_v63, %v10004_v59  ;;  %14416 = vst [vmem:[%s19229_s10 + $0x14] sm:$0xf] %v13426_v23 }
 0x44a   : > { %10068 = vst [vmem:[#allocation2 + $0xf8] sm:$0xf] %v10036_v6 }
 0x451   : > { %v10484_v14 = vld [vmem:[#allocation2 + $0xf8] sm:$0xf] }
 0x452   : > { %v10516_v28 = vadd.f32 %v19455_v60, %v10484_v14 }
 0x454   : > { %10548 = vst [vmem:[#allocation2 + $0xf8] sm:$0xf] %v10516_v28 }
 0x45b   : > { %v10933_v43 = vld [vmem:[#allocation2 + $0xf8] sm:$0xf] }
 0x45c   : > { %v10965_v53 = vadd.f32 %v19456_v16, %v10933_v43 }
 0x45e   : > { %10997 = vst [vmem:[#allocation2 + $0xf8] sm:$0xf] %v10965_v53 }
 0x465   : > { %v11509_v51 = vld [vmem:[#allocation2 + $0xf8] sm:$0xf] }
 0x466   : > { %v11541_v5 = vadd.f32 %v19457_v50, %v11509_v51 }
 0x468   : > { %11573 = vst [vmem:[#allocation2 + $0xf8] sm:$0xf] %v11541_v5 }
 0x46f   : > { %v11989_v25 = vld [vmem:[#allocation2 + $0xf8] sm:$0xf] }
 0x470   : > { %v12021_v22 = vadd.f32 %v19458_v24, %v11989_v25 }
 0x472   : > { %12053 = vst [vmem:[#allocation2 + $0xf8] sm:$0xf] %v12021_v22 }
 0x479   : > { %v12581_v15 = vld [vmem:[#allocation2 + $0xf8] sm:$0xf] }
 0x47a   : > { %v12613_v26 = vadd.f32 %v19459_v62, %v12581_v15 }
 0x47c   : > { %12645 = vst [vmem:[#allocation2 + $0xf8] sm:$0xf] %v12613_v26 }
 0x483   : > { %v13061_v18 = vld [vmem:[#allocation2 + $0xf8] sm:$0xf] }
 0x484   : > { %v13093_v20 = vadd.f32 %v19310_v49, %v13061_v18 }
 0x486   : > { %13125 = vst [vmem:[#allocation2 + $0xf8] sm:$0xf] %v13093_v20 }
 0x48d   : > { %v13184_v45 = vld [vmem:[#allocation2 + $0xf2] sm:$0xff]  ;;  %v13185_v8 = vld [vmem:[#allocation2 + $0xfa] sm:$0x3] }
 0x48e   : > { %v13214_v56 = vmax.f32 %v19381_v27, %v13184_v45  ;;  %v13215_v0 = vmax.f32 %v13155_v47, %v13185_v8  ;;  %v14417_v27 = vld [vmem:[%s19229_s10 + $0x18] sm:$0xf] }
 0x490   : > { %13244 = vst [vmem:[#allocation2 + $0xe0] sm:$0xff] %v13214_v56  ;;  %13245 = vst [vmem:[#allocation2 + $0xe8] sm:$0x3] %v13215_v0 }
 0x497   : > { %v13275_v52 = vld [vmem:[#allocation2 + $0xe8] sm:$0x1]  ;;  %v13303_v10 = vld [vmem:[#allocation2 + $0xd9] sm:$0xff]  ;;  %v13305_v7 = vld [vmem:[#allocation2 + $0xe9] sm:$0x1] }
 0x498   : > { %v13304_v37 = vld [vmem:[#allocation2 + $0xe1] sm:$0xff]  ;;  %v13333_v13 = vmax.f32 %v13213_v12, %v13303_v10  ;;  %v13335_v57 = vmax.f32 %v13275_v52, %v13305_v7 }
 0x499   : > { %v13334_v36 = vmax.f32 %v13214_v56, %v13304_v37 }
 0x49a   : > { %13363 = vst [vmem:[#allocation2 + $0xd8] sm:$0xff] %v13333_v13  ;;  %13365 = vst [vmem:[#allocation2 + $0xe8] sm:$0x1] %v13335_v57 }
 0x49b   : > { %13364 = vst [vmem:[#allocation2 + $0xe0] sm:$0xff] %v13334_v36 }
 0x4a2   : > { %v13429_v49 = vld [vmem:[#allocation2 + $0xd8] ss:$2 sm:$0x7f] }
 0x4a3   : > { %v13430_v38 = vadd.f32 %v19216_v2, %v13429_v49 }
 0x4a5   : > { %v13431_v21 = vmax.f32 %v13430_v38, 0.0 }
 0x4a7   : > { %v13432_v11 = vpack.c.bf16 %v13431_v21, %v13431_v21 }
 0x4a9   : > { %v13435_v42 = vsel %vm19242_vm10, %v13432_v11, %v14417_v27 }
 0x4aa   : > { %14418 = vst [vmem:[%s19229_s10 + $0x18] sm:$0xf] %v13435_v42 }
 0x4ab PF: > { %s13_s12 = sadd.s32 1, %s17184_s12  }
 0x4ac   : > { %p10_p4 = scmp.ge.s32.totalorder %s13_s12, 4  }
 0x4ae   :  { %12 = sbr.rel (!%p10_p4) target bundleno = 1 (0x1), region = 74 }

</bundles_post_ra>
